<compile_context>
chip_gen: v7x
topology: tpu7x:2x2x1
jax: 0.10.0
libtpu: 0.0.40
codegen_flags: <defaults>
</compile_context>

<pallas_src>
import jax
import jax.numpy as jnp
import numpy as np
from jax.experimental import pallas as pl
from jax.experimental.pallas import tpu as pltpu

# ---------------------------------------------------------------------------
# Dimensions implied by ConvNet5
# ---------------------------------------------------------------------------
N_BATCH = 2
KS = 3                       # kernel_size
PAD = (KS - 1) // 2          # 1
C0_IN, C0_OUT = 3, 32        # conv block 0:  3 -> 32
H0 = W0 = 32
C1_IN, C1_OUT = 32, 64       # conv block 1: 32 -> 64
H1 = W1 = 16
HF = WF = 8                  # spatial size after the 2nd pool
NPOS = HF * WF               # 64 spatial positions
FEAT = NPOS * C1_OUT         # 4096
N_CLS = 10
BN_EPS = 1e-5


# ---------------------------------------------------------------------------
# Fused kernel (per batch item): conv0 matmul + pool + conv1 (3 matmuls) + pool + FC.
# ---------------------------------------------------------------------------
def convnet5_kernel(pat0_ref, w0_ref, t0_ref, w1_ref, t1_ref,
                    wfp_ref, msk_ref, rsel_ref, bf_ref, o_ref, xp1_ref):
    # ----- conv block 0: single bf16 im2col matmul (patches prebuilt in wrapper) -----
    acc0 = jnp.dot(pat0_ref[0], w0_ref[...],
                   preferred_element_type=jnp.float32)          # (1024, 32) f32
    y0 = jnp.maximum(acc0 + t0_ref[...], 0.0)                   # BN folded into weights

    # 2x2/2 max-pool (w pairs then h pairs); reshapes keep channels on lanes.
    y0 = y0.reshape(H0, W0 // 2, 2, C0_OUT)
    y0 = jnp.maximum(y0[:, :, 0, :], y0[:, :, 1, :])            # (32, 16, 32)
    y0 = y0.reshape(H0 // 2, 2, W0 // 2, C0_OUT)
    p0 = jnp.maximum(y0[:, 0], y0[:, 1])                        # (16, 16, 32)

    # ----- conv block 1: halo-padded bf16 scratch + 3 accumulating matmuls -----
    # Zero only the 1-pixel halo (4 thin stores); the interior is overwritten below.
    zr = jnp.zeros((1, W1 + 2 * PAD, C1_IN), jnp.bfloat16)
    xp1_ref[0:1, :, :] = zr
    xp1_ref[H1 + PAD:H1 + 2 * PAD, :, :] = zr
    zc = jnp.zeros((H1 + 2 * PAD, 1, C1_IN), jnp.bfloat16)
    xp1_ref[:, 0:1, :] = zc
    xp1_ref[:, W1 + PAD:W1 + 2 * PAD, :] = zc
    xp1_ref[PAD:PAD + H1, PAD:PAD + W1, :] = p0.astype(jnp.bfloat16)

    acc1 = jnp.zeros((H1 * W1, C1_OUT), jnp.float32)
    for kh in range(KS):
        taps = [xp1_ref[kh:kh + H1, kw:kw + W1, :].reshape(H1 * W1, C1_IN)
                for kw in range(KS)]
        row = jnp.concatenate(taps, axis=-1)                    # (256, 96) bf16
        acc1 = acc1 + jnp.dot(row, w1_ref[kh],
                              preferred_element_type=jnp.float32)
    y1 = jnp.maximum(acc1 + t1_ref[...], 0.0)                   # (256, 64)

    y1 = y1.reshape(H1, W1 // 2, 2, C1_OUT)
    y1 = jnp.maximum(y1[:, :, 0, :], y1[:, :, 1, :])            # (16, 8, 64)
    y1 = y1.reshape(H1 // 2, 2, W1 // 2, C1_OUT)
    p1 = jnp.maximum(y1[:, 0], y1[:, 1])                        # (8, 8, 64)

    # ----- classifier: Linear(4096 -> 10) on the natural (64_pos, 64_ch) layout -----
    # T[p, p'*10+d] = sum_c P[p,c] * wf[d, c*64+p'] ; keep the p==p' diagonal via a
    # constant mask, reduce over positions, then a tiny select-matmul recovers logits.
    P = p1.reshape(NPOS, C1_OUT)                                # (64, 64), lane-preserving
    t = jnp.dot(P.astype(jnp.bfloat16), wfp_ref[...],
                preferred_element_type=jnp.float32)             # (64, 640) f32
    colsum = jnp.sum(t * msk_ref[...], axis=0, keepdims=True)   # (1, 640)
    logits = jnp.dot(colsum, rsel_ref[...],
                     preferred_element_type=jnp.float32) + bf_ref[...]
    o_ref[0] = logits                                           # (1, 10)


def _c2(b):
    return (0, 0)


def _c3(b):
    return (0, 0, 0)


def convnet5_pallas(pat0, w0s, t0, w1s, t1, wfp, msk, rsel, bfb):
    n = pat0.shape[0]
    in_specs = [
        pl.BlockSpec((1, H0 * W0, KS * KS * C0_IN), lambda b: (b, 0, 0)),  # patches
        pl.BlockSpec((KS * KS * C0_IN, C0_OUT), _c2),                       # conv0 W (bf16)
        pl.BlockSpec((1, C0_OUT), _c2),                                     # conv0 bias+BN shift
        pl.BlockSpec((KS, KS * C1_IN, C1_OUT), _c3),                        # conv1 W (bf16)
        pl.BlockSpec((1, C1_OUT), _c2),                                     # conv1 bias+BN shift
        pl.BlockSpec((C1_OUT, NPOS * N_CLS), _c2),                          # FC pos-expanded W
        pl.BlockSpec((NPOS, NPOS * N_CLS), _c2),                            # diagonal mask
        pl.BlockSpec((NPOS * N_CLS, N_CLS), _c2),                           # class-select matrix
        pl.BlockSpec((1, N_CLS), _c2),                                      # FC bias
    ]
    return pl.pallas_call(
        convnet5_kernel,
        out_shape=jax.ShapeDtypeStruct((n, 1, N_CLS), jnp.float32),
        grid=(n,),
        in_specs=in_specs,
        out_specs=pl.BlockSpec((1, 1, N_CLS), lambda b: (b, 0, 0)),
        scratch_shapes=[
            pltpu.VMEM((H1 + 2 * PAD, W1 + 2 * PAD, C1_IN), jnp.bfloat16),  # padded conv1 input
        ],
        compiler_params=pltpu.CompilerParams(
            dimension_semantics=("parallel",),          # shards batch across v7x's 2 TCs
            vmem_limit_bytes=16 * 1024 * 1024),
    )(pat0, w0s, t0, w1s, t1, wfp, msk, rsel, bfb)


@jax.jit
def convnet5_forward(x_nchw, w0s, t0, w1s, t1, wfp, msk, rsel, bfb):
    # NCHW -> NHWC and conv0 im2col (layout plumbing only; ~108 KB bf16), so the
    # kernel never performs the worst-case (3-of-128-lane) patch relayout.
    n = x_nchw.shape[0]
    x_nhwc = jnp.transpose(x_nchw, (0, 2, 3, 1))
    xp = jnp.pad(x_nhwc, ((0, 0), (PAD, PAD), (PAD, PAD), (0, 0)))
    taps = [xp[:, kh:kh + H0, kw:kw + W0, :] for kh in range(KS) for kw in range(KS)]
    pat0 = jnp.concatenate(taps, axis=-1).reshape(n, H0 * W0, KS * KS * C0_IN)
    out = convnet5_pallas(pat0.astype(jnp.bfloat16),
                          w0s, t0, w1s, t1, wfp, msk, rsel, bfb)
    return out.reshape(n, N_CLS)


# ---------------------------------------------------------------------------
# One-time constant parameter transforms (hoisted out of the forward path).
# ---------------------------------------------------------------------------
def prepare_params(w0, b0, g0, be0, m0, v0, w1, b1, g1, be1, m1, v1, wf, bf):
    def fold_bn(b, g, be, m, v):
        s = g / jnp.sqrt(v + BN_EPS)            # per-channel scale
        t = (b - m) * s + be                    # conv bias + BN shift folded
        return s, t

    s0, t0 = fold_bn(b0, g0, be0, m0, v0)
    s1, t1 = fold_bn(b1, g1, be1, m1, v1)

    # OIHW -> (kh, kw, cin, cout); BN scale folded into the weight columns; bf16 MXU operands.
    w0s = (jnp.transpose(w0, (2, 3, 1, 0)) * s0).reshape(KS * KS * C0_IN, C0_OUT)
    w0s = w0s.astype(jnp.bfloat16)
    w1s = (jnp.transpose(w1, (2, 3, 1, 0)) * s1).reshape(KS, KS * C1_IN, C1_OUT)
    w1s = w1s.astype(jnp.bfloat16)

    # FC: PyTorch flattens CHW (k = c*64 + p, p = h*8 + w).  Fold the permutation into a
    # position-expanded weight  wfp[c, p*10 + d] = wf[d, c*64 + p]  plus two constant
    # select matrices, so the kernel needs no lane-dense flatten of the features.
    wf3 = wf.reshape(N_CLS, C1_OUT, NPOS)                       # [d, c, p]
    wfp = jnp.transpose(wf3, (1, 2, 0)).reshape(C1_OUT, NPOS * N_CLS).astype(jnp.bfloat16)
    j = jnp.arange(NPOS * N_CLS)
    msk = (j[None, :] // N_CLS == jnp.arange(NPOS)[:, None]).astype(jnp.float32)   # (64, 640)
    rsel = (j[:, None] % N_CLS == jnp.arange(N_CLS)[None, :]).astype(jnp.float32)  # (640, 10)

    return (w0s, t0.reshape(1, C0_OUT).astype(jnp.float32),
            w1s, t1.reshape(1, C1_OUT).astype(jnp.float32),
            wfp, msk, rsel, bf.reshape(1, N_CLS).astype(jnp.float32))


# ---------------------------------------------------------------------------
# Pure-JAX reference (PyTorch conventions, eval-mode BN, f32) for correctness.
# ---------------------------------------------------------------------------
def reference_forward(x_nchw, w0, b0, g0, be0, m0, v0,
                      w1, b1, g1, be1, m1, v1, wf, bf):
    def block(x, w, b, g, be, m, v):
        y = jax.lax.conv_general_dilated(
            x, w, window_strides=(1, 1), padding=((PAD, PAD), (PAD, PAD)),
            dimension_numbers=("NCHW", "OIHW", "NCHW"))
        y = y + b.reshape(1, -1, 1, 1)
        y = ((y - m.reshape(1, -1, 1, 1))
             / jnp.sqrt(v.reshape(1, -1, 1, 1) + BN_EPS)
             * g.reshape(1, -1, 1, 1) + be.reshape(1, -1, 1, 1))
        y = jnp.maximum(y, 0.0)
        return jax.lax.reduce_window(y, -jnp.inf, jax.lax.max,
                                     (1, 1, 2, 2), (1, 1, 2, 2), "VALID")

    y = block(x_nchw, w0, b0, g0, be0, m0, v0)
    y = block(y, w1, b1, g1, be1, m1, v1)
    y = y.reshape(x_nchw.shape[0], -1)          # CHW flatten (PyTorch order)
    return y @ wf.T + bf


if __name__ == "__main__":
    key = jax.random.PRNGKey(0)
    ks = jax.random.split(key, 15)

    # Deterministic synthetic input + parameters (PyTorch layouts).
    x = jax.random.normal(ks[0], (N_BATCH, C0_IN, H0, W0), jnp.float32)

    w0 = 0.10 * jax.random.normal(ks[1], (C0_OUT, C0_IN, KS, KS), jnp.float32)
    b0 = 0.10 * jax.random.normal(ks[2], (C0_OUT,), jnp.float32)
    g0 = 1.0 + 0.10 * jax.random.normal(ks[3], (C0_OUT,), jnp.float32)
    be0 = 0.10 * jax.random.normal(ks[4], (C0_OUT,), jnp.float32)
    m0 = 0.10 * jax.random.normal(ks[5], (C0_OUT,), jnp.float32)
    v0 = 0.5 + jax.random.uniform(ks[6], (C0_OUT,), jnp.float32)

    w1 = 0.05 * jax.random.normal(ks[7], (C1_OUT, C1_IN, KS, KS), jnp.float32)
    b1 = 0.05 * jax.random.normal(ks[8], (C1_OUT,), jnp.float32)
    g1 = 1.0 + 0.10 * jax.random.normal(ks[9], (C1_OUT,), jnp.float32)
    be1 = 0.10 * jax.random.normal(ks[10], (C1_OUT,), jnp.float32)
    m1 = 0.10 * jax.random.normal(ks[11], (C1_OUT,), jnp.float32)
    v1 = 0.5 + jax.random.uniform(ks[12], (C1_OUT,), jnp.float32)

    wf = 0.02 * jax.random.normal(ks[13], (N_CLS, FEAT), jnp.float32)
    bf = 0.02 * jax.random.normal(ks[14], (N_CLS,), jnp.float32)

    # Constant transforms done ONCE (hoisted out of the per-call forward path).
    params = prepare_params(w0, b0, g0, be0, m0, v0,
                            w1, b1, g1, be1, m1, v1, wf, bf)

    out = jax.block_until_ready(convnet5_forward(x, *params))

    ref = jax.block_until_ready(
        reference_forward(x, w0, b0, g0, be0, m0, v0,
                          w1, b1, g1, be1, m1, v1, wf, bf))
    # Matmul operands are bf16 (per the perf review) with f32 accumulation; the
    # resulting logit error is ~1e-2 on O(1) logits, hence the 2e-2 tolerance.
    np.testing.assert_allclose(np.asarray(out), np.asarray(ref),
                               rtol=2e-2, atol=2e-2)
    assert out.shape == (N_BATCH, N_CLS)

    print("KERNEL_OK")
</pallas_src>

<mosaic_0001>
module attributes {stable_mosaic.version = 11 : i64} {
  func.func @convnet5_kernel(%arg0: i32, %arg1: memref<1x1024x27xbf16, #tpu.memory_space<vmem>>, %arg2: memref<27x32xbf16, #tpu.memory_space<vmem>>, %arg3: memref<1x32xf32, #tpu.memory_space<vmem>>, %arg4: memref<3x96x64xbf16, #tpu.memory_space<vmem>>, %arg5: memref<1x64xf32, #tpu.memory_space<vmem>>, %arg6: memref<64x640xbf16, #tpu.memory_space<vmem>>, %arg7: memref<64x640xf32, #tpu.memory_space<vmem>>, %arg8: memref<640x10xf32, #tpu.memory_space<vmem>>, %arg9: memref<1x10xf32, #tpu.memory_space<vmem>>, %arg10: memref<1x1x10xf32, #tpu.memory_space<vmem>>, %arg11: memref<18x18x32xbf16, #tpu.memory_space<vmem>>) attributes {dimension_semantics = [#tpu.dimension_semantics<parallel>], iteration_bounds = array<i64: 2>, scalar_prefetch = 0 : i64, scratch_operands = 1 : i64, tpu.core_type = #tpu.core_type<tc>, window_params = [{transform_indices = @transform_0, window_bounds = array<i64: 1, 1024, 27>}, {pipeline_mode = #tpu.pipeline_mode<synchronous>, transform_indices = @transform_1, window_bounds = array<i64: 27, 32>}, {pipeline_mode = #tpu.pipeline_mode<synchronous>, transform_indices = @transform_2, window_bounds = array<i64: 1, 32>}, {pipeline_mode = #tpu.pipeline_mode<synchronous>, transform_indices = @transform_3, window_bounds = array<i64: 3, 96, 64>}, {pipeline_mode = #tpu.pipeline_mode<synchronous>, transform_indices = @transform_4, window_bounds = array<i64: 1, 64>}, {pipeline_mode = #tpu.pipeline_mode<synchronous>, transform_indices = @transform_5, window_bounds = array<i64: 64, 640>}, {pipeline_mode = #tpu.pipeline_mode<synchronous>, transform_indices = @transform_6, window_bounds = array<i64: 64, 640>}, {pipeline_mode = #tpu.pipeline_mode<synchronous>, transform_indices = @transform_7, window_bounds = array<i64: 640, 10>}, {pipeline_mode = #tpu.pipeline_mode<synchronous>, transform_indices = @transform_8, window_bounds = array<i64: 1, 10>}, {transform_indices = @transform_9, window_bounds = array<i64: 1, 1, 10>}]} {
    %c0 = arith.constant 0 : index
    %c0_0 = arith.constant 0 : index
    %c0_1 = arith.constant 0 : index
    %0 = vector.load %arg1[%c0, %c0_0, %c0_1] : memref<1x1024x27xbf16, #tpu.memory_space<vmem>>, vector<1x1024x27xbf16>
    %1 = vector.shape_cast %0 : vector<1x1024x27xbf16> to vector<1024x27xbf16>
    %c0_2 = arith.constant 0 : index
    %c0_3 = arith.constant 0 : index
    %2 = vector.load %arg2[%c0_2, %c0_3] : memref<27x32xbf16, #tpu.memory_space<vmem>>, vector<27x32xbf16>
    %cst = arith.constant dense<0.000000e+00> : vector<1024x32xf32>
    %3 = tpu.matmul %1, %2, %cst {dimension_numbers = #tpu.dot_dimension_numbers<[1], [0], [0], [1], [0, 0, 1, 1], [], []>} : vector<1024x27xbf16>, vector<27x32xbf16>, vector<1024x32xf32> -> vector<1024x32xf32>
    %c0_4 = arith.constant 0 : index
    %c0_5 = arith.constant 0 : index
    %4 = vector.load %arg3[%c0_4, %c0_5] : memref<1x32xf32, #tpu.memory_space<vmem>>, vector<1x32xf32>
    %5 = vector.broadcast %4 : vector<1x32xf32> to vector<1024x32xf32>
    %6 = arith.addf %3, %5 : vector<1024x32xf32>
    %cst_6 = arith.constant 0.000000e+00 : f32
    %7 = vector.broadcast %cst_6 : f32 to vector<1024x32xf32>
    %8 = arith.maximumf %6, %7 : vector<1024x32xf32>
    %9 = vector.shape_cast %8 : vector<1024x32xf32> to vector<32x16x2x32xf32>
    %10 = vector.extract_strided_slice %9 {offsets = [0, 0, 0, 0], sizes = [32, 16, 1, 32], strides = [1, 1, 1, 1]} : vector<32x16x2x32xf32> to vector<32x16x1x32xf32>
    %11 = vector.shape_cast %10 : vector<32x16x1x32xf32> to vector<32x16x32xf32>
    %12 = vector.extract_strided_slice %9 {offsets = [0, 0, 1, 0], sizes = [32, 16, 1, 32], strides = [1, 1, 1, 1]} : vector<32x16x2x32xf32> to vector<32x16x1x32xf32>
    %13 = vector.shape_cast %12 : vector<32x16x1x32xf32> to vector<32x16x32xf32>
    %14 = arith.maximumf %11, %13 : vector<32x16x32xf32>
    %15 = vector.shape_cast %14 : vector<32x16x32xf32> to vector<16x2x16x32xf32>
    %16 = vector.extract_strided_slice %15 {offsets = [0, 0, 0, 0], sizes = [16, 1, 16, 32], strides = [1, 1, 1, 1]} : vector<16x2x16x32xf32> to vector<16x1x16x32xf32>
    %17 = vector.shape_cast %16 : vector<16x1x16x32xf32> to vector<16x16x32xf32>
    %18 = vector.extract_strided_slice %15 {offsets = [0, 1, 0, 0], sizes = [16, 1, 16, 32], strides = [1, 1, 1, 1]} : vector<16x2x16x32xf32> to vector<16x1x16x32xf32>
    %19 = vector.shape_cast %18 : vector<16x1x16x32xf32> to vector<16x16x32xf32>
    %20 = arith.maximumf %17, %19 : vector<16x16x32xf32>
    %cst_7 = arith.constant 0.000000e+00 : bf16
    %21 = vector.broadcast %cst_7 : bf16 to vector<1x18x32xbf16>
    %c0_8 = arith.constant 0 : index
    %c0_9 = arith.constant 0 : index
    %c0_10 = arith.constant 0 : index
    %22 = vector.load %arg11[%c0_8, %c0_9, %c0_10] : memref<18x18x32xbf16, #tpu.memory_space<vmem>>, vector<1x18x32xbf16>
    tpu.vector_store %arg11[%c0_8, %c0_9, %c0_10], %21 {strides = array<i32>} : memref<18x18x32xbf16, #tpu.memory_space<vmem>>, vector<1x18x32xbf16>,
    %c17 = arith.constant 17 : index
    %c0_11 = arith.constant 0 : index
    %c0_12 = arith.constant 0 : index
    %23 = vector.load %arg11[%c17, %c0_11, %c0_12] : memref<18x18x32xbf16, #tpu.memory_space<vmem>>, vector<1x18x32xbf16>
    tpu.vector_store %arg11[%c17, %c0_11, %c0_12], %21 {strides = array<i32>} : memref<18x18x32xbf16, #tpu.memory_space<vmem>>, vector<1x18x32xbf16>,
    %cst_13 = arith.constant 0.000000e+00 : bf16
    %24 = vector.broadcast %cst_13 : bf16 to vector<18x1x32xbf16>
    %c0_14 = arith.constant 0 : index
    %c0_15 = arith.constant 0 : index
    %c0_16 = arith.constant 0 : index
    %25 = vector.load %arg11[%c0_14, %c0_15, %c0_16] : memref<18x18x32xbf16, #tpu.memory_space<vmem>>, vector<18x1x32xbf16>
    tpu.vector_store %arg11[%c0_14, %c0_15, %c0_16], %24 {strides = array<i32>} : memref<18x18x32xbf16, #tpu.memory_space<vmem>>, vector<18x1x32xbf16>,
    %c0_17 = arith.constant 0 : index
    %c17_18 = arith.constant 17 : index
    %c0_19 = arith.constant 0 : index
    %26 = vector.load %arg11[%c0_17, %c17_18, %c0_19] : memref<18x18x32xbf16, #tpu.memory_space<vmem>>, vector<18x1x32xbf16>
    tpu.vector_store %arg11[%c0_17, %c17_18, %c0_19], %24 {strides = array<i32>} : memref<18x18x32xbf16, #tpu.memory_space<vmem>>, vector<18x1x32xbf16>,
    %27 = arith.truncf %20 : vector<16x16x32xf32> to vector<16x16x32xbf16>
    %c1 = arith.constant 1 : index
    %c1_20 = arith.constant 1 : index
    %c0_21 = arith.constant 0 : index
    %28 = vector.load %arg11[%c1, %c1_20, %c0_21] : memref<18x18x32xbf16, #tpu.memory_space<vmem>>, vector<16x16x32xbf16>
    tpu.vector_store %arg11[%c1, %c1_20, %c0_21], %27 {strides = array<i32>} : memref<18x18x32xbf16, #tpu.memory_space<vmem>>, vector<16x16x32xbf16>,
    %cst_22 = arith.constant 0.000000e+00 : f32
    %29 = vector.broadcast %cst_22 : f32 to vector<256x64xf32>
    %c0_23 = arith.constant 0 : index
    %c0_24 = arith.constant 0 : index
    %c0_25 = arith.constant 0 : index
    %30 = vector.load %arg11[%c0_23, %c0_24, %c0_25] : memref<18x18x32xbf16, #tpu.memory_space<vmem>>, vector<16x16x32xbf16>
    %31 = vector.shape_cast %30 : vector<16x16x32xbf16> to vector<256x32xbf16>
    %c0_26 = arith.constant 0 : index
    %c1_27 = arith.constant 1 : index
    %c0_28 = arith.constant 0 : index
    %32 = vector.load %arg11[%c0_26, %c1_27, %c0_28] : memref<18x18x32xbf16, #tpu.memory_space<vmem>>, vector<16x16x32xbf16>
    %33 = vector.shape_cast %32 : vector<16x16x32xbf16> to vector<256x32xbf16>
    %c0_29 = arith.constant 0 : index
    %c2 = arith.constant 2 : index
    %c0_30 = arith.constant 0 : index
    %34 = vector.load %arg11[%c0_29, %c2, %c0_30] : memref<18x18x32xbf16, #tpu.memory_space<vmem>>, vector<16x16x32xbf16>
    %35 = vector.shape_cast %34 : vector<16x16x32xbf16> to vector<256x32xbf16>
    %36 = tpu.concatenate %31, %33, %35 in 1 : vector<256x32xbf16>, vector<256x32xbf16>, vector<256x32xbf16> -> vector<256x96xbf16>
    %c0_31 = arith.constant 0 : index
    %c0_32 = arith.constant 0 : index
    %c0_33 = arith.constant 0 : index
    %37 = vector.load %arg4[%c0_31, %c0_32, %c0_33] : memref<3x96x64xbf16, #tpu.memory_space<vmem>>, vector<1x96x64xbf16>
    %38 = vector.shape_cast %37 : vector<1x96x64xbf16> to vector<96x64xbf16>
    %cst_34 = arith.constant dense<0.000000e+00> : vector<256x64xf32>
    %39 = tpu.matmul %36, %38, %cst_34 {dimension_numbers = #tpu.dot_dimension_numbers<[1], [0], [0], [1], [0, 0, 1, 1], [], []>} : vector<256x96xbf16>, vector<96x64xbf16>, vector<256x64xf32> -> vector<256x64xf32>
    %40 = arith.addf %29, %39 : vector<256x64xf32>
    %c1_35 = arith.constant 1 : index
    %c0_36 = arith.constant 0 : index
    %c0_37 = arith.constant 0 : index
    %41 = vector.load %arg11[%c1_35, %c0_36, %c0_37] : memref<18x18x32xbf16, #tpu.memory_space<vmem>>, vector<16x16x32xbf16>
    %42 = vector.shape_cast %41 : vector<16x16x32xbf16> to vector<256x32xbf16>
    %c1_38 = arith.constant 1 : index
    %c1_39 = arith.constant 1 : index
    %c0_40 = arith.constant 0 : index
    %43 = vector.load %arg11[%c1_38, %c1_39, %c0_40] : memref<18x18x32xbf16, #tpu.memory_space<vmem>>, vector<16x16x32xbf16>
    %44 = vector.shape_cast %43 : vector<16x16x32xbf16> to vector<256x32xbf16>
    %c1_41 = arith.constant 1 : index
    %c2_42 = arith.constant 2 : index
    %c0_43 = arith.constant 0 : index
    %45 = vector.load %arg11[%c1_41, %c2_42, %c0_43] : memref<18x18x32xbf16, #tpu.memory_space<vmem>>, vector<16x16x32xbf16>
    %46 = vector.shape_cast %45 : vector<16x16x32xbf16> to vector<256x32xbf16>
    %47 = tpu.concatenate %42, %44, %46 in 1 : vector<256x32xbf16>, vector<256x32xbf16>, vector<256x32xbf16> -> vector<256x96xbf16>
    %c1_44 = arith.constant 1 : index
    %c0_45 = arith.constant 0 : index
    %c0_46 = arith.constant 0 : index
    %48 = vector.load %arg4[%c1_44, %c0_45, %c0_46] : memref<3x96x64xbf16, #tpu.memory_space<vmem>>, vector<1x96x64xbf16>
    %49 = vector.shape_cast %48 : vector<1x96x64xbf16> to vector<96x64xbf16>
    %cst_47 = arith.constant dense<0.000000e+00> : vector<256x64xf32>
    %50 = tpu.matmul %47, %49, %cst_47 {dimension_numbers = #tpu.dot_dimension_numbers<[1], [0], [0], [1], [0, 0, 1, 1], [], []>} : vector<256x96xbf16>, vector<96x64xbf16>, vector<256x64xf32> -> vector<256x64xf32>
    %51 = arith.addf %40, %50 : vector<256x64xf32>
    %c2_48 = arith.constant 2 : index
    %c0_49 = arith.constant 0 : index
    %c0_50 = arith.constant 0 : index
    %52 = vector.load %arg11[%c2_48, %c0_49, %c0_50] : memref<18x18x32xbf16, #tpu.memory_space<vmem>>, vector<16x16x32xbf16>
    %53 = vector.shape_cast %52 : vector<16x16x32xbf16> to vector<256x32xbf16>
    %c2_51 = arith.constant 2 : index
    %c1_52 = arith.constant 1 : index
    %c0_53 = arith.constant 0 : index
    %54 = vector.load %arg11[%c2_51, %c1_52, %c0_53] : memref<18x18x32xbf16, #tpu.memory_space<vmem>>, vector<16x16x32xbf16>
    %55 = vector.shape_cast %54 : vector<16x16x32xbf16> to vector<256x32xbf16>
    %c2_54 = arith.constant 2 : index
    %c2_55 = arith.constant 2 : index
    %c0_56 = arith.constant 0 : index
    %56 = vector.load %arg11[%c2_54, %c2_55, %c0_56] : memref<18x18x32xbf16, #tpu.memory_space<vmem>>, vector<16x16x32xbf16>
    %57 = vector.shape_cast %56 : vector<16x16x32xbf16> to vector<256x32xbf16>
    %58 = tpu.concatenate %53, %55, %57 in 1 : vector<256x32xbf16>, vector<256x32xbf16>, vector<256x32xbf16> -> vector<256x96xbf16>
    %c2_57 = arith.constant 2 : index
    %c0_58 = arith.constant 0 : index
    %c0_59 = arith.constant 0 : index
    %59 = vector.load %arg4[%c2_57, %c0_58, %c0_59] : memref<3x96x64xbf16, #tpu.memory_space<vmem>>, vector<1x96x64xbf16>
    %60 = vector.shape_cast %59 : vector<1x96x64xbf16> to vector<96x64xbf16>
    %cst_60 = arith.constant dense<0.000000e+00> : vector<256x64xf32>
    %61 = tpu.matmul %58, %60, %cst_60 {dimension_numbers = #tpu.dot_dimension_numbers<[1], [0], [0], [1], [0, 0, 1, 1], [], []>} : vector<256x96xbf16>, vector<96x64xbf16>, vector<256x64xf32> -> vector<256x64xf32>
    %62 = arith.addf %51, %61 : vector<256x64xf32>
    %c0_61 = arith.constant 0 : index
    %c0_62 = arith.constant 0 : index
    %63 = vector.load %arg5[%c0_61, %c0_62] : memref<1x64xf32, #tpu.memory_space<vmem>>, vector<1x64xf32>
    %64 = vector.broadcast %63 : vector<1x64xf32> to vector<256x64xf32>
    %65 = arith.addf %62, %64 : vector<256x64xf32>
    %cst_63 = arith.constant 0.000000e+00 : f32
    %66 = vector.broadcast %cst_63 : f32 to vector<256x64xf32>
    %67 = arith.maximumf %65, %66 : vector<256x64xf32>
    %68 = vector.shape_cast %67 : vector<256x64xf32> to vector<16x8x2x64xf32>
    %69 = vector.extract_strided_slice %68 {offsets = [0, 0, 0, 0], sizes = [16, 8, 1, 64], strides = [1, 1, 1, 1]} : vector<16x8x2x64xf32> to vector<16x8x1x64xf32>
    %70 = vector.shape_cast %69 : vector<16x8x1x64xf32> to vector<16x8x64xf32>
    %71 = vector.extract_strided_slice %68 {offsets = [0, 0, 1, 0], sizes = [16, 8, 1, 64], strides = [1, 1, 1, 1]} : vector<16x8x2x64xf32> to vector<16x8x1x64xf32>
    %72 = vector.shape_cast %71 : vector<16x8x1x64xf32> to vector<16x8x64xf32>
    %73 = arith.maximumf %70, %72 : vector<16x8x64xf32>
    %74 = vector.shape_cast %73 : vector<16x8x64xf32> to vector<8x2x8x64xf32>
    %75 = vector.extract_strided_slice %74 {offsets = [0, 0, 0, 0], sizes = [8, 1, 8, 64], strides = [1, 1, 1, 1]} : vector<8x2x8x64xf32> to vector<8x1x8x64xf32>
    %76 = vector.shape_cast %75 : vector<8x1x8x64xf32> to vector<8x8x64xf32>
    %77 = vector.extract_strided_slice %74 {offsets = [0, 1, 0, 0], sizes = [8, 1, 8, 64], strides = [1, 1, 1, 1]} : vector<8x2x8x64xf32> to vector<8x1x8x64xf32>
    %78 = vector.shape_cast %77 : vector<8x1x8x64xf32> to vector<8x8x64xf32>
    %79 = arith.maximumf %76, %78 : vector<8x8x64xf32>
    %80 = vector.shape_cast %79 : vector<8x8x64xf32> to vector<64x64xf32>
    %81 = arith.truncf %80 : vector<64x64xf32> to vector<64x64xbf16>
    %c0_64 = arith.constant 0 : index
    %c0_65 = arith.constant 0 : index
    %82 = vector.load %arg6[%c0_64, %c0_65] : memref<64x640xbf16, #tpu.memory_space<vmem>>, vector<64x640xbf16>
    %cst_66 = arith.constant dense<0.000000e+00> : vector<64x640xf32>
    %83 = tpu.matmul %81, %82, %cst_66 {dimension_numbers = #tpu.dot_dimension_numbers<[1], [0], [0], [1], [0, 0, 1, 1], [], []>} : vector<64x64xbf16>, vector<64x640xbf16>, vector<64x640xf32> -> vector<64x640xf32>
    %c0_67 = arith.constant 0 : index
    %c0_68 = arith.constant 0 : index
    %84 = vector.load %arg7[%c0_67, %c0_68] : memref<64x640xf32, #tpu.memory_space<vmem>>, vector<64x640xf32>
    %85 = arith.mulf %83, %84 : vector<64x640xf32>
    %cst_69 = arith.constant dense<0.000000e+00> : vector<640xf32>
    %86 = vector.multi_reduction <add>, %85, %cst_69 [0] : vector<64x640xf32> to vector<640xf32>
    %87 = vector.shape_cast %86 : vector<640xf32> to vector<1x640xf32>
    %c0_70 = arith.constant 0 : index
    %c0_71 = arith.constant 0 : index
    %88 = vector.load %arg8[%c0_70, %c0_71] : memref<640x10xf32, #tpu.memory_space<vmem>>, vector<640x10xf32>
    %cst_72 = arith.constant dense<0.000000e+00> : vector<1x10xf32>
    %89 = tpu.matmul %87, %88, %cst_72 {dimension_numbers = #tpu.dot_dimension_numbers<[1], [0], [0], [1], [0, 0, 1, 1], [], []>} : vector<1x640xf32>, vector<640x10xf32>, vector<1x10xf32> -> vector<1x10xf32>
    %c0_73 = arith.constant 0 : index
    %c0_74 = arith.constant 0 : index
    %90 = vector.load %arg9[%c0_73, %c0_74] : memref<1x10xf32, #tpu.memory_space<vmem>>, vector<1x10xf32>
    %91 = arith.addf %89, %90 : vector<1x10xf32>
    %c0_75 = arith.constant 0 : index
    %c0_76 = arith.constant 0 : index
    %c0_77 = arith.constant 0 : index
    %92 = vector.load %arg10[%c0_75, %c0_76, %c0_77] : memref<1x1x10xf32, #tpu.memory_space<vmem>>, vector<1x1x10xf32>
    %93 = vector.shape_cast %92 : vector<1x1x10xf32> to vector<1x10xf32>
    %94 = vector.shape_cast %91 : vector<1x10xf32> to vector<1x1x10xf32>
    tpu.vector_store %arg10[%c0_75, %c0_76, %c0_77], %94 {strides = array<i32>} : memref<1x1x10xf32, #tpu.memory_space<vmem>>, vector<1x1x10xf32>,
    return
  }
  func.func @transform_0(%arg0: i32) -> (i32, i32, i32) {
    %c0_i32 = arith.constant 0 : i32
    %c0_i32_0 = arith.constant 0 : i32
    %c0_i32_1 = arith.constant 0 : i32
    return %arg0, %c0_i32, %c0_i32_0 : i32, i32, i32
  }
  func.func @transform_1(%arg0: i32) -> (i32, i32) {
    %c0_i32 = arith.constant 0 : i32
    %c0_i32_0 = arith.constant 0 : i32
    %c0_i32_1 = arith.constant 0 : i32
    return %c0_i32, %c0_i32_0 : i32, i32
  }
  func.func @transform_2(%arg0: i32) -> (i32, i32) {
    %c0_i32 = arith.constant 0 : i32
    %c0_i32_0 = arith.constant 0 : i32
    %c0_i32_1 = arith.constant 0 : i32
    return %c0_i32, %c0_i32_0 : i32, i32
  }
  func.func @transform_3(%arg0: i32) -> (i32, i32, i32) {
    %c0_i32 = arith.constant 0 : i32
    %c0_i32_0 = arith.constant 0 : i32
    %c0_i32_1 = arith.constant 0 : i32
    %c0_i32_2 = arith.constant 0 : i32
    return %c0_i32, %c0_i32_0, %c0_i32_1 : i32, i32, i32
  }
  func.func @transform_4(%arg0: i32) -> (i32, i32) {
    %c0_i32 = arith.constant 0 : i32
    %c0_i32_0 = arith.constant 0 : i32
    %c0_i32_1 = arith.constant 0 : i32
    return %c0_i32, %c0_i32_0 : i32, i32
  }
  func.func @transform_5(%arg0: i32) -> (i32, i32) {
    %c0_i32 = arith.constant 0 : i32
    %c0_i32_0 = arith.constant 0 : i32
    %c0_i32_1 = arith.constant 0 : i32
    return %c0_i32, %c0_i32_0 : i32, i32
  }
  func.func @transform_6(%arg0: i32) -> (i32, i32) {
    %c0_i32 = arith.constant 0 : i32
    %c0_i32_0 = arith.constant 0 : i32
    %c0_i32_1 = arith.constant 0 : i32
    return %c0_i32, %c0_i32_0 : i32, i32
  }
  func.func @transform_7(%arg0: i32) -> (i32, i32) {
    %c0_i32 = arith.constant 0 : i32
    %c0_i32_0 = arith.constant 0 : i32
    %c0_i32_1 = arith.constant 0 : i32
    return %c0_i32, %c0_i32_0 : i32, i32
  }
  func.func @transform_8(%arg0: i32) -> (i32, i32) {
    %c0_i32 = arith.constant 0 : i32
    %c0_i32_0 = arith.constant 0 : i32
    %c0_i32_1 = arith.constant 0 : i32
    return %c0_i32, %c0_i32_0 : i32, i32
  }
  func.func @transform_9(%arg0: i32) -> (i32, i32, i32) {
    %c0_i32 = arith.constant 0 : i32
    %c0_i32_0 = arith.constant 0 : i32
    %c0_i32_1 = arith.constant 0 : i32
    return %arg0, %c0_i32, %c0_i32_0 : i32, i32, i32
  }
}

</mosaic_0001>

<bundles_post_ra>
// kernel: convnet5_forward.1
= control target key start
LH: loop header
LB: loop body
LE: loop exit
PB: predicated region body
PF: predicated region fallthrough
CT: control target
= control target key end

     0   :  { %14 = vsyncpa [#allocation4], 0  ;;  %s22421_s0 = inlined_call_operand.vmem [shape: bf16[2,1024,27], index: 0, kind: input, shape index: {}]   ;;  %s22422_s1 = inlined_call_operand.vmem [shape: bf16[27,32], index: 1, kind: input, shape index: {}]   ;;  %s22423_s2 = inlined_call_operand.vmem [shape: f32[1,32], index: 2, kind: input, shape index: {}]   ;;  %s22424_s3 = inlined_call_operand.vmem [shape: bf16[3,96,64], index: 3, kind: input, shape index: {}]   ;;  %s22425_s4 = inlined_call_operand.vmem [shape: f32[1,64], index: 4, kind: input, shape index: {}]   ;;  %s22426_s5 = inlined_call_operand.vmem [shape: bf16[64,640], index: 5, kind: input, shape index: {}]   ;;  %s22427_s6 = inlined_call_operand.vmem [shape: f32[64,640], index: 6, kind: input, shape index: {}]   ;;  %s22428_s7 = inlined_call_operand.vmem [shape: f32[640,10], index: 7, kind: input, shape index: {}]   ;;  %s22429_s8 = inlined_call_operand.vmem [shape: f32[1,10], index: 8, kind: input, shape index: {}]   ;;  %s22430_s9 = inlined_call_operand.hbm [shape: f32[2,1,10], index: 9, kind: output, shape index: {}]  }
   0x1   :  { %16 = vsyncpa [#allocation4 + $0x1], 0  ;;  %s17595_s30 = smov 0   ;;  %s17597_s10 = smov 0  }
   0x2   :  { %s17599_s11 = smov 0   ;;  %s17601_s12 = smov 0  }
   0x3 LB: > { %s17616_s13 = sadd.s32 4294967295, %s17534_s12   ;;  %s14865_s14 = sadd.s32 4294967294, %s17534_s12   ;;  %s17534_s12 = sphi %s17601_s12, %s22549_s12   ;;  %s17530_s11 = sphi %s17599_s11, %s22548_s11   ;;  %s17526_s10 = sphi %s17597_s10, %s22547_s10   ;;  %s17522_s30 = sphi %s17595_s30, %s22546_s30  }
   0x4   : > { %s17620_s15 = sadd.s32 1, %s17534_s12   ;;  %s223_s16 = sadd.s32 1, %s17530_s11 }
   0x5   : > { %s220_s17 = ssub.s32 %s17534_s12, %s17620_s15  ;;  %p233_p0 = scmp.ne.s32.totalorder %s17530_s11, %s17526_s10 }
   0x6   : > { %p221_p1 = scmp.eq.s32.totalorder %s220_s17, 0  ;;  %p234_p2 = scmp.eq.s32.totalorder %s17616_s13, 1 }
   0x7   : > { %p239_p3 = scmp.ne.s32.totalorder %s17526_s10, %s17522_s30  ;;  %p240_p4 = scmp.eq.s32.totalorder %s14865_s14, 1 }
   0x8   : > { %s17631_s18 = scalar_select %p221_p1, %s17530_s11, %s223_s16  }
   0x9   : > { %p17633_p5 = por %p234_p2, %p233_p0  ;;  %p17637_p6 = por %p240_p4, %p239_p3 }
   0xa   : > { %p14868_p7 = scmp.ge.s32.totalorder %s17534_s12, 1  ;;  %p290_p8 = scmp.lt.s32.totalorder %s17534_s12, 3 }
   0xc   : > { %p291_p9 = pnand %p14868_p7, %p290_p8 }
   0xe   : > { %294 = sbr.rel (%p291_p9) target bundleno = 2327 (0x917), region = 56 }
  0x15   : > { %v17246_v0 = vld [vmem:[%s22422_s1] sm:$0xff]   ;;  %vm994_vm0 = vcmask 1044480   ;;  %v17247_v1 = vld [vmem:[%s22422_s1 + $0x8] sm:$0x3f]   ;;  %vm995_vm1 = vcmask 1045504   ;;  %p325_p10 = scmp.lt.s32.totalorder %s17616_s13, 1 }
  0x16   : > { %16732 = vmatprep.subr.bf16.mxu0 %v17246_v0  ;;  %vm801_vm2 = vcmask 220160   ;;  %v17536_v2 = vmov 65535   ;;  %vm22431_vm3 = vcmask 253952   ;;  %vm6860_vm4 = vsmask.f32 7938  ;;  %s17538_s22 = smov 64  }
  0x17   : > { %16733 = vmatpush3.bf16.msra.mxu0 %v17246_v0  ;;  %v996_v3 = vsel %vm994_vm0, 4294967295, %v17536_v2  ;;  %s326_s25 = scalar_select %p325_p10, %s17616_s13, 1  ;;  %vm17723_vm5 = vmand %vm22431_vm3, %vm6860_vm4  ;;  %v6865_v40 = vld [vmem:[#allocation2 + $0x14] sm:$0x1]  ;;  %vm6804_vm6 = vsmask.f32 256 }
  0x18   : > { %v997_v4 = vsel %vm995_vm1, %v996_v3, 0  ;;  %v6866_v41 = vsel %vm17723_vm5, 0, %v6865_v40  ;;  %vm17735_vm7 = vmand %vm22431_vm3, %vm6804_vm6  ;;  %v6809_v47 = vld [vmem:[#allocation2 + $0xc] sm:$0x1]  ;;  %v6868_v57 = vld [vmem:[#allocation2 + $0x20] sm:$0x1] }
  0x19   : > { %v999_v5 = vand.u32 %v17247_v1, %v997_v4  ;;  %s16232_s26 = sshll.u32 %s326_s25, 9  ;;  %6867 = vst [vmem:[#allocation2 + $0x14] sm:$0x1] %v6866_v41  ;;  %v6810_v48 = vsel %vm17735_vm7, 0, %v6809_v47  ;;  %v6869_v59 = vsel %vm17723_vm5, 0, %v6868_v57  ;;  %vm8198_vm8 = vcmask 1042434  }
  0x1a   : > { %s17654_s29 = scalar_lea.vmem %s22421_s0, %s16232_s26  ;;  %6811 = vst [vmem:[#allocation2 + $0xc] sm:$0x1] %v6810_v48  ;;  %6870 = vst [vmem:[#allocation2 + $0x20] sm:$0x1] %v6869_v59  ;;  %v6812_v63 = vld [vmem:[#allocation2 + $0x18] sm:$0x1] }
  0x1b   : > { %16734 = vmatprep.subr.bf16.mxu0 %v999_v5  ;;  %v17248_v6 = vld [vmem:[%s17654_s29] sm:$0xff]   ;;  %v17249_v7 = vld [vmem:[%s17654_s29 + $0x8] sm:$0xff]   ;;  %v17250_v8 = vld [vmem:[%s17654_s29 + $0x10] sm:$0xff]   ;;  %v6813_v0 = vsel %vm17735_vm7, 0, %v6812_v63  ;;  %vm8201_vm9 = vcmask 1043459   ;;  %vm8204_vm10 = vcmask 1044484  }
  0x1c   : > { %16735 = vmatpush3.bf16.msra.mxu0 %v999_v5  ;;  %16736 = vmatprep.mubr.msk.bf16.mxu0 %vm801_vm2, %v17248_v6  ;;  %v17251_v9 = vld [vmem:[%s17654_s29 + $0x18] sm:$0xff]   ;;  %v17252_v10 = vld [vmem:[%s17654_s29 + $0x20] sm:$0xff]   ;;  %v17253_v11 = vld [vmem:[%s17654_s29 + $0x28] sm:$0xff]   ;;  %6814 = vst [vmem:[#allocation2 + $0x18] sm:$0x1] %v6813_v0  ;;  %vm8207_vm11 = vcmask 1045509  }
  0x1d   : > { %v17254_v12 = vld [vmem:[%s17654_s29 + $0x30] sm:$0xff]   ;;  %v17255_v13 = vld [vmem:[%s17654_s29 + $0x38] sm:$0xff]   ;;  %v17256_v14 = vld [vmem:[%s17654_s29 + $0x40] sm:$0xff]   ;;  %v17537_v6 = vmov 1983009808   ;;  %vm8210_vm12 = vcmask 1046534  }
  0x1e   : > { %v17257_v15 = vld [vmem:[%s17654_s29 + $0x48] sm:$0xff]   ;;  %v17258_v16 = vld [vmem:[%s17654_s29 + $0x50] sm:$0xff]   ;;  %v17259_v17 = vld [vmem:[%s17654_s29 + $0x58] sm:$0xff]   ;;  %vm8216_vm13 = vcmask 1041409   ;;  %vm6794_vm14 = vcmask 257024   ;;  %vm22432_vm15 = vcmask 1047559  }
  0x1f   : > { %16737 = vmatmul.mubr.msk.bf16.vlgmr.msra.gmra.mrb[0].mxu0 %vm801_vm2, %v17249_v7  ;;  %v17260_v18 = vld [vmem:[%s17654_s29 + $0x60] sm:$0xff]   ;;  %v17261_v19 = vld [vmem:[%s17654_s29 + $0x68] sm:$0xff]   ;;  %v17262_v20 = vld [vmem:[%s17654_s29 + $0x70] sm:$0xff]   ;;  %v1804_v7 = vunpack.c.l.s4 %v17537_v6  ;;  %vm9345_vm1 = vcmask 1042432   ;;  %vm8894_vm6 = vsmask.f32 3328 }
  0x20   : > { %16740 = vmatprep.mubr.msk.bf16.mxu0 %vm801_vm2, %v17250_v8  ;;  %v17263_v21 = vld [vmem:[%s17654_s29 + $0x78] sm:$0xff]   ;;  %v17264_v22 = vld [vmem:[%s17654_s29 + $0x80] sm:$0xff]   ;;  %v17265_v23 = vld [vmem:[%s17654_s29 + $0x88] sm:$0xff]   ;;  %v1806_v8 = vlaneseq  ;;  %s17539_s23 = smov 32   ;;  %vm10739_vm3 = vcmask 785408   ;;  %s16229_s21 = sshll.u32 %s17616_s13, 4 }
  0x21   : > { %v17266_v24 = vld [vmem:[%s17654_s29 + $0x90] sm:$0xff]   ;;  %v17267_v25 = vld [vmem:[%s17654_s29 + $0x98] sm:$0xff]   ;;  %v17268_v26 = vld [vmem:[%s17654_s29 + $0xa0] sm:$0xff]   ;;  %s22379_s28 = scalar_lea.hbm %s22430_s9, %s16229_s21  ;;  %s17544_s13 = smov [#allocation3]  }
  0x22   : > { %v17269_v27 = vld [vmem:[%s17654_s29 + $0xa8] sm:$0xff]   ;;  %v17270_v28 = vld [vmem:[%s17654_s29 + $0xb0] sm:$0xff]   ;;  %v17271_v29 = vld [vmem:[%s17654_s29 + $0xb8] sm:$0xff]   ;;  %s17476_s16 = sshll.u32 %s17544_s13, 4  ;;  %s17477_s16 = int_to_ptr.vmem [resolvable:$false] %s17476_s16 }
  0x23   : > { %v17272_v30 = vld [vmem:[%s17654_s29 + $0xc0] sm:$0xff]   ;;  %v17273_v31 = vld [vmem:[%s17654_s29 + $0xc8] sm:$0xff]   ;;  %v17274_v32 = vld [vmem:[%s17654_s29 + $0xd0] sm:$0xff]  }
  0x24   : > { %v17275_v33 = vld [vmem:[%s17654_s29 + $0xd8] sm:$0xff]   ;;  %v17276_v34 = vld [vmem:[%s17654_s29 + $0xe0] sm:$0xff]   ;;  %v17277_v35 = vld [vmem:[%s17654_s29 + $0xe8] sm:$0xff]  }
  0x25   : > { %v17278_v36 = vld [vmem:[%s17654_s29 + $0xf0] sm:$0xff]   ;;  %v17279_v37 = vld [vmem:[%s17654_s29 + $0xf8] sm:$0xff]   ;;  %v17280_v38 = vld [vmem:[%s17654_s29 + $0x100] sm:$0xff]  }
  0x26   : > { %v17281_v42 = vld [vmem:[%s17654_s29 + $0x108] sm:$0xff]   ;;  %v17282_v43 = vld [vmem:[%s17654_s29 + $0x110] sm:$0xff]   ;;  %v17283_v45 = vld [vmem:[%s17654_s29 + $0x118] sm:$0xff]  }
  0x27   : > { %16741 = vmatmul.mubr.msk.bf16.gmra.mrb[4].mxu0 %vm801_vm2, %v17251_v9  ;;  %v17284_v46 = vld [vmem:[%s17654_s29 + $0x120] sm:$0xff]   ;;  %v17285_v49 = vld [vmem:[%s17654_s29 + $0x128] sm:$0xff]   ;;  %v17286_v50 = vld [vmem:[%s17654_s29 + $0x130] sm:$0xff]  }
  0x28   : > { %16744 = vmatprep.mubr.msk.bf16.mxu0 %vm801_vm2, %v17252_v10  ;;  %v17287_v51 = vld [vmem:[%s17654_s29 + $0x138] sm:$0xff]   ;;  %v17288_v52 = vld [vmem:[%s17654_s29 + $0x140] sm:$0xff]   ;;  %v17289_v53 = vld [vmem:[%s17654_s29 + $0x148] sm:$0xff]   ;;  %v1805_v10 = vunpack.c.0.s8 %v1804_v7 }
  0x29   : > { %v17290_v54 = vld [vmem:[%s17654_s29 + $0x150] sm:$0xff]   ;;  %v17291_v55 = vld [vmem:[%s17654_s29 + $0x158] sm:$0xff]   ;;  %v17292_v56 = vld [vmem:[%s17654_s29 + $0x160] sm:$0xff]  }
  0x2a   : > { %v17293_v58 = vld [vmem:[%s17654_s29 + $0x168] sm:$0xff]   ;;  %v17294_v60 = vld [vmem:[%s17654_s29 + $0x170] sm:$0xff]   ;;  %v17295_v61 = vld [vmem:[%s17654_s29 + $0x178] sm:$0xff]  }
  0x2b   : > { %v17296_v62 = vld [vmem:[%s17654_s29 + $0x180] sm:$0xff]   ;;  %v17297_v1 = vld [vmem:[%s17654_s29 + $0x188] sm:$0xff]   ;;  %v17298_v2 = vld [vmem:[%s17654_s29 + $0x190] sm:$0xff]  }
  0x2c   : > { %v17299_v3 = vld [vmem:[%s17654_s29 + $0x198] sm:$0xff]   ;;  %v17300_v4 = vld [vmem:[%s17654_s29 + $0x1a0] sm:$0xff]   ;;  %v17301_v5 = vld [vmem:[%s17654_s29 + $0x1a8] sm:$0xff]  }
  0x2d   : > { %v17302_v9 = vld [vmem:[%s17654_s29 + $0x1b0] sm:$0xff]   ;;  %v17305_v48 = vld [vmem:[%s17654_s29 + $0x1c8] sm:$0xff]   ;;  %vm17999_vm0 = vmand %vm6794_vm14, %vm6860_vm4 }
  0x2e   : > { %v17431_v39 = vld [vmem:[%s22424_s3 + $0x60] sm:$0xff]  }
  0x2f   : > { %16745 = vmatmul.mubr.msk.bf16.gmra.mrb[8].mxu0 %vm801_vm2, %v17253_v11  ;;  %v1807_v11 = vshrl.u32 %v1806_v8, 7 }
  0x30   : > { %16748 = vmatprep.mubr.msk.bf16.mxu0 %vm801_vm2, %v17254_v12  ;;  %v17787_v12 = vld [vmem:[%s22423_s2] ss:$0 sm:$0xff] }
  0x37   : > { %16749 = vmatmul.mubr.msk.bf16.gmra.mrb[12].mxu0 %vm801_vm2, %v17255_v13 }
  0x38   : > { %16752 = vmatprep.mubr.msk.bf16.mxu0 %vm801_vm2, %v17256_v14 }
  0x3f   : > { %16753 = vmatmul.mubr.msk.bf16.gmra.mrb[16].mxu0 %vm801_vm2, %v17257_v15  ;;  %v17791_v15 = vsub.s32 %v1805_v10, %v1807_v11 }
  0x40   : > { %16756 = vmatprep.mubr.msk.bf16.mxu0 %vm801_vm2, %v17258_v16 }
  0x47   : > { %16757 = vmatmul.mubr.msk.bf16.gmra.mrb[20].mxu0 %vm801_vm2, %v17259_v17  ;;  %v17303_v17 = vld [vmem:[%s17654_s29 + $0x1b8] sm:$0xff]  }
  0x48   : > { %16760 = vmatprep.mubr.msk.bf16.mxu0 %vm801_vm2, %v17260_v18 }
  0x4f   : > { %16761 = vmatmul.mubr.msk.bf16.gmra.mrb[24].mxu0 %vm801_vm2, %v17261_v19 }
  0x50   : > { %16764 = vmatprep.mubr.msk.bf16.mxu0 %vm801_vm2, %v17262_v20  ;;  %v17304_v20 = vld [vmem:[%s17654_s29 + $0x1c0] sm:$0xff]  }
  0x57   : > { %16765 = vmatmul.mubr.msk.bf16.gmra.mrb[28].mxu0 %vm801_vm2, %v17263_v21 }
  0x58   : > { %16768 = vmatprep.mubr.msk.bf16.mxu0 %vm801_vm2, %v17264_v22 }
  0x5f   : > { %16769 = vmatmul.mubr.msk.bf16.gmra.mrb[32].mxu0 %vm801_vm2, %v17265_v23 }
  0x60   : > { %16772 = vmatprep.mubr.msk.bf16.mxu0 %vm801_vm2, %v17266_v24 }
  0x67   : > { %16773 = vmatmul.mubr.msk.bf16.gmra.mrb[36].mxu0 %vm801_vm2, %v17267_v25 }
  0x68   : > { %16776 = vmatprep.mubr.msk.bf16.mxu0 %vm801_vm2, %v17268_v26 }
  0x6f   : > { %16777 = vmatmul.mubr.msk.bf16.gmra.mrb[40].mxu0 %vm801_vm2, %v17269_v27 }
  0x70   : > { %16780 = vmatprep.mubr.msk.bf16.mxu0 %vm801_vm2, %v17270_v28 }
  0x77   : > { %16781 = vmatmul.mubr.msk.bf16.gmra.mrb[44].mxu0 %vm801_vm2, %v17271_v29 }
  0x78   : > { %16784 = vmatprep.mubr.msk.bf16.mxu0 %vm801_vm2, %v17272_v30 }
  0x7f   : > { %16785 = vmatmul.mubr.msk.bf16.gmra.mrb[48].mxu0 %vm801_vm2, %v17273_v31 }
  0x80   : > { %16788 = vmatprep.mubr.msk.bf16.mxu0 %vm801_vm2, %v17274_v32 }
  0x87   : > { %16789 = vmatmul.mubr.msk.bf16.gmra.mrb[52].mxu0 %vm801_vm2, %v17275_v33 }
  0x88   : > { %16792 = vmatprep.mubr.msk.bf16.mxu0 %vm801_vm2, %v17276_v34 }
  0x8f   : > { %16793 = vmatmul.mubr.msk.bf16.gmra.mrb[56].mxu0 %vm801_vm2, %v17277_v35 }
  0x90   : > { %16796 = vmatprep.mubr.msk.bf16.mxu0 %vm801_vm2, %v17278_v36 }
  0x97   : > { %16797 = vmatmul.mubr.msk.bf16.gmra.mrb[60].mxu0 %vm801_vm2, %v17279_v37 }
  0x98   : > { %16800 = vmatprep.mubr.msk.bf16.mxu0 %vm801_vm2, %v17280_v38 }
  0x9f   : > { %16801 = vmatmul.mubr.msk.bf16.gmra.mrb[64].mxu0 %vm801_vm2, %v17281_v42 }
  0xa0   : > { %16804 = vmatprep.mubr.msk.bf16.mxu0 %vm801_vm2, %v17282_v43 }
  0xa7   : > { %16805 = vmatmul.mubr.msk.bf16.gmra.mrb[68].mxu0 %vm801_vm2, %v17283_v45 }
  0xa8   : > { %16808 = vmatprep.mubr.msk.bf16.mxu0 %vm801_vm2, %v17284_v46 }
  0xaf   : > { %16809 = vmatmul.mubr.msk.bf16.gmra.mrb[72].mxu0 %vm801_vm2, %v17285_v49 }
  0xb0   : > { %16812 = vmatprep.mubr.msk.bf16.mxu0 %vm801_vm2, %v17286_v50 }
  0xb7   : > { %16813 = vmatmul.mubr.msk.bf16.gmra.mrb[76].mxu0 %vm801_vm2, %v17287_v51 }
  0xb8   : > { %16816 = vmatprep.mubr.msk.bf16.mxu0 %vm801_vm2, %v17288_v52 }
  0xbf   : > { %16817 = vmatmul.mubr.msk.bf16.gmra.mrb[80].mxu0 %vm801_vm2, %v17289_v53 }
  0xc0   : > { %16820 = vmatprep.mubr.msk.bf16.mxu0 %vm801_vm2, %v17290_v54  ;;  %v17306_v54 = vld [vmem:[%s17654_s29 + $0x1d0] sm:$0xff]  }
  0xc7   : > { %16821 = vmatmul.mubr.msk.bf16.gmra.mrb[84].mxu0 %vm801_vm2, %v17291_v55 }
  0xc8   : > { %16824 = vmatprep.mubr.msk.bf16.mxu0 %vm801_vm2, %v17292_v56 }
  0xcf   : > { %16825 = vmatmul.mubr.msk.bf16.gmra.mrb[88].mxu0 %vm801_vm2, %v17293_v58 }
  0xd0   : > { %16828 = vmatprep.mubr.msk.bf16.mxu0 %vm801_vm2, %v17294_v60 }
  0xd7   : > { %16829 = vmatmul.mubr.msk.bf16.gmra.mrb[92].mxu0 %vm801_vm2, %v17295_v61 }
  0xd8   : > { %16832 = vmatprep.mubr.msk.bf16.mxu0 %vm801_vm2, %v17296_v62 }
  0xdf   : > { %16833 = vmatmul.mubr.msk.bf16.gmra.mrb[96].mxu0 %vm801_vm2, %v17297_v1 }
  0xe0   : > { %16836 = vmatprep.mubr.msk.bf16.mxu0 %vm801_vm2, %v17298_v2 }
  0xe7   : > { %16837 = vmatmul.mubr.msk.bf16.gmra.mrb[100].mxu0 %vm801_vm2, %v17299_v3 }
  0xe8   : > { %16840 = vmatprep.mubr.msk.bf16.mxu0 %vm801_vm2, %v17300_v4 }
  0xef   : > { %16841 = vmatmul.mubr.msk.bf16.gmra.mrb[104].mxu0 %vm801_vm2, %v17301_v5 }
  0xf0   : > { %16844 = vmatprep.mubr.msk.bf16.mxu0 %vm801_vm2, %v17302_v9 }
  0xf2   : > { %v16738_v13 = vpop.f32.mrb[0].mxu0 }
  0xf3   : > { %v1044_v14 = vadd.f32 %v16738_v13, %v17787_v12  ;;  %v1035_v16 = vpop.f32.mrb[1].mxu0 }
  0xf4   : > { %v1036_v18 = vadd.f32 %v17787_v12, %v1035_v16  ;;  %v16739_v19 = vpop.f32.mrb[2].mxu0 }
  0xf5   : > { %v1548_v21 = vmax.f32 %v1044_v14, 0.0  ;;  %v1047_v22 = vadd.f32 %v16739_v19, %v17787_v12  ;;  %v1038_v23 = vpop.f32.mrb[3].mxu0 }
  0xf6   : > { %v1546_v24 = vmax.f32 %v1036_v18, 0.0  ;;  %v1039_v25 = vadd.f32 %v17787_v12, %v1038_v23 }
  0xf7   : > { %v1836_v26 = vcombine.high %v1548_v21, %v1548_v21  ;;  %v1843_v27 = vrot.slane %v1548_v21, %v17791_v15  ;;  %v1549_v28 = vmax.f32 %v1047_v22, 0.0  ;;  %16845 = vmatmul.mubr.msk.bf16.gmra.mrb[108].mxu0 %vm801_vm2, %v17303_v17 }
  0xf8   : > { %v1802_v29 = vcombine.high %v1546_v24, %v1546_v24  ;;  %v1809_v30 = vrot.slane %v1546_v24, %v17791_v15  ;;  %v1547_v31 = vmax.f32 %v1039_v25, 0.0  ;;  %16848 = vmatprep.mubr.msk.bf16.mxu0 %vm801_vm2, %v17304_v20  ;;  %v17307_v24 = vld [vmem:[%s17654_s29 + $0x1d8] sm:$0xff]  }
  0xf9   : > { %v1850_v32 = vrot.slane %v1836_v26, %v17791_v15  ;;  %v1851_v33 = vcombine.high %v1843_v27, %v1843_v27  ;;  %v15010_v34 = vrot.slane %v1843_v27, 9  ;;  %v1853_v35 = vcombine.high %v1549_v28, %v1549_v28 }
  0xfa   : > { %v1816_v36 = vrot.slane %v1802_v29, %v17791_v15  ;;  %v1817_v37 = vcombine.high %v1809_v30, %v1809_v30  ;;  %v15002_v38 = vrot.slane %v1809_v30, 9  ;;  %v1860_v40 = vrot.slane %v1549_v28, %v17791_v15  ;;  %v16742_v41 = vpop.f32.mrb[4].mxu0 }
  0xfb   : > { %v1852_v42 = vcombine.high %v1850_v32, %v1850_v32  ;;  %v15011_v43 = vrot.slane %v1851_v33, 9  ;;  %v15012_v45 = vrot.slane %v1850_v32, 9  ;;  %v17805_v46 = vmax.f32 %v1843_v27, %v15010_v34  ;;  %v1051_v47 = vpop.f32.mrb[5].mxu0 }
  0xfc   : > { %v1818_v49 = vcombine.high %v1816_v36, %v1816_v36  ;;  %v15003_v50 = vrot.slane %v1817_v37, 9  ;;  %v15004_v51 = vrot.slane %v1816_v36, 9  ;;  %v17808_v52 = vmax.f32 %v1809_v30, %v15002_v38  ;;  %v16743_v53 = vpop.f32.mrb[6].mxu0  ;;  %v17308_v30 = vld [vmem:[%s17654_s29 + $0x1e0] sm:$0xff]  }
  0xfd   : > { %v15013_v55 = vrot.slane %v1852_v42, 9  ;;  %v17811_v56 = vmax.f32 %v1851_v33, %v15011_v43  ;;  %v17813_v57 = vmax.f32 %v1850_v32, %v15012_v45  ;;  %v1867_v58 = vrot.slane %v1853_v35, %v17791_v15  ;;  %v1054_v59 = vpop.f32.mrb[7].mxu0 }
  0xfe   : > { %v15005_v60 = vrot.slane %v1818_v49, 9  ;;  %v17816_v61 = vmax.f32 %v1817_v37, %v15003_v50  ;;  %v17818_v62 = vmax.f32 %v1816_v36, %v15004_v51  ;;  %v1868_v63 = vcombine.high %v1860_v40, %v1860_v40 }
  0xff   : > { %v17820_v0 = vmax.f32 %v1852_v42, %v15013_v55  ;;  %v1869_v1 = vcombine.high %v1867_v58, %v1867_v58  ;;  %v15014_v2 = vrot.slane %v1860_v40, 9  ;;  %v15016_v3 = vrot.slane %v1867_v58, 9  ;;  %16849 = vmatmul.mubr.msk.bf16.gmra.mrb[112].mxu0 %vm801_vm2, %v17305_v48 }
 0x100   : > { %v17823_v4 = vmax.f32 %v1818_v49, %v15005_v60  ;;  %v15015_v5 = vrot.slane %v1868_v63, 9  ;;  %v1819_v6 = vcombine.high %v1547_v31, %v1547_v31  ;;  %v1826_v7 = vrot.slane %v1547_v31, %v17791_v15  ;;  %16852 = vmatprep.mubr.msk.bf16.mxu0 %vm801_vm2, %v17306_v54 }
 0x101   : > { %v15017_v8 = vrot.slane %v1869_v1, 9  ;;  %v17827_v9 = vmax.f32 %v1860_v40, %v15014_v2  ;;  %v17829_v10 = vmax.f32 %v1867_v58, %v15016_v3  ;;  %v1060_v11 = vadd.f32 %v16742_v41, %v17787_v12 }
 0x102   : > { %v17832_v13 = vmax.f32 %v1868_v63, %v15015_v5  ;;  %v1833_v14 = vrot.slane %v1819_v6, %v17791_v15  ;;  %v1834_v16 = vcombine.high %v1826_v7, %v1826_v7  ;;  %v15006_v17 = vrot.slane %v1826_v7, 9  ;;  %v17835_v18 = vpop.f32.mrb[8].mxu0 }
 0x103   : > { %v17837_v19 = vmax.f32 %v1869_v1, %v15017_v8  ;;  %v1552_v20 = vmax.f32 %v1060_v11, 0.0  ;;  %v1052_v21 = vadd.f32 %v17787_v12, %v1051_v47  ;;  %v1063_v22 = vadd.f32 %v16743_v53, %v17787_v12  ;;  %v17841_v23 = vpop.f32.mrb[9].mxu0  ;;  %v17309_v8 = vld [vmem:[%s17654_s29 + $0x1e8] sm:$0xff]  }
 0x104   : > { %v1835_v25 = vcombine.high %v1833_v14, %v1833_v14  ;;  %v15007_v26 = vrot.slane %v1834_v16, 9  ;;  %v15008_v27 = vrot.slane %v1833_v14, 9  ;;  %v17844_v28 = vmax.f32 %v1826_v7, %v15006_v17  ;;  %v17846_v29 = vpop.f32.mrb[10].mxu0 }
 0x105   : > { %v1904_v31 = vcombine.high %v1552_v20, %v1552_v20  ;;  %v1911_v32 = vrot.slane %v1552_v20, %v17791_v15  ;;  %v1550_v33 = vmax.f32 %v1052_v21, 0.0  ;;  %v1553_v34 = vmax.f32 %v1063_v22, 0.0  ;;  %v17850_v35 = vpop.f32.mrb[11].mxu0  ;;  %v17310_v21 = vld [vmem:[%s17654_s29 + $0x1f0] sm:$0xff]  }
 0x106   : > { %v15009_v36 = vrot.slane %v1835_v25, 9  ;;  %v17852_v37 = vmax.f32 %v1834_v16, %v15007_v26  ;;  %v17854_v38 = vmax.f32 %v1833_v14, %v15008_v27  ;;  %v17857_v40 = vadd.f32 %v17787_v12, %v1054_v59 }
 0x107   : > { %v1918_v41 = vrot.slane %v1904_v31, %v17791_v15  ;;  %v1919_v42 = vcombine.high %v1911_v32, %v1911_v32  ;;  %v15026_v43 = vrot.slane %v1911_v32, 9  ;;  %v1870_v45 = vcombine.high %v1550_v33, %v1550_v33  ;;  %16853 = vmatmul.mubr.msk.bf16.gmra.mrb[116].mxu0 %vm801_vm2, %v17307_v24 }
 0x108   : > { %v17861_v47 = vmax.f32 %v1835_v25, %v15009_v36  ;;  %v1877_v48 = vrot.slane %v1550_v33, %v17791_v15  ;;  %v1921_v49 = vcombine.high %v1553_v34, %v1553_v34  ;;  %v17865_v50 = vrot.slane %v1553_v34, %v17791_v15  ;;  %16856 = vmatprep.mubr.msk.bf16.mxu0 %vm801_vm2, %v17308_v30 }
 0x109   : > { %v1920_v51 = vcombine.high %v1918_v41, %v1918_v41  ;;  %v15027_v53 = vrot.slane %v1919_v42, 9  ;;  %v15028_v54 = vrot.slane %v1918_v41, 9  ;;  %v6050_v55 = vmax.f32 %v1911_v32, %v15026_v43 }
 0x10a   : > { %v1884_v58 = vrot.slane %v1870_v45, %v17791_v15  ;;  %v1885_v59 = vcombine.high %v1877_v48, %v1877_v48  ;;  %v15018_v60 = vrot.slane %v1877_v48, 9  ;;  %v17870_v63 = vrot.slane %v1921_v49, %v17791_v15  ;;  %v17872_v1 = vpop.f32.mrb[12].mxu0 }
 0x10b   : > { %v15029_v2 = vrot.slane %v1920_v51, 9  ;;  %v6051_v3 = vmax.f32 %v1919_v42, %v15027_v53  ;;  %v6052_v5 = vmax.f32 %v1918_v41, %v15028_v54  ;;  %v6546_v6 = vmax.f32 %v17805_v46, %v6050_v55  ;;  %v17875_v7 = vpop.f32.mrb[13].mxu0 }
 0x10c   : > { %v1886_v11 = vcombine.high %v1884_v58, %v1884_v58  ;;  %v15019_v14 = vrot.slane %v1885_v59, 9  ;;  %v15020_v16 = vrot.slane %v1884_v58, 9  ;;  %v6042_v17 = vmax.f32 %v1877_v48, %v15018_v60  ;;  %v17878_v20 = vpop.f32.mrb[14].mxu0 }
 0x10d   : > { %v6053_v22 = vmax.f32 %v1920_v51, %v15029_v2  ;;  %v6547_v24 = vmax.f32 %v17811_v56, %v6051_v3  ;;  %v6548_v25 = vmax.f32 %v17813_v57, %v6052_v5  ;;  %v16241_v26 = vpack.c.bf16 %v6546_v6, %v6546_v6  ;;  %v17883_v27 = vpop.f32.mrb[15].mxu0  ;;  %v17311_v2 = vld [vmem:[%s17654_s29 + $0x1f8] sm:$0xff]  }
 0x10e   : > { %v15021_v46 = vrot.slane %v1886_v11, 9  ;;  %v6043_v30 = vmax.f32 %v1885_v59, %v15019_v14  ;;  %v6044_v31 = vmax.f32 %v1884_v58, %v15020_v16  ;;  %v6538_v32 = vmax.f32 %v17808_v52, %v6042_v17 }
 0x10f   : > { %v6549_v33 = vmax.f32 %v17820_v0, %v6053_v22  ;;  %v16242_v34 = vpack.c.bf16 %v6547_v24, %v6547_v24  ;;  %v16243_v36 = vpack.c.bf16 %v6548_v25, %v6548_v25  ;;  %v17887_v41 = vunpack.c.l.b16 %v16241_v26  ;;  %16857 = vmatmul.mubr.msk.bf16.gmra.mrb[120].mxu0 %vm801_vm2, %v17309_v8 }
 0x110   : > { %v6045_v56 = vmax.f32 %v1886_v11, %v15021_v46  ;;  %v6539_v57 = vmax.f32 %v17816_v61, %v6043_v30  ;;  %v6540_v42 = vmax.f32 %v17818_v62, %v6044_v31  ;;  %v16233_v43 = vpack.c.bf16 %v6538_v32, %v6538_v32  ;;  %16860 = vmatprep.mubr.msk.bf16.mxu0 %vm801_vm2, %v17310_v21 }
 0x111   : > { %v16244_v52 = vpack.c.bf16 %v6549_v33, %v6549_v33  ;;  %v17893_v45 = vunpack.c.l.b16 %v16242_v34  ;;  %v17895_v0 = vunpack.c.l.b16 %v16243_v36  ;;  %v8215_v48 = vrot.slane %v17887_v41, 7  ;;  %v8734_v41 = vld [vmem:[#allocation2 + $0xc] sm:$0xf] }
 0x112   : > { %v6541_v49 = vmax.f32 %v17823_v4, %v6045_v56  ;;  %v16234_v51 = vpack.c.bf16 %v6539_v57, %v6539_v57  ;;  %v16235_v53 = vpack.c.bf16 %v6540_v42, %v6540_v42  ;;  %v7940_v54 = vunpack.c.l.b16 %v16233_v43  ;;  %v17899_v55 = vpop.f32.mrb[16].mxu0 }
 0x113   : > { %v17901_v61 = vunpack.c.l.b16 %v16244_v52  ;;  %v8218_v62 = vrot.slane %v17893_v45, 6  ;;  %v8220_v58 = vrot.slane %v17895_v0, 5  ;;  %v1936_v59 = vcombine.high %v17865_v50, %v17865_v50  ;;  %v17907_v60 = vpop.f32.mrb[17].mxu0 }
 0x114   : > { %v16236_v3 = vpack.c.bf16 %v6541_v49, %v6541_v49  ;;  %v7941_v5 = vunpack.c.l.b16 %v16234_v51  ;;  %v7942_v4 = vunpack.c.l.b16 %v16235_v53  ;;  %v8196_v6 = vrot.slane %v7940_v54, 7  ;;  %v17910_v8 = vpop.f32.mrb[18].mxu0 }
 0x115   : > { %v8222_v11 = vrot.slane %v17901_v61, 4  ;;  %v1937_v14 = vcombine.high %v17870_v63, %v17870_v63  ;;  %v15030_v16 = vrot.slane %v17865_v50, 9  ;;  %v15031_v17 = vrot.slane %v1936_v59, 9  ;;  %v17916_v21 = vpop.f32.mrb[19].mxu0 }
 0x116   : > { %v7943_v22 = vunpack.c.l.b16 %v16236_v3  ;;  %v8197_v24 = vrot.slane %v7941_v5, 6  ;;  %v8200_v25 = vrot.slane %v7942_v4, 5  ;;  %v15032_v26 = vrot.slane %v17870_v63, 9  ;;  %v8738_v3 = vld [vmem:[#allocation2 + $0x14] sm:$0x1] }
 0x117   : > { %v15033_v46 = vrot.slane %v1937_v14, 9  ;;  %v6054_v30 = vmax.f32 %v17865_v50, %v15030_v16  ;;  %v6055_v31 = vmax.f32 %v1936_v59, %v15031_v17  ;;  %v1551_v32 = vmax.f32 %v17857_v40, 0.0  ;;  %16861 = vmatmul.mubr.msk.bf16.gmra.mrb[124].mxu0 %vm801_vm2, %v17311_v2 }
 0x118   : > { %v8199_v33 = vsel %vm8198_vm8, %v8197_v24, %v8196_v6  ;;  %v8203_v34 = vrot.slane %v7943_v22, 4  ;;  %v6056_v36 = vmax.f32 %v17870_v63, %v15032_v26  ;;  %v1076_v56 = vadd.f32 %v17835_v18, %v17787_v12 }
 0x119   : > { %v8202_v57 = vsel %vm8201_vm9, %v8200_v25, %v8199_v33  ;;  %v6057_v42 = vmax.f32 %v1937_v14, %v15033_v46  ;;  %v6550_v43 = vmax.f32 %v17827_v9, %v6054_v30  ;;  %v6551_v50 = vmax.f32 %v17832_v13, %v6055_v31 }
 0x11a   : > { %v6552_v52 = vmax.f32 %v17829_v10, %v6056_v36  ;;  %v1887_v40 = vcombine.high %v1551_v32, %v1551_v32  ;;  %v1894_v49 = vrot.slane %v1551_v32, %v17791_v15  ;;  %v17932_v51 = vsel %vm8204_vm10, %v8203_v34, %v8202_v57  ;;  %v17934_v53 = vpop.f32.mrb[20].mxu0 }
 0x11b   : > { %v6553_v63 = vmax.f32 %v17837_v19, %v6057_v42  ;;  %v16245_v18 = vpack.c.bf16 %v6550_v43, %v6550_v43  ;;  %v16246_v54 = vpack.c.bf16 %v6551_v50, %v6551_v50  ;;  %v1556_v59 = vmax.f32 %v1076_v56, 0.0  ;;  %v17937_v2 = vpop.f32.mrb[21].mxu0 }
 0x11c   : > { %v16247_v9 = vpack.c.bf16 %v6552_v52, %v6552_v52  ;;  %v1901_v13 = vrot.slane %v1887_v40, %v17791_v15  ;;  %v1902_v10 = vcombine.high %v1894_v49, %v1894_v49  ;;  %v15022_v5 = vrot.slane %v1894_v49, 9  ;;  %v17940_v4 = vpop.f32.mrb[22].mxu0 }
 0x11d   : > { %v17942_v6 = vunpack.c.l.b16 %v16245_v18  ;;  %v17944_v14 = vunpack.c.l.b16 %v16246_v54  ;;  %v16489_v16 = vpack.c.bf16 %v6553_v63, %v6553_v63  ;;  %v1972_v17 = vcombine.high %v1556_v59, %v1556_v59  ;;  %v17946_v19 = vpop.f32.mrb[23].mxu0 }
 0x11e   : > { %v17948_v22 = vunpack.c.l.b16 %v16247_v9  ;;  %v1903_v24 = vcombine.high %v1901_v13, %v1901_v13  ;;  %v15023_v25 = vrot.slane %v1902_v10, 9  ;;  %v15024_v26 = vrot.slane %v1901_v13, 9 }
 0x11f   : > { %v8224_v46 = vrot.slane %v17942_v6, 3  ;;  %v8226_v30 = vrot.slane %v17944_v14, 2  ;;  %v8739_v31 = vsel %vm17735_vm7, %v16489_v16, %v8738_v3  ;;  %v6046_v32 = vmax.f32 %v1894_v49, %v15022_v5 }
 0x120   : > { %v8228_v33 = vrot.slane %v17948_v22, 1  ;;  %8740 = vst [vmem:[#allocation2 + $0x14] sm:$0x1] %v8739_v31  ;;  %v15025_v34 = vrot.slane %v1903_v24, 9  ;;  %v6047_v36 = vmax.f32 %v1902_v10, %v15023_v25  ;;  %v6048_v56 = vmax.f32 %v1901_v13, %v15024_v26 }
 0x121   : > { %v6542_v57 = vmax.f32 %v17844_v28, %v6046_v32  ;;  %v1979_v42 = vrot.slane %v1556_v59, %v17791_v15  ;;  %v1986_v43 = vrot.slane %v1972_v17, %v17791_v15  ;;  %v1068_v50 = vadd.f32 %v17787_v12, %v17841_v23 }
 0x122   : > { %v6049_v52 = vmax.f32 %v1903_v24, %v15025_v34  ;;  %v6543_v40 = vmax.f32 %v17852_v37, %v6047_v36  ;;  %v6544_v49 = vmax.f32 %v17854_v38, %v6048_v56  ;;  %v1079_v63 = vadd.f32 %v17846_v29, %v17787_v12  ;;  %v17964_v18 = vpop.f32.mrb[24].mxu0 }
 0x123   : > { %v16237_v54 = vpack.c.bf16 %v6542_v57, %v6542_v57  ;;  %v1987_v9 = vcombine.high %v1979_v42, %v1979_v42  ;;  %v1988_v28 = vcombine.high %v1986_v43, %v1986_v43  ;;  %v15042_v3 = vrot.slane %v1979_v42, 9  ;;  %v17966_v59 = vpop.f32.mrb[25].mxu0 }
 0x124   : > { %v6545_v13 = vmax.f32 %v17861_v47, %v6049_v52  ;;  %v16238_v10 = vpack.c.bf16 %v6543_v40, %v6543_v40  ;;  %v16239_v23 = vpack.c.bf16 %v6544_v49, %v6544_v49  ;;  %v15044_v5 = vrot.slane %v1986_v43, 9  ;;  %v17969_v16 = vpop.f32.mrb[26].mxu0 }
 0x125   : > { %v7944_v37 = vunpack.c.l.b16 %v16237_v54  ;;  %v15043_v38 = vrot.slane %v1987_v9, 9  ;;  %v15045_v17 = vrot.slane %v1988_v28, 9  ;;  %v17971_v24 = vmax.f32 %v1979_v42, %v15042_v3  ;;  %v17973_v29 = vpop.f32.mrb[27].mxu0 }
 0x126   : > { %v16240_v25 = vpack.c.bf16 %v6545_v13, %v6545_v13  ;;  %v7945_v26 = vunpack.c.l.b16 %v16238_v10  ;;  %v7946_v31 = vunpack.c.l.b16 %v16239_v23  ;;  %v17975_v32 = vmax.f32 %v1986_v43, %v15044_v5 }
 0x127   : > { %v8206_v34 = vrot.slane %v7944_v37, 3  ;;  %v17977_v36 = vmax.f32 %v1987_v9, %v15043_v38  ;;  %v17979_v47 = vmax.f32 %v1988_v28, %v15045_v17  ;;  %v1554_v56 = vmax.f32 %v1068_v50, 0.0 }
 0x128   : > { %v7947_v57 = vunpack.c.l.b16 %v16240_v25  ;;  %v8209_v52 = vrot.slane %v7945_v26, 2  ;;  %v8212_v40 = vrot.slane %v7946_v31, 1  ;;  %v1557_v49 = vmax.f32 %v1079_v63, 0.0 }
 0x129   : > { %v8208_v42 = vsel %vm8207_vm11, %v8206_v34, %v17932_v51  ;;  %v1938_v54 = vcombine.high %v1554_v56, %v1554_v56  ;;  %v1945_v3 = vrot.slane %v1554_v56, %v17791_v15  ;;  %v1071_v43 = vadd.f32 %v17787_v12, %v17850_v35  ;;  %v17318_v35 = vld [vmem:[%s22424_s3] sm:$0xff]  }
 0x12a   : > { %v8211_v13 = vsel %vm8210_vm12, %v8209_v52, %v8208_v42  ;;  %v8217_v9 = vsel %vm8216_vm13, %v8215_v48, %v7947_v57  ;;  %v1989_v50 = vcombine.high %v1557_v49, %v1557_v49  ;;  %v1996_v28 = vrot.slane %v1557_v49, %v17791_v15  ;;  %v17991_v10 = vpop.f32.mrb[28].mxu0 }
 0x12b   : > { %v8214_v63 = vsel %vm22432_vm15, %v8212_v40, %v8211_v13  ;;  %v8219_v51 = vsel %vm8198_vm8, %v8218_v62, %v8217_v9  ;;  %v1952_v48 = vrot.slane %v1938_v54, %v17791_v15  ;;  %v1953_v23 = vcombine.high %v1945_v3, %v1945_v3  ;;  %v18004_v5 = vpop.f32.mrb[29].mxu0 }
 0x12c   : > { %v8221_v37 = vsel %vm8201_vm9, %v8220_v58, %v8219_v51  ;;  %v8635_v38 = vpack.c.b16 %v8214_v63, %v8214_v63  ;;  %v15034_v45 = vrot.slane %v1945_v3, 9  ;;  %v2003_v62 = vrot.slane %v1989_v50, %v17791_v15  ;;  %v18032_v13 = vpop.f32.mrb[30].mxu0 }
 0x12d   : > { %v8223_v17 = vsel %vm8204_vm10, %v8222_v11, %v8221_v37  ;;  %v1954_v25 = vcombine.high %v1952_v48, %v1952_v48  ;;  %v15035_v26 = vrot.slane %v1953_v23, 9  ;;  %v15036_v31 = vrot.slane %v1952_v48, 9  ;;  %v18040_v63 = vpop.f32.mrb[31].mxu0 }
 0x12e   : > { %v8225_v34 = vsel %vm8207_vm11, %v8224_v46, %v8223_v17  ;;  %v8735_v0 = vsel %vm17999_vm0, %v8635_v38, %v8734_v41  ;;  %v18018_v56 = vmax.f32 %v1945_v3, %v15034_v45  ;;  %v2004_v58 = vcombine.high %v1996_v28, %v1996_v28  ;;  %22445 = vst [vmem:[#allocation6_spill] sm:$0xff] %v18040_v63 }
 0x12f   : > { %v8227_v57 = vsel %vm8210_vm12, %v8226_v30, %v8225_v34  ;;  %8736 = vst [vmem:[#allocation2 + $0xc] sm:$0xf] %v8735_v0  ;;  %v15037_v61 = vrot.slane %v1954_v25, 9  ;;  %v18023_v11 = vmax.f32 %v1953_v23, %v15035_v26  ;;  %v18025_v52 = vmax.f32 %v1952_v48, %v15036_v31 }
 0x130   : > { %v8229_v6 = vsel %vm22432_vm15, %v8228_v33, %v8227_v57  ;;  %v2005_v46 = vcombine.high %v2003_v62, %v2003_v62  ;;  %v15046_v40 = vrot.slane %v1996_v28, 9  ;;  %v15047_v49 = vrot.slane %v2004_v58, 9 }
 0x131   : > { %v8636_v42 = vpack.c.b16 %v8229_v6, %v8229_v6  ;;  %v18030_v54 = vmax.f32 %v1954_v25, %v15037_v61  ;;  %v15048_v3 = vrot.slane %v2003_v62, 9  ;;  %v1555_v14 = vmax.f32 %v1071_v43, 0.0 }
 0x132   : > { %v15049_v30 = vrot.slane %v2005_v46, 9  ;;  %v18034_v9 = vmax.f32 %v1996_v28, %v15046_v40  ;;  %v18036_v50 = vmax.f32 %v2004_v58, %v15047_v49  ;;  %v1092_v22 = vadd.f32 %v17872_v1, %v17787_v12 }
 0x133   : > { %8737 = vst.msk [vmem:[#allocation2 + $0x10] sm:$0xf] %vm6794_vm14, %v8636_v42  ;;  %v18043_v33 = vmax.f32 %v2003_v62, %v15048_v3  ;;  %v1955_v51 = vcombine.high %v1555_v14, %v1555_v14  ;;  %v1962_v41 = vrot.slane %v1555_v14, %v17791_v15  ;;  %v1084_v43 = vadd.f32 %v17787_v12, %v17875_v7 }
 0x134   : > { %v18048_v48 = vmax.f32 %v2005_v46, %v15049_v30  ;;  %v1560_v28 = vmax.f32 %v1092_v22, 0.0  ;;  %v1095_v23 = vadd.f32 %v17878_v20, %v17787_v12  ;;  %v1087_v1 = vadd.f32 %v17787_v12, %v17883_v27 }
 0x135   : > { %v1969_v37 = vrot.slane %v1955_v51, %v17791_v15  ;;  %v1970_v38 = vcombine.high %v1962_v41, %v1962_v41  ;;  %v15038_v45 = vrot.slane %v1962_v41, 9  ;;  %v1558_v62 = vmax.f32 %v1084_v43, 0.0 }
 0x136   : > { %v2040_v17 = vcombine.high %v1560_v28, %v1560_v28  ;;  %v2047_v25 = vrot.slane %v1560_v28, %v17791_v15  ;;  %v18056_v26 = vmax.f32 %v1095_v23, 0.0  ;;  %v18058_v7 = vmax.f32 %v1087_v1, 0.0 }
 0x137   : > { %v1971_v31 = vcombine.high %v1969_v37, %v1969_v37  ;;  %v15039_v34 = vrot.slane %v1970_v38, 9  ;;  %v15040_v0 = vrot.slane %v1969_v37, 9  ;;  %v18060_v58 = vmax.f32 %v1962_v41, %v15038_v45 }
 0x138   : > { %v2054_v20 = vrot.slane %v2040_v17, %v17791_v15  ;;  %v2055_v27 = vcombine.high %v2047_v25, %v2047_v25  ;;  %v15058_v57 = vrot.slane %v2047_v25, 9  ;;  %v2006_v61 = vcombine.high %v1558_v62, %v1558_v62 }
 0x139   : > { %v15041_v6 = vrot.slane %v1971_v31, 9  ;;  %v18063_v46 = vmax.f32 %v1970_v38, %v15039_v34  ;;  %v18065_v40 = vmax.f32 %v1969_v37, %v15040_v0  ;;  %v2013_v49 = vrot.slane %v1558_v62, %v17791_v15 }
 0x13a   : > { %v2056_v42 = vcombine.high %v2054_v20, %v2054_v20  ;;  %v15059_v3 = vrot.slane %v2055_v27, 9  ;;  %v15060_v14 = vrot.slane %v2054_v20, 9  ;;  %v6082_v30 = vmax.f32 %v2047_v25, %v15058_v57 }
 0x13b   : > { %v18068_v22 = vmax.f32 %v1971_v31, %v15041_v6  ;;  %v2020_v51 = vrot.slane %v2006_v61, %v17791_v15  ;;  %v2021_v41 = vcombine.high %v2013_v49, %v2013_v49  ;;  %v15050_v43 = vrot.slane %v2013_v49, 9 }
 0x13c   : > { %v15061_v28 = vrot.slane %v2056_v42, 9  ;;  %v6083_v23 = vmax.f32 %v2055_v27, %v15059_v3  ;;  %v6084_v1 = vmax.f32 %v2054_v20, %v15060_v14  ;;  %v6562_v38 = vmax.f32 %v17971_v24, %v6082_v30 }
 0x13d   : > { %v2022_v45 = vcombine.high %v2020_v51, %v2020_v51  ;;  %v15051_v37 = vrot.slane %v2021_v41, 9  ;;  %v15052_v17 = vrot.slane %v2020_v51, 9  ;;  %v6074_v34 = vmax.f32 %v2013_v49, %v15050_v43 }
 0x13e   : > { %v6085_v62 = vmax.f32 %v2056_v42, %v15061_v28  ;;  %v6563_v0 = vmax.f32 %v17977_v36, %v6083_v23  ;;  %v6564_v25 = vmax.f32 %v17975_v32, %v6084_v1  ;;  %v16257_v31 = vpack.c.bf16 %v6562_v38, %v6562_v38 }
 0x13f   : > { %v15053_v57 = vrot.slane %v2022_v45, 9  ;;  %v6075_v6 = vmax.f32 %v2021_v41, %v15051_v37  ;;  %v6076_v61 = vmax.f32 %v2020_v51, %v15052_v17  ;;  %v6554_v63 = vmax.f32 %v18018_v56, %v6074_v34 }
 0x140   : > { %v6565_v27 = vmax.f32 %v17979_v47, %v6085_v62  ;;  %v16258_v20 = vpack.c.bf16 %v6563_v0, %v6563_v0  ;;  %v16259_v3 = vpack.c.bf16 %v6564_v25, %v6564_v25  ;;  %v18076_v24 = vunpack.c.l.b16 %v16257_v31 }
 0x141   : > { %v6077_v14 = vmax.f32 %v2022_v45, %v15053_v57  ;;  %v6555_v49 = vmax.f32 %v18023_v11, %v6075_v6  ;;  %v6556_v42 = vmax.f32 %v18025_v52, %v6076_v61  ;;  %v16249_v36 = vpack.c.bf16 %v6554_v63, %v6554_v63 }
 0x142   : > { %v16260_v30 = vpack.c.bf16 %v6565_v27, %v6565_v27  ;;  %v18080_v32 = vunpack.c.l.b16 %v16258_v20  ;;  %v18082_v43 = vunpack.c.l.b16 %v16259_v3  ;;  %v8243_v51 = vrot.slane %v18076_v24, 7 }
 0x143   : > { %v6557_v56 = vmax.f32 %v18030_v54, %v6077_v14  ;;  %v16250_v47 = vpack.c.bf16 %v6555_v49, %v6555_v49  ;;  %v16251_v41 = vpack.c.bf16 %v6556_v42, %v6556_v42  ;;  %v7956_v28 = vunpack.c.l.b16 %v16249_v36 }
 0x144   : > { %v18086_v23 = vunpack.c.l.b16 %v16260_v30  ;;  %v8245_v1 = vrot.slane %v18080_v32, 6  ;;  %v8247_v11 = vrot.slane %v18082_v43, 5  ;;  %v2057_v52 = vcombine.high %v18056_v26, %v18056_v26 }
 0x145   : > { %v16252_v63 = vpack.c.bf16 %v6557_v56, %v6557_v56  ;;  %v7957_v38 = vunpack.c.l.b16 %v16250_v47  ;;  %v7958_v45 = vunpack.c.l.b16 %v16251_v41  ;;  %v8230_v37 = vrot.slane %v7956_v28, 7 }
 0x146   : > { %v2064_v54 = vrot.slane %v18056_v26, %v17791_v15  ;;  %v2071_v34 = vrot.slane %v2057_v52, %v17791_v15  ;;  %v2023_v62 = vcombine.high %v18058_v7, %v18058_v7  ;;  %v2030_v57 = vrot.slane %v18058_v7, %v17791_v15 }
 0x147   : > { %v7959_v0 = vunpack.c.l.b16 %v16252_v63  ;;  %v8231_v25 = vrot.slane %v7957_v38, 6  ;;  %v8233_v31 = vrot.slane %v7958_v45, 5  ;;  %vm9346_vm2 = vcmask 1046532  }
 0x148   : > { %v2072_v6 = vcombine.high %v2064_v54, %v2064_v54  ;;  %v2073_v61 = vcombine.high %v2071_v34, %v2071_v34  ;;  %v15062_v27 = vrot.slane %v2064_v54, 9  ;;  %v15064_v20 = vrot.slane %v2071_v34, 9  ;;  %vm18372_vm4 = vmor %vm9345_vm1, %vm9346_vm2 }
 0x149   : > { %v8232_v3 = vsel %vm8198_vm8, %v8231_v25, %v8230_v37  ;;  %v8235_v14 = vrot.slane %v7959_v0, 4  ;;  %v2037_v26 = vrot.slane %v2023_v62, %v17791_v15  ;;  %v2038_v49 = vcombine.high %v2030_v57, %v2030_v57 }
 0x14a   : > { %v8234_v42 = vsel %vm8201_vm9, %v8233_v31, %v8232_v3  ;;  %v15063_v36 = vrot.slane %v2072_v6, 9  ;;  %v15065_v30 = vrot.slane %v2073_v61, 9  ;;  %v6086_v56 = vmax.f32 %v2064_v54, %v15062_v27 }
 0x14b   : > { %v6088_v47 = vmax.f32 %v2071_v34, %v15064_v20  ;;  %v2039_v41 = vcombine.high %v2037_v26, %v2037_v26  ;;  %v15054_v28 = vrot.slane %v2030_v57, 9  ;;  %v15055_v52 = vrot.slane %v2038_v49, 9  ;;  %v18107_v34 = vpop.f32.mrb[32].mxu0  ;;  %v8745_v20 = vld [vmem:[#allocation2 + $0x20] sm:$0x1] }
 0x14c   : > { %v6087_v7 = vmax.f32 %v2072_v6, %v15063_v36  ;;  %v6089_v63 = vmax.f32 %v2073_v61, %v15065_v30  ;;  %v6566_v38 = vmax.f32 %v18034_v9, %v6086_v56  ;;  %v15056_v45 = vrot.slane %v2037_v26, 9  ;;  %v18111_v36 = vpop.f32.mrb[33].mxu0 }
 0x14d   : > { %v6568_v37 = vmax.f32 %v18043_v33, %v6088_v47  ;;  %v15057_v0 = vrot.slane %v2039_v41, 9  ;;  %v6078_v25 = vmax.f32 %v2030_v57, %v15054_v28  ;;  %v6079_v62 = vmax.f32 %v2038_v49, %v15055_v52  ;;  %v18114_v30 = vpop.f32.mrb[34].mxu0 }
 0x14e   : > { %v6567_v17 = vmax.f32 %v18036_v50, %v6087_v7  ;;  %v6569_v31 = vmax.f32 %v18048_v48, %v6089_v63  ;;  %v16261_v3 = vpack.c.bf16 %v6566_v38, %v6566_v38  ;;  %v6080_v54 = vmax.f32 %v2037_v26, %v15056_v45  ;;  %v18119_v52 = vpop.f32.mrb[35].mxu0 }
 0x14f   : > { %v16263_v27 = vpack.c.bf16 %v6568_v37, %v6568_v37  ;;  %v6081_v6 = vmax.f32 %v2039_v41, %v15057_v0  ;;  %v6558_v61 = vmax.f32 %v18060_v58, %v6078_v25  ;;  %v6559_v9 = vmax.f32 %v18063_v46, %v6079_v62 }
 0x150   : > { %v16262_v33 = vpack.c.bf16 %v6567_v17, %v6567_v17  ;;  %v7968_v57 = vunpack.c.l.b16 %v16261_v3  ;;  %v16490_v49 = vpack.c.bf16 %v6569_v31, %v6569_v31  ;;  %v6560_v50 = vmax.f32 %v18065_v40, %v6080_v54  ;;  %v18126_v3 = vpop.f32.mrb[36].mxu0 }
 0x151   : > { %v7970_v48 = vunpack.c.l.b16 %v16263_v27  ;;  %v6561_v26 = vmax.f32 %v18068_v22, %v6081_v6  ;;  %v16253_v56 = vpack.c.bf16 %v6558_v61, %v6558_v61  ;;  %v16254_v47 = vpack.c.bf16 %v6559_v9, %v6559_v9 }
 0x152   : > { %v7969_v28 = vunpack.c.l.b16 %v16262_v33  ;;  %v8251_v41 = vrot.slane %v7968_v57, 3  ;;  %v8746_v58 = vsel %vm17735_vm7, %v16490_v49, %v8745_v20  ;;  %v16255_v46 = vpack.c.bf16 %v6560_v50, %v6560_v50 }
 0x153   : > { %v8255_v17 = vrot.slane %v7970_v48, 1  ;;  %8747 = vst [vmem:[#allocation2 + $0x20] sm:$0x1] %v8746_v58  ;;  %v16256_v7 = vpack.c.bf16 %v6561_v26, %v6561_v26  ;;  %v7960_v63 = vunpack.c.l.b16 %v16253_v56  ;;  %v7961_v40 = vunpack.c.l.b16 %v16254_v47 }
 0x154   : > { %v8253_v38 = vrot.slane %v7969_v28, 2  ;;  %v7962_v45 = vunpack.c.l.b16 %v16255_v46  ;;  %v8236_v37 = vsel %vm8204_vm10, %v8235_v14, %v8234_v42  ;;  %v1108_v22 = vadd.f32 %v17899_v55, %v17787_v12 }
 0x155   : > { %v7963_v0 = vunpack.c.l.b16 %v16256_v7  ;;  %v8237_v25 = vrot.slane %v7960_v63, 3  ;;  %v8239_v62 = vrot.slane %v7961_v40, 2  ;;  %v1100_v31 = vadd.f32 %v17787_v12, %v17907_v60 }
 0x156   : > { %v8241_v54 = vrot.slane %v7962_v45, 1  ;;  %v1564_v27 = vmax.f32 %v1108_v22, 0.0  ;;  %v1111_v20 = vadd.f32 %v17910_v8, %v17787_v12  ;;  %v1103_v6 = vadd.f32 %v17787_v12, %v17916_v21 }
 0x157   : > { %v8238_v14 = vsel %vm8207_vm11, %v8237_v25, %v8236_v37  ;;  %v8244_v55 = vsel %vm8216_vm13, %v8243_v51, %v7963_v0  ;;  %v1562_v42 = vmax.f32 %v1100_v31, 0.0  ;;  %v1124_v60 = vadd.f32 %v17934_v53, %v17787_v12  ;;  %v8741_v51 = vld [vmem:[#allocation2 + $0x18] sm:$0xf] }
 0x158   : > { %v8240_v61 = vsel %vm8210_vm12, %v8239_v62, %v8238_v14  ;;  %v8246_v9 = vsel %vm8198_vm8, %v8245_v1, %v8244_v55  ;;  %v2108_v8 = vcombine.high %v1564_v27, %v1564_v27  ;;  %v2115_v33 = vrot.slane %v1564_v27, %v17791_v15 }
 0x159   : > { %v8242_v21 = vsel %vm22432_vm15, %v8241_v54, %v8240_v61  ;;  %v8248_v24 = vsel %vm8201_vm9, %v8247_v11, %v8246_v9  ;;  %v2074_v57 = vcombine.high %v1562_v42, %v1562_v42  ;;  %v2081_v49 = vrot.slane %v1562_v42, %v17791_v15  ;;  %v18175_v61 = vpop.f32.mrb[37].mxu0 }
 0x15a   : > { %v22446_v12 = vrot.slane %v18086_v23, 4  ;;  %v8638_v32 = vpack.c.b16 %v8242_v21, %v8242_v21  ;;  %v2122_v1 = vrot.slane %v2108_v8, %v17791_v15  ;;  %v2123_v50 = vcombine.high %v2115_v33, %v2115_v33 }
 0x15b   : > { %v15074_v26 = vrot.slane %v2115_v33, 9  ;;  %v2088_v56 = vrot.slane %v2074_v57, %v17791_v15  ;;  %v2089_v43 = vcombine.high %v2081_v49, %v2081_v49  ;;  %v15066_v37 = vrot.slane %v2081_v49, 9 }
 0x15c   : > { %v8250_v53 = vsel %vm8204_vm10, %v22446_v12, %v8248_v24  ;;  %v8742_v47 = vsel %vm17999_vm0, %v8638_v32, %v8741_v51  ;;  %v2124_v28 = vcombine.high %v2122_v1, %v2122_v1  ;;  %v15075_v58 = vrot.slane %v2123_v50, 9 }
 0x15d   : > { %v8252_v48 = vsel %vm8207_vm11, %v8251_v41, %v8250_v53  ;;  %8743 = vst [vmem:[#allocation2 + $0x18] sm:$0xf] %v8742_v47  ;;  %v15076_v46 = vrot.slane %v2122_v1, 9  ;;  %v18158_v7 = vmax.f32 %v2115_v33, %v15074_v26  ;;  %v2090_v63 = vcombine.high %v2088_v56, %v2088_v56 }
 0x15e   : > { %v8254_v11 = vsel %vm8210_vm12, %v8253_v38, %v8252_v48  ;;  %v15077_v41 = vrot.slane %v2124_v28, 9  ;;  %v18160_v45 = vmax.f32 %v2123_v50, %v15075_v58  ;;  %v15067_v38 = vrot.slane %v2089_v43, 9 }
 0x15f   : > { %v8256_v23 = vsel %vm22432_vm15, %v8255_v17, %v8254_v11  ;;  %v18162_v22 = vmax.f32 %v2122_v1, %v15076_v46  ;;  %v15068_v0 = vrot.slane %v2088_v56, 9  ;;  %v15069_v25 = vrot.slane %v2090_v63, 9 }
 0x160   : > { %v8639_v40 = vpack.c.b16 %v8256_v23, %v8256_v23  ;;  %v18165_v62 = vmax.f32 %v2124_v28, %v15077_v41  ;;  %v18167_v17 = vmax.f32 %v2081_v49, %v15066_v37  ;;  %v1565_v31 = vmax.f32 %v1111_v20, 0.0  ;;  %v18183_v20 = vld [vmem:[%s22423_s2] ss:$0 sm:$0xff] }
 0x161   : > { %v1563_v54 = vmax.f32 %v1103_v6, 0.0  ;;  %v18169_v27 = vmax.f32 %v2089_v43, %v15067_v38  ;;  %v18171_v14 = vmax.f32 %v2088_v56, %v15068_v0  ;;  %v18173_v55 = vmax.f32 %v2090_v63, %v15069_v25  ;;  %v6871_v0 = vld [vmem:[#allocation2 + $0x2c] sm:$0x1]  ;;  %v18204_v25 = vpop.f32.mrb[38].mxu0 }
 0x162   : > { %8744 = vst.msk [vmem:[#allocation2 + $0x1c] sm:$0xf] %vm6794_vm14, %v8639_v40  ;;  %v1568_v42 = vmax.f32 %v1124_v60, 0.0  ;;  %v2125_v9 = vcombine.high %v1565_v31, %v1565_v31  ;;  %v2132_v8 = vrot.slane %v1565_v31, %v17791_v15  ;;  %v1116_v6 = vadd.f32 %v18183_v20, %v17937_v2 }
 0x163   : > { %v2091_v33 = vcombine.high %v1563_v54, %v1563_v54  ;;  %v2098_v21 = vrot.slane %v1563_v54, %v17791_v15  ;;  %v1127_v60 = vadd.f32 %v18183_v20, %v17940_v4  ;;  %vm8895_vm1 = vsmask.f32 7440 }
 0x164   : > { %v2176_v24 = vcombine.high %v1568_v42, %v1568_v42  ;;  %v2183_v51 = vrot.slane %v1568_v42, %v17791_v15  ;;  %v2139_v57 = vrot.slane %v2125_v9, %v17791_v15  ;;  %v2140_v49 = vcombine.high %v2132_v8, %v2132_v8  ;;  %vm18453_vm2 = vmor %vm8894_vm6, %vm8895_vm1 }
 0x165   : > { %v15078_v12 = vrot.slane %v2132_v8, 9  ;;  %v2105_v53 = vrot.slane %v2091_v33, %v17791_v15  ;;  %v2106_v32 = vcombine.high %v2098_v21, %v2098_v21  ;;  %v15070_v1 = vrot.slane %v2098_v21, 9 }
 0x166   : > { %v2190_v50 = vrot.slane %v2176_v24, %v17791_v15  ;;  %v2191_v48 = vcombine.high %v2183_v51, %v2183_v51  ;;  %v2141_v26 = vcombine.high %v2139_v57, %v2139_v57  ;;  %v15079_v56 = vrot.slane %v2140_v49, 9 }
 0x167   : > { %v15080_v43 = vrot.slane %v2139_v57, 9  ;;  %v18192_v11 = vmax.f32 %v2132_v8, %v15078_v12  ;;  %v2107_v2 = vcombine.high %v2105_v53, %v2105_v53  ;;  %v15071_v47 = vrot.slane %v2106_v32, 9  ;;  %v18208_v8 = vpop.f32.mrb[39].mxu0 }
 0x168   : > { %v15072_v28 = vrot.slane %v2105_v53, 9  ;;  %v18194_v4 = vmax.f32 %v2098_v21, %v15070_v1  ;;  %v15081_v58 = vrot.slane %v2141_v26, 9  ;;  %v18196_v23 = vmax.f32 %v2140_v49, %v15079_v56 }
 0x169   : > { %v18198_v46 = vmax.f32 %v2139_v57, %v15080_v43  ;;  %v2192_v63 = vcombine.high %v2190_v50, %v2190_v50  ;;  %v15073_v40 = vrot.slane %v2107_v2, 9  ;;  %v18200_v41 = vmax.f32 %v2106_v32, %v15071_v47 }
 0x16a   : > { %v18202_v37 = vmax.f32 %v2105_v53, %v15072_v28  ;;  %v15090_v38 = vrot.slane %v2183_v51, 9  ;;  %v18206_v31 = vmax.f32 %v2141_v26, %v15081_v58  ;;  %v15091_v54 = vrot.slane %v2191_v48, 9 }
 0x16b   : > { %v15092_v42 = vrot.slane %v2190_v50, 9  ;;  %v15093_v9 = vrot.slane %v2192_v63, 9  ;;  %v18210_v33 = vmax.f32 %v2107_v2, %v15073_v40  ;;  %v1566_v24 = vmax.f32 %v1116_v6, 0.0 }
 0x16c   : > { %v6114_v21 = vmax.f32 %v2183_v51, %v15090_v38  ;;  %v1569_v57 = vmax.f32 %v1127_v60, 0.0  ;;  %v6115_v49 = vmax.f32 %v2191_v48, %v15091_v54  ;;  %v6872_v32 = vsel %vm17723_vm5, 0, %v6871_v0 }
 0x16d   : > { %v6116_v12 = vmax.f32 %v2190_v50, %v15092_v42  ;;  %v6117_v53 = vmax.f32 %v2192_v63, %v15093_v9  ;;  %v2142_v26 = vcombine.high %v1566_v24, %v1566_v24  ;;  %v2149_v56 = vrot.slane %v1566_v24, %v17791_v15  ;;  %6873 = vst [vmem:[#allocation2 + $0x2c] sm:$0x1] %v6872_v32 }
 0x16e   : > { %v6578_v1 = vmax.f32 %v18158_v7, %v6114_v21  ;;  %v2193_v43 = vcombine.high %v1569_v57, %v1569_v57  ;;  %v6579_v47 = vmax.f32 %v18160_v45, %v6115_v49  ;;  %v2200_v6 = vrot.slane %v1569_v57, %v17791_v15 }
 0x16f   : > { %v6580_v2 = vmax.f32 %v18162_v22, %v6116_v12  ;;  %v6581_v51 = vmax.f32 %v18165_v62, %v6117_v53  ;;  %v2156_v50 = vrot.slane %v2142_v26, %v17791_v15  ;;  %v2157_v48 = vcombine.high %v2149_v56, %v2149_v56 }
 0x170   : > { %v16273_v60 = vpack.c.bf16 %v6578_v1, %v6578_v1  ;;  %v15082_v28 = vrot.slane %v2149_v56, 9  ;;  %v16274_v58 = vpack.c.bf16 %v6579_v47, %v6579_v47  ;;  %v2207_v40 = vrot.slane %v2193_v43, %v17791_v15 }
 0x171   : > { %v16275_v7 = vpack.c.bf16 %v6580_v2, %v6580_v2  ;;  %v16276_v63 = vpack.c.bf16 %v6581_v51, %v6581_v51  ;;  %v2158_v0 = vcombine.high %v2156_v50, %v2156_v50  ;;  %v15083_v45 = vrot.slane %v2157_v48, 9 }
 0x172   : > { %v18222_v38 = vunpack.c.l.b16 %v16273_v60  ;;  %v15084_v54 = vrot.slane %v2156_v50, 9  ;;  %v18224_v22 = vunpack.c.l.b16 %v16274_v58  ;;  %v6106_v9 = vmax.f32 %v2149_v56, %v15082_v28 }
 0x173   : > { %v18226_v62 = vunpack.c.l.b16 %v16275_v7  ;;  %v18228_v42 = vunpack.c.l.b16 %v16276_v63  ;;  %v15085_v24 = vrot.slane %v2158_v0, 9  ;;  %v6107_v57 = vmax.f32 %v2157_v48, %v15083_v45 }
 0x174   : > { %v8270_v21 = vrot.slane %v18222_v38, 7  ;;  %v6108_v49 = vmax.f32 %v2156_v50, %v15084_v54  ;;  %v8272_v12 = vrot.slane %v18224_v22, 6  ;;  %v6570_v1 = vmax.f32 %v18167_v17, %v6106_v9 }
 0x175   : > { %v6109_v26 = vmax.f32 %v2158_v0, %v15085_v24  ;;  %v6571_v43 = vmax.f32 %v18169_v27, %v6107_v57  ;;  %v2208_v2 = vcombine.high %v2200_v6, %v2200_v6  ;;  %v2209_v51 = vcombine.high %v2207_v40, %v2207_v40 }
 0x176   : > { %v6572_v47 = vmax.f32 %v18171_v14, %v6108_v49  ;;  %v16265_v56 = vpack.c.bf16 %v6570_v1, %v6570_v1  ;;  %v15094_v60 = vrot.slane %v2200_v6, 9  ;;  %v15096_v28 = vrot.slane %v2207_v40, 9  ;;  %v6815_v1 = vld [vmem:[#allocation2 + $0x24] sm:$0x1] }
 0x177   : > { %v6573_v50 = vmax.f32 %v18173_v55, %v6109_v26  ;;  %v16266_v48 = vpack.c.bf16 %v6571_v43, %v6571_v43  ;;  %v15095_v7 = vrot.slane %v2208_v2, 9  ;;  %v15097_v45 = vrot.slane %v2209_v51, 9 }
 0x178   : > { %v16267_v58 = vpack.c.bf16 %v6572_v47, %v6572_v47  ;;  %v7972_v63 = vunpack.c.l.b16 %v16265_v56  ;;  %v6118_v54 = vmax.f32 %v2200_v6, %v15094_v60  ;;  %v6120_v32 = vmax.f32 %v2207_v40, %v15096_v28 }
 0x179   : > { %v16268_v17 = vpack.c.bf16 %v6573_v50, %v6573_v50  ;;  %v7973_v0 = vunpack.c.l.b16 %v16266_v48  ;;  %v6119_v27 = vmax.f32 %v2208_v2, %v15095_v7  ;;  %v6121_v14 = vmax.f32 %v2209_v51, %v15097_v45 }
 0x17a   : > { %v7974_v9 = vunpack.c.l.b16 %v16267_v58  ;;  %v8257_v24 = vrot.slane %v7972_v63, 7  ;;  %v6582_v57 = vmax.f32 %v18192_v11, %v6118_v54  ;;  %v6584_v49 = vmax.f32 %v18198_v46, %v6120_v32  ;;  %v8752_v11 = vld [vmem:[#allocation2 + $0x2c] sm:$0x1] }
 0x17b   : > { %v7975_v53 = vunpack.c.l.b16 %v16268_v17  ;;  %v8258_v55 = vrot.slane %v7973_v0, 6  ;;  %v6583_v43 = vmax.f32 %v18196_v23, %v6119_v27  ;;  %v6585_v47 = vmax.f32 %v18206_v31, %v6121_v14 }
 0x17c   : > { %v8260_v26 = vrot.slane %v7974_v9, 5  ;;  %v16277_v6 = vpack.c.bf16 %v6582_v57, %v6582_v57  ;;  %v16279_v40 = vpack.c.bf16 %v6584_v49, %v6584_v49  ;;  %v1119_v56 = vadd.f32 %v18183_v20, %v17946_v19 }
 0x17d   : > { %v8259_v2 = vsel %vm8198_vm8, %v8258_v55, %v8257_v24  ;;  %v8262_v51 = vrot.slane %v7975_v53, 4  ;;  %v16278_v60 = vpack.c.bf16 %v6583_v43, %v6583_v43  ;;  %v6816_v46 = vsel %vm17735_vm7, 0, %v6815_v1 }
 0x17e   : > { %v8261_v32 = vsel %vm8201_vm9, %v8260_v26, %v8259_v2  ;;  %v18248_v28 = vunpack.c.l.b16 %v16277_v6  ;;  %v18250_v23 = vunpack.c.l.b16 %v16279_v40  ;;  %v16491_v31 = vpack.c.bf16 %v6585_v47, %v6585_v47  ;;  %6817 = vst [vmem:[#allocation2 + $0x24] sm:$0x1] %v6816_v46 }
 0x17f   : > { %v18252_v50 = vunpack.c.l.b16 %v16278_v60  ;;  %v1567_v48 = vmax.f32 %v1119_v56, 0.0  ;;  %v18255_v19 = vsel %vm8204_vm10, %v8262_v51, %v8261_v32  ;;  %v1140_v53 = vadd.f32 %v18183_v20, %v17964_v18  ;;  %v18280_v56 = vpop.f32.mrb[40].mxu0 }
 0x180   : > { %v8278_v58 = vrot.slane %v18248_v28, 3  ;;  %v8753_v63 = vsel %vm17735_vm7, %v16491_v31, %v8752_v11  ;;  %v1132_v45 = vadd.f32 %v18183_v20, %v17966_v59  ;;  %v1143_v18 = vadd.f32 %v18183_v20, %v17969_v16  ;;  %v18284_v11 = vpop.f32.mrb[41].mxu0 }
 0x181   : > { %v8280_v54 = vrot.slane %v18252_v50, 2  ;;  %8754 = vst [vmem:[#allocation2 + $0x2c] sm:$0x1] %v8753_v63  ;;  %v2159_v17 = vcombine.high %v1567_v48, %v1567_v48  ;;  %v2166_v0 = vrot.slane %v1567_v48, %v17791_v15  ;;  %v1572_v9 = vmax.f32 %v1140_v53, 0.0  ;;  %v18287_v53 = vpop.f32.mrb[42].mxu0 }
 0x182   : > { %v1570_v27 = vmax.f32 %v1132_v45, 0.0  ;;  %v18271_v24 = vadd.f32 %v18183_v20, %v17973_v29  ;;  %v18275_v14 = vadd.f32 %v18183_v20, %v17991_v10  ;;  %v1573_v47 = vmax.f32 %v1143_v18, 0.0 }
 0x183   : > { %v2173_v59 = vrot.slane %v2159_v17, %v17791_v15  ;;  %v2174_v57 = vcombine.high %v2166_v0, %v2166_v0  ;;  %v15086_v49 = vrot.slane %v2166_v0, 9  ;;  %v2244_v1 = vcombine.high %v1572_v9, %v1572_v9 }
 0x184   : > { %v2251_v55 = vrot.slane %v1572_v9, %v17791_v15  ;;  %v2210_v26 = vcombine.high %v1570_v27, %v1570_v27  ;;  %v2217_v43 = vrot.slane %v1570_v27, %v17791_v15  ;;  %vm9684_vm6 = vcmask 261120  }
 0x185   : > { %v2175_v16 = vcombine.high %v2173_v59, %v2173_v59  ;;  %v15087_v6 = vrot.slane %v2174_v57, 9  ;;  %v15088_v40 = vrot.slane %v2173_v59, 9  ;;  %v6110_v29 = vmax.f32 %v2166_v0, %v15086_v49 }
 0x186   : > { %v2258_v10 = vrot.slane %v2244_v1, %v17791_v15  ;;  %v2259_v2 = vcombine.high %v2251_v55, %v2251_v55  ;;  %v15106_v51 = vrot.slane %v2251_v55, 9  ;;  %v2224_v60 = vrot.slane %v2210_v26, %v17791_v15 }
 0x187   : > { %v15089_v46 = vrot.slane %v2175_v16, 9  ;;  %v6111_v32 = vmax.f32 %v2174_v57, %v15087_v6  ;;  %v6112_v31 = vmax.f32 %v2173_v59, %v15088_v40  ;;  %v6574_v48 = vmax.f32 %v18194_v4, %v6110_v29 }
 0x188   : > { %v2260_v63 = vcombine.high %v2258_v10, %v2258_v10  ;;  %v15107_v45 = vrot.slane %v2259_v2, 9  ;;  %v15108_v17 = vrot.slane %v2258_v10, 9  ;;  %v18289_v0 = vmax.f32 %v2251_v55, %v15106_v51 }
 0x189   : > { %v6113_v9 = vmax.f32 %v2175_v16, %v15089_v46  ;;  %v6575_v27 = vmax.f32 %v18200_v41, %v6111_v32  ;;  %v6576_v18 = vmax.f32 %v18202_v37, %v6112_v31  ;;  %v16269_v49 = vpack.c.bf16 %v6574_v48, %v6574_v48  ;;  %v18300_v31 = vpop.f32.mrb[43].mxu0 }
 0x18a   : > { %v15109_v1 = vrot.slane %v2260_v63, 9  ;;  %v18293_v26 = vmax.f32 %v2259_v2, %v15107_v45  ;;  %v18295_v57 = vmax.f32 %v2258_v10, %v15108_v17  ;;  %v2225_v59 = vcombine.high %v2217_v43, %v2217_v43 }
 0x18b   : > { %v6577_v4 = vmax.f32 %v18210_v33, %v6113_v9  ;;  %v16270_v6 = vpack.c.bf16 %v6575_v27, %v6575_v27  ;;  %v16271_v40 = vpack.c.bf16 %v6576_v18, %v6576_v18  ;;  %v7976_v29 = vunpack.c.l.b16 %v16269_v49 }
 0x18c   : > { %v18298_v7 = vmax.f32 %v2260_v63, %v15109_v1  ;;  %v2226_v55 = vcombine.high %v2224_v60, %v2224_v60  ;;  %v15098_v16 = vrot.slane %v2217_v43, 9  ;;  %v15099_v51 = vrot.slane %v2225_v59, 9 }
 0x18d   : > { %v16272_v41 = vpack.c.bf16 %v6577_v4, %v6577_v4  ;;  %v7977_v46 = vunpack.c.l.b16 %v16270_v6  ;;  %v7978_v37 = vunpack.c.l.b16 %v16271_v40  ;;  %v8264_v32 = vrot.slane %v7976_v29, 3  ;;  %v18313_v4 = vpop.f32.mrb[44].mxu0  ;;  %v8748_v29 = vld [vmem:[#allocation2 + $0x24] sm:$0xf] }
 0x18e   : > { %v15100_v2 = vrot.slane %v2224_v60, 9  ;;  %v15101_v10 = vrot.slane %v2226_v55, 9  ;;  %v18302_v48 = vmax.f32 %v2217_v43, %v15098_v16  ;;  %v18304_v45 = vmax.f32 %v2225_v59, %v15099_v51 }
 0x18f   : > { %v7979_v33 = vunpack.c.l.b16 %v16272_v41  ;;  %v8265_v63 = vsel %vm8207_vm11, %v8264_v32, %v18255_v19  ;;  %v8266_v17 = vrot.slane %v7977_v46, 2  ;;  %v8268_v9 = vrot.slane %v7978_v37, 1 }
 0x190   : > { %v18308_v27 = vmax.f32 %v2224_v60, %v15100_v2  ;;  %v18310_v18 = vmax.f32 %v2226_v55, %v15101_v10  ;;  %v2261_v49 = vcombine.high %v1573_v47, %v1573_v47  ;;  %v2268_v1 = vrot.slane %v1573_v47, %v17791_v15 }
 0x191   : > { %v8267_v43 = vsel %vm8210_vm12, %v8266_v17, %v8265_v63  ;;  %v8271_v59 = vsel %vm8216_vm13, %v8270_v21, %v7979_v33  ;;  %v1571_v6 = vmax.f32 %v18271_v24, 0.0  ;;  %v1576_v19 = vmax.f32 %v18275_v14, 0.0  ;;  %v18329_v24 = vpop.f32.mrb[45].mxu0 }
 0x192   : > { %v8269_v60 = vsel %vm22432_vm15, %v8268_v9, %v8267_v43  ;;  %v8273_v40 = vsel %vm8198_vm8, %v8272_v12, %v8271_v59  ;;  %v2275_v47 = vrot.slane %v2261_v49, %v17791_v15  ;;  %v2276_v55 = vcombine.high %v2268_v1, %v2268_v1  ;;  %22448 = vst [vmem:[#allocation7_spill] sm:$0xff] %v18329_v24  ;;  %v18334_v32 = vpop.f32.mrb[46].mxu0 }
 0x193   : > { %v22447_v16 = vrot.slane %v18226_v62, 5  ;;  %v8641_v51 = vpack.c.b16 %v8269_v60, %v8269_v60  ;;  %v15110_v21 = vrot.slane %v2268_v1, 9  ;;  %v2227_v41 = vcombine.high %v1571_v6, %v1571_v6  ;;  %22450 = vst [vmem:[#allocation8_spill] sm:$0xff] %v18334_v32  ;;  %v18344_v63 = vpop.f32.mrb[47].mxu0 }
 0x194   : > { %v22449_v14 = vrot.slane %v18228_v42, 4  ;;  %v2277_v22 = vcombine.high %v2275_v47, %v2275_v47  ;;  %v15111_v37 = vrot.slane %v2276_v55, 9  ;;  %v15112_v12 = vrot.slane %v2275_v47, 9  ;;  %22451 = vst [vmem:[#allocation9_spill] sm:$0xff] %v18344_v63 }
 0x195   : > { %v8275_v38 = vsel %vm8201_vm9, %v22447_v16, %v8273_v40  ;;  %v8749_v2 = vsel %vm17999_vm0, %v8641_v51, %v8748_v29  ;;  %v18341_v10 = vmax.f32 %v2268_v1, %v15110_v21  ;;  %v2234_v33 = vrot.slane %v1571_v6, %v17791_v15  ;;  %v18366_v21 = vld [vmem:[#allocation2 + $0x10] sm:$0xf] }
 0x196   : > { %v8277_v46 = vsel %vm8204_vm10, %v22449_v14, %v8275_v38  ;;  %8750 = vst [vmem:[#allocation2 + $0x24] sm:$0xf] %v8749_v2  ;;  %v15113_v17 = vrot.slane %v2277_v22, 9  ;;  %v18349_v9 = vmax.f32 %v2276_v55, %v15111_v37  ;;  %v18351_v28 = vmax.f32 %v2275_v47, %v15112_v12  ;;  %v18362_v47 = vld [vmem:[#allocation2 + $0x14] sm:$0x1] }
 0x197   : > { %v8279_v62 = vsel %vm8207_vm11, %v8278_v58, %v8277_v46  ;;  %v22452_v58 = vrot.slane %v18250_v23, 1  ;;  %v2241_v1 = vrot.slane %v2227_v41, %v17791_v15  ;;  %v2242_v43 = vcombine.high %v2234_v33, %v2234_v33  ;;  %v10210_v41 = vld [vmem:[#allocation2 + $0xc] sm:$0xe] }
 0x198   : > { %v8281_v42 = vsel %vm8210_vm12, %v8280_v54, %v8279_v62  ;;  %v15102_v59 = vrot.slane %v2234_v33, 9  ;;  %v18357_v60 = vmax.f32 %v2277_v22, %v15113_v17  ;;  %v2312_v50 = vcombine.high %v1576_v19, %v1576_v19  ;;  %v17363_v2 = vld [vmem:[%s22426_s5 + $0x38] ss:$20 sps:$4 sm:$0xff]  }
 0x199   : > { %v8283_v49 = vsel %vm22432_vm15, %v22452_v58, %v8281_v42  ;;  %v2319_v54 = vrot.slane %v1576_v19, %v17791_v15  ;;  %v2243_v40 = vcombine.high %v2241_v1, %v2241_v1  ;;  %v15103_v29 = vrot.slane %v2242_v43, 9 }
 0x19a   : > { %v8642_v6 = vpack.c.b16 %v8283_v49, %v8283_v49  ;;  %v15104_v55 = vrot.slane %v2241_v1, 9  ;;  %v18360_v16 = vmax.f32 %v2234_v33, %v15102_v59  ;;  %v2326_v23 = vrot.slane %v2312_v50, %v17791_v15 }
 0x19b   : > { %v2327_v38 = vcombine.high %v2319_v54, %v2319_v54  ;;  %v15122_v51 = vrot.slane %v2319_v54, 9  ;;  %v15105_v14 = vrot.slane %v2243_v40, 9  ;;  %v18368_v46 = vmax.f32 %v2242_v43, %v15103_v29 }
 0x19c   : > { %8751 = vst.msk [vmem:[#allocation2 + $0x28] sm:$0xf] %vm6794_vm14, %v8642_v6  ;;  %v18370_v19 = vmax.f32 %v2241_v1, %v15104_v55  ;;  %v2328_v22 = vcombine.high %v2326_v23, %v2326_v23  ;;  %v15124_v12 = vrot.slane %v2326_v23, 9  ;;  %v15850_v42 = vrot.slane %v10210_v41, 9  ;;  %v6874_v6 = vld [vmem:[#allocation2 + $0x38] sm:$0x1] }
 0x19d   : > { %v15123_v37 = vrot.slane %v2327_v38, 9  ;;  %v6146_v62 = vmax.f32 %v2319_v54, %v15122_v51  ;;  %v18376_v33 = vmax.f32 %v2243_v40, %v15105_v14  ;;  %v10276_v17 = vrot.slane %v18366_v21, 5 }
 0x19e   : > { %v10279_v58 = vrot.slane %v18362_v47, 5  ;;  %v15125_v49 = vrot.slane %v2328_v22, 9  ;;  %v6148_v1 = vmax.f32 %v2326_v23, %v15124_v12  ;;  %v1148_v29 = vadd.f32 %v18183_v20, %v18004_v5 }
 0x19f   : > { %v6147_v43 = vmax.f32 %v2327_v38, %v15123_v37  ;;  %v6594_v59 = vmax.f32 %v18289_v0, %v6146_v62  ;;  %v10277_v50 = vsel %vm18372_vm4, %v15850_v42, %v10276_v17  ;;  %v10278_v54 = vrot.slane %v10276_v17, 4 }
 0x1a0   : > { %v1159_v40 = vadd.f32 %v18183_v20, %v18032_v13  ;;  %v6149_v55 = vmax.f32 %v2328_v22, %v15125_v49  ;;  %v6596_v41 = vmax.f32 %v18295_v57, %v6148_v1  ;;  %v1574_v23 = vmax.f32 %v1148_v29, 0.0 }
 0x1a1   : > { %v6595_v51 = vmax.f32 %v18293_v26, %v6147_v43  ;;  %v16289_v38 = vpack.c.bf16 %v6594_v59, %v6594_v59  ;;  %v10280_v0 = vsel %vm18372_vm4, %v10278_v54, %v10279_v58  ;;  %v6875_v37 = vsel %vm17723_vm5, 0, %v6874_v6 }
 0x1a2   : > { %v1577_v14 = vmax.f32 %v1159_v40, 0.0  ;;  %v6597_v12 = vmax.f32 %v18298_v7, %v6149_v55  ;;  %v16291_v62 = vpack.c.bf16 %v6596_v41, %v6596_v41  ;;  %6876 = vst [vmem:[#allocation2 + $0x38] sm:$0x1] %v6875_v37  ;;  %v15898_v13 = vcombine.low %v10277_v50, %v10280_v0 }
 0x1a3   : > { %v16290_v5 = vpack.c.bf16 %v6595_v51, %v6595_v51  ;;  %v18394_v42 = vunpack.c.l.b16 %v16289_v38  ;;  %v2278_v26 = vcombine.high %v1574_v23, %v1574_v23  ;;  %v2285_v57 = vrot.slane %v1574_v23, %v17791_v15 }
 0x1a4   : > { %v2329_v22 = vcombine.high %v1577_v14, %v1577_v14  ;;  %v16292_v17 = vpack.c.bf16 %v6597_v12, %v6597_v12  ;;  %v18399_v58 = vunpack.c.l.b16 %v16291_v62  ;;  %10578 = vrot.lane.b32.xlu1 %v15898_v13, %s17538_s22  ;;  %v2336_v6 = vrot.slane %v1577_v14, %v17791_v15 }
 0x1a5   : > { %v18397_v49 = vunpack.c.l.b16 %v16290_v5  ;;  %v2292_v7 = vrot.slane %v2278_v26, %v17791_v15  ;;  %v2293_v1 = vcombine.high %v2285_v57, %v2285_v57  ;;  %v15114_v59 = vrot.slane %v2285_v57, 9 }
 0x1a6   : > { %v18405_v50 = vunpack.c.l.b16 %v16292_v17  ;;  %v2343_v40 = vrot.slane %v2329_v22, %v17791_v15  ;;  %v2344_v23 = vcombine.high %v2336_v6, %v2336_v6  ;;  %v15126_v12 = vrot.slane %v2336_v6, 9 }
 0x1a7   : > { %v2294_v55 = vcombine.high %v2292_v7, %v2292_v7  ;;  %v15115_v51 = vrot.slane %v2293_v1, 9  ;;  %v15116_v41 = vrot.slane %v2292_v7, 9  ;;  %v6138_v38 = vmax.f32 %v2285_v57, %v15114_v59 }
 0x1a8   : > { %v2345_v37 = vcombine.high %v2343_v40, %v2343_v40  ;;  %v15127_v26 = vrot.slane %v2344_v23, 9  ;;  %v15128_v17 = vrot.slane %v2343_v40, 9  ;;  %v6150_v29 = vmax.f32 %v2336_v6, %v15126_v12 }
 0x1a9   : > { %v15117_v5 = vrot.slane %v2294_v55, 9  ;;  %v6139_v62 = vmax.f32 %v2293_v1, %v15115_v51  ;;  %v6140_v14 = vmax.f32 %v2292_v7, %v15116_v41  ;;  %v6586_v13 = vmax.f32 %v18302_v48, %v6138_v38 }
 0x1aa   : > { %v15129_v54 = vrot.slane %v2345_v37, 9  ;;  %v6151_v59 = vmax.f32 %v2344_v23, %v15127_v26  ;;  %v6152_v0 = vmax.f32 %v2343_v40, %v15128_v17  ;;  %v6598_v24 = vmax.f32 %v18341_v10, %v6150_v29  ;;  %v8759_v40 = vld [vmem:[#allocation2 + $0x38] sm:$0x1]  ;;  %v9778_v17 = vld [vmem:[#allocation2 + $0xc] sm:$0xf] }
 0x1ab   : > { %v6141_v43 = vmax.f32 %v2294_v55, %v15117_v5  ;;  %v6587_v22 = vmax.f32 %v18304_v45, %v6139_v62  ;;  %v6588_v63 = vmax.f32 %v18308_v27, %v6140_v14  ;;  %v16281_v57 = vpack.c.bf16 %v6586_v13, %v6586_v13 }
 0x1ac   : > { %v6153_v32 = vmax.f32 %v2345_v37, %v15129_v54  ;;  %v6599_v41 = vmax.f32 %v18349_v9, %v6151_v59  ;;  %v6600_v6 = vmax.f32 %v18351_v28, %v6152_v0  ;;  %v16293_v45 = vpack.c.bf16 %v6598_v24, %v6598_v24  ;;  %v22455_v9 = vld [vmem:[#allocation6_spill] sm:$0xff] }
 0x1ad   : > { %v6589_v1 = vmax.f32 %v18310_v18, %v6141_v43  ;;  %v16282_v7 = vpack.c.bf16 %v6587_v22, %v6587_v22  ;;  %v16283_v51 = vpack.c.bf16 %v6588_v63, %v6588_v63  ;;  %v7988_v48 = vunpack.c.l.b16 %v16281_v57  ;;  %v6818_v43 = vld [vmem:[#allocation2 + $0x30] sm:$0x1] }
 0x1ae   : > { %v6601_v55 = vmax.f32 %v18357_v60, %v6153_v32  ;;  %v16294_v54 = vpack.c.bf16 %v6599_v41, %v6599_v41  ;;  %v16295_v37 = vpack.c.bf16 %v6600_v6, %v6600_v6  ;;  %v18419_v10 = vunpack.c.l.b16 %v16293_v45 }
 0x1af   : > { %v16284_v38 = vpack.c.bf16 %v6589_v1, %v6589_v1  ;;  %v7989_v27 = vunpack.c.l.b16 %v16282_v7  ;;  %v7990_v12 = vunpack.c.l.b16 %v16283_v51  ;;  %v8284_v23 = vrot.slane %v7988_v48, 7 }
 0x1b0   : > { %v16492_v18 = vpack.c.bf16 %v6601_v55, %v6601_v55  ;;  %v1151_v28 = vadd.f32 %v18183_v20, %v22455_v9  ;;  %v18423_v0 = vunpack.c.l.b16 %v16294_v54  ;;  %v18425_v24 = vunpack.c.l.b16 %v16295_v37 }
 0x1b1   : > { %v7991_v63 = vunpack.c.l.b16 %v16284_v38  ;;  %v8285_v29 = vrot.slane %v7989_v27, 6  ;;  %v8287_v5 = vrot.slane %v7990_v12, 5  ;;  %v8305_v32 = vrot.slane %v18419_v10, 3 }
 0x1b2   : > { %v8760_v60 = vsel %vm17735_vm7, %v16492_v18, %v8759_v40  ;;  %v1575_v13 = vmax.f32 %v1151_v28, 0.0  ;;  %v6819_v26 = vsel %vm17735_vm7, 0, %v6818_v43  ;;  %v8307_v57 = vrot.slane %v18423_v0, 2 }
 0x1b3   : > { %v8286_v62 = vsel %vm8198_vm8, %v8285_v29, %v8284_v23  ;;  %v8289_v14 = vrot.slane %v7991_v63, 4  ;;  %8761 = vst [vmem:[#allocation2 + $0x38] sm:$0x1] %v8760_v60  ;;  %v8309_v59 = vrot.slane %v18425_v24, 1  ;;  %6820 = vst [vmem:[#allocation2 + $0x30] sm:$0x1] %v6819_v26 }
 0x1b4   : > { %v8288_v22 = vsel %vm8201_vm9, %v8287_v5, %v8286_v62  ;;  %v2295_v1 = vcombine.high %v1575_v13, %v1575_v13  ;;  %v2302_v7 = vrot.slane %v1575_v13, %v17791_v15  ;;  %v9827_v48 = vshrl.u32 %v9778_v17, 16  ;;  %v18444_v23 = vpop.f32.mrb[48].mxu0 }
 0x1b5   : > { %v18438_v51 = vsel %vm8204_vm10, %v8289_v14, %v8288_v22  ;;  %v9830_v41 = vshll.u32 %v9778_v17, 16  ;;  %v9836_v6 = vshll.u32 %v18366_v21, 16  ;;  %v9840_v55 = vshrl.u32 %v18366_v21, 16  ;;  %v18448_v62 = vpop.f32.mrb[49].mxu0 }
 0x1b6   : > { %v2309_v45 = vrot.slane %v2295_v1, %v17791_v15  ;;  %v2310_v38 = vcombine.high %v2302_v7, %v2302_v7  ;;  %v15118_v27 = vrot.slane %v2302_v7, 9  ;;  %v9846_v12 = vshll.u32 %v18362_v47, 16 }
 0x1b7   : > { %v9829_v40 = vrot.slane %v9827_v48, 4  ;;  %v9832_v54 = vrot.slane %v9830_v41, 5  ;;  %v9838_v37 = vrot.slane %v9836_v6, 5  ;;  %v9842_v18 = vrot.slane %v9840_v55, 4 }
 0x1b8   : > { %v2311_v43 = vcombine.high %v2309_v45, %v2309_v45  ;;  %v15119_v63 = vrot.slane %v2310_v38, 9  ;;  %v15120_v29 = vrot.slane %v2309_v45, 9  ;;  %v6142_v5 = vmax.f32 %v2302_v7, %v15118_v27 }
 0x1b9   : > { %v9833_v9 = vor.u32 %v9832_v54, %v9829_v40  ;;  %v9843_v28 = vor.u32 %v9842_v18, %v9838_v37  ;;  %v9848_v60 = vrot.slane %v9846_v12, 5  ;;  %v1172_v21 = vadd.f32 %v18183_v20, %v18107_v34 }
 0x1ba   : > { %v15121_v14 = vrot.slane %v2311_v43, 9  ;;  %v6143_v47 = vmax.f32 %v2310_v38, %v15119_v63  ;;  %v6144_v13 = vmax.f32 %v2309_v45, %v15120_v29  ;;  %v6590_v26 = vmax.f32 %v18360_v16, %v6142_v5  ;;  %v18468_v63 = vpop.f32.mrb[50].mxu0 }
 0x1bb   : > { %v9834_v22 = vrot.slane %v9833_v9, 4  ;;  %v9844_v1 = vrot.slane %v9843_v28, 4  ;;  %v1580_v7 = vmax.f32 %v1172_v21, 0.0  ;;  %v1164_v48 = vadd.f32 %v18183_v20, %v18111_v36  ;;  %v18470_v28 = vpop.f32.mrb[51].mxu0 }
 0x1bc   : > { %v6145_v34 = vmax.f32 %v2311_v43, %v15121_v14  ;;  %v6591_v41 = vmax.f32 %v18368_v46, %v6143_v47  ;;  %v6592_v6 = vmax.f32 %v18370_v19, %v6144_v13  ;;  %v16285_v55 = vpack.c.bf16 %v6590_v26, %v6590_v26 }
 0x1bd   : > { %v9839_v16 = vsel %vm18453_vm2, %v9834_v22, %v9838_v37  ;;  %v9849_v45 = vsel %vm18453_vm2, %v9844_v1, %v9848_v60  ;;  %v2380_v38 = vcombine.high %v1580_v7, %v1580_v7  ;;  %v2387_v27 = vrot.slane %v1580_v7, %v17791_v15 }
 0x1be   : > { %v6593_v12 = vmax.f32 %v18376_v33, %v6145_v34  ;;  %v16286_v40 = vpack.c.bf16 %v6591_v41, %v6591_v41  ;;  %v16287_v54 = vpack.c.bf16 %v6592_v6, %v6592_v6  ;;  %v7992_v36 = vunpack.c.l.b16 %v16285_v55 }
 0x1bf   : > { %v15882_v18 = vcombine.low %v9839_v16, %v9849_v45  ;;  %v2394_v46 = vrot.slane %v2380_v38, %v17791_v15  ;;  %v2395_v43 = vcombine.high %v2387_v27, %v2387_v27  ;;  %v15138_v19 = vrot.slane %v2387_v27, 9  ;;  %v18489_v38 = vpop.f32.mrb[52].mxu0 }
 0x1c0   : > { %v16288_v29 = vpack.c.bf16 %v6593_v12, %v6593_v12  ;;  %v7993_v37 = vunpack.c.l.b16 %v16286_v40  ;;  %v7994_v5 = vunpack.c.l.b16 %v16287_v54  ;;  %v8291_v9 = vrot.slane %v7992_v36, 3  ;;  %v8755_v40 = vld [vmem:[#allocation2 + $0x30] sm:$0xf] }
 0x1c1   : > { %10498 = vrot.lane.b32.xlu0 %v15882_v18, %s17539_s23  ;;  %v2396_v33 = vcombine.high %v2394_v46, %v2394_v46  ;;  %v15139_v60 = vrot.slane %v2395_v43, 9  ;;  %v15140_v21 = vrot.slane %v2394_v46, 9  ;;  %v18473_v14 = vmax.f32 %v2387_v27, %v15138_v19 }
 0x1c2   : > { %v7995_v47 = vunpack.c.l.b16 %v16288_v29  ;;  %v8292_v13 = vsel %vm8207_vm11, %v8291_v9, %v18438_v51  ;;  %v8293_v26 = vrot.slane %v7993_v37, 2  ;;  %v8295_v22 = vrot.slane %v7994_v5, 1 }
 0x1c3   : > { %v15141_v1 = vrot.slane %v2396_v33, 9  ;;  %v18477_v7 = vmax.f32 %v2395_v43, %v15139_v60  ;;  %v18479_v34 = vmax.f32 %v2394_v46, %v15140_v21  ;;  %v1578_v41 = vmax.f32 %v1164_v48, 0.0 }
 0x1c4   : > { %v8294_v6 = vsel %vm8210_vm12, %v8293_v26, %v8292_v13  ;;  %v22458_v55 = vrot.slane %v18394_v42, 7  ;;  %v1175_v45 = vadd.f32 %v18183_v20, %v18114_v30  ;;  %v1167_v51 = vadd.f32 %v18183_v20, %v18119_v52 }
 0x1c5   : > { %v8296_v27 = vsel %vm22432_vm15, %v8295_v22, %v8294_v6  ;;  %v22459_v12 = vrot.slane %v18397_v49, 6  ;;  %v18495_v54 = vmax.f32 %v2396_v33, %v15141_v1  ;;  %v2346_v42 = vcombine.high %v1578_v41, %v1578_v41 }
 0x1c6   : > { %v8298_v16 = vsel %vm8216_vm13, %v22458_v55, %v7995_v47  ;;  %v22460_v36 = vrot.slane %v18399_v58, 5  ;;  %v8644_v30 = vpack.c.b16 %v8296_v27, %v8296_v27  ;;  %v2353_v46 = vrot.slane %v1578_v41, %v17791_v15 }
 0x1c7   : > { %v8300_v48 = vsel %vm8198_vm8, %v22459_v12, %v8298_v16  ;;  %v1581_v52 = vmax.f32 %v1175_v45, 0.0  ;;  %v22461_v43 = vrot.slane %v18405_v50, 4  ;;  %v2360_v49 = vrot.slane %v2346_v42, %v17791_v15 }
 0x1c8   : > { %v8302_v18 = vsel %vm8201_vm9, %v22460_v36, %v8300_v48  ;;  %v1579_v29 = vmax.f32 %v1167_v51, 0.0  ;;  %v1188_v37 = vadd.f32 %v18183_v20, %v18126_v3  ;;  %v8756_v5 = vsel %vm17999_vm0, %v8644_v30, %v8755_v40 }
 0x1c9   : > { %v8304_v19 = vsel %vm8204_vm10, %v22461_v43, %v8302_v18  ;;  %v2361_v9 = vcombine.high %v2353_v46, %v2353_v46  ;;  %v15130_v33 = vrot.slane %v2353_v46, 9  ;;  %8757 = vst [vmem:[#allocation2 + $0x30] sm:$0xf] %v8756_v5  ;;  %v2362_v60 = vcombine.high %v2360_v49, %v2360_v49  ;;  %v10211_v18 = vld [vmem:[#allocation2 + $0x18] sm:$0xe] }
 0x1ca   : > { %v8306_v58 = vsel %vm8207_vm11, %v8305_v32, %v8304_v19  ;;  %v15132_v21 = vrot.slane %v2360_v49, 9  ;;  %v2397_v47 = vcombine.high %v1581_v52, %v1581_v52  ;;  %v2404_v32 = vrot.slane %v1581_v52, %v17791_v15  ;;  %v18537_v19 = vld [vmem:[#allocation2 + $0x1c] sm:$0xf]  ;;  %v18544_v5 = vld [vmem:[#allocation2 + $0x20] sm:$0x1] }
 0x1cb   : > { %v8308_v50 = vsel %vm8210_vm12, %v8307_v57, %v8306_v58  ;;  %v15131_v20 = vrot.slane %v2361_v9, 9  ;;  %v18518_v10 = vmax.f32 %v2353_v46, %v15130_v33  ;;  %v15133_v26 = vrot.slane %v2362_v60, 9 }
 0x1cc   : > { %v8310_v3 = vsel %vm22432_vm15, %v8309_v59, %v8308_v50  ;;  %v18521_v22 = vmax.f32 %v2360_v49, %v15132_v21  ;;  %v2411_v0 = vrot.slane %v2397_v47, %v17791_v15  ;;  %v2412_v1 = vcombine.high %v2404_v32, %v2404_v32 }
 0x1cd   : > { %v8645_v13 = vpack.c.b16 %v8310_v3, %v8310_v3  ;;  %v18524_v57 = vmax.f32 %v2361_v9, %v15131_v20  ;;  %v15142_v41 = vrot.slane %v2404_v32, 9  ;;  %v2363_v6 = vcombine.high %v1579_v29, %v1579_v29 }
 0x1ce   : > { %v18527_v24 = vmax.f32 %v2362_v60, %v15133_v26  ;;  %v2413_v59 = vcombine.high %v2411_v0, %v2411_v0  ;;  %v15144_v55 = vrot.slane %v2411_v0, 9  ;;  %v2370_v16 = vrot.slane %v1579_v29, %v17791_v15 }
 0x1cf   : > { %8758 = vst.msk [vmem:[#allocation2 + $0x34] sm:$0xf] %vm6794_vm14, %v8645_v13  ;;  %v15143_v45 = vrot.slane %v2412_v1, 9  ;;  %v18530_v51 = vmax.f32 %v2404_v32, %v15142_v41  ;;  %v2377_v27 = vrot.slane %v2363_v6, %v17791_v15  ;;  %v1584_v12 = vmax.f32 %v1188_v37, 0.0  ;;  %v18552_v32 = vpop.f32.mrb[53].mxu0 }
 0x1d0   : > { %v15145_v48 = vrot.slane %v2413_v59, 9  ;;  %v18533_v40 = vmax.f32 %v2411_v0, %v15144_v55  ;;  %v2378_v42 = vcombine.high %v2370_v16, %v2370_v16  ;;  %v15134_v36 = vrot.slane %v2370_v16, 9  ;;  %v6877_v41 = vld [vmem:[#allocation2 + $0x44] sm:$0x1]  ;;  %v18557_v6 = vpop.f32.mrb[54].mxu0 }
 0x1d1   : > { %v18535_v30 = vmax.f32 %v2412_v1, %v15143_v45  ;;  %v2379_v46 = vcombine.high %v2377_v27, %v2377_v27  ;;  %v15136_v52 = vrot.slane %v2377_v27, 9  ;;  %v2448_v43 = vcombine.high %v1584_v12, %v1584_v12 }
 0x1d2   : > { %v18539_v49 = vmax.f32 %v2413_v59, %v15145_v48  ;;  %v15135_v29 = vrot.slane %v2378_v42, 9  ;;  %v18541_v58 = vmax.f32 %v2370_v16, %v15134_v36  ;;  %v2455_v37 = vrot.slane %v1584_v12, %v17791_v15 }
 0x1d3   : > { %v15137_v9 = vrot.slane %v2379_v46, 9  ;;  %v18546_v33 = vmax.f32 %v2377_v27, %v15136_v52  ;;  %v2462_v50 = vrot.slane %v2448_v43, %v17791_v15  ;;  %v15851_v60 = vrot.slane %v10211_v18, 9  ;;  %v18561_v27 = vpop.f32.mrb[55].mxu0 }
 0x1d4   : > { %v18549_v21 = vmax.f32 %v2378_v42, %v15135_v29  ;;  %v2463_v47 = vcombine.high %v2455_v37, %v2455_v37  ;;  %v15154_v3 = vrot.slane %v2455_v37, 9  ;;  %v10283_v20 = vrot.slane %v18537_v19, 5  ;;  %22462 = vst [vmem:[#allocation6_spill] sm:$0xff] %v18561_v27  ;;  %v18566_v42 = vld [vmem:[%s22423_s2] ss:$0 sm:$0xff] }
 0x1d5   : > { %v18554_v13 = vmax.f32 %v2379_v46, %v15137_v9  ;;  %v2464_v26 = vcombine.high %v2462_v50, %v2462_v50  ;;  %v15156_v0 = vrot.slane %v2462_v50, 9  ;;  %v10286_v1 = vrot.slane %v18544_v5, 5 }
 0x1d6   : > { %v15155_v59 = vrot.slane %v2463_v47, 9  ;;  %v6178_v55 = vmax.f32 %v2455_v37, %v15154_v3  ;;  %v10284_v16 = vsel %vm18372_vm4, %v15851_v60, %v10283_v20  ;;  %v10285_v45 = vrot.slane %v10283_v20, 4 }
 0x1d7   : > { %v15157_v12 = vrot.slane %v2464_v26, 9  ;;  %v6180_v48 = vmax.f32 %v2462_v50, %v15156_v0  ;;  %v1180_v36 = vadd.f32 %v18566_v42, %v18175_v61  ;;  %v1191_v18 = vadd.f32 %v18566_v42, %v18204_v25 }
 0x1d8   : > { %v6179_v46 = vmax.f32 %v2463_v47, %v15155_v59  ;;  %v6610_v52 = vmax.f32 %v18473_v14, %v6178_v55  ;;  %v10287_v43 = vsel %vm18372_vm4, %v10285_v45, %v10286_v1  ;;  %v6878_v29 = vsel %vm17723_vm5, 0, %v6877_v41 }
 0x1d9   : > { %v6181_v37 = vmax.f32 %v2464_v26, %v15157_v12  ;;  %v6612_v9 = vmax.f32 %v18479_v34, %v6180_v48  ;;  %v15899_v50 = vcombine.low %v10284_v16, %v10287_v43  ;;  %v1582_v60 = vmax.f32 %v1180_v36, 0.0  ;;  %6879 = vst [vmem:[#allocation2 + $0x44] sm:$0x1] %v6878_v29 }
 0x1da   : > { %v6611_v61 = vmax.f32 %v18477_v7, %v6179_v46  ;;  %v16305_v3 = vpack.c.bf16 %v6610_v52, %v6610_v52  ;;  %v1585_v20 = vmax.f32 %v1191_v18, 0.0  ;;  %v18581_v25 = vadd.f32 %v18566_v42, %v18208_v8 }
 0x1db   : > { %v6613_v14 = vmax.f32 %v18495_v54, %v6181_v37  ;;  %v16307_v47 = vpack.c.bf16 %v6612_v9, %v6612_v9  ;;  %10580 = vrot.lane.b32.xlu1 %v15899_v50, %s17538_s22  ;;  %v2414_v0 = vcombine.high %v1582_v60, %v1582_v60  ;;  %v2421_v26 = vrot.slane %v1582_v60, %v17791_v15 }
 0x1dc   : > { %v16306_v34 = vpack.c.bf16 %v6611_v61, %v6611_v61  ;;  %v18586_v1 = vunpack.c.l.b16 %v16305_v3  ;;  %v2465_v41 = vcombine.high %v1585_v20, %v1585_v20  ;;  %v2472_v7 = vrot.slane %v1585_v20, %v17791_v15 }
 0x1dd   : > { %v16308_v59 = vpack.c.bf16 %v6613_v14, %v6613_v14  ;;  %v18589_v55 = vunpack.c.l.b16 %v16307_v47  ;;  %v2428_v8 = vrot.slane %v2414_v0, %v17791_v15  ;;  %v2429_v16 = vcombine.high %v2421_v26, %v2421_v26 }
 0x1de   : > { %v18592_v45 = vunpack.c.l.b16 %v16306_v34  ;;  %v15146_v12 = vrot.slane %v2421_v26, 9  ;;  %v2479_v48 = vrot.slane %v2465_v41, %v17791_v15  ;;  %v2480_v9 = vcombine.high %v2472_v7, %v2472_v7 }
 0x1df   : > { %v18596_v36 = vunpack.c.l.b16 %v16308_v59  ;;  %v2430_v46 = vcombine.high %v2428_v8, %v2428_v8  ;;  %v15147_v52 = vrot.slane %v2429_v16, 9  ;;  %v15148_v29 = vrot.slane %v2428_v8, 9 }
 0x1e0   : > { %v6170_v37 = vmax.f32 %v2421_v26, %v15146_v12  ;;  %v2481_v3 = vcombine.high %v2479_v48, %v2479_v48  ;;  %v15158_v47 = vrot.slane %v2472_v7, 9  ;;  %v15159_v0 = vrot.slane %v2480_v9, 9 }
 0x1e1   : > { %v15149_v60 = vrot.slane %v2430_v46, 9  ;;  %v6171_v61 = vmax.f32 %v2429_v16, %v15147_v52  ;;  %v6172_v20 = vmax.f32 %v2428_v8, %v15148_v29  ;;  %v15160_v59 = vrot.slane %v2479_v48, 9 }
 0x1e2   : > { %v6602_v14 = vmax.f32 %v18518_v10, %v6170_v37  ;;  %v15161_v18 = vrot.slane %v2481_v3, 9  ;;  %v6182_v26 = vmax.f32 %v2472_v7, %v15158_v47  ;;  %v6183_v12 = vmax.f32 %v2480_v9, %v15159_v0  ;;  %v9780_v0 = vld [vmem:[#allocation2 + $0x18] sm:$0xf] }
 0x1e3   : > { %v6173_v34 = vmax.f32 %v2430_v46, %v15149_v60  ;;  %v6603_v41 = vmax.f32 %v18524_v57, %v6171_v61  ;;  %v6604_v43 = vmax.f32 %v18521_v22, %v6172_v20  ;;  %v6184_v16 = vmax.f32 %v2479_v48, %v15160_v59 }
 0x1e4   : > { %v16297_v54 = vpack.c.bf16 %v6602_v14, %v6602_v14  ;;  %v6185_v52 = vmax.f32 %v2481_v3, %v15161_v18  ;;  %v6614_v10 = vmax.f32 %v18530_v51, %v6182_v26  ;;  %v6615_v46 = vmax.f32 %v18535_v30, %v6183_v12 }
 0x1e5   : > { %v6605_v50 = vmax.f32 %v18527_v24, %v6173_v34  ;;  %v16298_v27 = vpack.c.bf16 %v6603_v41, %v6603_v41  ;;  %v16299_v8 = vpack.c.bf16 %v6604_v43, %v6604_v43  ;;  %v6616_v60 = vmax.f32 %v18533_v40, %v6184_v16  ;;  %v8766_v24 = vld [vmem:[#allocation2 + $0x44] sm:$0x1] }
 0x1e6   : > { %v8004_v29 = vunpack.c.l.b16 %v16297_v54  ;;  %v6617_v22 = vmax.f32 %v18539_v49, %v6185_v52  ;;  %v16309_v9 = vpack.c.bf16 %v6614_v10, %v6614_v10  ;;  %v16310_v20 = vpack.c.bf16 %v6615_v46, %v6615_v46 }
 0x1e7   : > { %v16300_v37 = vpack.c.bf16 %v6605_v50, %v6605_v50  ;;  %v8005_v57 = vunpack.c.l.b16 %v16298_v27  ;;  %v8006_v61 = vunpack.c.l.b16 %v16299_v8  ;;  %v16311_v18 = vpack.c.bf16 %v6616_v60, %v6616_v60  ;;  %v6821_v27 = vld [vmem:[#allocation2 + $0x3c] sm:$0x1] }
 0x1e8   : > { %v8311_v7 = vrot.slane %v8004_v29, 7  ;;  %v16493_v43 = vpack.c.bf16 %v6617_v22, %v6617_v22  ;;  %v18609_v3 = vunpack.c.l.b16 %v16309_v9  ;;  %v18611_v51 = vunpack.c.l.b16 %v16310_v20 }
 0x1e9   : > { %v8007_v14 = vunpack.c.l.b16 %v16300_v37  ;;  %v8312_v48 = vrot.slane %v8005_v57, 6  ;;  %v8314_v54 = vrot.slane %v8006_v61, 5  ;;  %v1583_v30 = vmax.f32 %v18581_v25, 0.0 }
 0x1ea   : > { %v18615_v50 = vunpack.c.l.b16 %v16311_v18  ;;  %v8767_v47 = vsel %vm17735_vm7, %v16493_v43, %v8766_v24  ;;  %v8332_v41 = vrot.slane %v18609_v3, 3  ;;  %v8334_v59 = vrot.slane %v18611_v51, 2  ;;  %v18631_v24 = vpop.f32.mrb[56].mxu0  ;;  %v6880_v51 = vld [vmem:[#allocation2 + $0x50] sm:$0x1] }
 0x1eb   : > { %v8313_v40 = vsel %vm8198_vm8, %v8312_v48, %v8311_v7  ;;  %v8316_v49 = vrot.slane %v8007_v14, 4  ;;  %8768 = vst [vmem:[#allocation2 + $0x44] sm:$0x1] %v8767_v47  ;;  %v2431_v26 = vcombine.high %v1583_v30, %v1583_v30  ;;  %v2438_v12 = vrot.slane %v1583_v30, %v17791_v15 }
 0x1ec   : > { %v8315_v34 = vsel %vm8201_vm9, %v8314_v54, %v8313_v40  ;;  %v8336_v25 = vrot.slane %v18615_v50, 1  ;;  %v6822_v16 = vsel %vm17735_vm7, 0, %v6821_v27  ;;  %v9851_v29 = vshrl.u32 %v9780_v0, 16  ;;  %v22467_v50 = vld [vmem:[#allocation7_spill] sm:$0xff] }
 0x1ed   : > { %v8317_v52 = vsel %vm8204_vm10, %v8316_v49, %v8315_v34  ;;  %v2445_v8 = vrot.slane %v2431_v26, %v17791_v15  ;;  %6823 = vst [vmem:[#allocation2 + $0x3c] sm:$0x1] %v6822_v16  ;;  %v9854_v10 = vshll.u32 %v9780_v0, 16  ;;  %v9860_v46 = vshll.u32 %v18537_v19, 16  ;;  %v18633_v49 = vpop.f32.mrb[57].mxu0 }
 0x1ee   : > { %v2446_v37 = vcombine.high %v2438_v12, %v2438_v12  ;;  %v15150_v57 = vrot.slane %v2438_v12, 9  ;;  %v9864_v60 = vshrl.u32 %v18537_v19, 16  ;;  %v9870_v22 = vshll.u32 %v18544_v5, 16 }
 0x1ef   : > { %v2447_v61 = vcombine.high %v2445_v8, %v2445_v8  ;;  %v15152_v7 = vrot.slane %v2445_v8, 9  ;;  %v9853_v9 = vrot.slane %v9851_v29, 4  ;;  %v9856_v20 = vrot.slane %v9854_v10, 5 }
 0x1f0   : > { %v15151_v14 = vrot.slane %v2446_v37, 9  ;;  %v6174_v48 = vmax.f32 %v2438_v12, %v15150_v57  ;;  %v9862_v18 = vrot.slane %v9860_v46, 5  ;;  %v9866_v43 = vrot.slane %v9864_v60, 4 }
 0x1f1   : > { %v15153_v54 = vrot.slane %v2447_v61, 9  ;;  %v6176_v30 = vmax.f32 %v2445_v8, %v15152_v7  ;;  %v9857_v27 = vor.u32 %v9856_v20, %v9853_v9  ;;  %v9872_v40 = vrot.slane %v9870_v22, 5 }
 0x1f2   : > { %v6175_v47 = vmax.f32 %v2446_v37, %v15151_v14  ;;  %v6606_v19 = vmax.f32 %v18541_v58, %v6174_v48  ;;  %v9867_v5 = vor.u32 %v9866_v43, %v9862_v18  ;;  %v1204_v0 = vadd.f32 %v18566_v42, %v18280_v56 }
 0x1f3   : > { %v6177_v34 = vmax.f32 %v2447_v61, %v15153_v54  ;;  %v6608_v26 = vmax.f32 %v18546_v33, %v6176_v30  ;;  %v9858_v16 = vrot.slane %v9857_v27, 4  ;;  %v1196_v12 = vadd.f32 %v18566_v42, %v18284_v11  ;;  %v18650_v27 = vpop.f32.mrb[58].mxu0 }
 0x1f4   : > { %v6607_v8 = vmax.f32 %v18549_v21, %v6175_v47  ;;  %v16301_v29 = vpack.c.bf16 %v6606_v19, %v6606_v19  ;;  %v9868_v10 = vrot.slane %v9867_v5, 4  ;;  %v1588_v46 = vmax.f32 %v1204_v0, 0.0  ;;  %v18653_v0 = vpop.f32.mrb[59].mxu0 }
 0x1f5   : > { %v6609_v37 = vmax.f32 %v18554_v13, %v6177_v34  ;;  %v16303_v57 = vpack.c.bf16 %v6608_v26, %v6608_v26  ;;  %v9863_v58 = vsel %vm18453_vm2, %v9858_v16, %v9862_v18  ;;  %v1586_v60 = vmax.f32 %v1196_v12, 0.0 }
 0x1f6   : > { %v16302_v56 = vpack.c.bf16 %v6607_v8, %v6607_v8  ;;  %v8008_v22 = vunpack.c.l.b16 %v16301_v29  ;;  %v9873_v33 = vsel %vm18453_vm2, %v9868_v10, %v9872_v40  ;;  %v2516_v61 = vcombine.high %v1588_v46, %v1588_v46 }
 0x1f7   : > { %v16304_v7 = vpack.c.bf16 %v6609_v37, %v6609_v37  ;;  %v8010_v11 = vunpack.c.l.b16 %v16303_v57  ;;  %v15883_v9 = vcombine.low %v9863_v58, %v9873_v33  ;;  %v2523_v21 = vrot.slane %v1588_v46, %v17791_v15  ;;  %v18667_v57 = vpop.f32.mrb[60].mxu0 }
 0x1f8   : > { %v8009_v20 = vunpack.c.l.b16 %v16302_v56  ;;  %v8318_v14 = vrot.slane %v8008_v22, 3  ;;  %v2530_v13 = vrot.slane %v2516_v61, %v17791_v15  ;;  %v2482_v48 = vcombine.high %v1586_v60, %v1586_v60  ;;  %v8762_v22 = vld [vmem:[#allocation2 + $0x3c] sm:$0xf] }
 0x1f9   : > { %v8011_v43 = vunpack.c.l.b16 %v16304_v7  ;;  %v8322_v54 = vrot.slane %v8010_v11, 1  ;;  %10500 = vrot.lane.b32.xlu0 %v15883_v9, %s17539_s23  ;;  %v2531_v18 = vcombine.high %v2523_v21, %v2523_v21  ;;  %v15170_v30 = vrot.slane %v2523_v21, 9 }
 0x1fa   : > { %v8319_v40 = vsel %vm8207_vm11, %v8318_v14, %v8317_v52  ;;  %v8320_v47 = vrot.slane %v8009_v20, 2  ;;  %v2532_v19 = vcombine.high %v2530_v13, %v2530_v13  ;;  %v15172_v5 = vrot.slane %v2530_v13, 9 }
 0x1fb   : > { %v22463_v34 = vrot.slane %v18586_v1, 7  ;;  %v15171_v16 = vrot.slane %v2531_v18, 9  ;;  %v18658_v12 = vmax.f32 %v2523_v21, %v15170_v30  ;;  %v2489_v8 = vrot.slane %v1586_v60, %v17791_v15 }
 0x1fc   : > { %v8321_v29 = vsel %vm8210_vm12, %v8320_v47, %v8319_v40  ;;  %v22464_v10 = vrot.slane %v18592_v45, 6  ;;  %v15173_v46 = vrot.slane %v2532_v19, 9  ;;  %v18665_v37 = vmax.f32 %v2530_v13, %v15172_v5  ;;  %v22468_v5 = vld [vmem:[#allocation8_spill] sm:$0xff] }
 0x1fd   : > { %v8325_v26 = vsel %vm8216_vm13, %v22463_v34, %v8011_v43  ;;  %v8323_v1 = vsel %vm22432_vm15, %v8322_v54, %v8321_v29  ;;  %v22465_v58 = vrot.slane %v18589_v55, 5  ;;  %v18673_v33 = vmax.f32 %v2531_v18, %v15171_v16 }
 0x1fe   : > { %v8327_v52 = vsel %vm8198_vm8, %v22464_v10, %v8325_v26  ;;  %v2496_v60 = vrot.slane %v2482_v48, %v17791_v15  ;;  %v22466_v45 = vrot.slane %v18596_v36, 4  ;;  %v8647_v7 = vpack.c.b16 %v8323_v1, %v8323_v1 }
 0x1ff   : > { %v8329_v56 = vsel %vm8201_vm9, %v22465_v58, %v8327_v52  ;;  %v18679_v11 = vmax.f32 %v2532_v19, %v15173_v46  ;;  %v2497_v9 = vcombine.high %v2489_v8, %v2489_v8  ;;  %v15162_v20 = vrot.slane %v2489_v8, 9 }
 0x200   : > { %v8331_v61 = vsel %vm8204_vm10, %v22466_v45, %v8329_v56  ;;  %v2498_v55 = vcombine.high %v2496_v60, %v2496_v60  ;;  %v15164_v14 = vrot.slane %v2496_v60, 9  ;;  %v8763_v36 = vsel %vm17999_vm0, %v8647_v7, %v8762_v22 }
 0x201   : > { %v8333_v21 = vsel %vm8207_vm11, %v8332_v41, %v8331_v61  ;;  %v15163_v48 = vrot.slane %v2497_v9, 9  ;;  %v1207_v43 = vadd.f32 %v18566_v42, %v18287_v53  ;;  %8764 = vst [vmem:[#allocation2 + $0x3c] sm:$0xf] %v8763_v36  ;;  %v18694_v54 = vmax.f32 %v2489_v8, %v15162_v20 }
 0x202   : > { %v8335_v13 = vsel %vm8210_vm12, %v8334_v59, %v8333_v21  ;;  %v15165_v41 = vrot.slane %v2498_v55, 9  ;;  %v18696_v18 = vmax.f32 %v2496_v60, %v15164_v14  ;;  %v1199_v47 = vadd.f32 %v18566_v42, %v18300_v31  ;;  %v18725_v14 = vpop.f32.mrb[61].mxu0 }
 0x203   : > { %v8337_v3 = vsel %vm22432_vm15, %v8336_v25, %v8335_v13  ;;  %v18698_v59 = vmax.f32 %v2497_v9, %v15163_v48  ;;  %v1589_v40 = vmax.f32 %v1207_v43, 0.0  ;;  %v1220_v53 = vadd.f32 %v18566_v42, %v18313_v4  ;;  %v22469_v4 = vld [vmem:[#allocation9_spill] sm:$0xff] }
 0x204   : > { %v8648_v30 = vpack.c.b16 %v8337_v3, %v8337_v3  ;;  %v18702_v19 = vmax.f32 %v2498_v55, %v15165_v41  ;;  %v1212_v25 = vadd.f32 %v18566_v42, %v22467_v50  ;;  %v1223_v34 = vadd.f32 %v18566_v42, %v22468_v5 }
 0x205   : > { %v2533_v26 = vcombine.high %v1589_v40, %v1589_v40  ;;  %v2540_v16 = vrot.slane %v1589_v40, %v17791_v15  ;;  %v1587_v8 = vmax.f32 %v1199_v47, 0.0  ;;  %v6881_v31 = vsel %vm17723_vm5, 0, %v6880_v51 }
 0x206   : > { %8765 = vst.msk [vmem:[#allocation2 + $0x40] sm:$0xf] %vm6794_vm14, %v8648_v30  ;;  %v1592_v29 = vmax.f32 %v1220_v53, 0.0  ;;  %v1590_v10 = vmax.f32 %v1212_v25, 0.0  ;;  %v18714_v52 = vmax.f32 %v1223_v34, 0.0  ;;  %v18718_v46 = vadd.f32 %v18566_v42, %v22469_v4 }
 0x207   : > { %6882 = vst [vmem:[#allocation2 + $0x50] sm:$0x1] %v6881_v31  ;;  %v2547_v1 = vrot.slane %v2533_v26, %v17791_v15  ;;  %v2548_v58 = vcombine.high %v2540_v16, %v2540_v16  ;;  %v15174_v56 = vrot.slane %v2540_v16, 9  ;;  %v2499_v22 = vcombine.high %v1587_v8, %v1587_v8 }
 0x208   : > { %v2506_v60 = vrot.slane %v1587_v8, %v17791_v15  ;;  %v2584_v45 = vcombine.high %v1592_v29, %v1592_v29  ;;  %v2591_v61 = vrot.slane %v1592_v29, %v17791_v15  ;;  %v2550_v7 = vcombine.high %v1590_v10, %v1590_v10 }
 0x209   : > { %v2549_v9 = vcombine.high %v2547_v1, %v2547_v1  ;;  %v15175_v21 = vrot.slane %v2548_v58, 9  ;;  %v15176_v55 = vrot.slane %v2547_v1, 9  ;;  %v18723_v20 = vmax.f32 %v2540_v16, %v15174_v56 }
 0x20a   : > { %v2513_v13 = vrot.slane %v2499_v22, %v17791_v15  ;;  %v2514_v36 = vcombine.high %v2506_v60, %v2506_v60  ;;  %v15166_v48 = vrot.slane %v2506_v60, 9  ;;  %v2598_v43 = vrot.slane %v2584_v45, %v17791_v15  ;;  %v18742_v22 = vpop.f32.mrb[62].mxu0 }
 0x20b   : > { %v15177_v3 = vrot.slane %v2549_v9, 9  ;;  %v18729_v41 = vmax.f32 %v2548_v58, %v15175_v21  ;;  %v18731_v51 = vmax.f32 %v2547_v1, %v15176_v55  ;;  %v2599_v30 = vcombine.high %v2591_v61, %v2591_v61 }
 0x20c   : > { %v2515_v40 = vcombine.high %v2513_v13, %v2513_v13  ;;  %v15167_v47 = vrot.slane %v2514_v36, 9  ;;  %v15168_v53 = vrot.slane %v2513_v13, 9  ;;  %v18733_v50 = vmax.f32 %v2506_v60, %v15166_v48 }
 0x20d   : > { %v18735_v25 = vmax.f32 %v2549_v9, %v15177_v3  ;;  %v2600_v5 = vcombine.high %v2598_v43, %v2598_v43  ;;  %v15186_v34 = vrot.slane %v2591_v61, 9  ;;  %v15187_v26 = vrot.slane %v2599_v30, 9 }
 0x20e   : > { %v15169_v16 = vrot.slane %v2515_v40, 9  ;;  %v18737_v8 = vmax.f32 %v2514_v36, %v15167_v47  ;;  %v18739_v31 = vmax.f32 %v2513_v13, %v15168_v53  ;;  %v15188_v29 = vrot.slane %v2598_v43, 9  ;;  %v18752_v47 = vpop.f32.mrb[63].mxu0 }
 0x20f   : > { %v15189_v4 = vrot.slane %v2600_v5, 9  ;;  %v6210_v1 = vmax.f32 %v2591_v61, %v15186_v34  ;;  %v6211_v58 = vmax.f32 %v2599_v30, %v15187_v26  ;;  %v2557_v56 = vrot.slane %v1590_v10, %v17791_v15 }
 0x210   : > { %v18744_v60 = vmax.f32 %v2515_v40, %v15169_v16  ;;  %v6212_v45 = vmax.f32 %v2598_v43, %v15188_v29  ;;  %v2564_v9 = vrot.slane %v2550_v7, %v17791_v15  ;;  %v2601_v21 = vcombine.high %v18714_v52, %v18714_v52 }
 0x211   : > { %v6213_v55 = vmax.f32 %v2600_v5, %v15189_v4  ;;  %v6626_v13 = vmax.f32 %v18658_v12, %v6210_v1  ;;  %v6627_v36 = vmax.f32 %v18673_v33, %v6211_v58  ;;  %v2565_v48 = vcombine.high %v2557_v56, %v2557_v56 }
 0x212   : > { %v6628_v61 = vmax.f32 %v18665_v37, %v6212_v45  ;;  %v2566_v3 = vcombine.high %v2564_v9, %v2564_v9  ;;  %v15178_v10 = vrot.slane %v2557_v56, 9  ;;  %v15180_v30 = vrot.slane %v2564_v9, 9 }
 0x213   : > { %v6629_v43 = vmax.f32 %v18679_v11, %v6213_v55  ;;  %v16321_v40 = vpack.c.bf16 %v6626_v13, %v6626_v13  ;;  %v16322_v7 = vpack.c.bf16 %v6627_v36, %v6627_v36  ;;  %v15179_v53 = vrot.slane %v2565_v48, 9 }
 0x214   : > { %v16323_v34 = vpack.c.bf16 %v6628_v61, %v6628_v61  ;;  %v15181_v26 = vrot.slane %v2566_v3, 9  ;;  %v6202_v5 = vmax.f32 %v2557_v56, %v15178_v10  ;;  %v6204_v16 = vmax.f32 %v2564_v9, %v15180_v30 }
 0x215   : > { %v16324_v12 = vpack.c.bf16 %v6629_v43, %v6629_v43  ;;  %v18755_v29 = vunpack.c.l.b16 %v16321_v40  ;;  %v18757_v33 = vunpack.c.l.b16 %v16322_v7  ;;  %v6203_v37 = vmax.f32 %v2565_v48, %v15179_v53 }
 0x216   : > { %v18759_v4 = vunpack.c.l.b16 %v16323_v34  ;;  %v6205_v1 = vmax.f32 %v2566_v3, %v15181_v26  ;;  %v6618_v58 = vmax.f32 %v18694_v54, %v6202_v5  ;;  %v6620_v11 = vmax.f32 %v18696_v18, %v6204_v16 }
 0x217   : > { %v18763_v45 = vunpack.c.l.b16 %v16324_v12  ;;  %v8351_v55 = vrot.slane %v18755_v29, 7  ;;  %v8353_v56 = vrot.slane %v18757_v33, 6  ;;  %v6619_v9 = vmax.f32 %v18698_v59, %v6203_v37 }
 0x218   : > { %v8355_v13 = vrot.slane %v18759_v4, 5  ;;  %v6621_v36 = vmax.f32 %v18702_v19, %v6205_v1  ;;  %v16313_v48 = vpack.c.bf16 %v6618_v58, %v6618_v58  ;;  %v16315_v61 = vpack.c.bf16 %v6620_v11, %v6620_v11 }
 0x219   : > { %v8357_v3 = vrot.slane %v18763_v45, 4  ;;  %v16314_v10 = vpack.c.bf16 %v6619_v9, %v6619_v9  ;;  %v2608_v54 = vrot.slane %v18714_v52, %v17791_v15  ;;  %v2615_v18 = vrot.slane %v2601_v21, %v17791_v15 }
 0x21a   : > { %v16316_v30 = vpack.c.bf16 %v6621_v36, %v6621_v36  ;;  %v8020_v43 = vunpack.c.l.b16 %v16313_v48  ;;  %v8022_v40 = vunpack.c.l.b16 %v16315_v61  ;;  %v1591_v7 = vmax.f32 %v18718_v46, 0.0 }
 0x21b   : > { %v8021_v59 = vunpack.c.l.b16 %v16314_v10  ;;  %v2616_v53 = vcombine.high %v2608_v54, %v2608_v54  ;;  %v2617_v34 = vcombine.high %v2615_v18, %v2615_v18  ;;  %v15190_v26 = vrot.slane %v2608_v54, 9 }
 0x21c   : > { %v8023_v19 = vunpack.c.l.b16 %v16316_v30  ;;  %v8338_v5 = vrot.slane %v8020_v43, 7  ;;  %v8341_v16 = vrot.slane %v8022_v40, 5  ;;  %v15192_v12 = vrot.slane %v2615_v18, 9 }
 0x21d   : > { %v8339_v37 = vrot.slane %v8021_v59, 6  ;;  %v15191_v1 = vrot.slane %v2616_v53, 9  ;;  %v15193_v58 = vrot.slane %v2617_v34, 9  ;;  %v6214_v11 = vmax.f32 %v2608_v54, %v15190_v26 }
 0x21e   : > { %v8343_v52 = vrot.slane %v8023_v19, 4  ;;  %v6216_v9 = vmax.f32 %v2615_v18, %v15192_v12  ;;  %v2567_v21 = vcombine.high %v1591_v7, %v1591_v7  ;;  %v2574_v36 = vrot.slane %v1591_v7, %v17791_v15  ;;  %v8773_v12 = vld [vmem:[#allocation2 + $0x50] sm:$0x1] }
 0x21f   : > { %v8340_v48 = vsel %vm8198_vm8, %v8339_v37, %v8338_v5  ;;  %v6215_v46 = vmax.f32 %v2616_v53, %v15191_v1  ;;  %v6217_v61 = vmax.f32 %v2617_v34, %v15193_v58  ;;  %v6630_v10 = vmax.f32 %v18723_v20, %v6214_v11 }
 0x220   : > { %v8342_v30 = vsel %vm8201_vm9, %v8341_v16, %v8340_v48  ;;  %v6632_v43 = vmax.f32 %v18731_v51, %v6216_v9  ;;  %v2581_v40 = vrot.slane %v2567_v21, %v17791_v15  ;;  %v2582_v59 = vcombine.high %v2574_v36, %v2574_v36 }
 0x221   : > { %v6631_v54 = vmax.f32 %v18729_v41, %v6215_v46  ;;  %v6633_v18 = vmax.f32 %v18735_v25, %v6217_v61  ;;  %v16325_v26 = vpack.c.bf16 %v6630_v10, %v6630_v10  ;;  %v15182_v19 = vrot.slane %v2574_v36, 9  ;;  %v6824_v41 = vld [vmem:[#allocation2 + $0x48] sm:$0x1]  ;;  %v9782_v61 = vld [vmem:[#allocation2 + $0x24] sm:$0xf] }
 0x222   : > { %v16327_v7 = vpack.c.bf16 %v6632_v43, %v6632_v43  ;;  %v2583_v5 = vcombine.high %v2581_v40, %v2581_v40  ;;  %v15183_v53 = vrot.slane %v2582_v59, 9  ;;  %v15184_v34 = vrot.slane %v2581_v40, 9 }
 0x223   : > { %v16326_v37 = vpack.c.bf16 %v6631_v54, %v6631_v54  ;;  %v18783_v20 = vunpack.c.l.b16 %v16325_v26  ;;  %v16494_v16 = vpack.c.bf16 %v6633_v18, %v6633_v18  ;;  %v6206_v1 = vmax.f32 %v2574_v36, %v15182_v19 }
 0x224   : > { %v18785_v51 = vunpack.c.l.b16 %v16327_v7  ;;  %v15185_v58 = vrot.slane %v2583_v5, 9  ;;  %v6207_v11 = vmax.f32 %v2582_v59, %v15183_v53  ;;  %v6208_v9 = vmax.f32 %v2581_v40, %v15184_v34  ;;  %v9783_v40 = vld [vmem:[#allocation2 + $0x28] sm:$0xf]  ;;  %v18800_v7 = vpop.f32.mrb[64].mxu0  ;;  %v9812_v34 = vld [vmem:[#allocation2 + $0x2c] sm:$0x1] }
 0x225   : > { %v18787_v21 = vunpack.c.l.b16 %v16326_v37  ;;  %v8359_v25 = vrot.slane %v18783_v20, 3  ;;  %v8774_v48 = vsel %vm17735_vm7, %v16494_v16, %v8773_v12  ;;  %v6622_v46 = vmax.f32 %v18733_v50, %v6206_v1 }
 0x226   : > { %v8363_v10 = vrot.slane %v18785_v51, 1  ;;  %8775 = vst [vmem:[#allocation2 + $0x50] sm:$0x1] %v8774_v48  ;;  %v6209_v36 = vmax.f32 %v2583_v5, %v15185_v58  ;;  %v6623_v43 = vmax.f32 %v18737_v8, %v6207_v11  ;;  %v6624_v59 = vmax.f32 %v18739_v31, %v6208_v9 }
 0x227   : > { %v8361_v54 = vrot.slane %v18787_v21, 2  ;;  %v6825_v18 = vsel %vm17735_vm7, 0, %v6824_v41  ;;  %v16317_v26 = vpack.c.bf16 %v6622_v46, %v6622_v46  ;;  %v8344_v19 = vsel %vm8204_vm10, %v8343_v52, %v8342_v30  ;;  %v18803_v41 = vpop.f32.mrb[65].mxu0 }
 0x228   : > { %v6625_v50 = vmax.f32 %v18744_v60, %v6209_v36  ;;  %6826 = vst [vmem:[#allocation2 + $0x48] sm:$0x1] %v6825_v18  ;;  %v16318_v12 = vpack.c.bf16 %v6623_v43, %v6623_v43  ;;  %v16319_v5 = vpack.c.bf16 %v6624_v59, %v6624_v59  ;;  %v9875_v53 = vshrl.u32 %v9782_v61, 16  ;;  %v10212_v60 = vld [vmem:[#allocation2 + $0x24] sm:$0xe] }
 0x229   : > { %v8024_v8 = vunpack.c.l.b16 %v16317_v26  ;;  %v9878_v31 = vshll.u32 %v9782_v61, 16  ;;  %v9884_v37 = vshll.u32 %v9783_v40, 16  ;;  %v9888_v16 = vshrl.u32 %v9783_v40, 16 }
 0x22a   : > { %v16320_v1 = vpack.c.bf16 %v6625_v50, %v6625_v50  ;;  %v8025_v58 = vunpack.c.l.b16 %v16318_v12  ;;  %v8026_v11 = vunpack.c.l.b16 %v16319_v5  ;;  %v9877_v9 = vrot.slane %v9875_v53, 4 }
 0x22b   : > { %v8345_v52 = vrot.slane %v8024_v8, 3  ;;  %v9880_v30 = vrot.slane %v9878_v31, 5  ;;  %v9886_v21 = vrot.slane %v9884_v37, 5  ;;  %v9890_v48 = vrot.slane %v9888_v16, 4 }
 0x22c   : > { %v8027_v46 = vunpack.c.l.b16 %v16320_v1  ;;  %v8347_v36 = vrot.slane %v8025_v58, 2  ;;  %v8349_v43 = vrot.slane %v8026_v11, 1  ;;  %v9894_v59 = vshll.u32 %v9812_v34, 16 }
 0x22d   : > { %v8346_v18 = vsel %vm8207_vm11, %v8345_v52, %v8344_v19  ;;  %v9881_v61 = vor.u32 %v9880_v30, %v9877_v9  ;;  %v9891_v26 = vor.u32 %v9890_v48, %v9886_v21  ;;  %v1236_v50 = vadd.f32 %v18566_v42, %v18444_v23  ;;  %v18819_v9 = vpop.f32.mrb[66].mxu0 }
 0x22e   : > { %v8348_v12 = vsel %vm8210_vm12, %v8347_v36, %v8346_v18  ;;  %v8352_v5 = vsel %vm8216_vm13, %v8351_v55, %v8027_v46  ;;  %v9896_v53 = vrot.slane %v9894_v59, 5  ;;  %v15852_v8 = vrot.slane %v10212_v60, 9  ;;  %v18828_v30 = vpop.f32.mrb[67].mxu0 }
 0x22f   : > { %v8350_v31 = vsel %vm22432_vm15, %v8349_v43, %v8348_v12  ;;  %v8354_v37 = vsel %vm8198_vm8, %v8353_v56, %v8352_v5  ;;  %v8769_v19 = vld [vmem:[#allocation2 + $0x48] sm:$0xf]  ;;  %v9882_v16 = vrot.slane %v9881_v61, 4  ;;  %v9892_v1 = vrot.slane %v9891_v26, 4  ;;  %22470 = vst [vmem:[#allocation7_spill] sm:$0xff] %v18828_v30  ;;  %v18850_v18 = vpop.f32.mrb[68].mxu0 }
 0x230   : > { %v8356_v23 = vsel %vm8201_vm9, %v8355_v13, %v8354_v37  ;;  %v8650_v58 = vpack.c.b16 %v8350_v31, %v8350_v31  ;;  %v1596_v11 = vmax.f32 %v1236_v50, 0.0  ;;  %v10290_v29 = vrot.slane %v9783_v40, 5  ;;  %22471 = vst [vmem:[#allocation8_spill] sm:$0xff] %v18850_v18 }
 0x231   : > { %v8358_v55 = vsel %vm8204_vm10, %v8357_v3, %v8356_v23  ;;  %v9887_v33 = vsel %vm18453_vm2, %v9882_v16, %v9886_v21  ;;  %v9897_v56 = vsel %vm18453_vm2, %v9892_v1, %v9896_v53  ;;  %v10293_v52 = vrot.slane %v9812_v34, 5 }
 0x232   : > { %v8360_v4 = vsel %vm8207_vm11, %v8359_v25, %v8358_v55  ;;  %v8770_v13 = vsel %vm17999_vm0, %v8650_v58, %v8769_v19  ;;  %v15884_v40 = vcombine.low %v9887_v33, %v9897_v56  ;;  %v2652_v45 = vcombine.high %v1596_v11, %v1596_v11 }
 0x233   : > { %v8362_v3 = vsel %vm8210_vm12, %v8361_v54, %v8360_v4  ;;  %8771 = vst [vmem:[#allocation2 + $0x48] sm:$0xf] %v8770_v13  ;;  %v2659_v21 = vrot.slane %v1596_v11, %v17791_v15  ;;  %v10291_v48 = vsel %vm18372_vm4, %v15852_v8, %v10290_v29  ;;  %v10292_v34 = vrot.slane %v10290_v29, 4 }
 0x234   : > { %v8364_v20 = vsel %vm22432_vm15, %v8363_v10, %v8362_v3  ;;  %10502 = vrot.lane.b32.xlu0 %v15884_v40, %s17539_s23  ;;  %v2666_v25 = vrot.slane %v2652_v45, %v17791_v15  ;;  %v1228_v60 = vadd.f32 %v18566_v42, %v18448_v62  ;;  %v1239_v54 = vadd.f32 %v18566_v42, %v18468_v63 }
 0x235   : > { %v8651_v46 = vpack.c.b16 %v8364_v20, %v8364_v20  ;;  %v2667_v36 = vcombine.high %v2659_v21, %v2659_v21  ;;  %v15202_v43 = vrot.slane %v2659_v21, 9  ;;  %v10294_v59 = vsel %vm18372_vm4, %v10292_v34, %v10293_v52 }
 0x236   : > { %v2668_v51 = vcombine.high %v2666_v25, %v2666_v25  ;;  %v15204_v10 = vrot.slane %v2666_v25, 9  ;;  %v15900_v61 = vcombine.low %v10291_v48, %v10294_v59  ;;  %v1594_v26 = vmax.f32 %v1228_v60, 0.0 }
 0x237   : > { %8772 = vst.msk [vmem:[#allocation2 + $0x4c] sm:$0xf] %vm6794_vm14, %v8651_v46  ;;  %v15203_v50 = vrot.slane %v2667_v36, 9  ;;  %v18853_v12 = vmax.f32 %v2659_v21, %v15202_v43  ;;  %v1597_v62 = vmax.f32 %v1239_v54, 0.0  ;;  %v1231_v63 = vadd.f32 %v18566_v42, %v18470_v28 }
 0x238   : > { %v15205_v5 = vrot.slane %v2668_v51, 9  ;;  %v18857_v53 = vmax.f32 %v2666_v25, %v15204_v10  ;;  %10582 = vrot.lane.b32.xlu0 %v15900_v61, %s17538_s22  ;;  %v2618_v8 = vcombine.high %v1594_v26, %v1594_v26  ;;  %v2625_v31 = vrot.slane %v1594_v26, %v17791_v15  ;;  %v6883_v26 = vld [vmem:[#allocation2 + $0x5c] sm:$0x1] }
 0x239   : > { %v18861_v37 = vmax.f32 %v2667_v36, %v15203_v50  ;;  %v2669_v19 = vcombine.high %v1597_v62, %v1597_v62  ;;  %v2676_v16 = vrot.slane %v1597_v62, %v17791_v15  ;;  %v1595_v1 = vmax.f32 %v1231_v63, 0.0 }
 0x23a   : > { %v18864_v23 = vmax.f32 %v2668_v51, %v15205_v5  ;;  %v2632_v58 = vrot.slane %v2618_v8, %v17791_v15  ;;  %v2633_v11 = vcombine.high %v2625_v31, %v2625_v31  ;;  %v15194_v28 = vrot.slane %v2625_v31, 9 }
 0x23b   : > { %v2683_v29 = vrot.slane %v2669_v19, %v17791_v15  ;;  %v2684_v55 = vcombine.high %v2676_v16, %v2676_v16  ;;  %v15206_v33 = vrot.slane %v2676_v16, 9  ;;  %v2635_v56 = vcombine.high %v1595_v1, %v1595_v1 }
 0x23c   : > { %v2634_v52 = vcombine.high %v2632_v58, %v2632_v58  ;;  %v15195_v4 = vrot.slane %v2633_v11, 9  ;;  %v15196_v13 = vrot.slane %v2632_v58, 9  ;;  %v18868_v40 = vmax.f32 %v2625_v31, %v15194_v28 }
 0x23d   : > { %v2685_v45 = vcombine.high %v2683_v29, %v2683_v29  ;;  %v15207_v3 = vrot.slane %v2684_v55, 9  ;;  %v15208_v21 = vrot.slane %v2683_v29, 9  ;;  %v18870_v48 = vmax.f32 %v2676_v16, %v15206_v33  ;;  %v18901_v33 = vpop.f32.mrb[69].mxu0 }
 0x23e   : > { %v15197_v34 = vrot.slane %v2634_v52, 9  ;;  %v18872_v20 = vmax.f32 %v2633_v11, %v15195_v4  ;;  %v18874_v25 = vmax.f32 %v2632_v58, %v15196_v13  ;;  %v2642_v60 = vrot.slane %v1595_v1, %v17791_v15  ;;  %22472 = vst [vmem:[#allocation9_spill] sm:$0xff] %v18901_v33  ;;  %v22473_v4 = vld [vmem:[#allocation6_spill] sm:$0xff] }
 0x23f   : > { %v15209_v54 = vrot.slane %v2685_v45, 9  ;;  %v18877_v46 = vmax.f32 %v2684_v55, %v15207_v3  ;;  %v18879_v36 = vmax.f32 %v2683_v29, %v15208_v21  ;;  %v2649_v43 = vrot.slane %v2635_v56, %v17791_v15 }
 0x240   : > { %v18882_v59 = vmax.f32 %v2634_v52, %v15197_v34  ;;  %v2650_v51 = vcombine.high %v2642_v60, %v2642_v60  ;;  %v15198_v10 = vrot.slane %v2642_v60, 9  ;;  %v1252_v61 = vadd.f32 %v18566_v42, %v18489_v38 }
 0x241   : > { %v18886_v50 = vmax.f32 %v2685_v45, %v15209_v54  ;;  %v2651_v62 = vcombine.high %v2649_v43, %v2649_v43  ;;  %v15200_v63 = vrot.slane %v2649_v43, 9  ;;  %v1244_v5 = vadd.f32 %v18566_v42, %v18552_v32  ;;  %v18910_v45 = vpop.f32.mrb[70].mxu0 }
 0x242   : > { %v15199_v8 = vrot.slane %v2650_v51, 9  ;;  %v18890_v31 = vmax.f32 %v2642_v60, %v15198_v10  ;;  %v1600_v19 = vmax.f32 %v1252_v61, 0.0  ;;  %v1255_v16 = vadd.f32 %v18566_v42, %v18557_v6  ;;  %22474 = vst [vmem:[#allocation6_spill] sm:$0xff] %v18910_v45  ;;  %v18913_v54 = vpop.f32.mrb[71].mxu0 }
 0x243   : > { %v15201_v1 = vrot.slane %v2651_v62, 9  ;;  %v18894_v58 = vmax.f32 %v2649_v43, %v15200_v63  ;;  %v1598_v11 = vmax.f32 %v1244_v5, 0.0  ;;  %v6884_v38 = vsel %vm17723_vm5, 0, %v6883_v26  ;;  %22475 = vst [vmem:[#allocation10_spill] sm:$0xff] %v18913_v54 }
 0x244   : > { %v18898_v28 = vmax.f32 %v2650_v51, %v15199_v8  ;;  %v2720_v29 = vcombine.high %v1600_v19, %v1600_v19  ;;  %v2727_v55 = vrot.slane %v1600_v19, %v17791_v15  ;;  %v1601_v32 = vmax.f32 %v1255_v16, 0.0  ;;  %6885 = vst [vmem:[#allocation2 + $0x5c] sm:$0x1] %v6884_v38 }
 0x245   : > { %v18903_v56 = vmax.f32 %v2651_v62, %v15201_v1  ;;  %v2686_v52 = vcombine.high %v1598_v11, %v1598_v11  ;;  %v2693_v6 = vrot.slane %v1598_v11, %v17791_v15  ;;  %v18908_v13 = vadd.f32 %v18566_v42, %v22473_v4 }
 0x246   : > { %v2734_v3 = vrot.slane %v2720_v29, %v17791_v15  ;;  %v2735_v21 = vcombine.high %v2727_v55, %v2727_v55  ;;  %v15218_v34 = vrot.slane %v2727_v55, 9  ;;  %v2737_v60 = vcombine.high %v1601_v32, %v1601_v32 }
 0x247   : > { %v2700_v43 = vrot.slane %v2686_v52, %v17791_v15  ;;  %v2701_v51 = vcombine.high %v2693_v6, %v2693_v6  ;;  %v15210_v10 = vrot.slane %v2693_v6, 9  ;;  %v2744_v61 = vrot.slane %v1601_v32, %v17791_v15 }
 0x248   : > { %v2736_v26 = vcombine.high %v2734_v3, %v2734_v3  ;;  %v15219_v62 = vrot.slane %v2735_v21, 9  ;;  %v15220_v63 = vrot.slane %v2734_v3, 9  ;;  %v6242_v42 = vmax.f32 %v2727_v55, %v15218_v34 }
 0x249   : > { %v2702_v5 = vcombine.high %v2700_v43, %v2700_v43  ;;  %v15211_v8 = vrot.slane %v2701_v51, 9  ;;  %v15212_v19 = vrot.slane %v2700_v43, 9  ;;  %v6234_v16 = vmax.f32 %v2693_v6, %v15210_v10 }
 0x24a   : > { %v15221_v1 = vrot.slane %v2736_v26, 9  ;;  %v6243_v11 = vmax.f32 %v2735_v21, %v15219_v62  ;;  %v6244_v38 = vmax.f32 %v2734_v3, %v15220_v63  ;;  %v6642_v29 = vmax.f32 %v18853_v12, %v6242_v42 }
 0x24b   : > { %v15213_v4 = vrot.slane %v2702_v5, 9  ;;  %v6235_v54 = vmax.f32 %v2701_v51, %v15211_v8  ;;  %v6236_v52 = vmax.f32 %v2700_v43, %v15212_v19  ;;  %v6634_v45 = vmax.f32 %v18868_v40, %v6234_v16 }
 0x24c   : > { %v6245_v33 = vmax.f32 %v2736_v26, %v15221_v1  ;;  %v6643_v32 = vmax.f32 %v18861_v37, %v6243_v11  ;;  %v6644_v18 = vmax.f32 %v18857_v53, %v6244_v38  ;;  %v16337_v55 = vpack.c.bf16 %v6642_v29, %v6642_v29  ;;  %v6827_v29 = vld [vmem:[#allocation2 + $0x54] sm:$0x1] }
 0x24d   : > { %v6237_v34 = vmax.f32 %v2702_v5, %v15213_v4  ;;  %v6635_v30 = vmax.f32 %v18872_v20, %v6235_v54  ;;  %v6636_v6 = vmax.f32 %v18874_v25, %v6236_v52  ;;  %v16329_v21 = vpack.c.bf16 %v6634_v45, %v6634_v45 }
 0x24e   : > { %v6645_v3 = vmax.f32 %v18864_v23, %v6245_v33  ;;  %v16338_v12 = vpack.c.bf16 %v6643_v32, %v6643_v32  ;;  %v16339_v10 = vpack.c.bf16 %v6644_v18, %v6644_v18  ;;  %v18924_v51 = vunpack.c.l.b16 %v16337_v55 }
 0x24f   : > { %v6637_v40 = vmax.f32 %v18882_v59, %v6237_v34  ;;  %v16330_v43 = vpack.c.bf16 %v6635_v30, %v6635_v30  ;;  %v16331_v26 = vpack.c.bf16 %v6636_v6, %v6636_v6  ;;  %v8036_v37 = vunpack.c.l.b16 %v16329_v21 }
 0x250   : > { %v16340_v62 = vpack.c.bf16 %v6645_v3, %v6645_v3  ;;  %v18927_v53 = vunpack.c.l.b16 %v16338_v12  ;;  %v18929_v63 = vunpack.c.l.b16 %v16339_v10  ;;  %v8378_v20 = vrot.slane %v18924_v51, 7 }
 0x251   : > { %v16332_v25 = vpack.c.bf16 %v6637_v40, %v6637_v40  ;;  %v8037_v45 = vunpack.c.l.b16 %v16330_v43  ;;  %v8038_v54 = vunpack.c.l.b16 %v16331_v26  ;;  %v8365_v23 = vrot.slane %v8036_v37, 7  ;;  %v9784_v43 = vld [vmem:[#allocation2 + $0x30] sm:$0xf] }
 0x252   : > { %v18932_v33 = vunpack.c.l.b16 %v16340_v62  ;;  %v8380_v18 = vrot.slane %v18927_v53, 6  ;;  %v8382_v59 = vrot.slane %v18929_v63, 5  ;;  %v2751_v30 = vrot.slane %v2737_v60, %v17791_v15 }
 0x253   : > { %v8039_v42 = vunpack.c.l.b16 %v16332_v25  ;;  %v8366_v5 = vrot.slane %v8037_v45, 6  ;;  %v8368_v8 = vrot.slane %v8038_v54, 5  ;;  %v2752_v19 = vcombine.high %v2744_v61, %v2744_v61 }
 0x254   : > { %v8384_v16 = vrot.slane %v18932_v33, 4  ;;  %v2753_v1 = vcombine.high %v2751_v30, %v2751_v30  ;;  %v15222_v11 = vrot.slane %v2744_v61, 9  ;;  %v15224_v38 = vrot.slane %v2751_v30, 9 }
 0x255   : > { %v8367_v4 = vsel %vm8198_vm8, %v8366_v5, %v8365_v23  ;;  %v8370_v52 = vrot.slane %v8039_v42, 4  ;;  %v15223_v32 = vrot.slane %v2752_v19, 9  ;;  %v1599_v55 = vmax.f32 %v18908_v13, 0.0 }
 0x256   : > { %v8369_v34 = vsel %vm8201_vm9, %v8368_v8, %v8367_v4  ;;  %v15225_v6 = vrot.slane %v2753_v1, 9  ;;  %v6246_v60 = vmax.f32 %v2744_v61, %v15222_v11  ;;  %v6248_v21 = vmax.f32 %v2751_v30, %v15224_v38 }
 0x257   : > { %v6247_v3 = vmax.f32 %v2752_v19, %v15223_v32  ;;  %v2703_v12 = vcombine.high %v1599_v55, %v1599_v55  ;;  %v2710_v10 = vrot.slane %v1599_v55, %v17791_v15  ;;  %v6828_v40 = vsel %vm17735_vm7, 0, %v6827_v29  ;;  %v8780_v19 = vld [vmem:[#allocation2 + $0x5c] sm:$0x1] }
 0x258   : > { %v6249_v26 = vmax.f32 %v2753_v1, %v15225_v6  ;;  %v6646_v37 = vmax.f32 %v18870_v48, %v6246_v60  ;;  %v6648_v62 = vmax.f32 %v18879_v36, %v6248_v21  ;;  %6829 = vst [vmem:[#allocation2 + $0x54] sm:$0x1] %v6828_v40  ;;  %v8371_v13 = vsel %vm8204_vm10, %v8370_v52, %v8369_v34 }
 0x259   : > { %v6647_v25 = vmax.f32 %v18877_v46, %v6247_v3  ;;  %v2717_v61 = vrot.slane %v2703_v12, %v17791_v15  ;;  %v2718_v45 = vcombine.high %v2710_v10, %v2710_v10  ;;  %v15214_v54 = vrot.slane %v2710_v10, 9 }
 0x25a   : > { %v6649_v23 = vmax.f32 %v18886_v50, %v6249_v26  ;;  %v16341_v30 = vpack.c.bf16 %v6646_v37, %v6646_v37  ;;  %v16343_v42 = vpack.c.bf16 %v6648_v62, %v6648_v62  ;;  %v9899_v5 = vshrl.u32 %v9784_v43, 16  ;;  %v18956_v50 = vld [vmem:[#allocation2 + $0x34] sm:$0xf]  ;;  %v18966_v26 = vld [vmem:[#allocation2 + $0x38] sm:$0x1] }
 0x25b   : > { %v16342_v8 = vpack.c.bf16 %v6647_v25, %v6647_v25  ;;  %v2719_v1 = vcombine.high %v2717_v61, %v2717_v61  ;;  %v15215_v48 = vrot.slane %v2718_v45, 9  ;;  %v15216_v11 = vrot.slane %v2717_v61, 9 }
 0x25c   : > { %v18950_v36 = vunpack.c.l.b16 %v16341_v30  ;;  %v18952_v38 = vunpack.c.l.b16 %v16343_v42  ;;  %v16495_v29 = vpack.c.bf16 %v6649_v23, %v6649_v23  ;;  %v6238_v46 = vmax.f32 %v2710_v10, %v15214_v54 }
 0x25d   : > { %v18954_v4 = vunpack.c.l.b16 %v16342_v8  ;;  %v15217_v52 = vrot.slane %v2719_v1, 9  ;;  %v6239_v32 = vmax.f32 %v2718_v45, %v15215_v48  ;;  %v6240_v55 = vmax.f32 %v2717_v61, %v15216_v11  ;;  %v18969_v45 = vpop.f32.mrb[72].mxu0  ;;  %v10213_v11 = vld [vmem:[#allocation2 + $0x30] sm:$0xe] }
 0x25e   : > { %v8386_v34 = vrot.slane %v18950_v36, 3  ;;  %v8390_v6 = vrot.slane %v18952_v38, 1  ;;  %v8781_v60 = vsel %vm17735_vm7, %v16495_v29, %v8780_v19  ;;  %v6638_v21 = vmax.f32 %v18890_v31, %v6238_v46  ;;  %v18974_v19 = vpop.f32.mrb[73].mxu0 }
 0x25f   : > { %v8388_v3 = vrot.slane %v18954_v4, 2  ;;  %8782 = vst [vmem:[#allocation2 + $0x5c] sm:$0x1] %v8781_v60  ;;  %v6241_v12 = vmax.f32 %v2719_v1, %v15217_v52  ;;  %v6639_v10 = vmax.f32 %v18898_v28, %v6239_v32  ;;  %v6640_v40 = vmax.f32 %v18894_v58, %v6240_v55 }
 0x260   : > { %v16333_v37 = vpack.c.bf16 %v6638_v21, %v6638_v21  ;;  %v9901_v62 = vrot.slane %v9899_v5, 4  ;;  %v9902_v25 = vshll.u32 %v9784_v43, 16  ;;  %v9908_v61 = vshll.u32 %v18956_v50, 16 }
 0x261   : > { %v6641_v54 = vmax.f32 %v18903_v56, %v6241_v12  ;;  %v16334_v31 = vpack.c.bf16 %v6639_v10, %v6639_v10  ;;  %v16335_v23 = vpack.c.bf16 %v6640_v40, %v6640_v40  ;;  %v9912_v30 = vshrl.u32 %v18956_v50, 16  ;;  %v18979_v56 = vld [vmem:[%s22423_s2] ss:$0 sm:$0xff] }
 0x262   : > { %v8040_v42 = vunpack.c.l.b16 %v16333_v37  ;;  %v9904_v8 = vrot.slane %v9902_v25, 5  ;;  %v9910_v28 = vrot.slane %v9908_v61, 5  ;;  %v9918_v58 = vshll.u32 %v18966_v26, 16 }
 0x263   : > { %v16336_v1 = vpack.c.bf16 %v6641_v54, %v6641_v54  ;;  %v8041_v5 = vunpack.c.l.b16 %v16334_v31  ;;  %v8042_v43 = vunpack.c.l.b16 %v16335_v23  ;;  %v9914_v48 = vrot.slane %v9912_v30, 4  ;;  %v8776_v31 = vld [vmem:[#allocation2 + $0x54] sm:$0xf] }
 0x264   : > { %v8372_v36 = vrot.slane %v8040_v42, 3  ;;  %v9905_v29 = vor.u32 %v9904_v8, %v9901_v62  ;;  %v9920_v46 = vrot.slane %v9918_v58, 5  ;;  %v1268_v4 = vadd.f32 %v18979_v56, %v18631_v24 }
 0x265   : > { %v8043_v52 = vunpack.c.l.b16 %v16336_v1  ;;  %v8374_v32 = vrot.slane %v8041_v5, 2  ;;  %v8376_v55 = vrot.slane %v8042_v43, 1  ;;  %v9915_v60 = vor.u32 %v9914_v48, %v9910_v28 }
 0x266   : > { %v8373_v21 = vsel %vm8207_vm11, %v8372_v36, %v8371_v13  ;;  %v9906_v12 = vrot.slane %v9905_v29, 4  ;;  %v1604_v10 = vmax.f32 %v1268_v4, 0.0  ;;  %v15853_v40 = vrot.slane %v10213_v11, 9 }
 0x267   : > { %v8375_v37 = vsel %vm8210_vm12, %v8374_v32, %v8373_v21  ;;  %v8379_v62 = vsel %vm8216_vm13, %v8378_v20, %v8043_v52  ;;  %v9916_v25 = vrot.slane %v9915_v60, 4  ;;  %v10297_v61 = vrot.slane %v18956_v50, 5  ;;  %v6886_v60 = vld [vmem:[#allocation2 + $0x68] sm:$0x1] }
 0x268   : > { %v8377_v24 = vsel %vm22432_vm15, %v8376_v55, %v8375_v37  ;;  %v8381_v54 = vsel %vm8198_vm8, %v8380_v18, %v8379_v62  ;;  %v9911_v13 = vsel %vm18453_vm2, %v9906_v12, %v9910_v28  ;;  %v2788_v23 = vcombine.high %v1604_v10, %v1604_v10  ;;  %v19007_v28 = vpop.f32.mrb[74].mxu0 }
 0x269   : > { %v8383_v51 = vsel %vm8201_vm9, %v8382_v59, %v8381_v54  ;;  %v8653_v30 = vpack.c.b16 %v8377_v24, %v8377_v24  ;;  %v9921_v20 = vsel %vm18453_vm2, %v9916_v25, %v9920_v46  ;;  %v2795_v50 = vrot.slane %v1604_v10, %v17791_v15  ;;  %v19012_v5 = vpop.f32.mrb[75].mxu0 }
 0x26a   : > { %v8385_v53 = vsel %vm8204_vm10, %v8384_v16, %v8383_v51  ;;  %v15885_v18 = vcombine.low %v9911_v13, %v9921_v20  ;;  %v2802_v42 = vrot.slane %v2788_v23, %v17791_v15  ;;  %v10298_v8 = vsel %vm18372_vm4, %v15853_v40, %v10297_v61  ;;  %v19022_v46 = vpop.f32.mrb[76].mxu0 }
 0x26b   : > { %v8387_v63 = vsel %vm8207_vm11, %v8386_v34, %v8385_v53  ;;  %v8777_v59 = vsel %vm17999_vm0, %v8653_v30, %v8776_v31  ;;  %v2803_v58 = vcombine.high %v2795_v50, %v2795_v50  ;;  %v15234_v1 = vrot.slane %v2795_v50, 9 }
 0x26c   : > { %v8389_v33 = vsel %vm8210_vm12, %v8388_v3, %v8387_v63  ;;  %8778 = vst [vmem:[#allocation2 + $0x54] sm:$0xf] %v8777_v59  ;;  %10504 = vrot.lane.b32.xlu1 %v15885_v18, %s17539_s23  ;;  %v2804_v16 = vcombine.high %v2802_v42, %v2802_v42  ;;  %v15236_v43 = vrot.slane %v2802_v42, 9  ;;  %v10299_v48 = vrot.slane %v10297_v61, 4 }
 0x26d   : > { %v8391_v11 = vsel %vm22432_vm15, %v8390_v6, %v8389_v33  ;;  %v15235_v34 = vrot.slane %v2803_v58, 9  ;;  %v19019_v36 = vmax.f32 %v2795_v50, %v15234_v1  ;;  %v10300_v29 = vrot.slane %v18966_v26, 5 }
 0x26e   : > { %v8654_v4 = vpack.c.b16 %v8391_v11, %v8391_v11  ;;  %v15237_v52 = vrot.slane %v2804_v16, 9  ;;  %v19024_v3 = vmax.f32 %v2802_v42, %v15236_v43  ;;  %v1260_v32 = vadd.f32 %v18979_v56, %v18633_v49 }
 0x26f   : > { %v19028_v55 = vmax.f32 %v2803_v58, %v15235_v34  ;;  %v10301_v38 = vsel %vm18372_vm4, %v10299_v48, %v10300_v29  ;;  %v1271_v6 = vadd.f32 %v18979_v56, %v18650_v27  ;;  %v1263_v26 = vadd.f32 %v18979_v56, %v18653_v0 }
 0x270   : > { %8779 = vst.msk [vmem:[#allocation2 + $0x58] sm:$0xf] %vm6794_vm14, %v8654_v4  ;;  %v19037_v21 = vmax.f32 %v2804_v16, %v15237_v52  ;;  %v15901_v12 = vcombine.low %v10298_v8, %v10301_v38  ;;  %v1602_v10 = vmax.f32 %v1260_v32, 0.0  ;;  %v1284_v49 = vadd.f32 %v18979_v56, %v18667_v57  ;;  %v19062_v32 = vpop.f32.mrb[77].mxu0 }
 0x271   : > { %v1605_v40 = vmax.f32 %v1271_v6, 0.0  ;;  %v1603_v37 = vmax.f32 %v1263_v26, 0.0  ;;  %v1276_v62 = vadd.f32 %v18979_v56, %v18725_v14  ;;  %v1287_v27 = vadd.f32 %v18979_v56, %v18742_v22 }
 0x272   : > { %10584 = vrot.lane.b32.xlu1 %v15901_v12, %s17538_s22  ;;  %v2754_v0 = vcombine.high %v1602_v10, %v1602_v10  ;;  %v2761_v25 = vrot.slane %v1602_v10, %v17791_v15  ;;  %v1608_v61 = vmax.f32 %v1284_v49, 0.0  ;;  %v6887_v24 = vsel %vm17723_vm5, 0, %v6886_v60 }
 0x273   : > { %v2805_v54 = vcombine.high %v1605_v40, %v1605_v40  ;;  %v2812_v57 = vrot.slane %v1605_v40, %v17791_v15  ;;  %v2771_v31 = vcombine.high %v1603_v37, %v1603_v37  ;;  %v2778_v13 = vrot.slane %v1603_v37, %v17791_v15  ;;  %6888 = vst [vmem:[#allocation2 + $0x68] sm:$0x1] %v6887_v24 }
 0x274   : > { %v2768_v14 = vrot.slane %v2754_v0, %v17791_v15  ;;  %v2769_v23 = vcombine.high %v2761_v25, %v2761_v25  ;;  %v15226_v22 = vrot.slane %v2761_v25, 9  ;;  %v2856_v51 = vcombine.high %v1608_v61, %v1608_v61 }
 0x275   : > { %v2819_v30 = vrot.slane %v2805_v54, %v17791_v15  ;;  %v2820_v20 = vcombine.high %v2812_v57, %v2812_v57  ;;  %v15238_v50 = vrot.slane %v2812_v57, 9  ;;  %v2785_v53 = vrot.slane %v2771_v31, %v17791_v15 }
 0x276   : > { %v2770_v18 = vcombine.high %v2768_v14, %v2768_v14  ;;  %v15227_v42 = vrot.slane %v2769_v23, 9  ;;  %v15228_v8 = vrot.slane %v2768_v14, 9  ;;  %v19054_v63 = vmax.f32 %v2761_v25, %v15226_v22 }
 0x277   : > { %v2821_v59 = vcombine.high %v2819_v30, %v2819_v30  ;;  %v15239_v58 = vrot.slane %v2820_v20, 9  ;;  %v15240_v1 = vrot.slane %v2819_v30, 9  ;;  %v19056_v33 = vmax.f32 %v2812_v57, %v15238_v50 }
 0x278   : > { %v15229_v16 = vrot.slane %v2770_v18, 9  ;;  %v6251_v43 = vmax.f32 %v2769_v23, %v15227_v42  ;;  %v6252_v48 = vmax.f32 %v2768_v14, %v15228_v8  ;;  %v2786_v11 = vcombine.high %v2778_v13, %v2778_v13 }
 0x279   : > { %v15241_v34 = vrot.slane %v2821_v59, 9  ;;  %v19058_v29 = vmax.f32 %v2820_v20, %v15239_v58  ;;  %v19060_v4 = vmax.f32 %v2819_v30, %v15240_v1  ;;  %v2787_v52 = vcombine.high %v2785_v53, %v2785_v53 }
 0x27a   : > { %v6253_v38 = vmax.f32 %v2770_v18, %v15229_v16  ;;  %v15230_v6 = vrot.slane %v2778_v13, 9  ;;  %v15231_v26 = vrot.slane %v2786_v11, 9  ;;  %v15232_v60 = vrot.slane %v2785_v53, 9  ;;  %v19079_v18 = vpop.f32.mrb[78].mxu0 }
 0x27b   : > { %v19064_v12 = vmax.f32 %v2821_v59, %v15241_v34  ;;  %v15233_v10 = vrot.slane %v2787_v52, 9  ;;  %v2863_v49 = vrot.slane %v1608_v61, %v17791_v15  ;;  %v2870_v40 = vrot.slane %v2856_v51, %v17791_v15 }
 0x27c   : > { %v19068_v37 = vmax.f32 %v2778_v13, %v15230_v6  ;;  %v19070_v0 = vmax.f32 %v2786_v11, %v15231_v26  ;;  %v19072_v25 = vmax.f32 %v2785_v53, %v15232_v60  ;;  %v1606_v24 = vmax.f32 %v1276_v62, 0.0  ;;  %v19084_v6 = vpop.f32.mrb[79].mxu0 }
 0x27d   : > { %v19074_v54 = vmax.f32 %v2787_v52, %v15233_v10  ;;  %v2871_v57 = vcombine.high %v2863_v49, %v2863_v49  ;;  %v2872_v31 = vcombine.high %v2870_v40, %v2870_v40  ;;  %v15250_v14 = vrot.slane %v2863_v49, 9 }
 0x27e   : > { %v15252_v23 = vrot.slane %v2870_v40, 9  ;;  %v2822_v22 = vcombine.high %v1606_v24, %v1606_v24  ;;  %v2829_v30 = vrot.slane %v1606_v24, %v17791_v15  ;;  %v1609_v20 = vmax.f32 %v1287_v27, 0.0 }
 0x27f   : > { %v15251_v61 = vrot.slane %v2871_v57, 9  ;;  %v15253_v50 = vrot.slane %v2872_v31, 9  ;;  %v6274_v51 = vmax.f32 %v2863_v49, %v15250_v14  ;;  %v1279_v13 = vadd.f32 %v18979_v56, %v18752_v47 }
 0x280   : > { %v6276_v53 = vmax.f32 %v2870_v40, %v15252_v23  ;;  %v2836_v62 = vrot.slane %v2822_v22, %v17791_v15  ;;  %v2837_v42 = vcombine.high %v2829_v30, %v2829_v30  ;;  %v15242_v8 = vrot.slane %v2829_v30, 9 }
 0x281   : > { %v6275_v59 = vmax.f32 %v2871_v57, %v15251_v61  ;;  %v6277_v58 = vmax.f32 %v2872_v31, %v15253_v50  ;;  %v6658_v1 = vmax.f32 %v19019_v36, %v6274_v51  ;;  %v2873_v16 = vcombine.high %v1609_v20, %v1609_v20 }
 0x282   : > { %v6660_v27 = vmax.f32 %v19024_v3, %v6276_v53  ;;  %v2838_v11 = vcombine.high %v2836_v62, %v2836_v62  ;;  %v15243_v34 = vrot.slane %v2837_v42, 9  ;;  %v15244_v52 = vrot.slane %v2836_v62, 9 }
 0x283   : > { %v6659_v47 = vmax.f32 %v19028_v55, %v6275_v59  ;;  %v6661_v26 = vmax.f32 %v19037_v21, %v6277_v58  ;;  %v16353_v60 = vpack.c.bf16 %v6658_v1, %v6658_v1  ;;  %v6266_v10 = vmax.f32 %v2829_v30, %v15242_v8 }
 0x284   : > { %v16355_v49 = vpack.c.bf16 %v6660_v27, %v6660_v27  ;;  %v15245_v40 = vrot.slane %v2838_v11, 9  ;;  %v6267_v24 = vmax.f32 %v2837_v42, %v15243_v34  ;;  %v6268_v57 = vmax.f32 %v2836_v62, %v15244_v52 }
 0x285   : > { %v16354_v31 = vpack.c.bf16 %v6659_v47, %v6659_v47  ;;  %v16356_v36 = vpack.c.bf16 %v6661_v26, %v6661_v26  ;;  %v19088_v14 = vunpack.c.l.b16 %v16353_v60  ;;  %v6650_v3 = vmax.f32 %v19054_v63, %v6266_v10 }
 0x286   : > { %v19091_v23 = vunpack.c.l.b16 %v16355_v49  ;;  %v6269_v22 = vmax.f32 %v2838_v11, %v15245_v40  ;;  %v6651_v61 = vmax.f32 %v6251_v43, %v6267_v24  ;;  %v6652_v50 = vmax.f32 %v6252_v48, %v6268_v57 }
 0x287   : > { %v19093_v55 = vunpack.c.l.b16 %v16354_v31  ;;  %v19095_v21 = vunpack.c.l.b16 %v16356_v36  ;;  %v8405_v30 = vrot.slane %v19088_v14, 7  ;;  %v16345_v51 = vpack.c.bf16 %v6650_v3, %v6650_v3 }
 0x288   : > { %v8409_v53 = vrot.slane %v19091_v23, 5  ;;  %v6653_v62 = vmax.f32 %v6253_v38, %v6269_v22  ;;  %v16346_v42 = vpack.c.bf16 %v6651_v61, %v6651_v61  ;;  %v16347_v8 = vpack.c.bf16 %v6652_v50, %v6652_v50  ;;  %v6830_v61 = vld [vmem:[#allocation2 + $0x60] sm:$0x1] }
 0x289   : > { %v8407_v59 = vrot.slane %v19093_v55, 6  ;;  %v8411_v63 = vrot.slane %v19095_v21, 4  ;;  %v8052_v58 = vunpack.c.l.b16 %v16345_v51  ;;  %v2880_v43 = vrot.slane %v1609_v20, %v17791_v15 }
 0x28a   : > { %v16348_v48 = vpack.c.bf16 %v6653_v62, %v6653_v62  ;;  %v8053_v1 = vunpack.c.l.b16 %v16346_v42  ;;  %v8054_v27 = vunpack.c.l.b16 %v16347_v8  ;;  %v2887_v11 = vrot.slane %v2873_v16, %v17791_v15 }
 0x28b   : > { %v8392_v34 = vrot.slane %v8052_v58, 7  ;;  %v2888_v52 = vcombine.high %v2880_v43, %v2880_v43  ;;  %v15254_v47 = vrot.slane %v2880_v43, 9  ;;  %v1607_v26 = vmax.f32 %v1279_v13, 0.0 }
 0x28c   : > { %v8055_v60 = vunpack.c.l.b16 %v16348_v48  ;;  %v8393_v38 = vrot.slane %v8053_v1, 6  ;;  %v8395_v10 = vrot.slane %v8054_v27, 5  ;;  %v2889_v49 = vcombine.high %v2887_v11, %v2887_v11 }
 0x28d   : > { %v15255_v40 = vrot.slane %v2888_v52, 9  ;;  %v15256_v24 = vrot.slane %v2887_v11, 9  ;;  %v6278_v57 = vmax.f32 %v2880_v43, %v15254_v47  ;;  %v2839_v31 = vcombine.high %v1607_v26, %v1607_v26 }
 0x28e   : > { %v8394_v36 = vsel %vm8198_vm8, %v8393_v38, %v8392_v34  ;;  %v8397_v20 = vrot.slane %v8055_v60, 4  ;;  %v15257_v3 = vrot.slane %v2889_v49, 9  ;;  %v2846_v22 = vrot.slane %v1607_v26, %v17791_v15  ;;  %v8787_v38 = vld [vmem:[#allocation2 + $0x68] sm:$0x1] }
 0x28f   : > { %v8396_v16 = vsel %vm8201_vm9, %v8395_v10, %v8394_v36  ;;  %v6279_v50 = vmax.f32 %v2888_v52, %v15255_v40  ;;  %v6280_v51 = vmax.f32 %v2887_v11, %v15256_v24  ;;  %v6662_v13 = vmax.f32 %v19056_v33, %v6278_v57  ;;  %v9786_v36 = vld [vmem:[#allocation2 + $0x3c] sm:$0xf] }
 0x290   : > { %v6281_v62 = vmax.f32 %v2889_v49, %v15257_v3  ;;  %v2853_v42 = vrot.slane %v2839_v31, %v17791_v15  ;;  %v2854_v8 = vcombine.high %v2846_v22, %v2846_v22  ;;  %v15246_v58 = vrot.slane %v2846_v22, 9 }
 0x291   : > { %v6663_v43 = vmax.f32 %v19058_v29, %v6279_v50  ;;  %v6664_v48 = vmax.f32 %v19060_v4, %v6280_v51  ;;  %v16357_v1 = vpack.c.bf16 %v6662_v13, %v6662_v13  ;;  %v6831_v27 = vsel %vm17735_vm7, 0, %v6830_v61  ;;  %v9787_v51 = vld [vmem:[#allocation2 + $0x40] sm:$0xf] }
 0x292   : > { %v6665_v34 = vmax.f32 %v19064_v12, %v6281_v62  ;;  %v2855_v47 = vcombine.high %v2853_v42, %v2853_v42  ;;  %v15247_v52 = vrot.slane %v2854_v8, 9  ;;  %v15248_v11 = vrot.slane %v2853_v42, 9  ;;  %6832 = vst [vmem:[#allocation2 + $0x60] sm:$0x1] %v6831_v27 }
 0x293   : > { %v16358_v33 = vpack.c.bf16 %v6663_v43, %v6663_v43  ;;  %v16359_v26 = vpack.c.bf16 %v6664_v48, %v6664_v48  ;;  %v19113_v60 = vunpack.c.l.b16 %v16357_v1  ;;  %v6270_v10 = vmax.f32 %v2846_v22, %v15246_v58  ;;  %v19128_v58 = vpop.f32.mrb[80].mxu0 }
 0x294   : > { %v16496_v49 = vpack.c.bf16 %v6665_v34, %v6665_v34  ;;  %v15249_v29 = vrot.slane %v2855_v47, 9  ;;  %v6271_v40 = vmax.f32 %v2854_v8, %v15247_v52  ;;  %v6272_v4 = vmax.f32 %v2853_v42, %v15248_v11 }
 0x295   : > { %v19115_v24 = vunpack.c.l.b16 %v16358_v33  ;;  %v19117_v57 = vunpack.c.l.b16 %v16359_v26  ;;  %v8413_v12 = vrot.slane %v19113_v60, 3  ;;  %v6654_v31 = vmax.f32 %v19068_v37, %v6270_v10  ;;  %v19131_v60 = vpop.f32.mrb[81].mxu0 }
 0x296   : > { %v8788_v3 = vsel %vm17735_vm7, %v16496_v49, %v8787_v38  ;;  %v6273_v61 = vmax.f32 %v2855_v47, %v15249_v29  ;;  %v6655_v50 = vmax.f32 %v19070_v0, %v6271_v40  ;;  %v6656_v22 = vmax.f32 %v19072_v25, %v6272_v4  ;;  %v9814_v0 = vld [vmem:[#allocation2 + $0x44] sm:$0x1]  ;;  %v10214_v49 = vld [vmem:[#allocation2 + $0x3c] sm:$0xe] }
 0x297   : > { %v8415_v13 = vrot.slane %v19115_v24, 2  ;;  %v8417_v62 = vrot.slane %v19117_v57, 1  ;;  %8789 = vst [vmem:[#allocation2 + $0x68] sm:$0x1] %v8788_v3  ;;  %v16349_v42 = vpack.c.bf16 %v6654_v31, %v6654_v31  ;;  %v8398_v8 = vsel %vm8204_vm10, %v8397_v20, %v8396_v16 }
 0x298   : > { %v6657_v37 = vmax.f32 %v19074_v54, %v6273_v61  ;;  %v16350_v43 = vpack.c.bf16 %v6655_v50, %v6655_v50  ;;  %v16351_v48 = vpack.c.bf16 %v6656_v22, %v6656_v22  ;;  %v9923_v1 = vshrl.u32 %v9786_v36, 16 }
 0x299   : > { %v8056_v27 = vunpack.c.l.b16 %v16349_v42  ;;  %v9926_v34 = vshll.u32 %v9786_v36, 16  ;;  %v9932_v25 = vshll.u32 %v9787_v51, 16  ;;  %v9936_v47 = vshrl.u32 %v9787_v51, 16 }
 0x29a   : > { %v16352_v52 = vpack.c.bf16 %v6657_v37, %v6657_v37  ;;  %v8057_v11 = vunpack.c.l.b16 %v16350_v43  ;;  %v8058_v33 = vunpack.c.l.b16 %v16351_v48  ;;  %v9925_v26 = vrot.slane %v9923_v1, 4 }
 0x29b   : > { %v8399_v38 = vrot.slane %v8056_v27, 3  ;;  %v9928_v20 = vrot.slane %v9926_v34, 5  ;;  %v9934_v16 = vrot.slane %v9932_v25, 5  ;;  %v9938_v10 = vrot.slane %v9936_v47, 4  ;;  %v19147_v34 = vpop.f32.mrb[82].mxu0 }
 0x29c   : > { %v8059_v54 = vunpack.c.l.b16 %v16352_v52  ;;  %v8401_v29 = vrot.slane %v8057_v11, 2  ;;  %v8403_v40 = vrot.slane %v8058_v33, 1  ;;  %v9942_v4 = vshll.u32 %v9814_v0, 16  ;;  %22476 = vst [vmem:[#allocation11_spill] sm:$0xff] %v19147_v34  ;;  %v19156_v47 = vpop.f32.mrb[83].mxu0 }
 0x29d   : > { %v8400_v24 = vsel %vm8207_vm11, %v8399_v38, %v8398_v8  ;;  %v9929_v57 = vor.u32 %v9928_v20, %v9925_v26  ;;  %v9939_v31 = vor.u32 %v9938_v10, %v9934_v16  ;;  %v1300_v36 = vadd.f32 %v18979_v56, %v18800_v7  ;;  %v8783_v8 = vld [vmem:[#allocation2 + $0x60] sm:$0xf]  ;;  %22477 = vst [vmem:[#allocation12_spill] sm:$0xff] %v19156_v47 }
 0x29e   : > { %v8402_v3 = vsel %vm8210_vm12, %v8401_v29, %v8400_v24  ;;  %v8406_v61 = vsel %vm8216_vm13, %v8405_v30, %v8059_v54  ;;  %v9944_v50 = vrot.slane %v9942_v4, 5  ;;  %v15854_v22 = vrot.slane %v10214_v49, 9  ;;  %v19174_v49 = vpop.f32.mrb[84].mxu0 }
 0x29f   : > { %v8404_v42 = vsel %vm22432_vm15, %v8403_v40, %v8402_v3  ;;  %v8408_v37 = vsel %vm8198_vm8, %v8407_v59, %v8406_v61  ;;  %v9930_v43 = vrot.slane %v9929_v57, 4  ;;  %v9940_v48 = vrot.slane %v9939_v31, 4  ;;  %22478 = vst [vmem:[#allocation13_spill] sm:$0xff] %v19174_v49  ;;  %v22479_v57 = vld [vmem:[#allocation7_spill] sm:$0xff] }
 0x2a0   : > { %v8410_v7 = vsel %vm8201_vm9, %v8409_v53, %v8408_v37  ;;  %v8656_v1 = vpack.c.b16 %v8404_v42, %v8404_v42  ;;  %v1612_v27 = vmax.f32 %v1300_v36, 0.0  ;;  %v10304_v14 = vrot.slane %v9787_v51, 5 }
 0x2a1   : > { %v8412_v30 = vsel %vm8204_vm10, %v8411_v63, %v8410_v7  ;;  %v9935_v55 = vsel %vm18453_vm2, %v9930_v43, %v9934_v16  ;;  %v9945_v59 = vsel %vm18453_vm2, %v9940_v48, %v9944_v50  ;;  %v10307_v25 = vrot.slane %v9814_v0, 5 }
 0x2a2   : > { %v8414_v23 = vsel %vm8207_vm11, %v8413_v12, %v8412_v30  ;;  %v8784_v53 = vsel %vm17999_vm0, %v8656_v1, %v8783_v8  ;;  %v15886_v51 = vcombine.low %v9935_v55, %v9945_v59  ;;  %v2924_v52 = vcombine.high %v1612_v27, %v1612_v27 }
 0x2a3   : > { %v8416_v21 = vsel %vm8210_vm12, %v8415_v13, %v8414_v23  ;;  %8785 = vst [vmem:[#allocation2 + $0x60] sm:$0xf] %v8784_v53  ;;  %v2931_v63 = vrot.slane %v1612_v27, %v17791_v15  ;;  %v10305_v11 = vsel %vm18372_vm4, %v15854_v22, %v10304_v14  ;;  %v10306_v33 = vrot.slane %v10304_v14, 4 }
 0x2a4   : > { %v8418_v0 = vsel %vm22432_vm15, %v8417_v62, %v8416_v21  ;;  %10506 = vrot.lane.b32.xlu0 %v15886_v51, %s17539_s23  ;;  %v2938_v12 = vrot.slane %v2924_v52, %v17791_v15  ;;  %v1292_v26 = vadd.f32 %v18979_v56, %v18803_v41  ;;  %v1303_v38 = vadd.f32 %v18979_v56, %v18819_v9 }
 0x2a5   : > { %v8657_v13 = vpack.c.b16 %v8418_v0, %v8418_v0  ;;  %v2939_v20 = vcombine.high %v2931_v63, %v2931_v63  ;;  %v15266_v16 = vrot.slane %v2931_v63, 9  ;;  %v10308_v10 = vsel %vm18372_vm4, %v10306_v33, %v10307_v25 }
 0x2a6   : > { %v2940_v54 = vcombine.high %v2938_v12, %v2938_v12  ;;  %v15268_v62 = vrot.slane %v2938_v12, 9  ;;  %v15902_v29 = vcombine.low %v10305_v11, %v10308_v10  ;;  %v1610_v40 = vmax.f32 %v1292_v26, 0.0 }
 0x2a7   : > { %8786 = vst.msk [vmem:[#allocation2 + $0x64] sm:$0xf] %vm6794_vm14, %v8657_v13  ;;  %v15267_v4 = vrot.slane %v2939_v20, 9  ;;  %v19177_v24 = vmax.f32 %v2931_v63, %v15266_v16  ;;  %v1613_v41 = vmax.f32 %v1303_v38, 0.0  ;;  %v1295_v9 = vadd.f32 %v18979_v56, %v22479_v57  ;;  %v22481_v57 = vld [vmem:[#allocation9_spill] sm:$0xff] }
 0x2a8   : > { %v15269_v31 = vrot.slane %v2940_v54, 9  ;;  %v19181_v36 = vmax.f32 %v2938_v12, %v15268_v62  ;;  %10586 = vrot.lane.b32.xlu0 %v15902_v29, %s17538_s22  ;;  %v2890_v3 = vcombine.high %v1610_v40, %v1610_v40  ;;  %v2897_v61 = vrot.slane %v1610_v40, %v17791_v15  ;;  %v6889_v29 = vld [vmem:[#allocation2 + $0x74] sm:$0x1] }
 0x2a9   : > { %v19185_v50 = vmax.f32 %v2939_v20, %v15267_v4  ;;  %v2941_v22 = vcombine.high %v1613_v41, %v1613_v41  ;;  %v2948_v42 = vrot.slane %v1613_v41, %v17791_v15  ;;  %v1611_v37 = vmax.f32 %v1295_v9, 0.0 }
 0x2aa   : > { %v19188_v8 = vmax.f32 %v2940_v54, %v15269_v31  ;;  %v2904_v43 = vrot.slane %v2890_v3, %v17791_v15  ;;  %v2905_v48 = vcombine.high %v2897_v61, %v2897_v61  ;;  %v15258_v7 = vrot.slane %v2897_v61, 9  ;;  %v22480_v54 = vld [vmem:[#allocation8_spill] sm:$0xff] }
 0x2ab   : > { %v2955_v1 = vrot.slane %v2941_v22, %v17791_v15  ;;  %v2956_v27 = vcombine.high %v2948_v42, %v2948_v42  ;;  %v15270_v14 = vrot.slane %v2948_v42, 9  ;;  %v2907_v30 = vcombine.high %v1611_v37, %v1611_v37  ;;  %v22482_v22 = vld [vmem:[#allocation6_spill] sm:$0xff] }
 0x2ac   : > { %v2906_v55 = vcombine.high %v2904_v43, %v2904_v43  ;;  %v15259_v59 = vrot.slane %v2905_v48, 9  ;;  %v15260_v25 = vrot.slane %v2904_v43, 9  ;;  %v19192_v23 = vmax.f32 %v2897_v61, %v15258_v7 }
 0x2ad   : > { %v2957_v53 = vcombine.high %v2955_v1, %v2955_v1  ;;  %v15271_v51 = vrot.slane %v2956_v27, 9  ;;  %v15272_v52 = vrot.slane %v2955_v1, 9  ;;  %v19194_v21 = vmax.f32 %v2948_v42, %v15270_v14 }
 0x2ae   : > { %v15261_v63 = vrot.slane %v2906_v55, 9  ;;  %v19196_v11 = vmax.f32 %v2905_v48, %v15259_v59  ;;  %v19198_v33 = vmax.f32 %v2904_v43, %v15260_v25  ;;  %v2914_v0 = vrot.slane %v1611_v37, %v17791_v15  ;;  %v17312_v37 = vld [vmem:[%s22424_s3 + $0x30] sm:$0xff]   ;;  %v19230_v59 = vpop.f32.mrb[85].mxu0 }
 0x2af   : > { %v15273_v12 = vrot.slane %v2957_v53, 9  ;;  %v19201_v26 = vmax.f32 %v2956_v27, %v15271_v51  ;;  %v19203_v38 = vmax.f32 %v2955_v1, %v15272_v52  ;;  %v2921_v13 = vrot.slane %v2907_v30, %v17791_v15  ;;  %22483 = vst [vmem:[#allocation7_spill] sm:$0xff] %v19230_v59  ;;  %16864 = vmatprep.subr.bf16.mxu1 %v17312_v37  ;;  %v22484_v52 = vld [vmem:[#allocation10_spill] sm:$0xff] }
 0x2b0   : > { %v19206_v20 = vmax.f32 %v2906_v55, %v15261_v63  ;;  %v2922_v16 = vcombine.high %v2914_v0, %v2914_v0  ;;  %v15262_v10 = vrot.slane %v2914_v0, 9  ;;  %v1316_v62 = vadd.f32 %v18979_v56, %v22480_v54  ;;  %16865 = vmatpush3.bf16.msra.mxu1 %v17312_v37 }
 0x2b1   : > { %v19210_v40 = vmax.f32 %v2957_v53, %v15273_v12  ;;  %v2923_v4 = vcombine.high %v2921_v13, %v2921_v13  ;;  %v15264_v41 = vrot.slane %v2921_v13, 9  ;;  %v1308_v9 = vadd.f32 %v18979_v56, %v22481_v57 }
 0x2b2   : > { %v15263_v31 = vrot.slane %v2922_v16, 9  ;;  %v19214_v3 = vmax.f32 %v2914_v0, %v15262_v10  ;;  %v1616_v61 = vmax.f32 %v1316_v62, 0.0  ;;  %v1319_v42 = vadd.f32 %v18979_v56, %v22482_v22  ;;  %v19239_v0 = vpop.f32.mrb[86].mxu0 }
 0x2b3   : > { %v15265_v43 = vrot.slane %v2923_v4, 9  ;;  %v19221_v48 = vmax.f32 %v2921_v13, %v15264_v41  ;;  %v1614_v7 = vmax.f32 %v1308_v9, 0.0  ;;  %v6890_v1 = vsel %vm17723_vm5, 0, %v6889_v29  ;;  %22485 = vst [vmem:[#allocation8_spill] sm:$0xff] %v19239_v0  ;;  %v19244_v54 = vpop.f32.mrb[87].mxu0 }
 0x2b4   : > { %v19225_v27 = vmax.f32 %v2922_v16, %v15263_v31  ;;  %v2992_v14 = vcombine.high %v1616_v61, %v1616_v61  ;;  %v2999_v30 = vrot.slane %v1616_v61, %v17791_v15  ;;  %v19228_v55 = vmax.f32 %v1319_v42, 0.0  ;;  %6891 = vst [vmem:[#allocation2 + $0x74] sm:$0x1] %v6890_v1  ;;  %22486 = vst [vmem:[#allocation9_spill] sm:$0xff] %v19244_v54 }
 0x2b5   : > { %v19232_v25 = vmax.f32 %v2923_v4, %v15265_v43  ;;  %v2958_v53 = vcombine.high %v1614_v7, %v1614_v7  ;;  %v2965_v51 = vrot.slane %v1614_v7, %v17791_v15  ;;  %v19237_v63 = vadd.f32 %v18979_v56, %v22484_v52 }
 0x2b6   : > { %v3006_v12 = vrot.slane %v2992_v14, %v17791_v15  ;;  %v3007_v13 = vcombine.high %v2999_v30, %v2999_v30  ;;  %v15282_v16 = vrot.slane %v2999_v30, 9  ;;  %v3009_v10 = vcombine.high %v19228_v55, %v19228_v55 }
 0x2b7   : > { %v2972_v62 = vrot.slane %v2958_v53, %v17791_v15  ;;  %v2973_v29 = vcombine.high %v2965_v51, %v2965_v51  ;;  %v15274_v4 = vrot.slane %v2965_v51, 9  ;;  %v3016_v41 = vrot.slane %v19228_v55, %v17791_v15 }
 0x2b8   : > { %v3008_v57 = vcombine.high %v3006_v12, %v3006_v12  ;;  %v15283_v9 = vrot.slane %v3007_v13, 9  ;;  %v15284_v31 = vrot.slane %v3006_v12, 9  ;;  %v6306_v61 = vmax.f32 %v2999_v30, %v15282_v16 }
 0x2b9   : > { %v2974_v22 = vcombine.high %v2972_v62, %v2972_v62  ;;  %v15275_v42 = vrot.slane %v2973_v29, 9  ;;  %v15276_v37 = vrot.slane %v2972_v62, 9  ;;  %v6298_v43 = vmax.f32 %v2965_v51, %v15274_v4 }
 0x2ba   : > { %v15285_v7 = vrot.slane %v3008_v57, 9  ;;  %v6307_v1 = vmax.f32 %v3007_v13, %v15283_v9  ;;  %v6308_v14 = vmax.f32 %v3006_v12, %v15284_v31  ;;  %v6674_v52 = vmax.f32 %v19177_v24, %v6306_v61 }
 0x2bb   : > { %v15277_v54 = vrot.slane %v2974_v22, 9  ;;  %v6299_v53 = vmax.f32 %v2973_v29, %v15275_v42  ;;  %v6300_v0 = vmax.f32 %v2972_v62, %v15276_v37  ;;  %v6666_v59 = vmax.f32 %v19192_v23, %v6298_v43 }
 0x2bc   : > { %v6309_v49 = vmax.f32 %v3008_v57, %v15285_v7  ;;  %v6675_v55 = vmax.f32 %v19185_v50, %v6307_v1  ;;  %v6676_v47 = vmax.f32 %v19181_v36, %v6308_v14  ;;  %v16369_v30 = vpack.c.bf16 %v6674_v52, %v6674_v52  ;;  %v6833_v14 = vld [vmem:[#allocation2 + $0x6c] sm:$0x1] }
 0x2bd   : > { %v6301_v16 = vmax.f32 %v2974_v22, %v15277_v54  ;;  %v6667_v34 = vmax.f32 %v19196_v11, %v6299_v53  ;;  %v6668_v51 = vmax.f32 %v19198_v33, %v6300_v0  ;;  %v16361_v13 = vpack.c.bf16 %v6666_v59, %v6666_v59 }
 0x2be   : > { %v6677_v12 = vmax.f32 %v19188_v8, %v6309_v49  ;;  %v16370_v24 = vpack.c.bf16 %v6675_v55, %v6675_v55  ;;  %v16371_v4 = vpack.c.bf16 %v6676_v47, %v6676_v47  ;;  %v19256_v29 = vunpack.c.l.b16 %v16369_v30 }
 0x2bf   : > { %v6669_v23 = vmax.f32 %v19206_v20, %v6301_v16  ;;  %v16362_v62 = vpack.c.bf16 %v6667_v34, %v6667_v34  ;;  %v16363_v57 = vpack.c.bf16 %v6668_v51, %v6668_v51  ;;  %v8068_v50 = vunpack.c.l.b16 %v16361_v13 }
 0x2c0   : > { %v16372_v9 = vpack.c.bf16 %v6677_v12, %v6677_v12  ;;  %v19259_v36 = vunpack.c.l.b16 %v16370_v24  ;;  %v19261_v54 = vunpack.c.l.b16 %v16371_v4  ;;  %v8432_v11 = vrot.slane %v19256_v29, 7  ;;  %v17314_v29 = vld [vmem:[%s22424_s3 + $0x40] sm:$0xff]  }
 0x2c1   : > { %v16364_v33 = vpack.c.bf16 %v6669_v23, %v6669_v23  ;;  %v8069_v59 = vunpack.c.l.b16 %v16362_v62  ;;  %v8070_v0 = vunpack.c.l.b16 %v16363_v57  ;;  %v8419_v49 = vrot.slane %v8068_v50, 7  ;;  %v9788_v62 = vld [vmem:[#allocation2 + $0x48] sm:$0xf] }
 0x2c2   : > { %v19264_v8 = vunpack.c.l.b16 %v16372_v9  ;;  %v8434_v47 = vrot.slane %v19259_v36, 6  ;;  %v8436_v20 = vrot.slane %v19261_v54, 5  ;;  %v3023_v34 = vrot.slane %v3009_v10, %v17791_v15 }
 0x2c3   : > { %v8071_v31 = vunpack.c.l.b16 %v16364_v33  ;;  %v8420_v61 = vrot.slane %v8069_v59, 6  ;;  %v8422_v22 = vrot.slane %v8070_v0, 5  ;;  %v3024_v42 = vcombine.high %v3016_v41, %v3016_v41 }
 0x2c4   : > { %v8438_v37 = vrot.slane %v19264_v8, 4  ;;  %v3025_v43 = vcombine.high %v3023_v34, %v3023_v34  ;;  %v15286_v7 = vrot.slane %v3016_v41, 9  ;;  %v15288_v1 = vrot.slane %v3023_v34, 9 }
 0x2c5   : > { %v8421_v52 = vsel %vm8198_vm8, %v8420_v61, %v8419_v49  ;;  %v8424_v53 = vrot.slane %v8071_v31, 4  ;;  %v15287_v55 = vrot.slane %v3024_v42, 9  ;;  %v1615_v30 = vmax.f32 %v19237_v63, 0.0 }
 0x2c6   : > { %v8423_v16 = vsel %vm8201_vm9, %v8422_v22, %v8421_v52  ;;  %v15289_v51 = vrot.slane %v3025_v43, 9  ;;  %v6310_v10 = vmax.f32 %v3016_v41, %v15286_v7  ;;  %v6312_v13 = vmax.f32 %v3023_v34, %v15288_v1 }
 0x2c7   : > { %v6311_v12 = vmax.f32 %v3024_v42, %v15287_v55  ;;  %v2975_v24 = vcombine.high %v1615_v30, %v1615_v30  ;;  %v2982_v4 = vrot.slane %v1615_v30, %v17791_v15  ;;  %v6834_v23 = vsel %vm17735_vm7, 0, %v6833_v14  ;;  %v8794_v42 = vld [vmem:[#allocation2 + $0x74] sm:$0x1] }
 0x2c8   : > { %v6313_v57 = vmax.f32 %v3025_v43, %v15289_v51  ;;  %v6678_v50 = vmax.f32 %v19194_v21, %v6310_v10  ;;  %v6680_v9 = vmax.f32 %v19203_v38, %v6312_v13  ;;  %6835 = vst [vmem:[#allocation2 + $0x6c] sm:$0x1] %v6834_v23  ;;  %v19279_v63 = vsel %vm8204_vm10, %v8424_v53, %v8423_v16 }
 0x2c9   : > { %v6679_v41 = vmax.f32 %v19201_v26, %v6311_v12  ;;  %v2989_v33 = vrot.slane %v2975_v24, %v17791_v15  ;;  %v2990_v59 = vcombine.high %v2982_v4, %v2982_v4  ;;  %v15278_v0 = vrot.slane %v2982_v4, 9 }
 0x2ca   : > { %v6681_v49 = vmax.f32 %v19210_v40, %v6313_v57  ;;  %v16373_v34 = vpack.c.bf16 %v6678_v50, %v6678_v50  ;;  %v16375_v31 = vpack.c.bf16 %v6680_v9, %v6680_v9  ;;  %v9947_v61 = vshrl.u32 %v9788_v62, 16  ;;  %v19290_v40 = vld [vmem:[#allocation2 + $0x4c] sm:$0xf]  ;;  %v19300_v57 = vld [vmem:[#allocation2 + $0x50] sm:$0x1] }
 0x2cb   : > { %v16374_v22 = vpack.c.bf16 %v6679_v41, %v6679_v41  ;;  %v2991_v21 = vcombine.high %v2989_v33, %v2989_v33  ;;  %v15279_v43 = vrot.slane %v2990_v59, 9  ;;  %v15280_v38 = vrot.slane %v2989_v33, 9 }
 0x2cc   : > { %v19284_v7 = vunpack.c.l.b16 %v16373_v34  ;;  %v19286_v1 = vunpack.c.l.b16 %v16375_v31  ;;  %v16497_v14 = vpack.c.bf16 %v6681_v49, %v6681_v49  ;;  %v6302_v26 = vmax.f32 %v2982_v4, %v15278_v0 }
 0x2cd   : > { %v19288_v52 = vunpack.c.l.b16 %v16374_v22  ;;  %v15281_v53 = vrot.slane %v2991_v21, 9  ;;  %v6303_v55 = vmax.f32 %v2990_v59, %v15279_v43  ;;  %v6304_v30 = vmax.f32 %v2989_v33, %v15280_v38  ;;  %v17313_v59 = vld [vmem:[%s22424_s3 + $0x38] sm:$0xff]   ;;  %v10215_v38 = vld [vmem:[#allocation2 + $0x48] sm:$0xe] }
 0x2ce   : > { %v8440_v16 = vrot.slane %v19284_v7, 3  ;;  %v8444_v51 = vrot.slane %v19286_v1, 1  ;;  %v8795_v10 = vsel %vm17735_vm7, %v16497_v14, %v8794_v42  ;;  %v6670_v13 = vmax.f32 %v19214_v3, %v6302_v26  ;;  %v19306_v3 = vpop.f32.mrb[88].mxu0  ;;  %16866 = vmatprep.subr.bf16.mxu1 %v17313_v59 }
 0x2cf   : > { %v8442_v12 = vrot.slane %v19288_v52, 2  ;;  %8796 = vst [vmem:[#allocation2 + $0x74] sm:$0x1] %v8795_v10  ;;  %v6305_v24 = vmax.f32 %v2991_v21, %v15281_v53  ;;  %v6671_v4 = vmax.f32 %v19225_v27, %v6303_v55  ;;  %v6672_v23 = vmax.f32 %v19221_v48, %v6304_v30  ;;  %16867 = vmatpush3.bf16.msra.mxu1 %v17313_v59  ;;  %v19311_v14 = vpop.f32.mrb[89].mxu0 }
 0x2d0   : > { %v16365_v50 = vpack.c.bf16 %v6670_v13, %v6670_v13  ;;  %v9949_v9 = vrot.slane %v9947_v61, 4  ;;  %v9950_v41 = vshll.u32 %v9788_v62, 16  ;;  %v9956_v33 = vshll.u32 %v19290_v40, 16  ;;  %16868 = vmatprep.subr.bf16.mxu1 %v17314_v29 }
 0x2d1   : > { %v6673_v0 = vmax.f32 %v19232_v25, %v6305_v24  ;;  %v16366_v49 = vpack.c.bf16 %v6671_v4, %v6671_v4  ;;  %v16367_v34 = vpack.c.bf16 %v6672_v23, %v6672_v23  ;;  %v9960_v27 = vshrl.u32 %v19290_v40, 16 }
 0x2d2   : > { %v8072_v48 = vunpack.c.l.b16 %v16365_v50  ;;  %v9952_v31 = vrot.slane %v9950_v41, 5  ;;  %v9958_v22 = vrot.slane %v9956_v33, 5  ;;  %v9966_v61 = vshll.u32 %v19300_v57, 16 }
 0x2d3   : > { %v16368_v62 = vpack.c.bf16 %v6673_v0, %v6673_v0  ;;  %v8073_v42 = vunpack.c.l.b16 %v16366_v49  ;;  %v8074_v21 = vunpack.c.l.b16 %v16367_v34  ;;  %v9962_v43 = vrot.slane %v9960_v27, 4  ;;  %v8790_v49 = vld [vmem:[#allocation2 + $0x6c] sm:$0xf]  ;;  %v19331_v27 = vpop.f32.mrb[90].mxu0  ;;  %16869 = vmatpush3.bf16.msra.mxu1 %v17314_v29 }
 0x2d4   : > { %v8426_v26 = vrot.slane %v8072_v48, 3  ;;  %v9953_v25 = vor.u32 %v9952_v31, %v9949_v9  ;;  %v9968_v53 = vrot.slane %v9966_v61, 5  ;;  %v1332_v55 = vadd.f32 %v18979_v56, %v18969_v45 }
 0x2d5   : > { %v8075_v30 = vunpack.c.l.b16 %v16368_v62  ;;  %v8428_v10 = vrot.slane %v8073_v42, 2  ;;  %v8430_v13 = vrot.slane %v8074_v21, 1  ;;  %v9963_v24 = vor.u32 %v9962_v43, %v9958_v22 }
 0x2d6   : > { %v8427_v4 = vsel %vm8207_vm11, %v8426_v26, %v19279_v63  ;;  %v9954_v23 = vrot.slane %v9953_v25, 4  ;;  %v1620_v50 = vmax.f32 %v1332_v55, 0.0  ;;  %v15855_v41 = vrot.slane %v10215_v38, 9 }
 0x2d7   : > { %v8429_v33 = vsel %vm8210_vm12, %v8428_v10, %v8427_v4  ;;  %v8433_v9 = vsel %vm8216_vm13, %v8432_v11, %v8075_v30  ;;  %v9964_v59 = vrot.slane %v9963_v24, 4  ;;  %v10311_v0 = vrot.slane %v19290_v40, 5  ;;  %v6892_v10 = vld [vmem:[#allocation2 + $0x80] sm:$0x1] }
 0x2d8   : > { %v8431_v45 = vsel %vm22432_vm15, %v8430_v13, %v8429_v33  ;;  %v8435_v56 = vsel %vm8198_vm8, %v8434_v47, %v8433_v9  ;;  %v9959_v63 = vsel %vm18453_vm2, %v9954_v23, %v9958_v22  ;;  %v3060_v34 = vcombine.high %v1620_v50, %v1620_v50  ;;  %v19377_v13 = vpop.f32.mrb[91].mxu0 }
 0x2d9   : > { %v8437_v11 = vsel %vm8201_vm9, %v8436_v20, %v8435_v56  ;;  %v8659_v40 = vpack.c.b16 %v8431_v45, %v8431_v45  ;;  %v9969_v36 = vsel %vm18453_vm2, %v9964_v59, %v9968_v53  ;;  %v3067_v47 = vrot.slane %v1620_v50, %v17791_v15  ;;  %v17315_v50 = vld [vmem:[%s22424_s3 + $0x48] sm:$0xff]  }
 0x2da   : > { %v8439_v48 = vsel %vm8204_vm10, %v8438_v37, %v8437_v11  ;;  %v15887_v31 = vcombine.low %v9959_v63, %v9969_v36  ;;  %v3074_v22 = vrot.slane %v3060_v34, %v17791_v15  ;;  %v10312_v61 = vsel %vm18372_vm4, %v15855_v41, %v10311_v0  ;;  %16870 = vmatprep.subr.bf16.mxu1 %v17315_v50 }
 0x2db   : > { %v8441_v54 = vsel %vm8207_vm11, %v8440_v16, %v8439_v48  ;;  %v8791_v20 = vsel %vm17999_vm0, %v8659_v40, %v8790_v49  ;;  %v3075_v62 = vcombine.high %v3067_v47, %v3067_v47  ;;  %v15298_v42 = vrot.slane %v3067_v47, 9  ;;  %16871 = vmatpush3.bf16.msra.mxu1 %v17315_v50 }
 0x2dc   : > { %v8443_v8 = vsel %vm8210_vm12, %v8442_v12, %v8441_v54  ;;  %8792 = vst [vmem:[#allocation2 + $0x6c] sm:$0xf] %v8791_v20  ;;  %10508 = vrot.lane.b32.xlu1 %v15887_v31, %s17539_s23  ;;  %v3076_v37 = vcombine.high %v3074_v22, %v3074_v22  ;;  %v15300_v21 = vrot.slane %v3074_v22, 9  ;;  %v10313_v43 = vrot.slane %v10311_v0, 4  ;;  %v19365_v12 = vld [vmem:[%s22423_s2] ss:$0 sm:$0xff] }
 0x2dd   : > { %v8445_v7 = vsel %vm22432_vm15, %v8444_v51, %v8443_v8  ;;  %v15299_v16 = vrot.slane %v3075_v62, 9  ;;  %v19357_v38 = vmax.f32 %v3067_v47, %v15298_v42  ;;  %v10314_v26 = vrot.slane %v19300_v57, 5 }
 0x2de   : > { %v8660_v25 = vpack.c.b16 %v8445_v7, %v8445_v7  ;;  %v15301_v53 = vrot.slane %v3076_v37, 9  ;;  %v19360_v52 = vmax.f32 %v3074_v22, %v15300_v21  ;;  %v1324_v55 = vadd.f32 %v19365_v12, %v18974_v19 }
 0x2df   : > { %v19369_v1 = vmax.f32 %v3075_v62, %v15299_v16  ;;  %v10315_v51 = vsel %vm18372_vm4, %v10313_v43, %v10314_v26  ;;  %v1335_v57 = vadd.f32 %v19365_v12, %v19007_v28  ;;  %v1327_v30 = vadd.f32 %v19365_v12, %v19012_v5  ;;  %v19387_v28 = vpop.f32.mrb[92].mxu0 }
 0x2e0   : > { %8793 = vst.msk [vmem:[#allocation2 + $0x70] sm:$0xf] %vm6794_vm14, %v8660_v25  ;;  %v19380_v24 = vmax.f32 %v3076_v37, %v15301_v53  ;;  %v15903_v4 = vcombine.low %v10312_v61, %v10315_v51  ;;  %v1618_v19 = vmax.f32 %v1324_v55, 0.0  ;;  %v1348_v23 = vadd.f32 %v19365_v12, %v19022_v46  ;;  %v19410_v55 = vpop.f32.mrb[93].mxu0 }
 0x2e1   : > { %v1621_v41 = vmax.f32 %v1335_v57, 0.0  ;;  %v1619_v5 = vmax.f32 %v1327_v30, 0.0  ;;  %v1340_v33 = vadd.f32 %v19365_v12, %v19062_v32  ;;  %v1351_v9 = vadd.f32 %v19365_v12, %v19079_v18 }
 0x2e2   : > { %10588 = vrot.lane.b32.xlu1 %v15903_v4, %s17538_s22  ;;  %v3026_v59 = vcombine.high %v1618_v19, %v1618_v19  ;;  %v3033_v0 = vrot.slane %v1618_v19, %v17791_v15  ;;  %v1624_v46 = vmax.f32 %v1348_v23, 0.0  ;;  %v6893_v45 = vsel %vm17723_vm5, 0, %v6892_v10 }
 0x2e3   : > { %v3077_v56 = vcombine.high %v1621_v41, %v1621_v41  ;;  %v3084_v49 = vrot.slane %v1621_v41, %v17791_v15  ;;  %v3043_v63 = vcombine.high %v1619_v5, %v1619_v5  ;;  %v3050_v34 = vrot.slane %v1619_v5, %v17791_v15  ;;  %6894 = vst [vmem:[#allocation2 + $0x80] sm:$0x1] %v6893_v45 }
 0x2e4   : > { %v3040_v32 = vrot.slane %v3026_v59, %v17791_v15  ;;  %v3041_v18 = vcombine.high %v3033_v0, %v3033_v0  ;;  %v15290_v29 = vrot.slane %v3033_v0, 9  ;;  %v3128_v11 = vcombine.high %v1624_v46, %v1624_v46 }
 0x2e5   : > { %v3091_v40 = vrot.slane %v3077_v56, %v17791_v15  ;;  %v3092_v36 = vcombine.high %v3084_v49, %v3084_v49  ;;  %v15302_v47 = vrot.slane %v3084_v49, 9  ;;  %v3057_v48 = vrot.slane %v3043_v63, %v17791_v15 }
 0x2e6   : > { %v3042_v31 = vcombine.high %v3040_v32, %v3040_v32  ;;  %v15291_v22 = vrot.slane %v3041_v18, 9  ;;  %v15292_v61 = vrot.slane %v3040_v32, 9  ;;  %v19402_v54 = vmax.f32 %v3033_v0, %v15290_v29 }
 0x2e7   : > { %v3093_v20 = vcombine.high %v3091_v40, %v3091_v40  ;;  %v15303_v62 = vrot.slane %v3092_v36, 9  ;;  %v15304_v42 = vrot.slane %v3091_v40, 9  ;;  %v19404_v8 = vmax.f32 %v3084_v49, %v15302_v47 }
 0x2e8   : > { %v15293_v37 = vrot.slane %v3042_v31, 9  ;;  %v6315_v21 = vmax.f32 %v3041_v18, %v15291_v22  ;;  %v6316_v43 = vmax.f32 %v3040_v32, %v15292_v61  ;;  %v3058_v7 = vcombine.high %v3050_v34, %v3050_v34 }
 0x2e9   : > { %v15305_v16 = vrot.slane %v3093_v20, 9  ;;  %v19406_v26 = vmax.f32 %v3092_v36, %v15303_v62  ;;  %v19408_v25 = vmax.f32 %v3091_v40, %v15304_v42  ;;  %v3059_v53 = vcombine.high %v3057_v48, %v3057_v48  ;;  %v19432_v42 = vpop.f32.mrb[94].mxu0 }
 0x2ea   : > { %v6317_v51 = vmax.f32 %v3042_v31, %v15293_v37  ;;  %v15294_v57 = vrot.slane %v3050_v34, 9  ;;  %v15295_v30 = vrot.slane %v3058_v7, 9  ;;  %v15296_v10 = vrot.slane %v3057_v48, 9 }
 0x2eb   : > { %v19412_v4 = vmax.f32 %v3093_v20, %v15305_v16  ;;  %v15297_v19 = vrot.slane %v3059_v53, 9  ;;  %v3135_v23 = vrot.slane %v1624_v46, %v17791_v15  ;;  %v3142_v50 = vrot.slane %v3128_v11, %v17791_v15 }
 0x2ec   : > { %v19416_v41 = vmax.f32 %v3050_v34, %v15294_v57  ;;  %v19418_v5 = vmax.f32 %v3058_v7, %v15295_v30  ;;  %v19420_v59 = vmax.f32 %v3057_v48, %v15296_v10  ;;  %v1622_v0 = vmax.f32 %v1340_v33, 0.0 }
 0x2ed   : > { %v19422_v45 = vmax.f32 %v3059_v53, %v15297_v19  ;;  %v3143_v56 = vcombine.high %v3135_v23, %v3135_v23  ;;  %v3144_v49 = vcombine.high %v3142_v50, %v3142_v50  ;;  %v15314_v63 = vrot.slane %v3135_v23, 9 }
 0x2ee   : > { %v15316_v32 = vrot.slane %v3142_v50, 9  ;;  %v3094_v18 = vcombine.high %v1622_v0, %v1622_v0  ;;  %v3101_v29 = vrot.slane %v1622_v0, %v17791_v15  ;;  %v1625_v40 = vmax.f32 %v1351_v9, 0.0  ;;  %v17316_v9 = vld [vmem:[%s22424_s3 + $0x50] sm:$0xff]  }
 0x2ef   : > { %v15315_v46 = vrot.slane %v3143_v56, 9  ;;  %v15317_v36 = vrot.slane %v3144_v49, 9  ;;  %v6338_v11 = vmax.f32 %v3135_v23, %v15314_v63  ;;  %v1343_v34 = vadd.f32 %v19365_v12, %v19084_v6  ;;  %16872 = vmatprep.subr.bf16.mxu1 %v17316_v9 }
 0x2f0   : > { %v6340_v47 = vmax.f32 %v3142_v50, %v15316_v32  ;;  %v3108_v48 = vrot.slane %v3094_v18, %v17791_v15  ;;  %v3109_v33 = vcombine.high %v3101_v29, %v3101_v29  ;;  %v15306_v31 = vrot.slane %v3101_v29, 9  ;;  %16873 = vmatpush3.bf16.msra.mxu1 %v17316_v9 }
 0x2f1   : > { %v6339_v22 = vmax.f32 %v3143_v56, %v15315_v46  ;;  %v6341_v61 = vmax.f32 %v3144_v49, %v15317_v36  ;;  %v6690_v20 = vmax.f32 %v19357_v38, %v6338_v11  ;;  %v3145_v62 = vcombine.high %v1625_v40, %v1625_v40 }
 0x2f2   : > { %v6692_v37 = vmax.f32 %v19360_v52, %v6340_v47  ;;  %v3110_v7 = vcombine.high %v3108_v48, %v3108_v48  ;;  %v15307_v6 = vrot.slane %v3109_v33, 9  ;;  %v15308_v16 = vrot.slane %v3108_v48, 9 }
 0x2f3   : > { %v6691_v53 = vmax.f32 %v19369_v1, %v6339_v22  ;;  %v6693_v57 = vmax.f32 %v19380_v24, %v6341_v61  ;;  %v16385_v30 = vpack.c.bf16 %v6690_v20, %v6690_v20  ;;  %v6330_v10 = vmax.f32 %v3101_v29, %v15306_v31 }
 0x2f4   : > { %v16387_v38 = vpack.c.bf16 %v6692_v37, %v6692_v37  ;;  %v15309_v19 = vrot.slane %v3110_v7, 9  ;;  %v6331_v23 = vmax.f32 %v3109_v33, %v15307_v6  ;;  %v6332_v50 = vmax.f32 %v3108_v48, %v15308_v16 }
 0x2f5   : > { %v16386_v0 = vpack.c.bf16 %v6691_v53, %v6691_v53  ;;  %v16388_v56 = vpack.c.bf16 %v6693_v57, %v6693_v57  ;;  %v19437_v49 = vunpack.c.l.b16 %v16385_v30  ;;  %v6682_v52 = vmax.f32 %v19402_v54, %v6330_v10 }
 0x2f6   : > { %v19440_v63 = vunpack.c.l.b16 %v16387_v38  ;;  %v6333_v32 = vmax.f32 %v3110_v7, %v15309_v19  ;;  %v6683_v1 = vmax.f32 %v6315_v21, %v6331_v23  ;;  %v6684_v18 = vmax.f32 %v6316_v43, %v6332_v50  ;;  %v19451_v43 = vpop.f32.mrb[95].mxu0 }
 0x2f7   : > { %v19442_v24 = vunpack.c.l.b16 %v16386_v0  ;;  %v19444_v29 = vunpack.c.l.b16 %v16388_v56  ;;  %v8459_v46 = vrot.slane %v19437_v49, 7  ;;  %v16377_v36 = vpack.c.bf16 %v6682_v52, %v6682_v52 }
 0x2f8   : > { %v8463_v11 = vrot.slane %v19440_v63, 5  ;;  %v6685_v47 = vmax.f32 %v6317_v51, %v6333_v32  ;;  %v16378_v48 = vpack.c.bf16 %v6683_v1, %v6683_v1  ;;  %v16379_v33 = vpack.c.bf16 %v6684_v18, %v6684_v18  ;;  %v6836_v32 = vld [vmem:[#allocation2 + $0x78] sm:$0x1] }
 0x2f9   : > { %v8461_v31 = vrot.slane %v19442_v24, 6  ;;  %v8465_v54 = vrot.slane %v19444_v29, 4  ;;  %v8084_v22 = vunpack.c.l.b16 %v16377_v36  ;;  %v3152_v21 = vrot.slane %v1625_v40, %v17791_v15 }
 0x2fa   : > { %v16380_v61 = vpack.c.bf16 %v6685_v47, %v6685_v47  ;;  %v8085_v20 = vunpack.c.l.b16 %v16378_v48  ;;  %v8086_v9 = vunpack.c.l.b16 %v16379_v33  ;;  %v3159_v37 = vrot.slane %v3145_v62, %v17791_v15 }
 0x2fb   : > { %v8446_v7 = vrot.slane %v8084_v22, 7  ;;  %v3160_v6 = vcombine.high %v3152_v21, %v3152_v21  ;;  %v15318_v16 = vrot.slane %v3152_v21, 9  ;;  %v1623_v51 = vmax.f32 %v1343_v34, 0.0 }
 0x2fc   : > { %v8087_v53 = vunpack.c.l.b16 %v16380_v61  ;;  %v8447_v57 = vrot.slane %v8085_v20, 6  ;;  %v8449_v30 = vrot.slane %v8086_v9, 5  ;;  %v3161_v10 = vcombine.high %v3159_v37, %v3159_v37 }
 0x2fd   : > { %v15319_v38 = vrot.slane %v3160_v6, 9  ;;  %v15320_v19 = vrot.slane %v3159_v37, 9  ;;  %v6342_v23 = vmax.f32 %v3152_v21, %v15318_v16  ;;  %v3111_v50 = vcombine.high %v1623_v51, %v1623_v51 }
 0x2fe   : > { %v8448_v40 = vsel %vm8198_vm8, %v8447_v57, %v8446_v7  ;;  %v8451_v0 = vrot.slane %v8087_v53, 4  ;;  %v15321_v56 = vrot.slane %v3161_v10, 9  ;;  %v3118_v52 = vrot.slane %v1623_v51, %v17791_v15  ;;  %v8801_v53 = vld [vmem:[#allocation2 + $0x80] sm:$0x1] }
 0x2ff   : > { %v8450_v62 = vsel %vm8201_vm9, %v8449_v30, %v8448_v40  ;;  %v6343_v1 = vmax.f32 %v3160_v6, %v15319_v38  ;;  %v6344_v18 = vmax.f32 %v3159_v37, %v15320_v19  ;;  %v6694_v34 = vmax.f32 %v19404_v8, %v6342_v23 }
 0x300   : > { %v6345_v36 = vmax.f32 %v3161_v10, %v15321_v56  ;;  %v3125_v47 = vrot.slane %v3111_v50, %v17791_v15  ;;  %v3126_v48 = vcombine.high %v3118_v52, %v3118_v52  ;;  %v15310_v33 = vrot.slane %v3118_v52, 9  ;;  %v9790_v50 = vld [vmem:[#allocation2 + $0x54] sm:$0xf] }
 0x301   : > { %v6695_v22 = vmax.f32 %v19406_v26, %v6343_v1  ;;  %v6696_v21 = vmax.f32 %v19408_v25, %v6344_v18  ;;  %v16389_v61 = vpack.c.bf16 %v6694_v34, %v6694_v34  ;;  %v6837_v20 = vsel %vm17735_vm7, 0, %v6836_v32  ;;  %v19476_v1 = vld [vmem:[#allocation2 + $0x58] sm:$0xf] }
 0x302   : > { %v6697_v9 = vmax.f32 %v19412_v4, %v6345_v36  ;;  %v3127_v7 = vcombine.high %v3125_v47, %v3125_v47  ;;  %v15311_v6 = vrot.slane %v3126_v48, 9  ;;  %v15312_v37 = vrot.slane %v3125_v47, 9  ;;  %6838 = vst [vmem:[#allocation2 + $0x78] sm:$0x1] %v6837_v20 }
 0x303   : > { %v16390_v8 = vpack.c.bf16 %v6695_v22, %v6695_v22  ;;  %v16391_v16 = vpack.c.bf16 %v6696_v21, %v6696_v21  ;;  %v19464_v51 = vunpack.c.l.b16 %v16389_v61  ;;  %v6334_v57 = vmax.f32 %v3118_v52, %v15310_v33  ;;  %v19485_v21 = vld [vmem:[#allocation2 + $0x5c] sm:$0x1] }
 0x304   : > { %v16498_v30 = vpack.c.bf16 %v6697_v9, %v6697_v9  ;;  %v15313_v26 = vrot.slane %v3127_v7, 9  ;;  %v6335_v10 = vmax.f32 %v3126_v48, %v15311_v6  ;;  %v6336_v25 = vmax.f32 %v3125_v47, %v15312_v37 }
 0x305   : > { %v19466_v38 = vunpack.c.l.b16 %v16390_v8  ;;  %v19468_v19 = vunpack.c.l.b16 %v16391_v16  ;;  %v8467_v4 = vrot.slane %v19464_v51, 3  ;;  %v6686_v23 = vmax.f32 %v19416_v41, %v6334_v57 }
 0x306   : > { %v8802_v40 = vsel %vm17735_vm7, %v16498_v30, %v8801_v53  ;;  %v6337_v56 = vmax.f32 %v3127_v7, %v15313_v26  ;;  %v6687_v32 = vmax.f32 %v19418_v5, %v6335_v10  ;;  %v6688_v52 = vmax.f32 %v19420_v59, %v6336_v25  ;;  %v17317_v5 = vld [vmem:[%s22424_s3 + $0x58] sm:$0xff]   ;;  %v19489_v7 = vpop.f32.mrb[96].mxu0  ;;  %v10216_v53 = vld [vmem:[#allocation2 + $0x54] sm:$0xe] }
 0x307   : > { %v8469_v18 = vrot.slane %v19466_v38, 2  ;;  %v8471_v34 = vrot.slane %v19468_v19, 1  ;;  %8803 = vst [vmem:[#allocation2 + $0x80] sm:$0x1] %v8802_v40  ;;  %v16381_v36 = vpack.c.bf16 %v6686_v23, %v6686_v23  ;;  %v8452_v47 = vsel %vm8204_vm10, %v8451_v0, %v8450_v62  ;;  %16874 = vmatprep.subr.bf16.mxu1 %v17317_v5  ;;  %v19492_v25 = vpop.f32.mrb[97].mxu0 }
 0x308   : > { %v6689_v41 = vmax.f32 %v19422_v45, %v6337_v56  ;;  %v16382_v48 = vpack.c.bf16 %v6687_v32, %v6687_v32  ;;  %v16383_v33 = vpack.c.bf16 %v6688_v52, %v6688_v52  ;;  %v9971_v22 = vshrl.u32 %v9790_v50, 16  ;;  %16875 = vmatpush3.bf16.msra.mxu1 %v17317_v5 }
 0x309   : > { %v8088_v59 = vunpack.c.l.b16 %v16381_v36  ;;  %v9974_v61 = vshll.u32 %v9790_v50, 16  ;;  %v9980_v20 = vshll.u32 %v19476_v1, 16  ;;  %v9984_v9 = vshrl.u32 %v19476_v1, 16  ;;  %16908 = vmatprep.subr.bf16.mxu1 %v17318_v35 }
 0x30a   : > { %v16384_v0 = vpack.c.bf16 %v6689_v41, %v6689_v41  ;;  %v8089_v62 = vunpack.c.l.b16 %v16382_v48  ;;  %v8090_v45 = vunpack.c.l.b16 %v16383_v33  ;;  %v9973_v6 = vrot.slane %v9971_v22, 4 }
 0x30b   : > { %v8453_v37 = vrot.slane %v8088_v59, 3  ;;  %v9976_v8 = vrot.slane %v9974_v61, 5  ;;  %v9982_v16 = vrot.slane %v9980_v20, 5  ;;  %v9986_v51 = vrot.slane %v9984_v9, 4 }
 0x30c   : > { %v8091_v57 = vunpack.c.l.b16 %v16384_v0  ;;  %v8455_v30 = vrot.slane %v8089_v62, 2  ;;  %v8457_v26 = vrot.slane %v8090_v45, 1  ;;  %v9990_v10 = vshll.u32 %v19485_v21, 16 }
 0x30d   : > { %v8454_v38 = vsel %vm8207_vm11, %v8453_v37, %v8452_v47  ;;  %v9977_v23 = vor.u32 %v9976_v8, %v9973_v6  ;;  %v9987_v50 = vor.u32 %v9986_v51, %v9982_v16  ;;  %v1364_v40 = vadd.f32 %v19365_v12, %v19128_v58  ;;  %v8797_v47 = vld [vmem:[#allocation2 + $0x78] sm:$0xf]  ;;  %v22489_v6 = vld [vmem:[#allocation11_spill] sm:$0xff] }
 0x30e   : > { %v8456_v56 = vsel %vm8210_vm12, %v8455_v30, %v8454_v38  ;;  %v8460_v32 = vsel %vm8216_vm13, %v8459_v46, %v8091_v57  ;;  %v9992_v52 = vrot.slane %v9990_v10, 5  ;;  %v15856_v36 = vrot.slane %v10216_v53, 9 }
 0x30f   : > { %v8458_v41 = vsel %vm22432_vm15, %v8457_v26, %v8456_v56  ;;  %v8462_v48 = vsel %vm8198_vm8, %v8461_v31, %v8460_v32  ;;  %v9978_v33 = vrot.slane %v9977_v23, 4  ;;  %v9988_v22 = vrot.slane %v9987_v50, 4 }
 0x310   : > { %v8464_v58 = vsel %vm8201_vm9, %v8463_v11, %v8462_v48  ;;  %v8662_v5 = vpack.c.b16 %v8458_v41, %v8458_v41  ;;  %v1628_v59 = vmax.f32 %v1364_v40, 0.0  ;;  %v10318_v49 = vrot.slane %v19476_v1, 5  ;;  %v19520_v1 = vpop.f32.mrb[98].mxu0 }
 0x311   : > { %v8466_v46 = vsel %vm8204_vm10, %v8465_v54, %v8464_v58  ;;  %v9983_v24 = vsel %vm18453_vm2, %v9978_v33, %v9982_v16  ;;  %v9993_v31 = vsel %vm18453_vm2, %v9988_v22, %v9992_v52  ;;  %v10321_v61 = vrot.slane %v19485_v21, 5  ;;  %22487 = vst [vmem:[#allocation6_spill] sm:$0xff] %v19520_v1  ;;  %v19526_v45 = vpop.f32.mrb[99].mxu0 }
 0x312   : > { %v8468_v63 = vsel %vm8207_vm11, %v8467_v4, %v8466_v46  ;;  %v8798_v11 = vsel %vm17999_vm0, %v8662_v5, %v8797_v47  ;;  %v15888_v20 = vcombine.low %v9983_v24, %v9993_v31  ;;  %v3196_v9 = vcombine.high %v1628_v59, %v1628_v59  ;;  %22488 = vst [vmem:[#allocation10_spill] sm:$0xff] %v19526_v45  ;;  %v19548_v52 = vpop.f32.mrb[100].mxu0 }
 0x313   : > { %v8470_v29 = vsel %vm8210_vm12, %v8469_v18, %v8468_v63  ;;  %8799 = vst [vmem:[#allocation2 + $0x78] sm:$0xf] %v8798_v11  ;;  %v3203_v54 = vrot.slane %v1628_v59, %v17791_v15  ;;  %v10319_v0 = vsel %vm18372_vm4, %v15856_v36, %v10318_v49  ;;  %v10320_v62 = vrot.slane %v10318_v49, 4  ;;  %22491 = vst [vmem:[#allocation11_spill] sm:$0xff] %v19548_v52 }
 0x314   : > { %v8472_v4 = vsel %vm22432_vm15, %v8471_v34, %v8470_v29  ;;  %10510 = vrot.lane.b32.xlu0 %v15888_v20, %s17539_s23  ;;  %v3210_v21 = vrot.slane %v3196_v9, %v17791_v15  ;;  %v1356_v18 = vadd.f32 %v19365_v12, %v19131_v60  ;;  %v1367_v37 = vadd.f32 %v19365_v12, %v22489_v6  ;;  %v22490_v60 = vld [vmem:[#allocation12_spill] sm:$0xff] }
 0x315   : > { %v8663_v8 = vpack.c.b16 %v8472_v4, %v8472_v4  ;;  %v3211_v16 = vcombine.high %v3203_v54, %v3203_v54  ;;  %v15330_v51 = vrot.slane %v3203_v54, 9  ;;  %v10322_v53 = vsel %vm18372_vm4, %v10320_v62, %v10321_v61 }
 0x316   : > { %v3212_v57 = vcombine.high %v3210_v21, %v3210_v21  ;;  %v15332_v19 = vrot.slane %v3210_v21, 9  ;;  %v15904_v30 = vcombine.low %v10319_v0, %v10322_v53  ;;  %v1626_v34 = vmax.f32 %v1356_v18, 0.0 }
 0x317   : > { %8800 = vst.msk [vmem:[#allocation2 + $0x7c] sm:$0xf] %vm6794_vm14, %v8663_v8  ;;  %v15331_v26 = vrot.slane %v3211_v16, 9  ;;  %v19540_v10 = vmax.f32 %v3203_v54, %v15330_v51  ;;  %v1629_v38 = vmax.f32 %v1367_v37, 0.0  ;;  %v1359_v23 = vadd.f32 %v19365_v12, %v22490_v60  ;;  %v22493_v60 = vld [vmem:[#allocation7_spill] sm:$0xff] }
 0x318   : > { %v15333_v50 = vrot.slane %v3212_v57, 9  ;;  %v19544_v40 = vmax.f32 %v3210_v21, %v15332_v19  ;;  %10590 = vrot.lane.b32.xlu0 %v15904_v30, %s17538_s22  ;;  %v3162_v56 = vcombine.high %v1626_v34, %v1626_v34  ;;  %v3169_v32 = vrot.slane %v1626_v34, %v17791_v15  ;;  %v6895_v30 = vld [vmem:[#allocation2 + $0x8c] sm:$0x1] }
 0x319   : > { %v19550_v36 = vmax.f32 %v3211_v16, %v15331_v26  ;;  %v3213_v41 = vcombine.high %v1629_v38, %v1629_v38  ;;  %v3220_v48 = vrot.slane %v1629_v38, %v17791_v15  ;;  %v1627_v47 = vmax.f32 %v1359_v23, 0.0 }
 0x31a   : > { %v19553_v33 = vmax.f32 %v3212_v57, %v15333_v50  ;;  %v3176_v22 = vrot.slane %v3162_v56, %v17791_v15  ;;  %v3177_v58 = vcombine.high %v3169_v32, %v3169_v32  ;;  %v15322_v5 = vrot.slane %v3169_v32, 9  ;;  %v22492_v57 = vld [vmem:[#allocation13_spill] sm:$0xff] }
 0x31b   : > { %v3227_v59 = vrot.slane %v3213_v41, %v17791_v15  ;;  %v3228_v49 = vcombine.high %v3220_v48, %v3220_v48  ;;  %v15334_v46 = vrot.slane %v3220_v48, 9  ;;  %v3179_v24 = vcombine.high %v1627_v47, %v1627_v47  ;;  %v22494_v41 = vld [vmem:[#allocation8_spill] sm:$0xff] }
 0x31c   : > { %v3178_v31 = vcombine.high %v3176_v22, %v3176_v22  ;;  %v15323_v61 = vrot.slane %v3177_v58, 9  ;;  %v15324_v63 = vrot.slane %v3176_v22, 9  ;;  %v19557_v11 = vmax.f32 %v3169_v32, %v15322_v5 }
 0x31d   : > { %v3229_v20 = vcombine.high %v3227_v59, %v3227_v59  ;;  %v15335_v9 = vrot.slane %v3228_v49, 9  ;;  %v15336_v29 = vrot.slane %v3227_v59, 9  ;;  %v19559_v54 = vmax.f32 %v3220_v48, %v15334_v46 }
 0x31e   : > { %v15325_v0 = vrot.slane %v3178_v31, 9  ;;  %v19561_v62 = vmax.f32 %v3177_v58, %v15323_v61  ;;  %v19563_v4 = vmax.f32 %v3176_v22, %v15324_v63  ;;  %v3186_v21 = vrot.slane %v1627_v47, %v17791_v15 }
 0x31f   : > { %v15337_v18 = vrot.slane %v3229_v20, 9  ;;  %v19566_v6 = vmax.f32 %v3228_v49, %v15335_v9  ;;  %v19568_v37 = vmax.f32 %v3227_v59, %v15336_v29  ;;  %v3193_v8 = vrot.slane %v3179_v24, %v17791_v15 }
 0x320   : > { %v19571_v16 = vmax.f32 %v3178_v31, %v15325_v0  ;;  %v3194_v51 = vcombine.high %v3186_v21, %v3186_v21  ;;  %v15326_v53 = vrot.slane %v3186_v21, 9  ;;  %v1380_v19 = vadd.f32 %v19365_v12, %v22492_v57 }
 0x321   : > { %v19575_v34 = vmax.f32 %v3229_v20, %v15337_v18  ;;  %v3195_v26 = vcombine.high %v3193_v8, %v3193_v8  ;;  %v15328_v38 = vrot.slane %v3193_v8, 9  ;;  %v1372_v23 = vadd.f32 %v19365_v12, %v22493_v60  ;;  %v22495_v20 = vld [vmem:[#allocation9_spill] sm:$0xff] }
 0x322   : > { %v15327_v50 = vrot.slane %v3194_v51, 9  ;;  %v19579_v56 = vmax.f32 %v3186_v21, %v15326_v53  ;;  %v1632_v32 = vmax.f32 %v1380_v19, 0.0  ;;  %v1383_v48 = vadd.f32 %v19365_v12, %v22494_v41 }
 0x323   : > { %v15329_v47 = vrot.slane %v3195_v26, 9  ;;  %v19583_v22 = vmax.f32 %v3193_v8, %v15328_v38  ;;  %v1630_v58 = vmax.f32 %v1372_v23, 0.0  ;;  %v6896_v5 = vsel %vm17723_vm5, 0, %v6895_v30  ;;  %v19598_v8 = vpop.f32.mrb[101].mxu0 }
 0x324   : > { %v19587_v59 = vmax.f32 %v3194_v51, %v15327_v50  ;;  %v3264_v49 = vcombine.high %v1632_v32, %v1632_v32  ;;  %v3271_v46 = vrot.slane %v1632_v32, %v17791_v15  ;;  %v1633_v24 = vmax.f32 %v1383_v48, 0.0  ;;  %6897 = vst [vmem:[#allocation2 + $0x8c] sm:$0x1] %v6896_v5  ;;  %22496 = vst [vmem:[#allocation12_spill] sm:$0xff] %v19598_v8  ;;  %v19602_v23 = vpop.f32.mrb[102].mxu0 }
 0x325   : > { %v19590_v31 = vmax.f32 %v3195_v26, %v15329_v47  ;;  %v3230_v61 = vcombine.high %v1630_v58, %v1630_v58  ;;  %v3237_v63 = vrot.slane %v1630_v58, %v17791_v15  ;;  %v19595_v9 = vadd.f32 %v19365_v12, %v22495_v20  ;;  %22497 = vst [vmem:[#allocation13_spill] sm:$0xff] %v19602_v23 }
 0x326   : > { %v3278_v29 = vrot.slane %v3264_v49, %v17791_v15  ;;  %v3279_v0 = vcombine.high %v3271_v46, %v3271_v46  ;;  %v15346_v21 = vrot.slane %v3271_v46, 9  ;;  %v3281_v18 = vcombine.high %v1633_v24, %v1633_v24 }
 0x327   : > { %v3244_v51 = vrot.slane %v3230_v61, %v17791_v15  ;;  %v3245_v53 = vcombine.high %v3237_v63, %v3237_v63  ;;  %v15338_v57 = vrot.slane %v3237_v63, 9  ;;  %v3288_v19 = vrot.slane %v1633_v24, %v17791_v15 }
 0x328   : > { %v3280_v30 = vcombine.high %v3278_v29, %v3278_v29  ;;  %v15347_v26 = vrot.slane %v3279_v0, 9  ;;  %v15348_v38 = vrot.slane %v3278_v29, 9  ;;  %v6370_v60 = vmax.f32 %v3271_v46, %v15346_v21 }
 0x329   : > { %v3246_v50 = vcombine.high %v3244_v51, %v3244_v51  ;;  %v15339_v32 = vrot.slane %v3245_v53, 9  ;;  %v15340_v41 = vrot.slane %v3244_v51, 9  ;;  %v6362_v48 = vmax.f32 %v3237_v63, %v15338_v57 }
 0x32a   : > { %v15349_v47 = vrot.slane %v3280_v30, 9  ;;  %v6371_v58 = vmax.f32 %v3279_v0, %v15347_v26  ;;  %v6372_v5 = vmax.f32 %v3278_v29, %v15348_v38  ;;  %v6706_v49 = vmax.f32 %v19540_v10, %v6370_v60 }
 0x32b   : > { %v15341_v61 = vrot.slane %v3246_v50, 9  ;;  %v6363_v20 = vmax.f32 %v3245_v53, %v15339_v32  ;;  %v6364_v8 = vmax.f32 %v3244_v51, %v15340_v41  ;;  %v6698_v24 = vmax.f32 %v19557_v11, %v6362_v48 }
 0x32c   : > { %v6373_v52 = vmax.f32 %v3280_v30, %v15349_v47  ;;  %v6707_v45 = vmax.f32 %v19550_v36, %v6371_v58  ;;  %v6708_v46 = vmax.f32 %v19544_v40, %v6372_v5  ;;  %v16401_v21 = vpack.c.bf16 %v6706_v49, %v6706_v49 }
 0x32d   : > { %v6365_v23 = vmax.f32 %v3246_v50, %v15341_v61  ;;  %v6699_v1 = vmax.f32 %v19561_v62, %v6363_v20  ;;  %v6700_v63 = vmax.f32 %v19563_v4, %v6364_v8  ;;  %v16393_v0 = vpack.c.bf16 %v6698_v24, %v6698_v24  ;;  %v6839_v61 = vld [vmem:[#allocation2 + $0x84] sm:$0x1] }
 0x32e   : > { %v6709_v29 = vmax.f32 %v19553_v33, %v6373_v52  ;;  %v16402_v10 = vpack.c.bf16 %v6707_v45, %v6707_v45  ;;  %v16403_v57 = vpack.c.bf16 %v6708_v46, %v6708_v46  ;;  %v19611_v53 = vunpack.c.l.b16 %v16401_v21  ;;  %v19619_v45 = vpop.f32.mrb[103].mxu0 }
 0x32f   : > { %v6701_v11 = vmax.f32 %v19571_v16, %v6365_v23  ;;  %v16394_v51 = vpack.c.bf16 %v6699_v1, %v6699_v1  ;;  %v16395_v30 = vpack.c.bf16 %v6700_v63, %v6700_v63  ;;  %v8100_v36 = vunpack.c.l.b16 %v16393_v0 }
 0x330   : > { %v16404_v26 = vpack.c.bf16 %v6709_v29, %v6709_v29  ;;  %v19614_v40 = vunpack.c.l.b16 %v16402_v10  ;;  %v19616_v38 = vunpack.c.l.b16 %v16403_v57  ;;  %v8486_v62 = vrot.slane %v19611_v53, 7 }
 0x331   : > { %v16396_v4 = vpack.c.bf16 %v6701_v11, %v6701_v11  ;;  %v8101_v8 = vunpack.c.l.b16 %v16394_v51  ;;  %v8102_v60 = vunpack.c.l.b16 %v16395_v30  ;;  %v8473_v52 = vrot.slane %v8100_v36, 7  ;;  %v9792_v30 = vld [vmem:[#allocation2 + $0x60] sm:$0xf] }
 0x332   : > { %v19621_v33 = vunpack.c.l.b16 %v16404_v26  ;;  %v8488_v16 = vrot.slane %v19614_v40, 6  ;;  %v8490_v1 = vrot.slane %v19616_v38, 5  ;;  %v3295_v23 = vrot.slane %v3281_v18, %v17791_v15 }
 0x333   : > { %v8103_v50 = vunpack.c.l.b16 %v16396_v4  ;;  %v8474_v32 = vrot.slane %v8101_v8, 6  ;;  %v8476_v41 = vrot.slane %v8102_v60, 5  ;;  %v3296_v48 = vcombine.high %v3288_v19, %v3288_v19 }
 0x334   : > { %v8492_v47 = vrot.slane %v19621_v33, 4  ;;  %v3297_v58 = vcombine.high %v3295_v23, %v3295_v23  ;;  %v15350_v5 = vrot.slane %v3288_v19, 9  ;;  %v15352_v49 = vrot.slane %v3295_v23, 9 }
 0x335   : > { %v8475_v20 = vsel %vm8198_vm8, %v8474_v32, %v8473_v52  ;;  %v8478_v24 = vrot.slane %v8103_v50, 4  ;;  %v15351_v46 = vrot.slane %v3296_v48, 9  ;;  %v1631_v21 = vmax.f32 %v19595_v9, 0.0 }
 0x336   : > { %v8477_v63 = vsel %vm8201_vm9, %v8476_v41, %v8475_v20  ;;  %v15353_v0 = vrot.slane %v3297_v58, 9  ;;  %v6374_v18 = vmax.f32 %v3288_v19, %v15350_v5  ;;  %v6376_v29 = vmax.f32 %v3295_v23, %v15352_v49 }
 0x337   : > { %v6375_v10 = vmax.f32 %v3296_v48, %v15351_v46  ;;  %v3247_v57 = vcombine.high %v1631_v21, %v1631_v21  ;;  %v3254_v11 = vrot.slane %v1631_v21, %v17791_v15  ;;  %v6840_v51 = vsel %vm17735_vm7, 0, %v6839_v61 }
 0x338   : > { %v6377_v36 = vmax.f32 %v3297_v58, %v15353_v0  ;;  %v6710_v26 = vmax.f32 %v19559_v54, %v6374_v18  ;;  %v6712_v4 = vmax.f32 %v19568_v37, %v6376_v29  ;;  %6841 = vst [vmem:[#allocation2 + $0x84] sm:$0x1] %v6840_v51  ;;  %v8479_v9 = vsel %vm8204_vm10, %v8478_v24, %v8477_v63  ;;  %v8808_v58 = vld [vmem:[#allocation2 + $0x8c] sm:$0x1] }
 0x339   : > { %v6711_v8 = vmax.f32 %v19566_v6, %v6375_v10  ;;  %v3261_v19 = vrot.slane %v3247_v57, %v17791_v15  ;;  %v3262_v60 = vcombine.high %v3254_v11, %v3254_v11  ;;  %v15342_v52 = vrot.slane %v3254_v11, 9 }
 0x33a   : > { %v6713_v23 = vmax.f32 %v19575_v34, %v6377_v36  ;;  %v16405_v50 = vpack.c.bf16 %v6710_v26, %v6710_v26  ;;  %v16407_v32 = vpack.c.bf16 %v6712_v4, %v6712_v4  ;;  %v9995_v41 = vshrl.u32 %v9792_v30, 16  ;;  %v19645_v34 = vld [vmem:[#allocation2 + $0x64] sm:$0xf]  ;;  %v19655_v26 = vld [vmem:[#allocation2 + $0x68] sm:$0x1] }
 0x33b   : > { %v16406_v48 = vpack.c.bf16 %v6711_v8, %v6711_v8  ;;  %v3263_v5 = vcombine.high %v3261_v19, %v3261_v19  ;;  %v15343_v54 = vrot.slane %v3262_v60, 9  ;;  %v15344_v49 = vrot.slane %v3261_v19, 9 }
 0x33c   : > { %v19639_v37 = vunpack.c.l.b16 %v16405_v50  ;;  %v19641_v61 = vunpack.c.l.b16 %v16407_v32  ;;  %v16499_v20 = vpack.c.bf16 %v6713_v23, %v6713_v23  ;;  %v6366_v6 = vmax.f32 %v3254_v11, %v15342_v52 }
 0x33d   : > { %v19643_v24 = vunpack.c.l.b16 %v16406_v48  ;;  %v15345_v46 = vrot.slane %v3263_v5, 9  ;;  %v6367_v21 = vmax.f32 %v3262_v60, %v15343_v54  ;;  %v6368_v63 = vmax.f32 %v3261_v19, %v15344_v49 }
 0x33e   : > { %v8494_v0 = vrot.slane %v19639_v37, 3  ;;  %v8498_v18 = vrot.slane %v19641_v61, 1  ;;  %v8809_v29 = vsel %vm17735_vm7, %v16499_v20, %v8808_v58  ;;  %v6702_v10 = vmax.f32 %v19579_v56, %v6366_v6  ;;  %v10217_v20 = vld [vmem:[#allocation2 + $0x60] sm:$0xe]  ;;  %v19661_v6 = vpop.f32.mrb[104].mxu0 }
 0x33f   : > { %v8496_v57 = vrot.slane %v19643_v24, 2  ;;  %8810 = vst [vmem:[#allocation2 + $0x8c] sm:$0x1] %v8809_v29  ;;  %v6369_v11 = vmax.f32 %v3263_v5, %v15345_v46  ;;  %v6703_v51 = vmax.f32 %v19587_v59, %v6367_v21  ;;  %v6704_v36 = vmax.f32 %v19583_v22, %v6368_v63  ;;  %v10499_v63 = vpop.permute.xlu0 %10498 }
 0x340   : > { %v16397_v4 = vpack.c.bf16 %v6702_v10, %v6702_v10  ;;  %v9997_v8 = vrot.slane %v9995_v41, 4  ;;  %v9998_v19 = vshll.u32 %v9792_v30, 16  ;;  %v10004_v60 = vshll.u32 %v19645_v34, 16 }
 0x341   : > { %v6705_v52 = vmax.f32 %v19590_v31, %v6369_v11  ;;  %v16398_v23 = vpack.c.bf16 %v6703_v51, %v6703_v51  ;;  %v16399_v50 = vpack.c.bf16 %v6704_v36, %v6704_v36  ;;  %v10008_v56 = vshrl.u32 %v19645_v34, 16  ;;  %v17394_v11 = vld [vmem:[#allocation2 + $0x10] sm:$0xf]  ;;  %v17395_v51 = vld [vmem:[#allocation2 + $0xc] sm:$0xf] }
 0x342   : > { %v8104_v32 = vunpack.c.l.b16 %v16397_v4  ;;  %v10000_v48 = vrot.slane %v9998_v19, 5  ;;  %v10006_v58 = vrot.slane %v10004_v60, 5  ;;  %v10014_v59 = vshll.u32 %v19655_v26, 16 }
 0x343   : > { %v16400_v5 = vpack.c.bf16 %v6705_v52, %v6705_v52  ;;  %v8105_v22 = vunpack.c.l.b16 %v16398_v23  ;;  %v8106_v54 = vunpack.c.l.b16 %v16399_v50  ;;  %v10010_v49 = vrot.slane %v10008_v56, 4  ;;  %v8804_v56 = vld [vmem:[#allocation2 + $0x84] sm:$0xf] }
 0x344   : > { %v8480_v37 = vrot.slane %v8104_v32, 3  ;;  %v10001_v41 = vor.u32 %v10000_v48, %v9997_v8  ;;  %v10016_v30 = vrot.slane %v10014_v59, 5  ;;  %v15866_v36 = vcombine.low %v17395_v51, %v17394_v11  ;;  %v19666_v8 = vpop.f32.mrb[105].mxu0 }
 0x345   : > { %v8107_v31 = vunpack.c.l.b16 %v16400_v5  ;;  %v8482_v24 = vrot.slane %v8105_v22, 2  ;;  %v8484_v46 = vrot.slane %v8106_v54, 1  ;;  %v10011_v21 = vor.u32 %v10010_v49, %v10006_v58 }
 0x346   : > { %v8481_v29 = vsel %vm8207_vm11, %v8480_v37, %v8479_v9  ;;  %v10002_v10 = vrot.slane %v10001_v41, 4  ;;  %v1396_v4 = vadd.f32 %v19365_v12, %v19306_v3  ;;  %v15857_v23 = vrot.slane %v10217_v20, 9 }
 0x347   : > { %v8483_v19 = vsel %vm8210_vm12, %v8482_v24, %v8481_v29  ;;  %v8487_v60 = vsel %vm8216_vm13, %v8486_v62, %v8107_v31  ;;  %v10012_v52 = vrot.slane %v10011_v21, 4  ;;  %v10612_v32 = vsel %vm9684_vm6, %v15866_v36, %v10499_v63  ;;  %v10579_v24 = vpop.permute.xlu1 %10578 }
 0x348   : > { %v8485_v50 = vsel %vm22432_vm15, %v8484_v46, %v8483_v19  ;;  %v8489_v9 = vsel %vm8198_vm8, %v8488_v16, %v8487_v60  ;;  %v10007_v3 = vsel %vm18453_vm2, %v10002_v10, %v10006_v58  ;;  %v1636_v59 = vmax.f32 %v1396_v4, 0.0 }
 0x349   : > { %v8491_v53 = vsel %vm8201_vm9, %v8490_v1, %v8489_v9  ;;  %v8665_v48 = vpack.c.b16 %v8485_v50, %v8485_v50  ;;  %v10017_v62 = vsel %vm18453_vm2, %v10012_v52, %v10016_v30  ;;  %v10325_v5 = vrot.slane %v19645_v34, 5 }
 0x34a   : > { %v8493_v40 = vsel %vm8204_vm10, %v8492_v47, %v8491_v53  ;;  %v15889_v16 = vcombine.low %v10007_v3, %v10017_v62  ;;  %v10328_v58 = vrot.slane %v19655_v26, 5  ;;  %v3332_v1 = vcombine.high %v1636_v59, %v1636_v59  ;;  %v19699_v26 = vpop.f32.mrb[106].mxu0 }
 0x34b   : > { %v8495_v22 = vsel %vm8207_vm11, %v8494_v0, %v8493_v40  ;;  %v8805_v38 = vsel %vm17999_vm0, %v8665_v48, %v8804_v56  ;;  %v3339_v54 = vrot.slane %v1636_v59, %v17791_v15  ;;  %v10326_v33 = vsel %vm18372_vm4, %v15857_v23, %v10325_v5  ;;  %v19709_v63 = vpop.f32.mrb[107].mxu0  ;;  %v19726_v23 = vld [vmem:[%s22423_s2] ss:$0 sm:$0xff] }
 0x34c   : > { %v8497_v49 = vsel %vm8210_vm12, %v8496_v57, %v8495_v22  ;;  %8806 = vst [vmem:[#allocation2 + $0x84] sm:$0xf] %v8805_v38  ;;  %10512 = vrot.lane.b32.xlu1 %v15889_v16, %s17539_s23  ;;  %v10327_v47 = vrot.slane %v10325_v5, 4  ;;  %v1388_v34 = vadd.f32 %v19365_v12, %v19311_v14  ;;  %v3346_v37 = vrot.slane %v3332_v1, %v17791_v15  ;;  %v19714_v11 = vpop.f32.mrb[108].mxu0 }
 0x34d   : > { %v8499_v0 = vsel %vm22432_vm15, %v8498_v18, %v8497_v49  ;;  %v3347_v41 = vcombine.high %v3339_v54, %v3339_v54  ;;  %v15362_v57 = vrot.slane %v3339_v54, 9  ;;  %vm9733_vm1 = vcmask 523264  }
 0x34e   : > { %v8666_v30 = vpack.c.b16 %v8499_v0, %v8499_v0  ;;  %v10329_v20 = vsel %vm18372_vm4, %v10327_v47, %v10328_v58  ;;  %v1634_v31 = vmax.f32 %v1388_v34, 0.0  ;;  %v3348_v46 = vcombine.high %v3346_v37, %v3346_v37 }
 0x34f   : > { %v15363_v21 = vrot.slane %v3347_v41, 9  ;;  %v15364_v14 = vrot.slane %v3346_v37, 9  ;;  %v19707_v12 = vmax.f32 %v3339_v54, %v15362_v57  ;;  %v15905_v61 = vcombine.low %v10326_v33, %v10329_v20 }
 0x350   : > { %8807 = vst.msk [vmem:[#allocation2 + $0x88] sm:$0xf] %vm6794_vm14, %v8666_v30  ;;  %v3298_v18 = vcombine.high %v1634_v31, %v1634_v31  ;;  %v3305_v29 = vrot.slane %v1634_v31, %v17791_v15  ;;  %v10659_v10 = vsel %vm9733_vm1, %v10612_v32, %v10579_v24  ;;  %v15365_v51 = vrot.slane %v3348_v46, 9 }
 0x351   : > { %v19716_v36 = vmax.f32 %v3347_v41, %v15363_v21  ;;  %v19718_v4 = vmax.f32 %v3346_v37, %v15364_v14  ;;  %10592 = vrot.lane.b32.xlu1 %v15905_v61, %s17538_s22  ;;  %16876 = vmatprep.mubr.msk.bf16.mxu1 %vm10739_vm3, %v10659_v10  ;;  %v1399_v50 = vadd.f32 %v19726_v23, %v19331_v27 }
 0x352   : > { %v3312_v19 = vrot.slane %v3298_v18, %v17791_v15  ;;  %v3313_v60 = vcombine.high %v3305_v29, %v3305_v29  ;;  %v15354_v52 = vrot.slane %v3305_v29, 9  ;;  %v19730_v9 = vmax.f32 %v3348_v46, %v15365_v51 }
 0x353   : > { %v1391_v56 = vadd.f32 %v19726_v23, %v19377_v13  ;;  %v1412_v3 = vadd.f32 %v19726_v23, %v19387_v28  ;;  %v1404_v32 = vadd.f32 %v19726_v23, %v19410_v55  ;;  %v1637_v40 = vmax.f32 %v1399_v50, 0.0  ;;  %v19762_v50 = vpop.f32.mrb[109].mxu0 }
 0x354   : > { %v3314_v53 = vcombine.high %v3312_v19, %v3312_v19  ;;  %v15355_v48 = vrot.slane %v3313_v60, 9  ;;  %v15356_v62 = vrot.slane %v3312_v19, 9  ;;  %v19738_v59 = vmax.f32 %v3305_v29, %v15354_v52 }
 0x355   : > { %v1635_v16 = vmax.f32 %v1391_v56, 0.0  ;;  %v1640_v5 = vmax.f32 %v1412_v3, 0.0  ;;  %v1638_v27 = vmax.f32 %v1404_v32, 0.0  ;;  %v1415_v13 = vadd.f32 %v19726_v23, %v19432_v42 }
 0x356   : > { %v15357_v58 = vrot.slane %v3314_v53, 9  ;;  %v19740_v22 = vmax.f32 %v3313_v60, %v15355_v48  ;;  %v19742_v38 = vmax.f32 %v3312_v19, %v15356_v62  ;;  %v3349_v28 = vcombine.high %v1637_v40, %v1637_v40 }
 0x357   : > { %v3356_v55 = vrot.slane %v1637_v40, %v17791_v15  ;;  %v3315_v1 = vcombine.high %v1635_v16, %v1635_v16  ;;  %v3322_v54 = vrot.slane %v1635_v16, %v17791_v15  ;;  %v3400_v33 = vcombine.high %v1640_v5, %v1640_v5 }
 0x358   : > { %v19748_v49 = vmax.f32 %v3314_v53, %v15357_v58  ;;  %v3407_v47 = vrot.slane %v1640_v5, %v17791_v15  ;;  %v3366_v34 = vcombine.high %v1638_v27, %v1638_v27  ;;  %v3363_v0 = vrot.slane %v3349_v28, %v17791_v15 }
 0x359   : > { %v3364_v37 = vcombine.high %v3356_v55, %v3356_v55  ;;  %v15366_v41 = vrot.slane %v3356_v55, 9  ;;  %v3329_v57 = vrot.slane %v3315_v1, %v17791_v15  ;;  %v3330_v30 = vcombine.high %v3322_v54, %v3322_v54 }
 0x35a   : > { %v15358_v42 = vrot.slane %v3322_v54, 9  ;;  %v3414_v20 = vrot.slane %v3400_v33, %v17791_v15  ;;  %v3415_v31 = vcombine.high %v3407_v47, %v3407_v47  ;;  %v3365_v24 = vcombine.high %v3363_v0, %v3363_v0 }
 0x35b   : > { %v15367_v46 = vrot.slane %v3364_v37, 9  ;;  %v15368_v21 = vrot.slane %v3363_v0, 9  ;;  %v19754_v14 = vmax.f32 %v3356_v55, %v15366_v41  ;;  %v3331_v61 = vcombine.high %v3329_v57, %v3329_v57 }
 0x35c   : > { %v15359_v18 = vrot.slane %v3330_v30, 9  ;;  %v15360_v29 = vrot.slane %v3329_v57, 9  ;;  %v19756_v10 = vmax.f32 %v3322_v54, %v15358_v42  ;;  %v15369_v51 = vrot.slane %v3365_v24, 9  ;;  %v19775_v42 = vpop.f32.mrb[110].mxu0 }
 0x35d   : > { %v19758_v19 = vmax.f32 %v3364_v37, %v15367_v46  ;;  %v19760_v60 = vmax.f32 %v3363_v0, %v15368_v21  ;;  %v3416_v52 = vcombine.high %v3414_v20, %v3414_v20  ;;  %v15361_v56 = vrot.slane %v3331_v61, 9 }
 0x35e   : > { %v19764_v3 = vmax.f32 %v3330_v30, %v15359_v18  ;;  %v19766_v32 = vmax.f32 %v3329_v57, %v15360_v29  ;;  %v15378_v53 = vrot.slane %v3407_v47, 9  ;;  %v19768_v48 = vmax.f32 %v3365_v24, %v15369_v51 }
 0x35f   : > { %v15379_v62 = vrot.slane %v3415_v31, 9  ;;  %v15380_v40 = vrot.slane %v3414_v20, 9  ;;  %v15381_v16 = vrot.slane %v3416_v52, 9  ;;  %v19770_v5 = vmax.f32 %v3331_v61, %v15361_v56 }
 0x360   : > { %v6402_v58 = vmax.f32 %v3407_v47, %v15378_v53  ;;  %v3373_v28 = vrot.slane %v1638_v27, %v17791_v15  ;;  %v3380_v55 = vrot.slane %v3366_v34, %v17791_v15  ;;  %v1641_v0 = vmax.f32 %v1415_v13, 0.0 }
 0x361   : > { %v6403_v1 = vmax.f32 %v3415_v31, %v15379_v62  ;;  %v6404_v54 = vmax.f32 %v3414_v20, %v15380_v40  ;;  %v6405_v33 = vmax.f32 %v3416_v52, %v15381_v16 }
 0x362   : > { %v6722_v37 = vmax.f32 %v19707_v12, %v6402_v58  ;;  %v3381_v41 = vcombine.high %v3373_v28, %v3373_v28  ;;  %v3382_v57 = vcombine.high %v3380_v55, %v3380_v55  ;;  %v15370_v30 = vrot.slane %v3373_v28, 9 }
 0x363   : > { %v6723_v24 = vmax.f32 %v19716_v36, %v6403_v1  ;;  %v6724_v46 = vmax.f32 %v19718_v4, %v6404_v54  ;;  %v6725_v47 = vmax.f32 %v19730_v9, %v6405_v33  ;;  %v15372_v27 = vrot.slane %v3380_v55, 9  ;;  %v19796_v33 = vpop.f32.mrb[111].mxu0 }
 0x364   : > { %v16417_v21 = vpack.c.bf16 %v6722_v37, %v6722_v37  ;;  %v15371_v34 = vrot.slane %v3381_v41, 9  ;;  %v15373_v31 = vrot.slane %v3382_v57, 9  ;;  %v6394_v20 = vmax.f32 %v3373_v28, %v15370_v30  ;;  %v6898_v28 = vld [vmem:[#allocation2 + $0x98] sm:$0x1] }
 0x365   : > { %v16418_v61 = vpack.c.bf16 %v6723_v24, %v6723_v24  ;;  %v16419_v13 = vpack.c.bf16 %v6724_v46, %v6724_v46  ;;  %v16420_v18 = vpack.c.bf16 %v6725_v47, %v6725_v47  ;;  %v6396_v12 = vmax.f32 %v3380_v55, %v15372_v27 }
 0x366   : > { %v19780_v29 = vunpack.c.l.b16 %v16417_v21  ;;  %v6395_v51 = vmax.f32 %v3381_v41, %v15371_v34  ;;  %v6397_v52 = vmax.f32 %v3382_v57, %v15373_v31  ;;  %v6714_v56 = vmax.f32 %v19738_v59, %v6394_v20 }
 0x367   : > { %v19783_v36 = vunpack.c.l.b16 %v16418_v61  ;;  %v19785_v4 = vunpack.c.l.b16 %v16419_v13  ;;  %v19787_v9 = vunpack.c.l.b16 %v16420_v18  ;;  %v6716_v53 = vmax.f32 %v19742_v38, %v6396_v12  ;;  %v6842_v13 = vld [vmem:[#allocation2 + $0x90] sm:$0x1] }
 0x368   : > { %v8513_v62 = vrot.slane %v19780_v29, 7  ;;  %v6715_v40 = vmax.f32 %v19740_v22, %v6395_v51  ;;  %v6717_v16 = vmax.f32 %v19748_v49, %v6397_v52  ;;  %v16409_v58 = vpack.c.bf16 %v6714_v56, %v6714_v56  ;;  %v10218_v29 = vld [vmem:[#allocation2 + $0x6c] sm:$0xe] }
 0x369   : > { %v8515_v55 = vrot.slane %v19783_v36, 6  ;;  %v8517_v59 = vrot.slane %v19785_v4, 5  ;;  %v8519_v1 = vrot.slane %v19787_v9, 4  ;;  %v16411_v54 = vpack.c.bf16 %v6716_v53, %v6716_v53 }
 0x36a   : > { %v16410_v37 = vpack.c.bf16 %v6715_v40, %v6715_v40  ;;  %v16412_v41 = vpack.c.bf16 %v6717_v16, %v6717_v16  ;;  %v8116_v38 = vunpack.c.l.b16 %v16409_v58  ;;  %v3417_v57 = vcombine.high %v1641_v0, %v1641_v0 }
 0x36b   : > { %v8118_v30 = vunpack.c.l.b16 %v16411_v54  ;;  %v3424_v22 = vrot.slane %v1641_v0, %v17791_v15  ;;  %v6899_v49 = vsel %vm17723_vm5, 0, %v6898_v28  ;;  %v1407_v24 = vadd.f32 %v19726_v23, %v19451_v43 }
 0x36c   : > { %v8117_v46 = vunpack.c.l.b16 %v16410_v37  ;;  %v19803_v47 = vunpack.c.l.b16 %v16412_v41  ;;  %v8500_v27 = vrot.slane %v8116_v38, 7  ;;  %v3431_v21 = vrot.slane %v3417_v57, %v17791_v15  ;;  %6900 = vst [vmem:[#allocation2 + $0x98] sm:$0x1] %v6899_v49 }
 0x36d   : > { %v8503_v34 = vrot.slane %v8118_v30, 5  ;;  %v3432_v31 = vcombine.high %v3424_v22, %v3424_v22  ;;  %v15382_v20 = vrot.slane %v3424_v22, 9  ;;  %v1639_v61 = vmax.f32 %v1407_v24, 0.0 }
 0x36e   : > { %v8501_v18 = vrot.slane %v8117_v46, 6  ;;  %v8505_v0 = vrot.slane %v19803_v47, 4  ;;  %v3433_v12 = vcombine.high %v3431_v21, %v3431_v21  ;;  %v15384_v51 = vrot.slane %v3431_v21, 9 }
 0x36f   : > { %v15383_v52 = vrot.slane %v3432_v31, 9  ;;  %v6406_v56 = vmax.f32 %v3424_v22, %v15382_v20  ;;  %v3383_v43 = vcombine.high %v1639_v61, %v1639_v61  ;;  %v3390_v53 = vrot.slane %v1639_v61, %v17791_v15 }
 0x370   : > { %v8502_v40 = vsel %vm8198_vm8, %v8501_v18, %v8500_v27  ;;  %v15385_v16 = vrot.slane %v3433_v12, 9  ;;  %v6408_v58 = vmax.f32 %v3431_v21, %v15384_v51  ;;  %v6843_v28 = vsel %vm17735_vm7, 0, %v6842_v13 }
 0x371   : > { %v8504_v54 = vsel %vm8201_vm9, %v8503_v34, %v8502_v40  ;;  %v6407_v37 = vmax.f32 %v3432_v31, %v15383_v52  ;;  %v6726_v41 = vmax.f32 %v19754_v14, %v6406_v56  ;;  %v3397_v38 = vrot.slane %v3383_v43, %v17791_v15  ;;  %6844 = vst [vmem:[#allocation2 + $0x90] sm:$0x1] %v6843_v28 }
 0x372   : > { %v6409_v57 = vmax.f32 %v3433_v12, %v15385_v16  ;;  %v6728_v30 = vmax.f32 %v19760_v60, %v6408_v58  ;;  %v3398_v22 = vcombine.high %v3390_v53, %v3390_v53  ;;  %v15374_v49 = vrot.slane %v3390_v53, 9 }
 0x373   : > { %v6727_v24 = vmax.f32 %v19758_v19, %v6407_v37  ;;  %v16421_v46 = vpack.c.bf16 %v6726_v41, %v6726_v41  ;;  %v3399_v47 = vcombine.high %v3397_v38, %v3397_v38  ;;  %v15376_v27 = vrot.slane %v3397_v38, 9  ;;  %v8815_v13 = vld [vmem:[#allocation2 + $0x98] sm:$0x1]  ;;  %v19830_v41 = vld [vmem:[#allocation2 + $0x70] sm:$0xf] }
 0x374   : > { %v6729_v21 = vmax.f32 %v19768_v48, %v6409_v57  ;;  %v16423_v20 = vpack.c.bf16 %v6728_v30, %v6728_v30  ;;  %v15375_v34 = vrot.slane %v3398_v22, 9  ;;  %v6398_v31 = vmax.f32 %v3390_v53, %v15374_v49  ;;  %v9794_v53 = vld [vmem:[#allocation2 + $0x6c] sm:$0xf] }
 0x375   : > { %v16422_v61 = vpack.c.bf16 %v6727_v24, %v6727_v24  ;;  %v19817_v14 = vunpack.c.l.b16 %v16421_v46  ;;  %v15377_v18 = vrot.slane %v3399_v47, 9  ;;  %v6400_v12 = vmax.f32 %v3397_v38, %v15376_v27  ;;  %v19835_v27 = vld [vmem:[#allocation2 + $0x74] sm:$0x1] }
 0x376   : > { %v19819_v51 = vunpack.c.l.b16 %v16423_v20  ;;  %v16500_v60 = vpack.c.bf16 %v6729_v21, %v6729_v21  ;;  %v6399_v52 = vmax.f32 %v3398_v22, %v15375_v34  ;;  %v6718_v19 = vmax.f32 %v19756_v10, %v6398_v31 }
 0x377   : > { %v19822_v56 = vunpack.c.l.b16 %v16422_v61  ;;  %v8521_v43 = vrot.slane %v19817_v14, 3  ;;  %v6401_v48 = vmax.f32 %v3399_v47, %v15377_v18  ;;  %v6720_v40 = vmax.f32 %v19766_v32, %v6400_v12 }
 0x378   : > { %v8525_v16 = vrot.slane %v19819_v51, 1  ;;  %v8816_v58 = vsel %vm17735_vm7, %v16500_v60, %v8815_v13  ;;  %v6719_v28 = vmax.f32 %v19764_v3, %v6399_v52  ;;  %v16413_v37 = vpack.c.bf16 %v6718_v19, %v6718_v19  ;;  %v10501_v19 = vpop.permute.xlu0 %10500 }
 0x379   : > { %v8523_v10 = vrot.slane %v19822_v56, 2  ;;  %8817 = vst [vmem:[#allocation2 + $0x98] sm:$0x1] %v8816_v58  ;;  %v6721_v38 = vmax.f32 %v19770_v5, %v6401_v48  ;;  %v16415_v57 = vpack.c.bf16 %v6720_v40, %v6720_v40  ;;  %v8506_v30 = vsel %vm8204_vm10, %v8505_v0, %v8504_v54  ;;  %v19839_v54 = vpop.f32.mrb[112].mxu0  ;;  %v17397_v40 = vld [vmem:[#allocation2 + $0x1c] sm:$0xf] }
 0x37a   : > { %v16414_v32 = vpack.c.bf16 %v6719_v28, %v6719_v28  ;;  %v8120_v22 = vunpack.c.l.b16 %v16413_v37  ;;  %v10019_v49 = vshrl.u32 %v9794_v53, 16  ;;  %v10022_v24 = vshll.u32 %v9794_v53, 16  ;;  %v17398_v53 = vld [vmem:[#allocation2 + $0x18] sm:$0xf]  ;;  %v19848_v37 = vpop.f32.mrb[113].mxu0 }
 0x37b   : > { %v16416_v46 = vpack.c.bf16 %v6721_v38, %v6721_v38  ;;  %v8122_v47 = vunpack.c.l.b16 %v16415_v57  ;;  %v10028_v3 = vshll.u32 %v19830_v41, 16  ;;  %v10032_v21 = vshrl.u32 %v19830_v41, 16  ;;  %22498 = vst [vmem:[#allocation7_spill] sm:$0xff] %v19848_v37 }
 0x37c   : > { %v8121_v20 = vunpack.c.l.b16 %v16414_v32  ;;  %v8507_v34 = vrot.slane %v8120_v22, 3  ;;  %v10021_v31 = vrot.slane %v10019_v49, 4  ;;  %v10024_v61 = vrot.slane %v10022_v24, 5  ;;  %v8811_v49 = vld [vmem:[#allocation2 + $0x90] sm:$0xf] }
 0x37d   : > { %v8123_v5 = vunpack.c.l.b16 %v16416_v46  ;;  %v8511_v14 = vrot.slane %v8122_v47, 1  ;;  %v10030_v13 = vrot.slane %v10028_v3, 5  ;;  %v10034_v0 = vrot.slane %v10032_v21, 4 }
 0x37e   : > { %v8508_v18 = vsel %vm8207_vm11, %v8507_v34, %v8506_v30  ;;  %v8509_v12 = vrot.slane %v8121_v20, 2  ;;  %v10025_v60 = vor.u32 %v10024_v61, %v10021_v31  ;;  %v10038_v52 = vshll.u32 %v19835_v27, 16 }
 0x37f   : > { %v8514_v56 = vsel %vm8216_vm13, %v8513_v62, %v8123_v5  ;;  %v10035_v48 = vor.u32 %v10034_v0, %v10030_v13  ;;  %v15867_v58 = vcombine.low %v17398_v53, %v17397_v40  ;;  %v1428_v28 = vadd.f32 %v19726_v23, %v19489_v7  ;;  %v19882_v0 = vpop.f32.mrb[114].mxu0 }
 0x380   : > { %v8510_v38 = vsel %vm8210_vm12, %v8509_v12, %v8508_v18  ;;  %v8516_v57 = vsel %vm8198_vm8, %v8515_v55, %v8514_v56  ;;  %v10026_v30 = vrot.slane %v10025_v60, 4  ;;  %v10040_v32 = vrot.slane %v10038_v52, 5  ;;  %22499 = vst [vmem:[#allocation8_spill] sm:$0xff] %v19882_v0  ;;  %v22500_v60 = vld [vmem:[#allocation6_spill] sm:$0xff] }
 0x381   : > { %v8512_v62 = vsel %vm22432_vm15, %v8511_v14, %v8510_v38  ;;  %v8518_v22 = vsel %vm8201_vm9, %v8517_v59, %v8516_v57  ;;  %v10036_v24 = vrot.slane %v10035_v48, 4  ;;  %v10615_v7 = vsel %vm9684_vm6, %v15867_v58, %v10501_v19  ;;  %v10581_v14 = vpop.permute.xlu1 %10580  ;;  %v19887_v19 = vpop.f32.mrb[115].mxu0 }
 0x382   : > { %v8520_v46 = vsel %vm8204_vm10, %v8519_v1, %v8518_v22  ;;  %v8668_v36 = vpack.c.b16 %v8512_v62, %v8512_v62  ;;  %v10031_v55 = vsel %vm18453_vm2, %v10026_v30, %v10030_v13  ;;  %v1644_v47 = vmax.f32 %v1428_v28, 0.0  ;;  %22501 = vst [vmem:[#allocation9_spill] sm:$0xff] %v19887_v19 }
 0x383   : > { %v8522_v3 = vsel %vm8207_vm11, %v8521_v43, %v8520_v46  ;;  %v10041_v4 = vsel %vm18453_vm2, %v10036_v24, %v10040_v32  ;;  %v15858_v21 = vrot.slane %v10218_v29, 9  ;;  %v10332_v59 = vrot.slane %v19830_v41, 5  ;;  %v19896_v32 = vpop.f32.mrb[116].mxu0 }
 0x384   : > { %v8524_v20 = vsel %vm8210_vm12, %v8523_v10, %v8522_v3  ;;  %v8812_v9 = vsel %vm17999_vm0, %v8668_v36, %v8811_v49  ;;  %v15890_v34 = vcombine.low %v10031_v55, %v10041_v4  ;;  %v3468_v1 = vcombine.high %v1644_v47, %v1644_v47  ;;  %22502 = vst [vmem:[#allocation6_spill] sm:$0xff] %v19896_v32  ;;  %v22503_v49 = vld [vmem:[#allocation10_spill] sm:$0xff] }
 0x385   : > { %v8526_v31 = vsel %vm22432_vm15, %v8525_v16, %v8524_v20  ;;  %8813 = vst [vmem:[#allocation2 + $0x90] sm:$0xf] %v8812_v9  ;;  %v3475_v43 = vrot.slane %v1644_v47, %v17791_v15  ;;  %v10333_v61 = vsel %vm18372_vm4, %v15858_v21, %v10332_v59  ;;  %v10334_v5 = vrot.slane %v10332_v59, 4 }
 0x386   : > { %v8669_v41 = vpack.c.b16 %v8526_v31, %v8526_v31  ;;  %10514 = vrot.lane.b32.xlu0 %v15890_v34, %s17539_s23  ;;  %v3482_v10 = vrot.slane %v3468_v1, %v17791_v15  ;;  %v10335_v13 = vrot.slane %v19835_v27, 5  ;;  %v1420_v51 = vadd.f32 %v19726_v23, %v19492_v25 }
 0x387   : > { %v3483_v16 = vcombine.high %v3475_v43, %v3475_v43  ;;  %v15394_v18 = vrot.slane %v3475_v43, 9  ;;  %v10661_v12 = vsel %vm9733_vm1, %v10615_v7, %v10581_v14  ;;  %v1431_v52 = vadd.f32 %v19726_v23, %v22500_v60 }
 0x388   : > { %8814 = vst.msk [vmem:[#allocation2 + $0x94] sm:$0xf] %vm6794_vm14, %v8669_v41  ;;  %v3484_v56 = vcombine.high %v3482_v10, %v3482_v10  ;;  %v15396_v48 = vrot.slane %v3482_v10, 9  ;;  %v10336_v27 = vsel %vm18372_vm4, %v10334_v5, %v10335_v13  ;;  %v1642_v40 = vmax.f32 %v1420_v51, 0.0  ;;  %16877 = vmatmul.mubr.msk.bf16.vlgmr.msra.gmra.mrb[0].mxu1 %vm10739_vm3, %v10661_v12 }
 0x389   : > { %v15395_v25 = vrot.slane %v3483_v16, 9  ;;  %v15906_v53 = vcombine.low %v10333_v61, %v10336_v27  ;;  %v1645_v58 = vmax.f32 %v1431_v52, 0.0  ;;  %v19893_v38 = vmax.f32 %v3475_v43, %v15394_v18  ;;  %v22504_v52 = vld [vmem:[#allocation11_spill] sm:$0xff]  ;;  %16909 = vmatpush3.bf16.msra.mxu1 %v17318_v35 }
 0x38a   : > { %v15397_v28 = vrot.slane %v3484_v56, 9  ;;  %v3434_v57 = vcombine.high %v1642_v40, %v1642_v40  ;;  %v3441_v30 = vrot.slane %v1642_v40, %v17791_v15  ;;  %v19898_v29 = vmax.f32 %v3482_v10, %v15396_v48  ;;  %v22505_v48 = vld [vmem:[#allocation12_spill] sm:$0xff]  ;;  %v6901_v40 = vld [vmem:[#allocation2 + $0xa4] sm:$0x1] }
 0x38b   : > { %10594 = vrot.lane.b32.xlu0 %v15906_v53, %s17538_s22  ;;  %v3485_v62 = vcombine.high %v1645_v58, %v1645_v58  ;;  %v3492_v22 = vrot.slane %v1645_v58, %v17791_v15  ;;  %v1423_v24 = vadd.f32 %v19726_v23, %v22503_v49  ;;  %v19904_v7 = vmax.f32 %v3483_v16, %v15395_v25  ;;  %v17412_v35 = vld [vmem:[#allocation2 + $0x64] sm:$0xf] }
 0x38c   : > { %v3448_v46 = vrot.slane %v3434_v57, %v17791_v15  ;;  %v3449_v36 = vcombine.high %v3441_v30, %v3441_v30  ;;  %v15386_v55 = vrot.slane %v3441_v30, 9  ;;  %v19908_v59 = vmax.f32 %v3484_v56, %v15397_v28  ;;  %v22506_v28 = vld [vmem:[#allocation13_spill] sm:$0xff] }
 0x38d   : > { %v3499_v47 = vrot.slane %v3485_v62, %v17791_v15  ;;  %v3500_v3 = vcombine.high %v3492_v22, %v3492_v22  ;;  %v15398_v4 = vrot.slane %v3492_v22, 9  ;;  %v1643_v21 = vmax.f32 %v1423_v24, 0.0 }
 0x38e   : > { %v3450_v20 = vcombine.high %v3448_v46, %v3448_v46  ;;  %v15387_v9 = vrot.slane %v3449_v36, 9  ;;  %v15388_v34 = vrot.slane %v3448_v46, 9  ;;  %v19910_v1 = vmax.f32 %v3441_v30, %v15386_v55 }
 0x38f   : > { %v3501_v31 = vcombine.high %v3499_v47, %v3499_v47  ;;  %v15399_v43 = vrot.slane %v3500_v3, 9  ;;  %v15400_v61 = vrot.slane %v3499_v47, 9  ;;  %v19914_v41 = vmax.f32 %v3492_v22, %v15398_v4 }
 0x390   : > { %v15389_v5 = vrot.slane %v3450_v20, 9  ;;  %v19912_v14 = vmax.f32 %v3449_v36, %v15387_v9  ;;  %v3451_v10 = vcombine.high %v1643_v21, %v1643_v21  ;;  %v6412_v13 = vmax.f32 %v3448_v46, %v15388_v34 }
 0x391   : > { %v15401_v51 = vrot.slane %v3501_v31, 9  ;;  %v19916_v16 = vmax.f32 %v3500_v3, %v15399_v43  ;;  %v3458_v18 = vrot.slane %v1643_v21, %v17791_v15  ;;  %v19919_v12 = vmax.f32 %v3499_v47, %v15400_v61  ;;  %v19942_v43 = vpop.f32.mrb[117].mxu0 }
 0x392   : > { %v3465_v60 = vrot.slane %v3451_v10, %v17791_v15  ;;  %v1444_v56 = vadd.f32 %v19726_v23, %v22504_v52  ;;  %v1436_v27 = vadd.f32 %v19726_v23, %v22505_v48  ;;  %v6413_v25 = vmax.f32 %v3450_v20, %v15389_v5  ;;  %22507 = vst [vmem:[#allocation10_spill] sm:$0xff] %v19942_v43 }
 0x393   : > { %v3466_v53 = vcombine.high %v3458_v18, %v3458_v18  ;;  %v15390_v58 = vrot.slane %v3458_v18, 9  ;;  %v1447_v57 = vadd.f32 %v19726_v23, %v22506_v28  ;;  %v19928_v24 = vmax.f32 %v3501_v31, %v15401_v51 }
 0x394   : > { %v3467_v30 = vcombine.high %v3465_v60, %v3465_v60  ;;  %v15392_v62 = vrot.slane %v3465_v60, 9  ;;  %v1648_v22 = vmax.f32 %v1444_v56, 0.0  ;;  %v1646_v49 = vmax.f32 %v1436_v27, 0.0 }
 0x395   : > { %v15391_v46 = vrot.slane %v3466_v53, 9  ;;  %v19930_v36 = vmax.f32 %v1447_v57, 0.0  ;;  %v6902_v55 = vsel %vm17723_vm5, 0, %v6901_v40  ;;  %v19934_v3 = vmax.f32 %v3458_v18, %v15390_v58 }
 0x396   : > { %v15393_v47 = vrot.slane %v3467_v30, 9  ;;  %v3536_v4 = vcombine.high %v1648_v22, %v1648_v22  ;;  %v3543_v21 = vrot.slane %v1648_v22, %v17791_v15  ;;  %6903 = vst [vmem:[#allocation2 + $0xa4] sm:$0x1] %v6902_v55  ;;  %v19939_v9 = vmax.f32 %v3465_v60, %v15392_v62  ;;  %v19952_v22 = vpop.f32.mrb[118].mxu0 }
 0x397   : > { %v19937_v20 = vmax.f32 %v3466_v53, %v15391_v46  ;;  %v3502_v34 = vcombine.high %v1646_v49, %v1646_v49  ;;  %v3509_v31 = vrot.slane %v1646_v49, %v17791_v15  ;;  %v3553_v51 = vcombine.high %v19930_v36, %v19930_v36  ;;  %22508 = vst [vmem:[#allocation11_spill] sm:$0xff] %v19952_v22 }
 0x398   : > { %v3550_v61 = vrot.slane %v3536_v4, %v17791_v15  ;;  %v3551_v5 = vcombine.high %v3543_v21, %v3543_v21  ;;  %v15410_v10 = vrot.slane %v3543_v21, 9  ;;  %v19950_v60 = vrot.slane %v19930_v36, %v17791_v15 }
 0x399   : > { %v3516_v18 = vrot.slane %v3502_v34, %v17791_v15  ;;  %v3517_v52 = vcombine.high %v3509_v31, %v3509_v31  ;;  %v15402_v56 = vrot.slane %v3509_v31, 9 }
 0x39a   : > { %v3552_v48 = vcombine.high %v3550_v61, %v3550_v61  ;;  %v15411_v27 = vrot.slane %v3551_v5, 9  ;;  %v15412_v40 = vrot.slane %v3550_v61, 9  ;;  %v6434_v53 = vmax.f32 %v3543_v21, %v15410_v10 }
 0x39b   : > { %v3518_v58 = vcombine.high %v3516_v18, %v3516_v18  ;;  %v15403_v28 = vrot.slane %v3517_v52, 9  ;;  %v15404_v57 = vrot.slane %v3516_v18, 9  ;;  %v6426_v62 = vmax.f32 %v3509_v31, %v15402_v56 }
 0x39c   : > { %v15413_v49 = vrot.slane %v3552_v48, 9  ;;  %v6435_v46 = vmax.f32 %v3551_v5, %v15411_v27  ;;  %v6436_v55 = vmax.f32 %v3550_v61, %v15412_v40  ;;  %v6738_v4 = vmax.f32 %v19893_v38, %v6434_v53 }
 0x39d   : > { %v15405_v34 = vrot.slane %v3518_v58, 9  ;;  %v6427_v43 = vmax.f32 %v3517_v52, %v15403_v28  ;;  %v6428_v32 = vmax.f32 %v3516_v18, %v15404_v57  ;;  %v6730_v36 = vmax.f32 %v19910_v1, %v6426_v62 }
 0x39e   : > { %v6437_v19 = vmax.f32 %v3552_v48, %v15413_v49  ;;  %v6739_v0 = vmax.f32 %v19904_v7, %v6435_v46  ;;  %v6740_v21 = vmax.f32 %v19898_v29, %v6436_v55  ;;  %v16433_v10 = vpack.c.bf16 %v6738_v4, %v6738_v4  ;;  %v6845_v46 = vld [vmem:[#allocation2 + $0x9c] sm:$0x1] }
 0x39f   : > { %v6429_v37 = vmax.f32 %v3518_v58, %v15405_v34  ;;  %v6731_v31 = vmax.f32 %v19912_v14, %v6427_v43  ;;  %v6732_v56 = vmax.f32 %v6412_v13, %v6428_v32  ;;  %v16425_v22 = vpack.c.bf16 %v6730_v36, %v6730_v36  ;;  %v19973_v43 = vpop.f32.mrb[119].mxu0  ;;  %v9796_v36 = vld [vmem:[#allocation2 + $0x78] sm:$0xf] }
 0x3a0   : > { %v6741_v61 = vmax.f32 %v19908_v59, %v6437_v19  ;;  %v16434_v5 = vpack.c.bf16 %v6739_v0, %v6739_v0  ;;  %v16435_v38 = vpack.c.bf16 %v6740_v21, %v6740_v21  ;;  %v19960_v27 = vunpack.c.l.b16 %v16433_v10 }
 0x3a1   : > { %v6733_v18 = vmax.f32 %v6413_v25, %v6429_v37  ;;  %v16426_v52 = vpack.c.bf16 %v6731_v31, %v6731_v31  ;;  %v16427_v1 = vpack.c.bf16 %v6732_v56, %v6732_v56  ;;  %v8132_v48 = vunpack.c.l.b16 %v16425_v22 }
 0x3a2   : > { %v19962_v40 = vmax.f32 %v3467_v30, %v15393_v47  ;;  %v16436_v7 = vpack.c.bf16 %v6741_v61, %v6741_v61  ;;  %v19964_v29 = vunpack.c.l.b16 %v16434_v5  ;;  %v19966_v53 = vunpack.c.l.b16 %v16435_v38 }
 0x3a3   : > { %v8540_v32 = vrot.slane %v19960_v27, 7  ;;  %v16428_v14 = vpack.c.bf16 %v6733_v18, %v6733_v18  ;;  %v8133_v13 = vunpack.c.l.b16 %v16426_v52  ;;  %v8134_v19 = vunpack.c.l.b16 %v16427_v1 }
 0x3a4   : > { %v19969_v0 = vunpack.c.l.b16 %v16436_v7  ;;  %v8542_v59 = vrot.slane %v19964_v29, 6  ;;  %v8527_v37 = vrot.slane %v8132_v48, 7  ;;  %v3567_v25 = vrot.slane %v3553_v51, %v17791_v15 }
 0x3a5   : > { %v8135_v30 = vunpack.c.l.b16 %v16428_v14  ;;  %v8528_v47 = vrot.slane %v8133_v13, 6  ;;  %v8530_v58 = vrot.slane %v8134_v19, 5  ;;  %v3568_v28 = vcombine.high %v19950_v60, %v19950_v60 }
 0x3a6   : > { %v8544_v57 = vrot.slane %v19966_v53, 5  ;;  %v3569_v62 = vcombine.high %v3567_v25, %v3567_v25  ;;  %v15414_v22 = vrot.slane %v19950_v60, 9  ;;  %v15416_v49 = vrot.slane %v3567_v25, 9 }
 0x3a7   : > { %v8529_v55 = vsel %vm8198_vm8, %v8528_v47, %v8527_v37  ;;  %v8532_v4 = vrot.slane %v8135_v30, 4  ;;  %v15415_v34 = vrot.slane %v3568_v28, 9  ;;  %v1439_v51 = vadd.f32 %v19726_v23, %v19619_v45 }
 0x3a8   : > { %v8531_v21 = vsel %vm8201_vm9, %v8530_v58, %v8529_v55  ;;  %v15417_v10 = vrot.slane %v3569_v62, 9  ;;  %v6438_v31 = vmax.f32 %v19950_v60, %v15414_v22  ;;  %v6440_v56 = vmax.f32 %v3567_v25, %v15416_v49  ;;  %v8822_v58 = vld [vmem:[#allocation2 + $0xa4] sm:$0x1] }
 0x3a9   : > { %v6439_v61 = vmax.f32 %v3568_v28, %v15415_v34  ;;  %v1647_v5 = vmax.f32 %v1439_v51, 0.0  ;;  %v6846_v38 = vsel %vm17735_vm7, 0, %v6845_v46  ;;  %v19987_v18 = vsel %vm8204_vm10, %v8532_v4, %v8531_v21  ;;  %v20000_v34 = vld [vmem:[#allocation2 + $0x7c] sm:$0xf] }
 0x3aa   : > { %v6441_v52 = vmax.f32 %v3569_v62, %v15417_v10  ;;  %v6742_v1 = vmax.f32 %v19914_v41, %v6438_v31  ;;  %v6744_v45 = vmax.f32 %v19919_v12, %v6440_v56  ;;  %6847 = vst [vmem:[#allocation2 + $0x9c] sm:$0x1] %v6846_v38  ;;  %v10043_v48 = vshrl.u32 %v9796_v36, 16  ;;  %v20007_v31 = vld [vmem:[#allocation2 + $0x80] sm:$0x1] }
 0x3ab   : > { %v6743_v7 = vmax.f32 %v19916_v16, %v6439_v61  ;;  %v3519_v14 = vcombine.high %v1647_v5, %v1647_v5  ;;  %v3526_v60 = vrot.slane %v1647_v5, %v17791_v15  ;;  %v10046_v13 = vshll.u32 %v9796_v36, 16 }
 0x3ac   : > { %v6745_v19 = vmax.f32 %v19928_v24, %v6441_v52  ;;  %v16437_v37 = vpack.c.bf16 %v6742_v1, %v6742_v1  ;;  %v16439_v25 = vpack.c.bf16 %v6744_v45, %v6744_v45  ;;  %v10045_v30 = vrot.slane %v10043_v48, 4 }
 0x3ad   : > { %v16438_v47 = vpack.c.bf16 %v6743_v7, %v6743_v7  ;;  %v3533_v28 = vrot.slane %v3519_v14, %v17791_v15  ;;  %v3534_v41 = vcombine.high %v3526_v60, %v3526_v60  ;;  %v15406_v62 = vrot.slane %v3526_v60, 9 }
 0x3ae   : > { %v19995_v12 = vunpack.c.l.b16 %v16437_v37  ;;  %v19997_v22 = vunpack.c.l.b16 %v16439_v25  ;;  %v16501_v16 = vpack.c.bf16 %v6745_v19, %v6745_v19  ;;  %v10048_v49 = vrot.slane %v10046_v13, 5  ;;  %v20016_v19 = vpop.f32.mrb[120].mxu0 }
 0x3af   : > { %v8546_v46 = vrot.slane %v19969_v0, 4  ;;  %v3535_v55 = vcombine.high %v3533_v28, %v3533_v28  ;;  %v15407_v4 = vrot.slane %v3534_v41, 9  ;;  %v15408_v24 = vrot.slane %v3533_v28, 9 }
 0x3b0   : > { %v20002_v51 = vunpack.c.l.b16 %v16438_v47  ;;  %v8548_v36 = vrot.slane %v19995_v12, 3  ;;  %v8823_v21 = vsel %vm17735_vm7, %v16501_v16, %v8822_v58  ;;  %v6430_v10 = vmax.f32 %v3526_v60, %v15406_v62  ;;  %v10503_v62 = vpop.permute.xlu0 %10502 }
 0x3b1   : > { %v8552_v56 = vrot.slane %v19997_v22, 1  ;;  %8824 = vst [vmem:[#allocation2 + $0xa4] sm:$0x1] %v8823_v21  ;;  %v15409_v61 = vrot.slane %v3535_v55, 9  ;;  %v6431_v5 = vmax.f32 %v3534_v41, %v15407_v4  ;;  %v6432_v38 = vmax.f32 %v3533_v28, %v15408_v24  ;;  %v10219_v24 = vld [vmem:[#allocation2 + $0x78] sm:$0xe] }
 0x3b2   : > { %v6734_v52 = vmax.f32 %v19934_v3, %v6430_v10  ;;  %v10049_v1 = vor.u32 %v10048_v49, %v10045_v30  ;;  %v10052_v45 = vshll.u32 %v20000_v34, 16  ;;  %v10056_v48 = vshrl.u32 %v20000_v34, 16  ;;  %v20020_v21 = vpop.f32.mrb[121].mxu0 }
 0x3b3   : > { %v6433_v7 = vmax.f32 %v3535_v55, %v15409_v61  ;;  %v6735_v14 = vmax.f32 %v19937_v20, %v6431_v5  ;;  %v6736_v60 = vmax.f32 %v19939_v9, %v6432_v38  ;;  %v10062_v13 = vshll.u32 %v20007_v31, 16  ;;  %v17399_v55 = vld [vmem:[#allocation2 + $0x24] sm:$0xf]  ;;  %v17400_v9 = vld [vmem:[#allocation2 + $0x28] sm:$0xf] }
 0x3b4   : > { %v16429_v37 = vpack.c.bf16 %v6734_v52, %v6734_v52  ;;  %v10050_v25 = vrot.slane %v10049_v1, 4  ;;  %v10054_v47 = vrot.slane %v10052_v45, 5  ;;  %v10058_v58 = vrot.slane %v10056_v48, 4 }
 0x3b5   : > { %v8550_v3 = vrot.slane %v20002_v51, 2  ;;  %v6737_v30 = vmax.f32 %v19962_v40, %v6433_v7  ;;  %v16430_v28 = vpack.c.bf16 %v6735_v14, %v6735_v14  ;;  %v16431_v41 = vpack.c.bf16 %v6736_v60, %v6736_v60 }
 0x3b6   : > { %v8136_v16 = vunpack.c.l.b16 %v16429_v37  ;;  %v10059_v49 = vor.u32 %v10058_v58, %v10054_v47  ;;  %v10064_v20 = vrot.slane %v10062_v13, 5  ;;  %v15868_v4 = vcombine.low %v17399_v55, %v17400_v9 }
 0x3b7   : > { %v16432_v10 = vpack.c.bf16 %v6737_v30, %v6737_v30  ;;  %v8137_v61 = vunpack.c.l.b16 %v16430_v28  ;;  %v8138_v5 = vunpack.c.l.b16 %v16431_v41  ;;  %v1460_v51 = vadd.f32 %v19726_v23, %v19661_v6  ;;  %v8818_v41 = vld [vmem:[#allocation2 + $0x9c] sm:$0xf] }
 0x3b8   : > { %v8534_v38 = vrot.slane %v8136_v16, 3  ;;  %v10055_v40 = vsel %vm18453_vm2, %v10050_v25, %v10054_v47  ;;  %v10060_v52 = vrot.slane %v10059_v49, 4  ;;  %v10618_v1 = vsel %vm9684_vm6, %v15868_v4, %v10503_v62 }
 0x3b9   : > { %v8139_v45 = vunpack.c.l.b16 %v16432_v10  ;;  %v8536_v48 = vrot.slane %v8137_v61, 2  ;;  %v1652_v7 = vmax.f32 %v1460_v51, 0.0  ;;  %v15859_v14 = vrot.slane %v10219_v24, 9 }
 0x3ba   : > { %v8535_v60 = vsel %vm8207_vm11, %v8534_v38, %v19987_v18  ;;  %v8538_v13 = vrot.slane %v8138_v5, 1  ;;  %v10065_v37 = vsel %vm18453_vm2, %v10060_v52, %v10064_v20  ;;  %v10339_v6 = vrot.slane %v20000_v34, 5  ;;  %v20042_v34 = vpop.f32.mrb[122].mxu0 }
 0x3bb   : > { %v8537_v58 = vsel %vm8210_vm12, %v8536_v48, %v8535_v60  ;;  %v8541_v25 = vsel %vm8216_vm13, %v8540_v32, %v8139_v45  ;;  %v15891_v47 = vcombine.low %v10055_v40, %v10065_v37  ;;  %v3604_v30 = vcombine.high %v1652_v7, %v1652_v7  ;;  %v20049_v29 = vpop.f32.mrb[123].mxu0  ;;  %v6904_v45 = vld [vmem:[#allocation2 + $0xb0] sm:$0x1] }
 0x3bc   : > { %v8539_v28 = vsel %vm22432_vm15, %v8538_v13, %v8537_v58  ;;  %v8543_v18 = vsel %vm8198_vm8, %v8542_v59, %v8541_v25  ;;  %v3611_v62 = vrot.slane %v1652_v7, %v17791_v15  ;;  %v10342_v16 = vrot.slane %v20007_v31, 5  ;;  %v20088_v37 = vpop.f32.mrb[124].mxu0 }
 0x3bd   : > { %v8545_v27 = vsel %vm8201_vm9, %v8544_v57, %v8543_v18  ;;  %v8671_v32 = vpack.c.b16 %v8539_v28, %v8539_v28  ;;  %10516 = vrot.lane.b32.xlu1 %v15891_v47, %s17539_s23  ;;  %v3618_v49 = vrot.slane %v3604_v30, %v17791_v15  ;;  %v10341_v20 = vrot.slane %v10339_v6, 4 }
 0x3be   : > { %v8547_v59 = vsel %vm8204_vm10, %v8546_v46, %v8545_v27  ;;  %v3619_v55 = vcombine.high %v3611_v62, %v3611_v62  ;;  %v15426_v31 = vrot.slane %v3611_v62, 9  ;;  %v1452_v9 = vadd.f32 %v19726_v23, %v19666_v8  ;;  %v10583_v8 = vpop.permute.xlu0 %10582 }
 0x3bf   : > { %v8549_v53 = vsel %vm8207_vm11, %v8548_v36, %v8547_v59  ;;  %v8819_v57 = vsel %vm17999_vm0, %v8671_v32, %v8818_v41  ;;  %v3620_v4 = vcombine.high %v3618_v49, %v3618_v49  ;;  %v15428_v24 = vrot.slane %v3618_v49, 9 }
 0x3c0   : > { %v8551_v10 = vsel %vm8210_vm12, %v8550_v3, %v8549_v53  ;;  %8820 = vst [vmem:[#allocation2 + $0x9c] sm:$0xf] %v8819_v57  ;;  %v15427_v0 = vrot.slane %v3619_v55, 9  ;;  %v10340_v46 = vsel %vm18372_vm4, %v15859_v14, %v10339_v6  ;;  %v10343_v61 = vsel %vm18372_vm4, %v10341_v20, %v10342_v16 }
 0x3c1   : > { %v8553_v12 = vsel %vm22432_vm15, %v8552_v56, %v8551_v10  ;;  %v15429_v36 = vrot.slane %v3620_v4, 9  ;;  %v20069_v5 = vmax.f32 %v3611_v62, %v15426_v31  ;;  %v15907_v51 = vcombine.low %v10340_v46, %v10343_v61  ;;  %v20100_v62 = vld [vmem:[%s22423_s2] ss:$0 sm:$0xff] }
 0x3c2   : > { %v8672_v38 = vpack.c.b16 %v8553_v12, %v8553_v12  ;;  %v20071_v40 = vmax.f32 %v3618_v49, %v15428_v24  ;;  %v1650_v3 = vmax.f32 %v1452_v9, 0.0  ;;  %v1463_v52 = vadd.f32 %v19726_v23, %v19699_v26 }
 0x3c3   : > { %v20075_v48 = vmax.f32 %v3619_v55, %v15427_v0  ;;  %10596 = vrot.lane.b32.xlu1 %v15907_v51, %s17538_s22  ;;  %v10663_v22 = vsel %vm9733_vm1, %v10618_v1, %v10583_v8  ;;  %v1455_v56 = vadd.f32 %v19726_v23, %v19709_v63  ;;  %v1476_v7 = vadd.f32 %v19726_v23, %v19714_v11 }
 0x3c4   : > { %8821 = vst.msk [vmem:[#allocation2 + $0xa0] sm:$0xf] %vm6794_vm14, %v8672_v38  ;;  %v20084_v14 = vmax.f32 %v3620_v4, %v15429_v36  ;;  %v3570_v60 = vcombine.high %v1650_v3, %v1650_v3  ;;  %v3577_v26 = vrot.slane %v1650_v3, %v17791_v15  ;;  %v1653_v13 = vmax.f32 %v1463_v52, 0.0  ;;  %16880 = vmatprep.mubr.msk.bf16.mxu1 %vm10739_vm3, %v10663_v22 }
 0x3c5   : > { %v1651_v6 = vmax.f32 %v1455_v56, 0.0  ;;  %v1656_v1 = vmax.f32 %v1476_v7, 0.0  ;;  %v1468_v63 = vadd.f32 %v19726_v23, %v19762_v50  ;;  %v6905_v11 = vsel %vm17723_vm5, 0, %v6904_v45 }
 0x3c6   : > { %v3584_v58 = vrot.slane %v3570_v60, %v17791_v15  ;;  %v3585_v25 = vcombine.high %v3577_v26, %v3577_v26  ;;  %v15418_v47 = vrot.slane %v3577_v26, 9  ;;  %v3621_v30 = vcombine.high %v1653_v13, %v1653_v13  ;;  %6906 = vst [vmem:[#allocation2 + $0xb0] sm:$0x1] %v6905_v11 }
 0x3c7   : > { %v3628_v28 = vrot.slane %v1653_v13, %v17791_v15  ;;  %v3587_v18 = vcombine.high %v1651_v6, %v1651_v6  ;;  %v3594_v41 = vrot.slane %v1651_v6, %v17791_v15  ;;  %v1479_v23 = vadd.f32 %v20100_v62, %v19775_v42  ;;  %v20124_v13 = vpop.f32.mrb[125].mxu0 }
 0x3c8   : > { %v3586_v50 = vcombine.high %v3584_v58, %v3584_v58  ;;  %v15419_v16 = vrot.slane %v3585_v25, 9  ;;  %v15420_v27 = vrot.slane %v3584_v58, 9  ;;  %v3672_v32 = vcombine.high %v1656_v1, %v1656_v1 }
 0x3c9   : > { %v3635_v49 = vrot.slane %v3621_v30, %v17791_v15  ;;  %v3636_v20 = vcombine.high %v3628_v28, %v3628_v28  ;;  %v15430_v59 = vrot.slane %v3628_v28, 9  ;;  %v3601_v55 = vrot.slane %v3587_v18, %v17791_v15 }
 0x3ca   : > { %v15421_v31 = vrot.slane %v3586_v50, 9  ;;  %v6442_v9 = vmax.f32 %v3577_v26, %v15418_v47  ;;  %v20106_v53 = vmax.f32 %v3585_v25, %v15419_v16  ;;  %v3602_v57 = vcombine.high %v3594_v41, %v3594_v41 }
 0x3cb   : > { %v20108_v4 = vmax.f32 %v3584_v58, %v15420_v27  ;;  %v3637_v24 = vcombine.high %v3635_v49, %v3635_v49  ;;  %v15431_v10 = vrot.slane %v3636_v20, 9  ;;  %v15432_v42 = vrot.slane %v3635_v49, 9 }
 0x3cc   : > { %v20110_v0 = vmax.f32 %v3628_v28, %v15430_v59  ;;  %v3603_v46 = vcombine.high %v3601_v55, %v3601_v55  ;;  %v15422_v61 = vrot.slane %v3594_v41, 9  ;;  %v15423_v8 = vrot.slane %v3602_v57, 9 }
 0x3cd   : > { %v6445_v12 = vmax.f32 %v3586_v50, %v15421_v31  ;;  %v15433_v36 = vrot.slane %v3637_v24, 9  ;;  %v20112_v51 = vmax.f32 %v3636_v20, %v15431_v10  ;;  %v15424_v38 = vrot.slane %v3601_v55, 9  ;;  %v20131_v20 = vpop.f32.mrb[126].mxu0 }
 0x3ce   : > { %v20114_v3 = vmax.f32 %v3635_v49, %v15432_v42  ;;  %v15425_v52 = vrot.slane %v3603_v46, 9  ;;  %v20116_v45 = vmax.f32 %v3594_v41, %v15422_v61  ;;  %v3679_v22 = vrot.slane %v1656_v1, %v17791_v15 }
 0x3cf   : > { %v20119_v56 = vmax.f32 %v3637_v24, %v15433_v36  ;;  %v20121_v7 = vmax.f32 %v3602_v57, %v15423_v8  ;;  %v3686_v60 = vrot.slane %v3672_v32, %v17791_v15  ;;  %v1654_v26 = vmax.f32 %v1468_v63, 0.0 }
 0x3d0   : > { %v20126_v6 = vmax.f32 %v3601_v55, %v15424_v38  ;;  %v3687_v11 = vcombine.high %v3679_v22, %v3679_v22  ;;  %v15442_v58 = vrot.slane %v3679_v22, 9  ;;  %v1657_v25 = vmax.f32 %v1479_v23, 0.0 }
 0x3d1   : > { %v3688_v47 = vcombine.high %v3686_v60, %v3686_v60  ;;  %v15444_v30 = vrot.slane %v3686_v60, 9  ;;  %v3638_v28 = vcombine.high %v1654_v26, %v1654_v26  ;;  %v3645_v18 = vrot.slane %v1654_v26, %v17791_v15 }
 0x3d2   : > { %v15443_v1 = vrot.slane %v3687_v11, 9  ;;  %v6466_v41 = vmax.f32 %v3679_v22, %v15442_v58  ;;  %v3689_v50 = vcombine.high %v1657_v25, %v1657_v25  ;;  %v3696_v16 = vrot.slane %v1657_v25, %v17791_v15 }
 0x3d3   : > { %v15445_v27 = vrot.slane %v3688_v47, 9  ;;  %v6468_v32 = vmax.f32 %v3686_v60, %v15444_v30  ;;  %v3652_v63 = vrot.slane %v3638_v28, %v17791_v15  ;;  %v3653_v49 = vcombine.high %v3645_v18, %v3645_v18 }
 0x3d4   : > { %v6467_v59 = vmax.f32 %v3687_v11, %v15443_v1  ;;  %v6754_v23 = vmax.f32 %v20069_v5, %v6466_v41  ;;  %v15434_v55 = vrot.slane %v3645_v18, 9  ;;  %v3703_v31 = vrot.slane %v3689_v50, %v17791_v15 }
 0x3d5   : > { %v6469_v57 = vmax.f32 %v3688_v47, %v15445_v27  ;;  %v6756_v24 = vmax.f32 %v20071_v40, %v6468_v32  ;;  %v3654_v10 = vcombine.high %v3652_v63, %v3652_v63  ;;  %v15435_v42 = vrot.slane %v3653_v49, 9 }
 0x3d6   : > { %v6755_v61 = vmax.f32 %v20075_v48, %v6467_v59  ;;  %v16449_v8 = vpack.c.bf16 %v6754_v23, %v6754_v23  ;;  %v15436_v36 = vrot.slane %v3652_v63, 9  ;;  %v6458_v38 = vmax.f32 %v3645_v18, %v15434_v55 }
 0x3d7   : > { %v6757_v22 = vmax.f32 %v20084_v14, %v6469_v57  ;;  %v16451_v60 = vpack.c.bf16 %v6756_v24, %v6756_v24  ;;  %v15437_v26 = vrot.slane %v3654_v10, 9  ;;  %v6459_v11 = vmax.f32 %v3653_v49, %v15435_v42  ;;  %v20153_v57 = vpop.f32.mrb[127].mxu0 }
 0x3d8   : > { %v16450_v58 = vpack.c.bf16 %v6755_v61, %v6755_v61  ;;  %v20138_v5 = vunpack.c.l.b16 %v16449_v8  ;;  %v6460_v25 = vmax.f32 %v3652_v63, %v15436_v36  ;;  %v6746_v30 = vmax.f32 %v6442_v9, %v6458_v38 }
 0x3d9   : > { %v16452_v47 = vpack.c.bf16 %v6757_v22, %v6757_v22  ;;  %v20140_v28 = vunpack.c.l.b16 %v16451_v60  ;;  %v6461_v40 = vmax.f32 %v3654_v10, %v15437_v26  ;;  %v6747_v1 = vmax.f32 %v20106_v53, %v6459_v11  ;;  %v6848_v11 = vld [vmem:[#allocation2 + $0xa8] sm:$0x1] }
 0x3da   : > { %v20143_v48 = vmax.f32 %v3603_v46, %v15425_v52  ;;  %v20145_v41 = vunpack.c.l.b16 %v16450_v58  ;;  %v6748_v14 = vmax.f32 %v20108_v4, %v6460_v25  ;;  %v16441_v18 = vpack.c.bf16 %v6746_v30, %v6746_v30 }
 0x3db   : > { %v20148_v50 = vunpack.c.l.b16 %v16452_v47  ;;  %v8567_v27 = vrot.slane %v20138_v5, 7  ;;  %v6749_v32 = vmax.f32 %v6445_v12, %v6461_v40  ;;  %v16442_v63 = vpack.c.bf16 %v6747_v1, %v6747_v1 }
 0x3dc   : > { %v8571_v9 = vrot.slane %v20140_v28, 5  ;;  %v16443_v49 = vpack.c.bf16 %v6748_v14, %v6748_v14  ;;  %v8148_v59 = vunpack.c.l.b16 %v16441_v18  ;;  %v3704_v23 = vcombine.high %v3696_v16, %v3696_v16 }
 0x3dd   : > { %v8569_v53 = vrot.slane %v20145_v41, 6  ;;  %v16444_v46 = vpack.c.bf16 %v6749_v32, %v6749_v32  ;;  %v8149_v52 = vunpack.c.l.b16 %v16442_v63  ;;  %v3705_v55 = vcombine.high %v3703_v31, %v3703_v31  ;;  %v9798_v32 = vld [vmem:[#allocation2 + $0x84] sm:$0xf] }
 0x3de   : > { %v8150_v4 = vunpack.c.l.b16 %v16443_v49  ;;  %v8554_v24 = vrot.slane %v8148_v59, 7  ;;  %v15446_v10 = vrot.slane %v3696_v16, 9  ;;  %v15447_v42 = vrot.slane %v3704_v23, 9 }
 0x3df   : > { %v8151_v61 = vunpack.c.l.b16 %v16444_v46  ;;  %v8555_v8 = vrot.slane %v8149_v52, 6  ;;  %v15448_v12 = vrot.slane %v3703_v31, 9  ;;  %v15449_v36 = vrot.slane %v3705_v55, 9 }
 0x3e0   : > { %v8557_v38 = vrot.slane %v8150_v4, 5  ;;  %v6470_v22 = vmax.f32 %v3696_v16, %v15446_v10  ;;  %v6471_v60 = vmax.f32 %v3704_v23, %v15447_v42  ;;  %v1471_v26 = vadd.f32 %v20100_v62, %v19796_v33  ;;  %v8829_v23 = vld [vmem:[#allocation2 + $0xb0] sm:$0x1] }
 0x3e1   : > { %v8556_v58 = vsel %vm8198_vm8, %v8555_v8, %v8554_v24  ;;  %v8559_v25 = vrot.slane %v8151_v61, 4  ;;  %v6472_v30 = vmax.f32 %v3703_v31, %v15448_v12  ;;  %v6473_v47 = vmax.f32 %v3705_v55, %v15449_v36  ;;  %v20177_v12 = vld [vmem:[#allocation2 + $0x88] sm:$0xf] }
 0x3e2   : > { %v8558_v40 = vsel %vm8201_vm9, %v8557_v38, %v8556_v58  ;;  %v6758_v1 = vmax.f32 %v20110_v0, %v6470_v22  ;;  %v6759_v14 = vmax.f32 %v20112_v51, %v6471_v60  ;;  %v1655_v18 = vmax.f32 %v1471_v26, 0.0 }
 0x3e3   : > { %v6760_v16 = vmax.f32 %v20114_v3, %v6472_v30  ;;  %v6761_v63 = vmax.f32 %v20119_v56, %v6473_v47  ;;  %v6849_v33 = vsel %vm17735_vm7, 0, %v6848_v11  ;;  %v20166_v49 = vsel %vm8204_vm10, %v8559_v25, %v8558_v40  ;;  %v20182_v11 = vld [vmem:[#allocation2 + $0x8c] sm:$0x1] }
 0x3e4   : > { %v16453_v31 = vpack.c.bf16 %v6758_v1, %v6758_v1  ;;  %v16454_v59 = vpack.c.bf16 %v6759_v14, %v6759_v14  ;;  %v3655_v46 = vcombine.high %v1655_v18, %v1655_v18  ;;  %v3662_v0 = vrot.slane %v1655_v18, %v17791_v15  ;;  %6850 = vst [vmem:[#allocation2 + $0xa8] sm:$0x1] %v6849_v33 }
 0x3e5   : > { %v16455_v51 = vpack.c.bf16 %v6760_v16, %v6760_v16  ;;  %v16502_v52 = vpack.c.bf16 %v6761_v63, %v6761_v63  ;;  %v10067_v55 = vshrl.u32 %v9798_v32, 16  ;;  %v10070_v4 = vshll.u32 %v9798_v32, 16 }
 0x3e6   : > { %v20169_v3 = vunpack.c.l.b16 %v16453_v31  ;;  %v20171_v56 = vunpack.c.l.b16 %v16454_v59  ;;  %v3669_v24 = vrot.slane %v3655_v46, %v17791_v15  ;;  %v3670_v10 = vcombine.high %v3662_v0, %v3662_v0 }
 0x3e7   : > { %v8573_v42 = vrot.slane %v20148_v50, 4  ;;  %v8830_v61 = vsel %vm17735_vm7, %v16502_v52, %v8829_v23  ;;  %v15438_v8 = vrot.slane %v3662_v0, 9  ;;  %v10069_v36 = vrot.slane %v10067_v55, 4 }
 0x3e8   : > { %v20179_v38 = vunpack.c.l.b16 %v16455_v51  ;;  %v8575_v22 = vrot.slane %v20169_v3, 3  ;;  %8831 = vst [vmem:[#allocation2 + $0xb0] sm:$0x1] %v8830_v61  ;;  %v3671_v60 = vcombine.high %v3669_v24, %v3669_v24  ;;  %v15439_v26 = vrot.slane %v3670_v10, 9 }
 0x3e9   : > { %v8577_v58 = vrot.slane %v20171_v56, 2  ;;  %v15440_v25 = vrot.slane %v3669_v24, 9  ;;  %v6462_v30 = vmax.f32 %v3662_v0, %v15438_v8  ;;  %v10072_v47 = vrot.slane %v10070_v4, 5 }
 0x3ea   : > { %v15441_v40 = vrot.slane %v3671_v60, 9  ;;  %v6463_v1 = vmax.f32 %v3670_v10, %v15439_v26  ;;  %v10076_v14 = vshll.u32 %v20177_v12, 16  ;;  %v10080_v18 = vshrl.u32 %v20177_v12, 16  ;;  %v17402_v26 = vld [vmem:[#allocation2 + $0x30] sm:$0xf] }
 0x3eb   : > { %v6464_v32 = vmax.f32 %v3669_v24, %v15440_v25  ;;  %v6750_v16 = vmax.f32 %v20116_v45, %v6462_v30  ;;  %v10073_v63 = vor.u32 %v10072_v47, %v10069_v36  ;;  %v10086_v33 = vshll.u32 %v20182_v11, 16  ;;  %v10505_v45 = vpop.permute.xlu1 %10504 }
 0x3ec   : > { %v6465_v31 = vmax.f32 %v3671_v60, %v15441_v40  ;;  %v6751_v59 = vmax.f32 %v20121_v7, %v6463_v1  ;;  %v10078_v23 = vrot.slane %v10076_v14, 5  ;;  %v10082_v46 = vrot.slane %v10080_v18, 4  ;;  %v17403_v60 = vld [vmem:[#allocation2 + $0x34] sm:$0xf]  ;;  %v10220_v18 = vld [vmem:[#allocation2 + $0x84] sm:$0xe] }
 0x3ed   : > { %v8579_v0 = vrot.slane %v20179_v38, 1  ;;  %v6752_v51 = vmax.f32 %v20126_v6, %v6464_v32  ;;  %v16445_v52 = vpack.c.bf16 %v6750_v16, %v6750_v16  ;;  %v10074_v55 = vrot.slane %v10073_v63, 4 }
 0x3ee   : > { %v6753_v4 = vmax.f32 %v20143_v48, %v6465_v31  ;;  %v16446_v10 = vpack.c.bf16 %v6751_v59, %v6751_v59  ;;  %v10083_v24 = vor.u32 %v10082_v46, %v10078_v23  ;;  %v10088_v61 = vrot.slane %v10086_v33, 5 }
 0x3ef   : > { %v16447_v8 = vpack.c.bf16 %v6752_v51, %v6752_v51  ;;  %v8152_v36 = vunpack.c.l.b16 %v16445_v52  ;;  %v15869_v25 = vcombine.low %v17402_v26, %v17403_v60  ;;  %v1492_v7 = vadd.f32 %v20100_v62, %v19839_v54 }
 0x3f0   : > { %v16448_v30 = vpack.c.bf16 %v6753_v4, %v6753_v4  ;;  %v8153_v38 = vunpack.c.l.b16 %v16446_v10  ;;  %v10079_v6 = vsel %vm18453_vm2, %v10074_v55, %v10078_v23  ;;  %v10084_v47 = vrot.slane %v10083_v24, 4  ;;  %v8825_v10 = vld [vmem:[#allocation2 + $0xa8] sm:$0xf] }
 0x3f1   : > { %v8154_v40 = vunpack.c.l.b16 %v16447_v8  ;;  %v8561_v48 = vrot.slane %v8152_v36, 3  ;;  %v10621_v1 = vsel %vm9684_vm6, %v15869_v25, %v10505_v45  ;;  %v1660_v14 = vmax.f32 %v1492_v7, 0.0  ;;  %v10585_v25 = vpop.permute.xlu1 %10584 }
 0x3f2   : > { %v8155_v32 = vunpack.c.l.b16 %v16448_v30  ;;  %v8563_v16 = vrot.slane %v8153_v38, 2  ;;  %v10089_v63 = vsel %vm18453_vm2, %v10084_v47, %v10088_v61  ;;  %v10346_v33 = vrot.slane %v20177_v12, 5  ;;  %v22509_v38 = vld [vmem:[#allocation7_spill] sm:$0xff]  ;;  %v6907_v47 = vld [vmem:[#allocation2 + $0xbc] sm:$0x1] }
 0x3f3   : > { %v8562_v54 = vsel %vm8207_vm11, %v8561_v48, %v20166_v49  ;;  %v8565_v31 = vrot.slane %v8154_v40, 1  ;;  %v15892_v59 = vcombine.low %v10079_v6, %v10089_v63  ;;  %v3740_v23 = vcombine.high %v1660_v14, %v1660_v14 }
 0x3f4   : > { %v8564_v46 = vsel %vm8210_vm12, %v8563_v16, %v8562_v54  ;;  %v8568_v51 = vsel %vm8216_vm13, %v8567_v27, %v8155_v32  ;;  %v3747_v52 = vrot.slane %v1660_v14, %v17791_v15  ;;  %v15860_v55 = vrot.slane %v10220_v18, 9  ;;  %v22511_v32 = vld [vmem:[#allocation9_spill] sm:$0xff]  ;;  %v22512_v16 = vld [vmem:[#allocation6_spill] sm:$0xff] }
 0x3f5   : > { %v8566_v4 = vsel %vm22432_vm15, %v8565_v31, %v8564_v46  ;;  %v8570_v12 = vsel %vm8198_vm8, %v8569_v53, %v8568_v51  ;;  %10518 = vrot.lane.b32.xlu0 %v15892_v59, %s17539_s23  ;;  %v3754_v49 = vrot.slane %v3740_v23, %v17791_v15  ;;  %v10348_v24 = vrot.slane %v10346_v33, 4 }
 0x3f6   : > { %v8572_v5 = vsel %vm8201_vm9, %v8571_v9, %v8570_v12  ;;  %v8674_v27 = vpack.c.b16 %v8566_v4, %v8566_v4  ;;  %v3755_v61 = vcombine.high %v3747_v52, %v3747_v52  ;;  %v15458_v45 = vrot.slane %v3747_v52, 9 }
 0x3f7   : > { %v8574_v8 = vsel %vm8204_vm10, %v8573_v42, %v8572_v5  ;;  %v3756_v41 = vcombine.high %v3754_v49, %v3754_v49  ;;  %v15460_v36 = vrot.slane %v3754_v49, 9  ;;  %v10349_v53 = vrot.slane %v20182_v11, 5 }
 0x3f8   : > { %v8576_v26 = vsel %vm8207_vm11, %v8575_v22, %v8574_v8  ;;  %v8826_v28 = vsel %vm17999_vm0, %v8674_v27, %v8825_v10  ;;  %v15459_v60 = vrot.slane %v3755_v61, 9  ;;  %v10347_v9 = vsel %vm18372_vm4, %v15860_v55, %v10346_v33  ;;  %v22513_v33 = vld [vmem:[#allocation10_spill] sm:$0xff] }
 0x3f9   : > { %v8578_v50 = vsel %vm8210_vm12, %v8577_v58, %v8576_v26  ;;  %8827 = vst [vmem:[#allocation2 + $0xa8] sm:$0xf] %v8826_v28  ;;  %v15461_v42 = vrot.slane %v3756_v41, 9  ;;  %v20231_v7 = vmax.f32 %v3747_v52, %v15458_v45  ;;  %v10350_v3 = vsel %vm18372_vm4, %v10348_v24, %v10349_v53  ;;  %v22510_v58 = vld [vmem:[#allocation8_spill] sm:$0xff] }
 0x3fa   : > { %v8580_v22 = vsel %vm22432_vm15, %v8579_v0, %v8578_v50  ;;  %v20236_v11 = vmax.f32 %v3754_v49, %v15460_v36  ;;  %v15908_v30 = vcombine.low %v10347_v9, %v10350_v3  ;;  %v1484_v6 = vadd.f32 %v20100_v62, %v22509_v38 }
 0x3fb   : > { %v8675_v40 = vpack.c.b16 %v8580_v22, %v8580_v22  ;;  %v20240_v56 = vmax.f32 %v3755_v61, %v15459_v60  ;;  %v1495_v48 = vadd.f32 %v20100_v62, %v22510_v58  ;;  %v10665_v14 = vsel %vm9733_vm1, %v10621_v1, %v10585_v25  ;;  %v22514_v1 = vld [vmem:[#allocation11_spill] sm:$0xff] }
 0x3fc   : > { %10598 = vrot.lane.b32.xlu0 %v15908_v30, %s17538_s22  ;;  %v1658_v18 = vmax.f32 %v1484_v6, 0.0  ;;  %v1487_v0 = vadd.f32 %v20100_v62, %v22511_v32  ;;  %16881 = vmatmul.mubr.msk.bf16.gmra.mrb[4].mxu1 %vm10739_vm3, %v10665_v14  ;;  %v1508_v63 = vadd.f32 %v20100_v62, %v22512_v16  ;;  %v1500_v54 = vadd.f32 %v20100_v62, %v22513_v33 }
 0x3fd   : > { %8828 = vst.msk [vmem:[#allocation2 + $0xac] sm:$0xf] %vm6794_vm14, %v8675_v40  ;;  %v20254_v31 = vmax.f32 %v3756_v41, %v15461_v42  ;;  %v1661_v59 = vmax.f32 %v1495_v48, 0.0  ;;  %v1511_v23 = vadd.f32 %v20100_v62, %v22514_v1  ;;  %v6908_v46 = vsel %vm17723_vm5, 0, %v6907_v47 }
 0x3fe   : > { %v3706_v51 = vcombine.high %v1658_v18, %v1658_v18  ;;  %v3713_v52 = vrot.slane %v1658_v18, %v17791_v15  ;;  %v1659_v55 = vmax.f32 %v1487_v0, 0.0  ;;  %6909 = vst [vmem:[#allocation2 + $0xbc] sm:$0x1] %v6908_v46  ;;  %v20263_v4 = vadd.f32 %v20100_v62, %v19973_v43 }
 0x3ff   : > { %v3757_v12 = vcombine.high %v1661_v59, %v1661_v59  ;;  %v3764_v10 = vrot.slane %v1661_v59, %v17791_v15  ;;  %v1664_v49 = vmax.f32 %v1508_v63, 0.0  ;;  %v1662_v24 = vmax.f32 %v1500_v54, 0.0 }
 0x400   : > { %v3720_v5 = vrot.slane %v3706_v51, %v17791_v15  ;;  %v3721_v27 = vcombine.high %v3713_v52, %v3713_v52  ;;  %v15450_v61 = vrot.slane %v3713_v52, 9  ;;  %v3723_v45 = vcombine.high %v1659_v55, %v1659_v55 }
 0x401   : > { %v3771_v8 = vrot.slane %v3757_v12, %v17791_v15  ;;  %v3772_v41 = vcombine.high %v3764_v10, %v3764_v10  ;;  %v15462_v36 = vrot.slane %v3764_v10, 9  ;;  %v3730_v53 = vrot.slane %v1659_v55, %v17791_v15 }
 0x402   : > { %v3722_v26 = vcombine.high %v3720_v5, %v3720_v5  ;;  %v15451_v28 = vrot.slane %v3721_v27, 9  ;;  %v15452_v43 = vrot.slane %v3720_v5, 9  ;;  %v20269_v60 = vmax.f32 %v1511_v23, 0.0 }
 0x403   : > { %v6474_v9 = vmax.f32 %v3713_v52, %v15450_v61  ;;  %v3773_v25 = vcombine.high %v3771_v8, %v3771_v8  ;;  %v15463_v50 = vrot.slane %v3772_v41, 9  ;;  %v15464_v42 = vrot.slane %v3771_v8, 9 }
 0x404   : > { %v15453_v3 = vrot.slane %v3722_v26, 9  ;;  %v6475_v22 = vmax.f32 %v3721_v27, %v15451_v28  ;;  %v20271_v30 = vmax.f32 %v3764_v10, %v15462_v36  ;;  %v3737_v38 = vrot.slane %v3723_v45, %v17791_v15 }
 0x405   : > { %v6476_v6 = vmax.f32 %v3720_v5, %v15452_v43  ;;  %v15465_v47 = vrot.slane %v3773_v25, 9  ;;  %v20274_v40 = vmax.f32 %v3772_v41, %v15463_v50  ;;  %v3738_v58 = vcombine.high %v3730_v53, %v3730_v53 }
 0x406   : > { %v20276_v48 = vmax.f32 %v3771_v8, %v15464_v42  ;;  %v3739_v14 = vcombine.high %v3737_v38, %v3737_v38  ;;  %v15454_v18 = vrot.slane %v3730_v53, 9  ;;  %v15456_v32 = vrot.slane %v3737_v38, 9 }
 0x407   : > { %v6477_v0 = vmax.f32 %v3722_v26, %v15453_v3  ;;  %v15455_v16 = vrot.slane %v3738_v58, 9  ;;  %v3808_v63 = vcombine.high %v1664_v49, %v1664_v49  ;;  %v3815_v33 = vrot.slane %v1664_v49, %v17791_v15 }
 0x408   : > { %v20279_v54 = vmax.f32 %v3773_v25, %v15465_v47  ;;  %v15457_v59 = vrot.slane %v3739_v14, 9  ;;  %v20281_v1 = vmax.f32 %v3730_v53, %v15454_v18  ;;  %v3774_v23 = vcombine.high %v1662_v24, %v1662_v24 }
 0x409   : > { %v20283_v46 = vmax.f32 %v3737_v38, %v15456_v32  ;;  %v3822_v51 = vrot.slane %v3808_v63, %v17791_v15  ;;  %v3823_v52 = vcombine.high %v3815_v33, %v3815_v33  ;;  %v15474_v55 = vrot.slane %v3815_v33, 9 }
 0x40a   : > { %v20286_v12 = vmax.f32 %v3738_v58, %v15455_v16  ;;  %v20288_v10 = vmax.f32 %v3739_v14, %v15457_v59  ;;  %v3781_v5 = vrot.slane %v1662_v24, %v17791_v15  ;;  %v3788_v49 = vrot.slane %v3774_v23, %v17791_v15 }
 0x40b   : > { %v3824_v27 = vcombine.high %v3822_v51, %v3822_v51  ;;  %v15475_v61 = vrot.slane %v3823_v52, 9  ;;  %v15476_v45 = vrot.slane %v3822_v51, 9  ;;  %v6498_v8 = vmax.f32 %v3815_v33, %v15474_v55 }
 0x40c   : > { %v3789_v41 = vcombine.high %v3781_v5, %v3781_v5  ;;  %v3790_v36 = vcombine.high %v3788_v49, %v3788_v49  ;;  %v15466_v53 = vrot.slane %v3781_v5, 9  ;;  %v15468_v26 = vrot.slane %v3788_v49, 9 }
 0x40d   : > { %v15477_v28 = vrot.slane %v3824_v27, 9  ;;  %v6499_v43 = vmax.f32 %v3823_v52, %v15475_v61  ;;  %v6500_v25 = vmax.f32 %v3822_v51, %v15476_v45  ;;  %v6770_v50 = vmax.f32 %v20231_v7, %v6498_v8 }
 0x40e   : > { %v15467_v42 = vrot.slane %v3789_v41, 9  ;;  %v15469_v3 = vrot.slane %v3790_v36, 9  ;;  %v6490_v38 = vmax.f32 %v3781_v5, %v15466_v53  ;;  %v6492_v47 = vmax.f32 %v3788_v49, %v15468_v26 }
 0x40f   : > { %v6501_v24 = vmax.f32 %v3824_v27, %v15477_v28  ;;  %v6771_v58 = vmax.f32 %v20240_v56, %v6499_v43  ;;  %v6772_v14 = vmax.f32 %v20236_v11, %v6500_v25  ;;  %v16465_v18 = vpack.c.bf16 %v6770_v50, %v6770_v50 }
 0x410   : > { %v6491_v32 = vmax.f32 %v3789_v41, %v15467_v42  ;;  %v6493_v16 = vmax.f32 %v3790_v36, %v15469_v3  ;;  %v6762_v63 = vmax.f32 %v6474_v9, %v6490_v38  ;;  %v6764_v33 = vmax.f32 %v6476_v6, %v6492_v47  ;;  %v6851_v36 = vld [vmem:[#allocation2 + $0xb4] sm:$0x1]  ;;  %v20312_v38 = vld [vmem:[#allocation2 + $0x90] sm:$0xf] }
 0x411   : > { %v6773_v59 = vmax.f32 %v20254_v31, %v6501_v24  ;;  %v16466_v23 = vpack.c.bf16 %v6771_v58, %v6771_v58  ;;  %v16467_v51 = vpack.c.bf16 %v6772_v14, %v6772_v14  ;;  %v20296_v52 = vunpack.c.l.b16 %v16465_v18 }
 0x412   : > { %v6763_v7 = vmax.f32 %v6475_v22, %v6491_v32  ;;  %v6765_v55 = vmax.f32 %v6477_v0, %v6493_v16  ;;  %v16457_v5 = vpack.c.bf16 %v6762_v63, %v6762_v63  ;;  %v16459_v49 = vpack.c.bf16 %v6764_v33, %v6764_v33 }
 0x413   : > { %v16468_v27 = vpack.c.bf16 %v6773_v59, %v6773_v59  ;;  %v20298_v61 = vunpack.c.l.b16 %v16466_v23  ;;  %v20300_v56 = vunpack.c.l.b16 %v16467_v51  ;;  %v3825_v11 = vcombine.high %v20269_v60, %v20269_v60 }
 0x414   : > { %v16458_v9 = vpack.c.bf16 %v6763_v7, %v6763_v7  ;;  %v16460_v6 = vpack.c.bf16 %v6765_v55, %v6765_v55  ;;  %v8164_v45 = vunpack.c.l.b16 %v16457_v5  ;;  %v8166_v31 = vunpack.c.l.b16 %v16459_v49 }
 0x415   : > { %v20304_v8 = vunpack.c.l.b16 %v16468_v27  ;;  %v8594_v41 = vrot.slane %v20296_v52, 7  ;;  %v8596_v22 = vrot.slane %v20298_v61, 6  ;;  %v3832_v0 = vrot.slane %v20269_v60, %v17791_v15 }
 0x416   : > { %v8598_v53 = vrot.slane %v20300_v56, 5  ;;  %v8165_v26 = vunpack.c.l.b16 %v16458_v9  ;;  %v8167_v28 = vunpack.c.l.b16 %v16460_v6  ;;  %v8581_v43 = vrot.slane %v8164_v45, 7 }
 0x417   : > { %v8584_v25 = vrot.slane %v8166_v31, 5  ;;  %v3839_v50 = vrot.slane %v3825_v11, %v17791_v15  ;;  %v3840_v42 = vcombine.high %v3832_v0, %v3832_v0  ;;  %v15478_v3 = vrot.slane %v3832_v0, 9 }
 0x418   : > { %v8582_v47 = vrot.slane %v8165_v26, 6  ;;  %v8586_v24 = vrot.slane %v8167_v28, 4  ;;  %v1663_v58 = vmax.f32 %v20263_v4, 0.0  ;;  %v6852_v60 = vsel %vm17735_vm7, 0, %v6851_v36 }
 0x419   : > { %v3841_v14 = vcombine.high %v3839_v50, %v3839_v50  ;;  %v15479_v18 = vrot.slane %v3840_v42, 9  ;;  %v15480_v32 = vrot.slane %v3839_v50, 9  ;;  %v6502_v16 = vmax.f32 %v3832_v0, %v15478_v3  ;;  %6853 = vst [vmem:[#allocation2 + $0xb4] sm:$0x1] %v6852_v60  ;;  %v8836_v3 = vld [vmem:[#allocation2 + $0xbc] sm:$0x1] }
 0x41a   : > { %v8583_v63 = vsel %vm8198_vm8, %v8582_v47, %v8581_v43  ;;  %v3791_v33 = vcombine.high %v1663_v58, %v1663_v58  ;;  %v3798_v59 = vrot.slane %v1663_v58, %v17791_v15  ;;  %v10091_v23 = vshrl.u32 %v20312_v38, 16 }
 0x41b   : > { %v8585_v51 = vsel %vm8201_vm9, %v8584_v25, %v8583_v63  ;;  %v15481_v7 = vrot.slane %v3841_v14, 9  ;;  %v6503_v55 = vmax.f32 %v3840_v42, %v15479_v18  ;;  %v6504_v4 = vmax.f32 %v3839_v50, %v15480_v32  ;;  %v20337_v63 = vld [vmem:[#allocation2 + $0x94] sm:$0xf] }
 0x41c   : > { %v6774_v5 = vmax.f32 %v20271_v30, %v6502_v16  ;;  %v3805_v49 = vrot.slane %v3791_v33, %v17791_v15  ;;  %v3806_v27 = vcombine.high %v3798_v59, %v3798_v59  ;;  %v15470_v11 = vrot.slane %v3798_v59, 9 }
 0x41d   : > { %v6505_v9 = vmax.f32 %v3841_v14, %v15481_v7  ;;  %v6775_v6 = vmax.f32 %v20274_v40, %v6503_v55  ;;  %v6776_v45 = vmax.f32 %v20276_v48, %v6504_v4  ;;  %v8587_v31 = vsel %vm8204_vm10, %v8586_v24, %v8585_v51  ;;  %v20343_v7 = vld [vmem:[#allocation2 + $0x98] sm:$0x1] }
 0x41e   : > { %v16469_v0 = vpack.c.bf16 %v6774_v5, %v6774_v5  ;;  %v3807_v36 = vcombine.high %v3805_v49, %v3805_v49  ;;  %v15471_v26 = vrot.slane %v3806_v27, 9  ;;  %v15472_v28 = vrot.slane %v3805_v49, 9 }
 0x41f   : > { %v6777_v43 = vmax.f32 %v20279_v54, %v6505_v9  ;;  %v16470_v25 = vpack.c.bf16 %v6775_v6, %v6775_v6  ;;  %v16471_v50 = vpack.c.bf16 %v6776_v45, %v6776_v45  ;;  %v6494_v30 = vmax.f32 %v3798_v59, %v15470_v11 }
 0x420   : > { %v20327_v42 = vunpack.c.l.b16 %v16469_v0  ;;  %v15473_v47 = vrot.slane %v3807_v36, 9  ;;  %v6495_v58 = vmax.f32 %v3806_v27, %v15471_v26  ;;  %v6496_v60 = vmax.f32 %v3805_v49, %v15472_v28 }
 0x421   : > { %v8600_v40 = vrot.slane %v20304_v8, 4  ;;  %v20330_v48 = vunpack.c.l.b16 %v16470_v25  ;;  %v16503_v24 = vpack.c.bf16 %v6777_v43, %v6777_v43  ;;  %v6766_v14 = vmax.f32 %v20281_v1, %v6494_v30 }
 0x422   : > { %v20333_v18 = vunpack.c.l.b16 %v16471_v50  ;;  %v6497_v32 = vmax.f32 %v3807_v36, %v15473_v47  ;;  %v6767_v54 = vmax.f32 %v20286_v12, %v6495_v58  ;;  %v6768_v16 = vmax.f32 %v20283_v46, %v6496_v60  ;;  %v10221_v47 = vld [vmem:[#allocation2 + $0x90] sm:$0xe] }
 0x423   : > { %v8602_v33 = vrot.slane %v20327_v42, 3  ;;  %v8604_v59 = vrot.slane %v20330_v48, 2  ;;  %v8837_v8 = vsel %vm17735_vm7, %v16503_v24, %v8836_v3  ;;  %v16461_v51 = vpack.c.bf16 %v6766_v14, %v6766_v14  ;;  %v17404_v48 = vld [vmem:[#allocation2 + $0x3c] sm:$0xf]  ;;  %v17405_v24 = vld [vmem:[#allocation2 + $0x40] sm:$0xf] }
 0x424   : > { %8838 = vst [vmem:[#allocation2 + $0xbc] sm:$0x1] %v8837_v8  ;;  %v6769_v1 = vmax.f32 %v20288_v10, %v6497_v32  ;;  %v16462_v55 = vpack.c.bf16 %v6767_v54, %v6767_v54  ;;  %v16463_v4 = vpack.c.bf16 %v6768_v16, %v6768_v16  ;;  %v10093_v12 = vrot.slane %v10091_v23, 4  ;;  %v8832_v54 = vld [vmem:[#allocation2 + $0xb4] sm:$0xf] }
 0x425   : > { %v8168_v5 = vunpack.c.l.b16 %v16461_v51  ;;  %v10094_v46 = vshll.u32 %v20312_v38, 16  ;;  %v10100_v49 = vshll.u32 %v20337_v63, 16  ;;  %v10104_v27 = vshrl.u32 %v20337_v63, 16  ;;  %v10507_v51 = vpop.permute.xlu0 %10506 }
 0x426   : > { %v16464_v11 = vpack.c.bf16 %v6769_v1, %v6769_v1  ;;  %v8169_v9 = vunpack.c.l.b16 %v16462_v55  ;;  %v8170_v6 = vunpack.c.l.b16 %v16463_v4  ;;  %v10110_v45 = vshll.u32 %v20343_v7, 16 }
 0x427   : > { %v8588_v0 = vrot.slane %v8168_v5, 3  ;;  %v10096_v36 = vrot.slane %v10094_v46, 5  ;;  %v10102_v26 = vrot.slane %v10100_v49, 5  ;;  %v10106_v28 = vrot.slane %v10104_v27, 4 }
 0x428   : > { %v8606_v10 = vrot.slane %v20333_v18, 1  ;;  %v8171_v43 = vunpack.c.l.b16 %v16464_v11  ;;  %v8590_v23 = vrot.slane %v8169_v9, 2  ;;  %v8592_v25 = vrot.slane %v8170_v6, 1 }
 0x429   : > { %v8589_v50 = vsel %vm8207_vm11, %v8588_v0, %v8587_v31  ;;  %v10097_v30 = vor.u32 %v10096_v36, %v10093_v12  ;;  %v10107_v42 = vor.u32 %v10106_v28, %v10102_v26  ;;  %v10112_v3 = vrot.slane %v10110_v45, 5 }
 0x42a   : > { %v8591_v58 = vsel %vm8210_vm12, %v8590_v23, %v8589_v50  ;;  %v8595_v60 = vsel %vm8216_vm13, %v8594_v41, %v8171_v43  ;;  %v15870_v14 = vcombine.low %v17404_v48, %v17405_v24  ;;  %v1524_v18 = vadd.f32 %v20100_v62, %v20016_v19  ;;  %v10587_v23 = vpop.permute.xlu0 %10586 }
 0x42b   : > { %v8593_v32 = vsel %vm22432_vm15, %v8592_v25, %v8591_v58  ;;  %v8597_v31 = vsel %vm8198_vm8, %v8596_v22, %v8595_v60  ;;  %v10098_v16 = vrot.slane %v10097_v30, 4  ;;  %v10108_v8 = vrot.slane %v10107_v42, 4 }
 0x42c   : > { %v8599_v52 = vsel %vm8201_vm9, %v8598_v53, %v8597_v31  ;;  %v8677_v41 = vpack.c.b16 %v8593_v32, %v8593_v32  ;;  %v1668_v1 = vmax.f32 %v1524_v18, 0.0  ;;  %v15861_v55 = vrot.slane %v10221_v47, 9 }
 0x42d   : > { %v8601_v4 = vsel %vm8204_vm10, %v8600_v40, %v8599_v52  ;;  %v10103_v19 = vsel %vm18453_vm2, %v10098_v16, %v10102_v26  ;;  %v10113_v61 = vsel %vm18453_vm2, %v10108_v8, %v10112_v3  ;;  %v10353_v22 = vrot.slane %v20337_v63, 5 }
 0x42e   : > { %v8603_v12 = vsel %vm8207_vm11, %v8602_v33, %v8601_v4  ;;  %v8833_v56 = vsel %vm17999_vm0, %v8677_v41, %v8832_v54  ;;  %v15893_v53 = vcombine.low %v10103_v19, %v10113_v61  ;;  %v3876_v5 = vcombine.high %v1668_v1, %v1668_v1 }
 0x42f   : > { %v8605_v46 = vsel %vm8210_vm12, %v8604_v59, %v8603_v12  ;;  %8834 = vst [vmem:[#allocation2 + $0xb4] sm:$0xf] %v8833_v56  ;;  %v3883_v40 = vrot.slane %v1668_v1, %v17791_v15  ;;  %v10354_v49 = vsel %vm18372_vm4, %v15861_v55, %v10353_v22  ;;  %v10355_v27 = vrot.slane %v10353_v22, 4 }
 0x430   : > { %v8607_v11 = vsel %vm22432_vm15, %v8606_v10, %v8605_v46  ;;  %10520 = vrot.lane.b32.xlu1 %v15893_v53, %s17539_s23  ;;  %v3890_v33 = vrot.slane %v3876_v5, %v17791_v15  ;;  %v10356_v9 = vrot.slane %v20343_v7, 5  ;;  %v1516_v6 = vadd.f32 %v20100_v62, %v20020_v21  ;;  %v6910_v5 = vld [vmem:[#allocation2 + $0xc8] sm:$0x1] }
 0x431   : > { %v8678_v45 = vpack.c.b16 %v8607_v11, %v8607_v11  ;;  %v3891_v59 = vcombine.high %v3883_v40, %v3883_v40  ;;  %v15490_v0 = vrot.slane %v3883_v40, 9  ;;  %v1527_v36 = vadd.f32 %v20100_v62, %v20042_v34 }
 0x432   : > { %v3892_v26 = vcombine.high %v3890_v33, %v3890_v33  ;;  %v15492_v28 = vrot.slane %v3890_v33, 9  ;;  %v10357_v10 = vsel %vm18372_vm4, %v10355_v27, %v10356_v9  ;;  %v1666_v43 = vmax.f32 %v1516_v6, 0.0 }
 0x433   : > { %8835 = vst.msk [vmem:[#allocation2 + $0xb8] sm:$0xf] %vm6794_vm14, %v8678_v45  ;;  %v10624_v7 = vsel %vm9684_vm6, %v15870_v14, %v10507_v51  ;;  %v15491_v25 = vrot.slane %v3891_v59, 9  ;;  %v15909_v50 = vcombine.low %v10354_v49, %v10357_v10  ;;  %v1669_v21 = vmax.f32 %v1527_v36, 0.0 }
 0x434   : > { %v15493_v30 = vrot.slane %v3892_v26, 9  ;;  %v20390_v42 = vmax.f32 %v3883_v40, %v15490_v0  ;;  %v3842_v3 = vcombine.high %v1666_v43, %v1666_v43  ;;  %v3849_v34 = vrot.slane %v1666_v43, %v17791_v15 }
 0x435   : > { %v20393_v47 = vmax.f32 %v3890_v33, %v15492_v28  ;;  %10600 = vrot.lane.b32.xlu1 %v15909_v50, %s17538_s22  ;;  %v3893_v58 = vcombine.high %v1669_v21, %v1669_v21  ;;  %v3900_v60 = vrot.slane %v1669_v21, %v17791_v15  ;;  %v10667_v48 = vsel %vm9733_vm1, %v10624_v7, %v10587_v23 }
 0x436   : > { %v20398_v24 = vmax.f32 %v3891_v59, %v15491_v25  ;;  %v3856_v14 = vrot.slane %v3842_v3, %v17791_v15  ;;  %v3857_v18 = vcombine.high %v3849_v34, %v3849_v34  ;;  %v15482_v32 = vrot.slane %v3849_v34, 9  ;;  %16884 = vmatprep.mubr.msk.bf16.mxu1 %vm10739_vm3, %v10667_v48 }
 0x437   : > { %v3907_v31 = vrot.slane %v3893_v58, %v17791_v15  ;;  %v3908_v54 = vcombine.high %v3900_v60, %v3900_v60  ;;  %v15494_v16 = vrot.slane %v3900_v60, 9  ;;  %v1519_v8 = vadd.f32 %v20100_v62, %v20049_v29 }
 0x438   : > { %v20405_v52 = vmax.f32 %v3892_v26, %v15493_v30  ;;  %v3858_v41 = vcombine.high %v3856_v14, %v3856_v14  ;;  %v15483_v51 = vrot.slane %v3857_v18, 9  ;;  %v15484_v1 = vrot.slane %v3856_v14, 9 }
 0x439   : > { %v20407_v55 = vmax.f32 %v3849_v34, %v15482_v32  ;;  %v3909_v4 = vcombine.high %v3907_v31, %v3907_v31  ;;  %v15495_v19 = vrot.slane %v3908_v54, 9  ;;  %v15496_v61 = vrot.slane %v3907_v31, 9 }
 0x43a   : > { %v15485_v22 = vrot.slane %v3858_v41, 9  ;;  %v20409_v12 = vmax.f32 %v3857_v18, %v15483_v51  ;;  %v20411_v56 = vmax.f32 %v3900_v60, %v15494_v16  ;;  %v1667_v53 = vmax.f32 %v1519_v8, 0.0 }
 0x43b   : > { %v20413_v46 = vmax.f32 %v3856_v14, %v15484_v1  ;;  %v15497_v29 = vrot.slane %v3909_v4, 9  ;;  %v20415_v40 = vmax.f32 %v3908_v54, %v15495_v19  ;;  %v1540_v49 = vadd.f32 %v20100_v62, %v20088_v37 }
 0x43c   : > { %v20419_v27 = vmax.f32 %v3907_v31, %v15496_v61  ;;  %v3859_v11 = vcombine.high %v1667_v53, %v1667_v53  ;;  %v3866_v33 = vrot.slane %v1667_v53, %v17791_v15  ;;  %v1532_v9 = vadd.f32 %v20100_v62, %v20124_v13 }
 0x43d   : > { %v6509_v6 = vmax.f32 %v3858_v41, %v15485_v22  ;;  %v1672_v45 = vmax.f32 %v1540_v49, 0.0  ;;  %v1543_v59 = vadd.f32 %v20100_v62, %v20131_v20  ;;  %v6911_v0 = vsel %vm17723_vm5, 0, %v6910_v5  ;;  %v17406_v62 = vld [vmem:[%s22423_s2] ss:$0 sm:$0xff] }
 0x43e   : > { %v3873_v36 = vrot.slane %v3859_v11, %v17791_v15  ;;  %v3874_v26 = vcombine.high %v3866_v33, %v3866_v33  ;;  %v15486_v37 = vrot.slane %v3866_v33, 9  ;;  %v1670_v28 = vmax.f32 %v1532_v9, 0.0  ;;  %6912 = vst [vmem:[#allocation2 + $0xc8] sm:$0x1] %v6911_v0 }
 0x43f   : > { %v20429_v10 = vmax.f32 %v3909_v4, %v15497_v29  ;;  %v3944_v43 = vcombine.high %v1672_v45, %v1672_v45  ;;  %v3951_v23 = vrot.slane %v1672_v45, %v17791_v15  ;;  %v20432_v13 = vmax.f32 %v1543_v59, 0.0 }
 0x440   : > { %v3875_v7 = vcombine.high %v3873_v36, %v3873_v36  ;;  %v15487_v25 = vrot.slane %v3874_v26, 9  ;;  %v15488_v50 = vrot.slane %v3873_v36, 9  ;;  %v1535_v20 = vadd.f32 %v17406_v62, %v20153_v57 }
 0x441   : > { %v3958_v21 = vrot.slane %v3944_v43, %v17791_v15  ;;  %v3959_v30 = vcombine.high %v3951_v23, %v3951_v23  ;;  %v15506_v3 = vrot.slane %v3951_v23, 9  ;;  %v3910_v34 = vcombine.high %v1670_v28, %v1670_v28 }
 0x442   : > { %v15489_v58 = vrot.slane %v3875_v7, 9  ;;  %v20439_v60 = vmax.f32 %v3866_v33, %v15486_v37  ;;  %v20441_v48 = vmax.f32 %v3874_v26, %v15487_v25  ;;  %v3917_v14 = vrot.slane %v1670_v28, %v17791_v15 }
 0x443   : > { %v3960_v18 = vcombine.high %v3958_v21, %v3958_v21  ;;  %v15507_v32 = vrot.slane %v3959_v30, 9  ;;  %v15508_v31 = vrot.slane %v3958_v21, 9  ;;  %v6530_v54 = vmax.f32 %v3951_v23, %v15506_v3 }
 0x444   : > { %v20444_v16 = vmax.f32 %v3873_v36, %v15488_v50  ;;  %v3924_v57 = vrot.slane %v3910_v34, %v17791_v15  ;;  %v3925_v8 = vcombine.high %v3917_v14, %v3917_v14  ;;  %v15498_v41 = vrot.slane %v3917_v14, 9 }
 0x445   : > { %v15509_v51 = vrot.slane %v3960_v18, 9  ;;  %v6531_v1 = vmax.f32 %v3959_v30, %v15507_v32  ;;  %v6532_v4 = vmax.f32 %v3958_v21, %v15508_v31  ;;  %v6786_v19 = vmax.f32 %v20390_v42, %v6530_v54 }
 0x446   : > { %v3926_v61 = vcombine.high %v3924_v57, %v3924_v57  ;;  %v15499_v22 = vrot.slane %v3925_v8, 9  ;;  %v15500_v53 = vrot.slane %v3924_v57, 9  ;;  %v6522_v5 = vmax.f32 %v3917_v14, %v15498_v41 }
 0x447   : > { %v6533_v29 = vmax.f32 %v3960_v18, %v15509_v51  ;;  %v6787_v49 = vmax.f32 %v20398_v24, %v6531_v1  ;;  %v6788_v11 = vmax.f32 %v20393_v47, %v6532_v4  ;;  %v16481_v33 = vpack.c.bf16 %v6786_v19, %v6786_v19 }
 0x448   : > { %v15501_v9 = vrot.slane %v3926_v61, 9  ;;  %v6523_v45 = vmax.f32 %v3925_v8, %v15499_v22  ;;  %v6524_v59 = vmax.f32 %v3924_v57, %v15500_v53  ;;  %v6778_v0 = vmax.f32 %v20407_v55, %v6522_v5 }
 0x449   : > { %v6789_v36 = vmax.f32 %v20405_v52, %v6533_v29  ;;  %v16482_v26 = vpack.c.bf16 %v6787_v49, %v6787_v49  ;;  %v16483_v37 = vpack.c.bf16 %v6788_v11, %v6788_v11  ;;  %v20452_v42 = vunpack.c.l.b16 %v16481_v33 }
 0x44a   : > { %v6525_v28 = vmax.f32 %v3926_v61, %v15501_v9  ;;  %v6779_v43 = vmax.f32 %v20409_v12, %v6523_v45  ;;  %v6780_v23 = vmax.f32 %v20413_v46, %v6524_v59  ;;  %v16473_v24 = vpack.c.bf16 %v6778_v0, %v6778_v0 }
 0x44b   : > { %v20456_v25 = vmax.f32 %v3875_v7, %v15489_v58  ;;  %v16484_v47 = vpack.c.bf16 %v6789_v36, %v6789_v36  ;;  %v20458_v50 = vunpack.c.l.b16 %v16482_v26  ;;  %v20460_v62 = vunpack.c.l.b16 %v16483_v37  ;;  %v6854_v7 = vld [vmem:[#allocation2 + $0xc0] sm:$0x1] }
 0x44c   : > { %v6781_v55 = vmax.f32 %v6509_v6, %v6525_v28  ;;  %v16474_v21 = vpack.c.bf16 %v6779_v43, %v6779_v43  ;;  %v16475_v52 = vpack.c.bf16 %v6780_v23, %v6780_v23  ;;  %v8180_v30 = vunpack.c.l.b16 %v16473_v24 }
 0x44d   : > { %v20462_v3 = vunpack.c.l.b16 %v16484_v47  ;;  %v8621_v34 = vrot.slane %v20452_v42, 7  ;;  %v8623_v12 = vrot.slane %v20458_v50, 6  ;;  %v3961_v46 = vcombine.high %v20432_v13, %v20432_v13 }
 0x44e   : > { %v8625_v58 = vrot.slane %v20460_v62, 5  ;;  %v16476_v14 = vpack.c.bf16 %v6781_v55, %v6781_v55  ;;  %v8181_v18 = vunpack.c.l.b16 %v16474_v21  ;;  %v8182_v32 = vunpack.c.l.b16 %v16475_v52 }
 0x44f   : > { %v8608_v31 = vrot.slane %v8180_v30, 7  ;;  %v3968_v6 = vrot.slane %v20432_v13, %v17791_v15  ;;  %v3975_v54 = vrot.slane %v3961_v46, %v17791_v15  ;;  %v1671_v57 = vmax.f32 %v1535_v20, 0.0 }
 0x450   : > { %v8183_v8 = vunpack.c.l.b16 %v16476_v14  ;;  %v8609_v41 = vrot.slane %v8181_v18, 6  ;;  %v8611_v51 = vrot.slane %v8182_v32, 5  ;;  %v6855_v1 = vsel %vm17735_vm7, 0, %v6854_v7  ;;  %v8843_v7 = vld [vmem:[#allocation2 + $0xc8] sm:$0x1] }
 0x451   : > { %v3976_v4 = vcombine.high %v3968_v6, %v3968_v6  ;;  %v3977_v19 = vcombine.high %v3975_v54, %v3975_v54  ;;  %v15510_v61 = vrot.slane %v3968_v6, 9  ;;  %v15512_v22 = vrot.slane %v3975_v54, 9  ;;  %6856 = vst [vmem:[#allocation2 + $0xc0] sm:$0x1] %v6855_v1 }
 0x452   : > { %v8610_v53 = vsel %vm8198_vm8, %v8609_v41, %v8608_v31  ;;  %v8613_v5 = vrot.slane %v8183_v8, 4  ;;  %v3927_v29 = vcombine.high %v1671_v57, %v1671_v57  ;;  %v3934_v13 = vrot.slane %v1671_v57, %v17791_v15  ;;  %v20490_v8 = vld [vmem:[#allocation2 + $0x9c] sm:$0xf] }
 0x453   : > { %v8612_v49 = vsel %vm8201_vm9, %v8611_v51, %v8610_v53  ;;  %v15511_v20 = vrot.slane %v3976_v4, 9  ;;  %v15513_v11 = vrot.slane %v3977_v19, 9  ;;  %v6534_v33 = vmax.f32 %v3968_v6, %v15510_v61 }
 0x454   : > { %v6536_v9 = vmax.f32 %v3975_v54, %v15512_v22  ;;  %v3941_v45 = vrot.slane %v3927_v29, %v17791_v15  ;;  %v3942_v59 = vcombine.high %v3934_v13, %v3934_v13  ;;  %v15502_v0 = vrot.slane %v3934_v13, 9  ;;  %v10509_v29 = vpop.permute.xlu1 %10508 }
 0x455   : > { %v6535_v36 = vmax.f32 %v3976_v4, %v15511_v20  ;;  %v6537_v26 = vmax.f32 %v3977_v19, %v15513_v11  ;;  %v6790_v37 = vmax.f32 %v20411_v56, %v6534_v33  ;;  %v8614_v28 = vsel %vm8204_vm10, %v8613_v5, %v8612_v49  ;;  %v20495_v19 = vld [vmem:[#allocation2 + $0xa0] sm:$0xf]  ;;  %v9822_v11 = vld [vmem:[#allocation2 + $0xa4] sm:$0x1] }
 0x456   : > { %v6792_v43 = vmax.f32 %v20419_v27, %v6536_v9  ;;  %v3943_v23 = vcombine.high %v3941_v45, %v3941_v45  ;;  %v15503_v24 = vrot.slane %v3942_v59, 9  ;;  %v15504_v47 = vrot.slane %v3941_v45, 9 }
 0x457   : > { %v6791_v55 = vmax.f32 %v20415_v40, %v6535_v36  ;;  %v6793_v21 = vmax.f32 %v20429_v10, %v6537_v26  ;;  %v16485_v52 = vpack.c.bf16 %v6790_v37, %v6790_v37  ;;  %v6526_v30 = vmax.f32 %v3934_v13, %v15502_v0 }
 0x458   : > { %v16487_v46 = vpack.c.bf16 %v6792_v43, %v6792_v43  ;;  %v15505_v14 = vrot.slane %v3943_v23, 9  ;;  %v6527_v18 = vmax.f32 %v3942_v59, %v15503_v24  ;;  %v6528_v32 = vmax.f32 %v3941_v45, %v15504_v47 }
 0x459   : > { %v16486_v31 = vpack.c.bf16 %v6791_v55, %v6791_v55  ;;  %v20483_v56 = vunpack.c.l.b16 %v16485_v52  ;;  %v16504_v6 = vpack.c.bf16 %v6793_v21, %v6793_v21  ;;  %v6782_v27 = vmax.f32 %v20439_v60, %v6526_v30  ;;  %v10222_v55 = vld [vmem:[#allocation2 + $0x9c] sm:$0xe] }
 0x45a   : > { %v20486_v54 = vunpack.c.l.b16 %v16487_v46  ;;  %v6529_v57 = vmax.f32 %v3943_v23, %v15505_v14  ;;  %v6783_v40 = vmax.f32 %v20441_v48, %v6527_v18  ;;  %v6784_v10 = vmax.f32 %v20444_v16, %v6528_v32  ;;  %v17407_v46 = vld [vmem:[#allocation2 + $0x48] sm:$0xf]  ;;  %v8839_v32 = vld [vmem:[#allocation2 + $0xc0] sm:$0xf] }
 0x45b   : > { %v8627_v41 = vrot.slane %v20462_v3, 4  ;;  %v8193_v51 = vunpack.c.l.b16 %v16486_v31  ;;  %v8844_v1 = vsel %vm17735_vm7, %v16504_v6, %v8843_v7  ;;  %v16477_v4 = vpack.c.bf16 %v6782_v27, %v6782_v27  ;;  %v17408_v7 = vld [vmem:[#allocation2 + $0x4c] sm:$0xf]  ;;  %v10589_v6 = vpop.permute.xlu1 %10588 }
 0x45c   : > { %v8629_v60 = vrot.slane %v20483_v56, 3  ;;  %8845 = vst [vmem:[#allocation2 + $0xc8] sm:$0x1] %v8844_v1  ;;  %v6785_v61 = vmax.f32 %v20456_v25, %v6529_v57  ;;  %v16478_v22 = vpack.c.bf16 %v6783_v40, %v6783_v40  ;;  %v16479_v48 = vpack.c.bf16 %v6784_v10, %v6784_v10 }
 0x45d   : > { %v8633_v16 = vrot.slane %v20486_v54, 1  ;;  %v8184_v53 = vunpack.c.l.b16 %v16477_v4  ;;  %v10115_v5 = vshrl.u32 %v20490_v8, 16  ;;  %v10118_v3 = vshll.u32 %v20490_v8, 16 }
 0x45e   : > { %v16480_v13 = vpack.c.bf16 %v6785_v61, %v6785_v61  ;;  %v8185_v49 = vunpack.c.l.b16 %v16478_v22  ;;  %v8186_v20 = vunpack.c.l.b16 %v16479_v48  ;;  %v10124_v33 = vshll.u32 %v20495_v19, 16  ;;  %v9805_v61 = vld [vmem:[#allocation2 + $0xac] sm:$0xf] }
 0x45f   : > { %v8615_v9 = vrot.slane %v8184_v53, 3  ;;  %v10117_v45 = vrot.slane %v10115_v5, 4  ;;  %v10120_v59 = vrot.slane %v10118_v3, 5  ;;  %v10128_v25 = vshrl.u32 %v20495_v19, 16 }
 0x460   : > { %v8187_v0 = vunpack.c.l.b16 %v16480_v13  ;;  %v8617_v36 = vrot.slane %v8185_v49, 2  ;;  %v8619_v26 = vrot.slane %v8186_v20, 1  ;;  %v10126_v37 = vrot.slane %v10124_v33, 5 }
 0x461   : > { %v8616_v43 = vsel %vm8207_vm11, %v8615_v9, %v8614_v28  ;;  %v10121_v23 = vor.u32 %v10120_v59, %v10117_v45  ;;  %v10130_v24 = vrot.slane %v10128_v25, 4  ;;  %v10134_v47 = vshll.u32 %v9822_v11, 16  ;;  %v10223_v45 = vld [vmem:[#allocation2 + $0xa8] sm:$0xe] }
 0x462   : > { %v8631_v21 = vrot.slane %v8193_v51, 2  ;;  %v8618_v52 = vsel %vm8210_vm12, %v8617_v36, %v8616_v43  ;;  %v8622_v30 = vsel %vm8216_vm13, %v8621_v34, %v8187_v0  ;;  %v15871_v14 = vcombine.low %v17407_v46, %v17408_v7  ;;  %v9804_v51 = vld [vmem:[#allocation2 + $0xa8] sm:$0xf]  ;;  %v17409_v43 = vld [vmem:[#allocation2 + $0x54] sm:$0xf]  ;;  %v10513_v7 = vpop.permute.xlu1 %10512 }
 0x463   : > { %v8620_v18 = vsel %vm22432_vm15, %v8619_v26, %v8618_v52  ;;  %v8624_v28 = vsel %vm8198_vm8, %v8623_v12, %v8622_v30  ;;  %v10122_v31 = vrot.slane %v10121_v23, 4  ;;  %v10131_v56 = vor.u32 %v10130_v24, %v10126_v37  ;;  %v10511_v12 = vpop.permute.xlu0 %10510  ;;  %v17410_v23 = vld [vmem:[#allocation2 + $0x58] sm:$0xf] }
 0x464   : > { %v8626_v27 = vsel %vm8201_vm9, %v8625_v58, %v8624_v28  ;;  %v8680_v42 = vpack.c.b16 %v8620_v18, %v8620_v18  ;;  %v10136_v54 = vrot.slane %v10134_v47, 5  ;;  %v15862_v34 = vrot.slane %v10222_v55, 9  ;;  %v20539_v46 = vld [vmem:[#allocation2 + $0xb8] sm:$0xf]  ;;  %v9824_v28 = vld [vmem:[#allocation2 + $0xbc] sm:$0x1] }
 0x465   : > { %v8628_v57 = vsel %vm8204_vm10, %v8627_v41, %v8626_v27  ;;  %v10132_v40 = vrot.slane %v10131_v56, 4  ;;  %v10627_v10 = vsel %vm9684_vm6, %v15871_v14, %v10509_v29  ;;  %v10360_v50 = vrot.slane %v20495_v19, 5 }
 0x466   : > { %v8630_v1 = vsel %vm8207_vm11, %v8629_v60, %v8628_v57  ;;  %v8840_v4 = vsel %vm17999_vm0, %v8680_v42, %v8839_v32  ;;  %v10127_v62 = vsel %vm18453_vm2, %v10122_v31, %v10126_v37  ;;  %v10669_v58 = vsel %vm9733_vm1, %v10627_v10, %v10589_v6  ;;  %v9823_v60 = vld [vmem:[#allocation2 + $0xb0] sm:$0x1] }
 0x467   : > { %v8632_v41 = vsel %vm8210_vm12, %v8631_v21, %v8630_v1  ;;  %8841 = vst [vmem:[#allocation2 + $0xc0] sm:$0xf] %v8840_v4  ;;  %v10137_v22 = vsel %vm18453_vm2, %v10132_v40, %v10136_v54  ;;  %v10362_v48 = vrot.slane %v10360_v50, 4  ;;  %v10363_v53 = vrot.slane %v9822_v11, 5  ;;  %16885 = vmatmul.mubr.msk.bf16.gmra.mrb[8].mxu1 %vm10739_vm3, %v10669_v58  ;;  %v10591_v47 = vpop.permute.xlu0 %10590  ;;  %v10224_v1 = vld [vmem:[#allocation2 + $0xb4] sm:$0xe] }
 0x468   : > { %v8634_v5 = vsel %vm22432_vm15, %v8633_v16, %v8632_v41  ;;  %v15894_v3 = vcombine.low %v10127_v62, %v10137_v22  ;;  %v10139_v29 = vshrl.u32 %v9804_v51, 16  ;;  %v10142_v13 = vshll.u32 %v9804_v51, 16  ;;  %v9806_v16 = vld [vmem:[#allocation2 + $0xb4] sm:$0xf] }
 0x469   : > { %v8681_v49 = vpack.c.b16 %v8634_v5, %v8634_v5  ;;  %v10364_v20 = vsel %vm18372_vm4, %v10362_v48, %v10363_v53  ;;  %v10148_v33 = vshll.u32 %v9805_v61, 16  ;;  %v10152_v9 = vshrl.u32 %v9805_v61, 16 }
 0x46a   : > { %10522 = vrot.lane.b32.xlu0 %v15894_v3, %s17539_s23  ;;  %v10361_v11 = vsel %vm18372_vm4, %v15862_v34, %v10360_v50  ;;  %v10141_v59 = vrot.slane %v10139_v29, 4  ;;  %v10144_v25 = vrot.slane %v10142_v13, 5  ;;  %v10158_v0 = vshll.u32 %v9823_v60, 16  ;;  %v10593_v3 = vpop.permute.xlu1 %10592 }
 0x46b   : > { %8842 = vst.msk [vmem:[#allocation2 + $0xc4] sm:$0xf] %vm6794_vm14, %v8681_v49  ;;  %v15910_v36 = vcombine.low %v10361_v11, %v10364_v20  ;;  %v10150_v26 = vrot.slane %v10148_v33, 5  ;;  %v10154_v37 = vrot.slane %v10152_v9, 4  ;;  %v15872_v24 = vcombine.low %v17409_v43, %v17410_v23  ;;  %v20560_v11 = vld [vmem:[#allocation2 + $0xc8] sm:$0x1] }
 0x46c   : > { %v10145_v55 = vor.u32 %v10144_v25, %v10141_v59  ;;  %v10160_v21 = vrot.slane %v10158_v0, 5  ;;  %v15863_v52 = vrot.slane %v10223_v45, 9  ;;  %v10367_v30 = vrot.slane %v9805_v61, 5  ;;  %v20562_v25 = vld [vmem:[#allocation2 + $0x18] sm:$0xf] }
 0x46d   : > { %v10155_v14 = vor.u32 %v10154_v37, %v10150_v26  ;;  %v10630_v18 = vsel %vm9684_vm6, %v15872_v24, %v10511_v12  ;;  %v10163_v32 = vshrl.u32 %v9806_v16, 16  ;;  %v10166_v31 = vshll.u32 %v9806_v16, 16 }
 0x46e   : > { %10602 = vrot.lane.b32.xlu0 %v15910_v36, %s17538_s22  ;;  %v10146_v56 = vrot.slane %v10145_v55, 4  ;;  %v10369_v6 = vrot.slane %v10367_v30, 4  ;;  %v10370_v27 = vrot.slane %v9823_v60, 5  ;;  %v10671_v42 = vsel %vm9733_vm1, %v10630_v18, %v10591_v47  ;;  %v9808_v41 = vld [vmem:[#allocation2 + $0xc0] sm:$0xf] }
 0x46f   : > { %v10156_v54 = vrot.slane %v10155_v14, 4  ;;  %16888 = vmatprep.mubr.msk.bf16.mxu1 %vm10739_vm3, %v10671_v42  ;;  %v10165_v34 = vrot.slane %v10163_v32, 4  ;;  %v10168_v57 = vrot.slane %v10166_v31, 5  ;;  %v10172_v40 = vshll.u32 %v20539_v46, 16  ;;  %v17411_v60 = vld [vmem:[#allocation2 + $0x60] sm:$0xf] }
 0x470   : > { %v10368_v10 = vsel %vm18372_vm4, %v15863_v52, %v10367_v30  ;;  %v10371_v50 = vsel %vm18372_vm4, %v10369_v6, %v10370_v27  ;;  %v10176_v51 = vshrl.u32 %v20539_v46, 16  ;;  %v10182_v12 = vshll.u32 %v9824_v28, 16  ;;  %v20585_v30 = vld [vmem:[#allocation2 + $0x1c] sm:$0xf]  ;;  %v20593_v32 = vld [vmem:[#allocation2 + $0x20] sm:$0x1] }
 0x471   : > { %v10151_v4 = vsel %vm18453_vm2, %v10146_v56, %v10150_v26  ;;  %v10161_v62 = vsel %vm18453_vm2, %v10156_v54, %v10160_v21  ;;  %v10169_v58 = vor.u32 %v10168_v57, %v10165_v34  ;;  %v10174_v61 = vrot.slane %v10172_v40, 5  ;;  %v20595_v31 = vld [vmem:[#allocation2 + $0xc0] sm:$0xe] }
 0x472   : > { %v15895_v22 = vcombine.low %v10151_v4, %v10161_v62  ;;  %v15911_v48 = vcombine.low %v10368_v10, %v10371_v50  ;;  %v10178_v53 = vrot.slane %v10176_v51, 4  ;;  %v15873_v5 = vcombine.low %v17411_v60, %v17412_v35  ;;  %v20556_v33 = vld [vmem:[#allocation2 + $0xc4] sm:$0xf] }
 0x473   : > { %v10170_v29 = vrot.slane %v10169_v58, 4  ;;  %v10184_v13 = vrot.slane %v10182_v12, 5  ;;  %v15864_v49 = vrot.slane %v10224_v1, 9  ;;  %v10374_v20 = vrot.slane %v20539_v46, 5  ;;  %v17413_v58 = vld [vmem:[#allocation2 + $0x6c] sm:$0xf] }
 0x474   : > { %10524 = vrot.lane.b32.xlu1 %v15895_v22, %s17539_s23  ;;  %v10179_v9 = vor.u32 %v10178_v53, %v10174_v61  ;;  %v10633_v45 = vsel %vm9684_vm6, %v15873_v5, %v10513_v7  ;;  %v10187_v59 = vshrl.u32 %v9808_v41, 16  ;;  %v10377_v36 = vrot.slane %v9824_v28, 5  ;;  %v10515_v22 = vpop.permute.xlu0 %10514  ;;  %v20605_v53 = vld [vmem:[#allocation2 + $0x7c] sm:$0xf]  ;;  %v20609_v35 = vld [vmem:[#allocation2 + $0x84] sm:$0xf] }
 0x475   : > { %v10175_v0 = vsel %vm18453_vm2, %v10170_v29, %v10174_v61  ;;  %v10376_v16 = vrot.slane %v10374_v20, 4  ;;  %v10673_v26 = vsel %vm9733_vm1, %v10633_v45, %v10593_v3  ;;  %v22433_v37 = vmov 0   ;;  %v17414_v61 = vld [vmem:[#allocation2 + $0x70] sm:$0xf]  ;;  %v20611_v5 = vld [vmem:[#allocation2 + $0x88] sm:$0xf] }
 0x476   : > { %6795 = vst.msk [vmem:[#allocation2] sm:$0xf] %vm6794_vm14, %v22433_v37  ;;  %6796 = vst.msk [vmem:[#allocation2 + $0x4] sm:$0xf] %vm6794_vm14, %v22433_v37  ;;  %vm22515_vm0 = vcmask 253952   ;;  %v10180_v43 = vrot.slane %v10179_v9, 4  ;;  %16889 = vmatmul.mubr.msk.bf16.gmra.mrb[12].mxu1 %vm10739_vm3, %v10673_v26  ;;  %v10375_v14 = vsel %vm18372_vm4, %v15864_v49, %v10374_v20  ;;  %v15876_v3 = vcombine.low %v20609_v35, %v20611_v5 }
 0x477   : > { %6798 = vst.msk [vmem:[#allocation2 + $0x8] sm:$0x1] %vm22515_vm0, %v22433_v37  ;;  %vm22516_vm15 = vmmov %vm22515_vm0  ;;  %v10189_v23 = vrot.slane %v10187_v59, 4  ;;  %v10190_v24 = vshll.u32 %v9808_v41, 16  ;;  %v10196_v47 = vshll.u32 %v20556_v33, 16  ;;  %v10378_v55 = vsel %vm18372_vm4, %v10376_v16, %v10377_v36  ;;  %v17319_v36 = vld [vmem:[%s22424_s3 + $0x8] sm:$0xff]  }
 0x478   : > { %6800 = vst.msk [vmem:[#allocation2 + $0xcc] sm:$0xf] %vm6794_vm14, %v22433_v37  ;;  %6801 = vst.msk [vmem:[#allocation2 + $0xd0] sm:$0xf] %vm6794_vm14, %v22433_v37  ;;  %v10200_v21 = vshrl.u32 %v20556_v33, 16  ;;  %v10206_v52 = vshll.u32 %v20560_v11, 16  ;;  %10604 = vrot.lane.b32.xlu1 %v15911_v48, %s17538_s22  ;;  %v10185_v7 = vsel %vm18453_vm2, %v10180_v43, %v10184_v13  ;;  %v15912_v6 = vcombine.low %v10375_v14, %v10378_v55 }
 0x479   : > { %6802 = vst.msk [vmem:[#allocation2 + $0xd4] sm:$0x1] %vm22516_vm15, %v22433_v37  ;;  %v8946_v46 = vshrl.u32 %v20562_v25, 16  ;;  %v10192_v18 = vrot.slane %v10190_v24, 5  ;;  %v10198_v28 = vrot.slane %v10196_v47, 5  ;;  %v15896_v56 = vcombine.low %v10175_v0, %v10185_v7  ;;  %16910 = vmatprep.subr.bf16.mxu1 %v17319_v36 }
 0x47a   : > { %v10202_v27 = vrot.slane %v10200_v21, 4  ;;  %v10208_v42 = vrot.slane %v10206_v52, 5  ;;  %v8949_v57 = vshll.u32 %v20562_v25, 16  ;;  %v8955_v40 = vshll.u32 %v20585_v30, 16  ;;  %v20603_v48 = vld [vmem:[#allocation2 + $0x78] sm:$0xf]  ;;  %16911 = vmatpush3.bf16.msra.mxu1 %v17319_v36 }
 0x47b   : > { %v10193_v54 = vor.u32 %v10192_v18, %v10189_v23  ;;  %v8948_v34 = vrot.slane %v8946_v46, 4  ;;  %10526 = vrot.lane.b32.xlu0 %v15896_v56, %s17539_s23  ;;  %v8959_v50 = vshrl.u32 %v20585_v30, 16  ;;  %v8965_v51 = vshll.u32 %v20593_v32, 16  ;;  %v20658_v36 = vld [vmem:[#allocation2 + $0x38] sm:$0x1] }
 0x47c   : > { %v10203_v10 = vor.u32 %v10202_v27, %v10198_v28  ;;  %v15865_v12 = vrot.slane %v20595_v31, 9  ;;  %v15874_v41 = vcombine.low %v17413_v58, %v17414_v61  ;;  %v15875_v60 = vcombine.low %v20603_v48, %v20605_v53  ;;  %v9283_v31 = vld [vmem:[#allocation2 + $0x18] sm:$0xe] }
 0x47d   : > { %v6806_v1 = vld [vmem:[#allocation2] sm:$0x1]  ;;  %v8847_v62 = vld [vmem:[#allocation2 + $0x4] sm:$0xf]  ;;  %v15878_v29 = vcombine.low %v20490_v8, %v20495_v19  ;;  %v9281_v45 = vld [vmem:[#allocation2] sm:$0xe]  ;;  %v15877_v52 = vcombine.low %v20312_v38, %v20337_v63 }
 0x47e   : > { %v6862_v4 = vld [vmem:[#allocation2 + $0x8] sm:$0x1]  ;;  %v6807_v13 = vsel %vm17735_vm7, 0, %v6806_v1  ;;  %v8907_v20 = vshll.u32 %v8847_v62, 16  ;;  %v8911_v9 = vshrl.u32 %v8847_v62, 16  ;;  %v15786_v59 = vrot.slane %v9281_v45, 9 }
 0x47f   : > { %v6863_v49 = vsel %vm17723_vm5, 0, %v6862_v4  ;;  %6808 = vst [vmem:[#allocation2] sm:$0x1] %v6807_v13  ;;  %v9350_v25 = vrot.slane %v8847_v62, 5  ;;  %v10194_v0 = vrot.slane %v10193_v54, 4  ;;  %v10204_v16 = vrot.slane %v10203_v10, 4  ;;  %10606 = vrot.lane.b32.xlu0 %v15912_v6, %s17538_s22  ;;  %v10595_v54 = vpop.permute.xlu0 %10594 }
 0x480   : > { %6864 = vst [vmem:[#allocation2 + $0x8] sm:$0x1] %v6863_v49  ;;  %v20625_v26 = vrot.slane %v8907_v20, 5  ;;  %v8913_v43 = vrot.slane %v8911_v9, 4  ;;  %v8951_v23 = vrot.slane %v8949_v57, 5  ;;  %v8957_v24 = vrot.slane %v8955_v40, 5 }
 0x481   : > { %v20629_v47 = vsel %vm18372_vm4, %v15786_v59, %v9350_v25  ;;  %v10199_v55 = vsel %vm18453_vm2, %v10194_v0, %v10198_v28  ;;  %v10209_v21 = vsel %vm18453_vm2, %v10204_v16, %v10208_v42  ;;  %v8961_v18 = vrot.slane %v8959_v50, 4  ;;  %v8854_v57 = vld [vmem:[#allocation2 + $0x30] sm:$0xf] }
 0x482   : > { %v8914_v46 = vor.u32 %v8913_v43, %v20625_v26  ;;  %v15897_v7 = vcombine.low %v10199_v55, %v10209_v21  ;;  %v8952_v14 = vor.u32 %v8951_v23, %v8948_v34  ;;  %v9352_v56 = vrot.slane %v9350_v25, 4  ;;  %v8848_v21 = vld [vmem:[#allocation2 + $0xc] sm:$0xf] }
 0x483   : > { %v8967_v6 = vrot.slane %v8965_v51, 5  ;;  %v10636_v27 = vsel %vm9684_vm6, %v15874_v41, %v10515_v22  ;;  %v10381_v28 = vrot.slane %v20556_v33, 5  ;;  %v8962_v10 = vor.u32 %v8961_v18, %v8957_v24 }
 0x484   : > { %v8915_v42 = vrot.slane %v8914_v46, 4  ;;  %10528 = vrot.lane.b32.xlu1 %v15897_v7, %s17539_s23  ;;  %v8953_v40 = vrot.slane %v8952_v14, 4  ;;  %v10384_v1 = vrot.slane %v20560_v11, 5  ;;  %v15788_v34 = vrot.slane %v9283_v31, 9  ;;  %v20668_v46 = vld [vmem:[#allocation2 + $0x10] sm:$0xf] }
 0x485   : > { %v10383_v4 = vrot.slane %v10381_v28, 4  ;;  %v9364_v50 = vrot.slane %v20585_v30, 5  ;;  %v9367_v62 = vrot.slane %v20593_v32, 5  ;;  %v8963_v61 = vrot.slane %v8962_v10, 4 }
 0x486   : > { %v8846_v51 = vld [vmem:[#allocation2] sm:$0xf]  ;;  %v10382_v33 = vsel %vm18372_vm4, %v15865_v12, %v10381_v28  ;;  %v10675_v41 = vsel %vm9733_vm1, %v10636_v27, %v10595_v54  ;;  %v8994_v22 = vshrl.u32 %v8854_v57, 16  ;;  %v8958_v11 = vsel %vm18453_vm2, %v8953_v40, %v8957_v24  ;;  %v8855_v12 = vld [vmem:[#allocation2 + $0x34] sm:$0xf] }
 0x487   : > { %v8878_v58 = vld [vmem:[#allocation2 + $0x8] sm:$0x1]  ;;  %v8898_v13 = vshrl.u32 %v8846_v51, 16  ;;  %v8901_v49 = vshll.u32 %v8846_v51, 16  ;;  %16892 = vmatprep.mubr.msk.bf16.mxu1 %vm10739_vm3, %v10675_v41  ;;  %v8968_v30 = vsel %vm18453_vm2, %v8963_v61, %v8967_v6  ;;  %v10385_v32 = vsel %vm18372_vm4, %v10383_v4, %v10384_v1 }
 0x488   : > { %v8917_v20 = vshll.u32 %v8878_v58, 16  ;;  %v9353_v9 = vrot.slane %v8878_v58, 5  ;;  %v9366_v45 = vrot.slane %v9364_v50, 4  ;;  %v20662_v23 = vcombine.low %v8958_v11, %v8968_v30 }
 0x489   : > { %v8900_v59 = vrot.slane %v8898_v13, 4  ;;  %v8903_v25 = vrot.slane %v8901_v49, 5  ;;  %v15913_v24 = vcombine.low %v10382_v33, %v10385_v32  ;;  %v20666_v55 = vsel %vm18372_vm4, %v15788_v34, %v9364_v50  ;;  %v9285_v33 = vld [vmem:[#allocation2 + $0x30] sm:$0xe] }
 0x48a   : > { %v8919_v0 = vrot.slane %v8917_v20, 5  ;;  %v20656_v16 = vsel %vm18372_vm4, %v9352_v56, %v9353_v9  ;;  %v20674_v18 = vsel %vm18372_vm4, %v9366_v45, %v9367_v62  ;;  %v8996_v31 = vrot.slane %v8994_v22, 4 }
 0x48b   : > { %v15834_v43 = vcombine.low %v20629_v47, %v20656_v16  ;;  %v8904_v7 = vor.u32 %v8903_v25, %v8900_v59  ;;  %10608 = vrot.lane.b32.xlu1 %v15913_v24, %s17538_s22  ;;  %v8997_v47 = vshll.u32 %v8854_v57, 16  ;;  %v9003_v56 = vshll.u32 %v8855_v12, 16  ;;  %v8879_v57 = vld [vmem:[#allocation2 + $0x14] sm:$0x1]  ;;  %v9282_v25 = vld [vmem:[#allocation2 + $0xc] sm:$0xe] }
 0x48c   : > { %v8920_v14 = vsel %vm18453_vm2, %v8915_v42, %v8919_v0  ;;  %v9007_v6 = vshrl.u32 %v8855_v12, 16  ;;  %v9013_v27 = vshll.u32 %v20658_v36, 16  ;;  %v8922_v54 = vshrl.u32 %v8848_v21, 16  ;;  %v17320_v42 = vld [vmem:[%s22424_s3 + $0x10] sm:$0xff]  }
 0x48d   : > { %v8905_v28 = vrot.slane %v8904_v7, 4  ;;  %v8925_v40 = vshll.u32 %v8848_v21, 16  ;;  %v8931_v10 = vshll.u32 %v20668_v46, 16  ;;  %v15836_v1 = vcombine.low %v20666_v55, %v20674_v18  ;;  %16912 = vmatprep.subr.bf16.mxu1 %v17320_v42  ;;  %v8858_v7 = vld [vmem:[#allocation2 + $0x48] sm:$0xf] }
 0x48e   : > { %v8999_v4 = vrot.slane %v8997_v47, 5  ;;  %v9005_v34 = vrot.slane %v9003_v56, 5  ;;  %v9009_v50 = vrot.slane %v9007_v6, 4  ;;  %v8924_v51 = vrot.slane %v8922_v54, 4  ;;  %16913 = vmatpush3.bf16.msra.mxu1 %v17320_v42  ;;  %v20698_v56 = vld [vmem:[#allocation2 + $0x4c] sm:$0xf] }
 0x48f   : > { %v8910_v62 = vsel %vm18453_vm2, %v8905_v28, %v20625_v26  ;;  %v8927_v58 = vrot.slane %v8925_v40, 5  ;;  %v8933_v61 = vrot.slane %v8931_v10, 5  ;;  %v8935_v49 = vshrl.u32 %v20668_v46, 16  ;;  %v20705_v54 = vld [vmem:[#allocation2 + $0x50] sm:$0x1] }
 0x490   : > { %v15818_v41 = vcombine.low %v8910_v62, %v8920_v14  ;;  %v9000_v22 = vor.u32 %v8999_v4, %v8996_v31  ;;  %v9010_v13 = vor.u32 %v9009_v50, %v9005_v34  ;;  %v9015_v20 = vrot.slane %v9013_v27, 5  ;;  %v8862_v18 = vld [vmem:[#allocation2 + $0x60] sm:$0xf] }
 0x491   : > { %v8928_v9 = vor.u32 %v8927_v58, %v8924_v51  ;;  %v8941_v11 = vshll.u32 %v8879_v57, 16  ;;  %v9378_v30 = vrot.slane %v8855_v12, 5  ;;  %v8937_v26 = vrot.slane %v8935_v49, 4  ;;  %v8852_v58 = vld [vmem:[#allocation2 + $0x24] sm:$0xf] }
 0x492   : > { %9572 = vrot.lane.b32.xlu0 %v15818_v41, %s17539_s23  ;;  %v9001_v32 = vrot.slane %v9000_v22, 4  ;;  %v9011_v45 = vrot.slane %v9010_v13, 4  ;;  %v15790_v59 = vrot.slane %v9285_v33, 9  ;;  %v9381_v21 = vrot.slane %v20658_v36, 5  ;;  %v20719_v41 = vld [vmem:[#allocation2 + $0x28] sm:$0xf] }
 0x493   : > { %v8929_v0 = vrot.slane %v8928_v9, 4  ;;  %v8943_v16 = vrot.slane %v8941_v11, 5  ;;  %v9380_v24 = vrot.slane %v9378_v30, 4  ;;  %v8938_v12 = vor.u32 %v8937_v26, %v8933_v61  ;;  %v20726_v9 = vld [vmem:[#allocation2 + $0x2c] sm:$0x1]  ;;  %v10517_v11 = vpop.permute.xlu1 %10516 }
 0x494   : > { %v9006_v14 = vsel %vm18453_vm2, %v9001_v32, %v9005_v34  ;;  %v9016_v31 = vsel %vm18453_vm2, %v9011_v45, %v9015_v20  ;;  %v20696_v47 = vsel %vm18372_vm4, %v15790_v59, %v9378_v30  ;;  %v15787_v36 = vrot.slane %v9282_v25, 9 }
 0x495   : > { %v20700_v6 = vcombine.low %v9006_v14, %v9016_v31  ;;  %v8934_v27 = vsel %vm18453_vm2, %v8929_v0, %v8933_v61  ;;  %v9357_v28 = vrot.slane %v20668_v46, 5  ;;  %v8939_v40 = vrot.slane %v8938_v12, 4 }
 0x496   : > { %9652 = vrot.lane.b32.xlu0 %v15834_v43, %s17538_s22  ;;  %v20710_v10 = vsel %vm18372_vm4, %v9380_v24, %v9381_v21  ;;  %v9360_v42 = vrot.slane %v8879_v57, 5  ;;  %v9042_v4 = vshrl.u32 %v8858_v7, 16  ;;  %v9045_v62 = vshll.u32 %v8858_v7, 16  ;;  %v17321_v57 = vld [vmem:[%s22424_s3 + $0x18] sm:$0xff]   ;;  %v9287_v24 = vld [vmem:[#allocation2 + $0x48] sm:$0xe] }
 0x497   : > { %v9358_v34 = vsel %vm18372_vm4, %v15787_v36, %v9357_v28  ;;  %v9359_v50 = vrot.slane %v9357_v28, 4  ;;  %v9051_v51 = vshll.u32 %v20698_v56, 16  ;;  %v8944_v46 = vsel %vm18453_vm2, %v8939_v40, %v8943_v16  ;;  %16914 = vmatprep.subr.bf16.mxu1 %v17321_v57  ;;  %v10597_v55 = vpop.permute.xlu1 %10596 }
 0x498   : > { %v9044_v61 = vrot.slane %v9042_v4, 4  ;;  %v9055_v43 = vshrl.u32 %v20698_v56, 16  ;;  %v9061_v33 = vshll.u32 %v20705_v54, 16  ;;  %v15819_v22 = vcombine.low %v8934_v27, %v8944_v46  ;;  %16915 = vmatpush3.bf16.msra.mxu1 %v17321_v57 }
 0x499   : > { %v9361_v13 = vsel %vm18372_vm4, %v9359_v50, %v9360_v42  ;;  %v9047_v49 = vrot.slane %v9045_v62, 5  ;;  %v9053_v20 = vrot.slane %v9051_v51, 5  ;;  %v15838_v30 = vcombine.low %v20696_v47, %v20710_v10  ;;  %v9284_v42 = vld [vmem:[#allocation2 + $0x24] sm:$0xe] }
 0x49a   : > { %9576 = vrot.lane.b32.xlu0 %v20662_v23, %s17539_s23  ;;  %v15835_v32 = vcombine.low %v9358_v34, %v9361_v13  ;;  %v9057_v45 = vrot.slane %v9055_v43, 4  ;;  %v8970_v26 = vshrl.u32 %v8852_v58, 16  ;;  %9574 = vrot.lane.b32.xlu1 %v15819_v22, %s17539_s23  ;;  %v8973_v25 = vshll.u32 %v8852_v58, 16  ;;  %v20761_v22 = vld [vmem:[#allocation2 + $0x68] sm:$0x1] }
 0x49b   : > { %v9048_v59 = vor.u32 %v9047_v49, %v9044_v61  ;;  %v8979_v0 = vshll.u32 %v20719_v41, 16  ;;  %v8983_v16 = vshrl.u32 %v20719_v41, 16  ;;  %v9063_v7 = vrot.slane %v9061_v33, 5  ;;  %v8863_v61 = vld [vmem:[#allocation2 + $0x64] sm:$0xf] }
 0x49c   : > { %v9058_v21 = vor.u32 %v9057_v45, %v9053_v20  ;;  %v8972_v23 = vrot.slane %v8970_v26, 4  ;;  %v8989_v14 = vshll.u32 %v20726_v9, 16  ;;  %v8975_v12 = vrot.slane %v8973_v25, 5  ;;  %v8856_v49 = vld [vmem:[#allocation2 + $0x3c] sm:$0xf] }
 0x49d   : > { %v9049_v31 = vrot.slane %v9048_v59, 4  ;;  %v8981_v47 = vrot.slane %v8979_v0, 5  ;;  %v8985_v27 = vrot.slane %v8983_v16, 4  ;;  %v10639_v28 = vsel %vm9684_vm6, %v15875_v60, %v10517_v11  ;;  %v20771_v11 = vld [vmem:[#allocation2 + $0x40] sm:$0xf] }
 0x49e   : > { %9656 = vrot.lane.b32.xlu0 %v15836_v1, %s17538_s22  ;;  %v9059_v36 = vrot.slane %v9058_v21, 4  ;;  %v15792_v40 = vrot.slane %v9287_v24, 9  ;;  %v9392_v10 = vrot.slane %v20698_v56, 5  ;;  %9654 = vrot.lane.b32.xlu1 %v15835_v32, %s17538_s22  ;;  %v8976_v34 = vor.u32 %v8975_v12, %v8972_v23 }
 0x49f   : > { %v9054_v4 = vsel %vm18453_vm2, %v9049_v31, %v9053_v20  ;;  %v8986_v50 = vor.u32 %v8985_v27, %v8981_v47  ;;  %v8991_v62 = vrot.slane %v8989_v14, 5  ;;  %v9395_v60 = vrot.slane %v20705_v54, 5 }
 0x4a0   : > { %v9064_v1 = vsel %vm18453_vm2, %v9059_v36, %v9063_v7  ;;  %v20752_v48 = vsel %vm18372_vm4, %v15792_v40, %v9392_v10  ;;  %v9394_v53 = vrot.slane %v9392_v10, 4  ;;  %v8977_v56 = vrot.slane %v8976_v34, 4  ;;  %v8883_v7 = vld [vmem:[#allocation2 + $0x44] sm:$0x1]  ;;  %v9289_v36 = vld [vmem:[#allocation2 + $0x60] sm:$0xe] }
 0x4a1   : > { %v8987_v51 = vrot.slane %v8986_v50, 4  ;;  %v15789_v58 = vrot.slane %v9284_v42, 9  ;;  %v9371_v46 = vrot.slane %v20719_v41, 5  ;;  %v15824_v43 = vcombine.low %v9054_v4, %v9064_v1 }
 0x4a2   : > { %9580 = vrot.lane.b32.xlu0 %v20700_v6, %s17539_s23  ;;  %v9396_v33 = vsel %vm18372_vm4, %v9394_v53, %v9395_v60  ;;  %v10677_v57 = vsel %vm9733_vm1, %v10639_v28, %v10597_v55  ;;  %v9090_v13 = vshrl.u32 %v8862_v18, 16  ;;  %v8982_v54 = vsel %vm18453_vm2, %v8977_v56, %v8981_v47 }
 0x4a3   : > { %v8992_v41 = vsel %vm18453_vm2, %v8987_v51, %v8991_v62  ;;  %v9372_v20 = vsel %vm18372_vm4, %v15789_v58, %v9371_v46  ;;  %v9374_v6 = vrot.slane %v20726_v9, 5  ;;  %16893 = vmatmul.mubr.msk.bf16.gmra.mrb[16].mxu1 %vm10739_vm3, %v10677_v57  ;;  %v9373_v45 = vrot.slane %v9371_v46, 4  ;;  %v9286_v62 = vld [vmem:[#allocation2 + $0x3c] sm:$0xe]  ;;  %v8866_v58 = vld [vmem:[#allocation2 + $0x78] sm:$0xf] }
 0x4a4   : > { %v15821_v32 = vcombine.low %v8982_v54, %v8992_v41  ;;  %v9092_v26 = vrot.slane %v9090_v13, 4  ;;  %v9093_v59 = vshll.u32 %v8862_v18, 16  ;;  %v9099_v25 = vshll.u32 %v8863_v61, 16  ;;  %v20791_v41 = vld [vmem:[#allocation2 + $0x7c] sm:$0xf] }
 0x4a5   : > { %v9103_v0 = vshrl.u32 %v8863_v61, 16  ;;  %v9109_v16 = vshll.u32 %v20761_v22, 16  ;;  %v9018_v24 = vshrl.u32 %v8856_v49, 16  ;;  %v9375_v9 = vsel %vm18372_vm4, %v9373_v45, %v9374_v6 }
 0x4a6   : > { %9660 = vrot.lane.b32.xlu0 %v15838_v30, %s17538_s22  ;;  %9578 = vrot.lane.b32.xlu1 %v15821_v32, %s17539_s23  ;;  %v9095_v21 = vrot.slane %v9093_v59, 5  ;;  %v9021_v23 = vshll.u32 %v8856_v49, 16  ;;  %v9027_v14 = vshll.u32 %v20771_v11, 16  ;;  %v15840_v31 = vcombine.low %v20752_v48, %v9396_v33  ;;  %v17322_v59 = vld [vmem:[%s22424_s3 + $0x20] sm:$0xff]  }
 0x4a7   : > { %v15837_v12 = vcombine.low %v9372_v20, %v9375_v9  ;;  %v9101_v47 = vrot.slane %v9099_v25, 5  ;;  %v9105_v27 = vrot.slane %v9103_v0, 4  ;;  %v9111_v40 = vrot.slane %v9109_v16, 5  ;;  %v20793_v20 = vld [vmem:[#allocation2 + $0x80] sm:$0x1]  ;;  %16916 = vmatprep.subr.bf16.mxu1 %v17322_v59 }
 0x4a8   : > { %v9096_v28 = vor.u32 %v9095_v21, %v9092_v26  ;;  %v9020_v10 = vrot.slane %v9018_v24, 4  ;;  %v9023_v30 = vrot.slane %v9021_v23, 5  ;;  %v9029_v4 = vrot.slane %v9027_v14, 5  ;;  %v8860_v26 = vld [vmem:[#allocation2 + $0x54] sm:$0xf]  ;;  %16917 = vmatpush3.bf16.msra.mxu1 %v17322_v59 }
 0x4a9   : > { %v9106_v42 = vor.u32 %v9105_v27, %v9101_v47  ;;  %v9031_v34 = vshrl.u32 %v20771_v11, 16  ;;  %v9037_v50 = vshll.u32 %v8883_v7, 16  ;;  %v15794_v1 = vrot.slane %v9289_v36, 9 }
 0x4aa   : > { %9584 = vrot.lane.b32.xlu0 %v15824_v43, %s17539_s23  ;;  %9658 = vrot.lane.b32.xlu1 %v15837_v12, %s17538_s22  ;;  %v9097_v55 = vrot.slane %v9096_v28, 4  ;;  %v9024_v18 = vor.u32 %v9023_v30, %v9020_v10  ;;  %v9406_v48 = vrot.slane %v8863_v61, 5  ;;  %v9409_v51 = vrot.slane %v20761_v22, 5  ;;  %v8861_v12 = vld [vmem:[#allocation2 + $0x58] sm:$0xf]  ;;  %v10519_v30 = vpop.permute.xlu0 %10518 }
 0x4ab   : > { %v9107_v53 = vrot.slane %v9106_v42, 4  ;;  %v9033_v60 = vrot.slane %v9031_v34, 4  ;;  %v9039_v56 = vrot.slane %v9037_v50, 5  ;;  %v15791_v13 = vrot.slane %v9286_v62, 9  ;;  %v9291_v62 = vld [vmem:[#allocation2 + $0x78] sm:$0xe] }
 0x4ac   : > { %v9102_v46 = vsel %vm18453_vm2, %v9097_v55, %v9101_v47  ;;  %v9025_v33 = vrot.slane %v9024_v18, 4  ;;  %v9408_v57 = vrot.slane %v9406_v48, 4  ;;  %v9407_v54 = vsel %vm18372_vm4, %v15794_v1, %v9406_v48  ;;  %v20810_v47 = vld [vmem:[#allocation2 + $0x5c] sm:$0x1] }
 0x4ad   : > { %v9112_v43 = vsel %vm18453_vm2, %v9107_v53, %v9111_v40  ;;  %v9034_v49 = vor.u32 %v9033_v60, %v9029_v4  ;;  %v9385_v61 = vrot.slane %v20771_v11, 5  ;;  %v9388_v32 = vrot.slane %v8883_v7, 5 }
 0x4ae   : > { %9664 = vrot.lane.b32.xlu0 %v15840_v31, %s17538_s22  ;;  %v15826_v22 = vcombine.low %v9102_v46, %v9112_v43  ;;  %v9410_v6 = vsel %vm18372_vm4, %v9408_v57, %v9409_v51  ;;  %v9138_v45 = vshrl.u32 %v8866_v58, 16  ;;  %v9030_v11 = vsel %vm18453_vm2, %v9025_v33, %v9029_v4 }
 0x4af   : > { %v9035_v25 = vrot.slane %v9034_v49, 4  ;;  %v15842_v0 = vcombine.low %v9407_v54, %v9410_v6  ;;  %v9387_v16 = vrot.slane %v9385_v61, 4  ;;  %v9141_v9 = vshll.u32 %v8866_v58, 16  ;;  %v10599_v6 = vpop.permute.xlu0 %10598 }
 0x4b0   : > { %v9140_v24 = vrot.slane %v9138_v45, 4  ;;  %v9147_v21 = vshll.u32 %v20791_v41, 16  ;;  %v9151_v23 = vshrl.u32 %v20791_v41, 16  ;;  %v9157_v31 = vshll.u32 %v20793_v20, 16 }
 0x4b1   : > { %v9040_v7 = vsel %vm18453_vm2, %v9035_v25, %v9039_v56  ;;  %v9389_v14 = vsel %vm18372_vm4, %v9387_v16, %v9388_v32  ;;  %v9066_v27 = vshrl.u32 %v8860_v26, 16  ;;  %v9386_v28 = vsel %vm18372_vm4, %v15791_v13, %v9385_v61  ;;  %v9288_v13 = vld [vmem:[#allocation2 + $0x54] sm:$0xe] }
 0x4b2   : > { %9588 = vrot.lane.b32.xlu0 %v15826_v22, %s17539_s23  ;;  %v15823_v36 = vcombine.low %v9030_v11, %v9040_v7  ;;  %v9143_v40 = vrot.slane %v9141_v9, 5  ;;  %v9149_v10 = vrot.slane %v9147_v21, 5  ;;  %v15839_v42 = vcombine.low %v9386_v28, %v9389_v14  ;;  %v8870_v11 = vld [vmem:[#allocation2 + $0x90] sm:$0xf]  ;;  %v20839_v7 = vld [vmem:[#allocation2 + $0x98] sm:$0x1] }
 0x4b3   : > { %v9153_v4 = vrot.slane %v9151_v23, 4  ;;  %v9068_v34 = vrot.slane %v9066_v27, 4  ;;  %v9069_v50 = vshll.u32 %v8860_v26, 16  ;;  %v9075_v18 = vshll.u32 %v8861_v12, 16 }
 0x4b4   : > { %9582 = vrot.lane.b32.xlu1 %v15823_v36, %s17539_s23  ;;  %v9144_v55 = vor.u32 %v9143_v40, %v9140_v24  ;;  %v9079_v1 = vshrl.u32 %v8861_v12, 16  ;;  %v9085_v48 = vshll.u32 %v20810_v47, 16  ;;  %v9159_v60 = vrot.slane %v9157_v31, 5  ;;  %v20831_v24 = vld [vmem:[#allocation2 + $0x94] sm:$0xf] }
 0x4b5   : > { %v9154_v53 = vor.u32 %v9153_v4, %v9149_v10  ;;  %v9071_v56 = vrot.slane %v9069_v50, 5  ;;  %v10642_v51 = vsel %vm9684_vm6, %v15876_v3, %v10519_v30  ;;  %v9077_v46 = vrot.slane %v9075_v18, 5  ;;  %v8864_v36 = vld [vmem:[#allocation2 + $0x6c] sm:$0xf]  ;;  %v20851_v30 = vld [vmem:[#allocation2 + $0x70] sm:$0xf] }
 0x4b6   : > { %9668 = vrot.lane.b32.xlu0 %v15842_v0, %s17538_s22  ;;  %v9145_v58 = vrot.slane %v9144_v55, 4  ;;  %v9081_v33 = vrot.slane %v9079_v1, 4  ;;  %v15796_v57 = vrot.slane %v9291_v62, 9  ;;  %v9087_v54 = vrot.slane %v9085_v48, 5  ;;  %v8887_v62 = vld [vmem:[#allocation2 + $0x74] sm:$0x1] }
 0x4b7   : > { %v9155_v43 = vrot.slane %v9154_v53, 4  ;;  %v9072_v49 = vor.u32 %v9071_v56, %v9068_v34  ;;  %v9420_v61 = vrot.slane %v20791_v41, 5  ;;  %v9423_v5 = vrot.slane %v20793_v20, 5  ;;  %v17325_v53 = vld [vmem:[%s22424_s3 + $0x28] sm:$0xff]  }
 0x4b8   : > { %9662 = vrot.lane.b32.xlu1 %v15839_v42, %s17538_s22  ;;  %v9150_v22 = vsel %vm18453_vm2, %v9145_v58, %v9149_v10  ;;  %v9082_v35 = vor.u32 %v9081_v33, %v9077_v46  ;;  %v9399_v3 = vrot.slane %v8861_v12, 5  ;;  %v15793_v59 = vrot.slane %v9288_v13, 9  ;;  %16918 = vmatprep.subr.bf16.mxu1 %v17325_v53 }
 0x4b9   : > { %v9160_v32 = vsel %vm18453_vm2, %v9155_v43, %v9159_v60  ;;  %v9073_v45 = vrot.slane %v9072_v49, 4  ;;  %v9422_v26 = vrot.slane %v9420_v61, 4  ;;  %v9421_v41 = vsel %vm18372_vm4, %v15796_v57, %v9420_v61  ;;  %16919 = vmatpush3.bf16.msra.mxu1 %v17325_v53  ;;  %v20889_v53 = vld [vmem:[#allocation2 + $0x8c] sm:$0x1] }
 0x4ba   : > { %v15828_v25 = vcombine.low %v9150_v22, %v9160_v32  ;;  %v9083_v0 = vrot.slane %v9082_v35, 4  ;;  %v9401_v16 = vrot.slane %v9399_v3, 4  ;;  %v9400_v9 = vsel %vm18372_vm4, %v15793_v59, %v9399_v3  ;;  %v9290_v35 = vld [vmem:[#allocation2 + $0x6c] sm:$0xe] }
 0x4bb   : > { %v9424_v20 = vsel %vm18372_vm4, %v9422_v26, %v9423_v5  ;;  %v9402_v21 = vrot.slane %v20810_v47, 5  ;;  %v10679_v23 = vsel %vm9733_vm1, %v10642_v51, %v10599_v6  ;;  %v9078_v14 = vsel %vm18453_vm2, %v9073_v45, %v9077_v46  ;;  %v9293_v46 = vld [vmem:[#allocation2 + $0x90] sm:$0xe] }
 0x4bc   : > { %9592 = vrot.lane.b32.xlu0 %v15828_v25, %s17539_s23  ;;  %v9088_v31 = vsel %vm18453_vm2, %v9083_v0, %v9087_v54  ;;  %v9186_v12 = vshrl.u32 %v8870_v11, 16  ;;  %v9189_v27 = vshll.u32 %v8870_v11, 16  ;;  %16896 = vmatprep.mubr.msk.bf16.mxu1 %vm10739_vm3, %v10679_v23  ;;  %v9195_v40 = vshll.u32 %v20831_v24, 16  ;;  %v8874_v25 = vld [vmem:[#allocation2 + $0xa8] sm:$0xf] }
 0x4bd   : > { %v15825_v28 = vcombine.low %v9078_v14, %v9088_v31  ;;  %v9403_v47 = vsel %vm18372_vm4, %v9401_v16, %v9402_v21  ;;  %v9199_v10 = vshrl.u32 %v20831_v24, 16  ;;  %v15844_v42 = vcombine.low %v9421_v41, %v9424_v20  ;;  %v20871_v14 = vld [vmem:[#allocation2 + $0xac] sm:$0xf]  ;;  %v20873_v31 = vld [vmem:[#allocation2 + $0xb0] sm:$0x1] }
 0x4be   : > { %v9188_v4 = vrot.slane %v9186_v12, 4  ;;  %v9191_v34 = vrot.slane %v9189_v27, 5  ;;  %v9205_v50 = vshll.u32 %v20839_v7, 16  ;;  %v9197_v55 = vrot.slane %v9195_v40, 5 }
 0x4bf   : > { %9586 = vrot.lane.b32.xlu1 %v15825_v28, %s17539_s23  ;;  %v9201_v18 = vrot.slane %v9199_v10, 4  ;;  %v9114_v1 = vshrl.u32 %v8864_v36, 16  ;;  %v9117_v48 = vshll.u32 %v8864_v36, 16  ;;  %v15841_v60 = vcombine.low %v9400_v9, %v9403_v47  ;;  %v8868_v28 = vld [vmem:[#allocation2 + $0x84] sm:$0xf] }
 0x4c0   : > { %9672 = vrot.lane.b32.xlu0 %v15844_v42, %s17538_s22  ;;  %v9192_v56 = vor.u32 %v9191_v34, %v9188_v4  ;;  %v9123_v51 = vshll.u32 %v20851_v30, 16  ;;  %v9127_v58 = vshrl.u32 %v20851_v30, 16  ;;  %v9133_v43 = vshll.u32 %v8887_v62, 16 }
 0x4c1   : > { %v9202_v33 = vor.u32 %v9201_v18, %v9197_v55  ;;  %v9116_v57 = vrot.slane %v9114_v1, 4  ;;  %v9119_v13 = vrot.slane %v9117_v48, 5  ;;  %v9207_v54 = vrot.slane %v9205_v50, 5 }
 0x4c2   : > { %v9193_v49 = vrot.slane %v9192_v56, 4  ;;  %v9125_v61 = vrot.slane %v9123_v51, 5  ;;  %v9129_v22 = vrot.slane %v9127_v58, 4  ;;  %v15798_v6 = vrot.slane %v9293_v46, 9  ;;  %v17328_v56 = vld [vmem:[%s22424_s3 + $0x60] sm:$0xff]  }
 0x4c3   : > { %9666 = vrot.lane.b32.xlu1 %v15841_v60, %s17538_s22  ;;  %v9203_v5 = vrot.slane %v9202_v33, 4  ;;  %v9120_v3 = vor.u32 %v9119_v13, %v9116_v57  ;;  %v9434_v32 = vrot.slane %v20831_v24, 5  ;;  %v9135_v59 = vrot.slane %v9133_v43, 5  ;;  %16952 = vmatprep.subr.bf16.mxu1 %v17328_v56 }
 0x4c4   : > { %v9198_v45 = vsel %vm18453_vm2, %v9193_v49, %v9197_v55  ;;  %v9130_v26 = vor.u32 %v9129_v22, %v9125_v61  ;;  %v9437_v11 = vrot.slane %v20839_v7, 5  ;;  %v15795_v20 = vrot.slane %v9290_v35, 9  ;;  %v20883_v55 = vld [vmem:[#allocation2 + $0x88] sm:$0xf] }
 0x4c5   : > { %v9208_v0 = vsel %vm18453_vm2, %v9203_v5, %v9207_v54  ;;  %v9121_v41 = vrot.slane %v9120_v3, 4  ;;  %v9436_v16 = vrot.slane %v9434_v32, 4  ;;  %v9435_v23 = vsel %vm18372_vm4, %v15798_v6, %v9434_v32  ;;  %v9295_v54 = vld [vmem:[#allocation2 + $0xa8] sm:$0xe] }
 0x4c6   : > { %v15830_v9 = vcombine.low %v9198_v45, %v9208_v0  ;;  %v9131_v21 = vrot.slane %v9130_v26, 4  ;;  %v9413_v24 = vrot.slane %v20851_v30, 5  ;;  %v9416_v12 = vrot.slane %v8887_v62, 5  ;;  %v10521_v62 = vpop.permute.xlu1 %10520  ;;  %v9292_v26 = vld [vmem:[#allocation2 + $0x84] sm:$0xe] }
 0x4c7   : > { %v9438_v7 = vsel %vm18372_vm4, %v9436_v16, %v9437_v11  ;;  %v9234_v27 = vshrl.u32 %v8874_v25, 16  ;;  %v9237_v36 = vshll.u32 %v8874_v25, 16  ;;  %v9126_v47 = vsel %vm18453_vm2, %v9121_v41, %v9125_v61 }
 0x4c8   : > { %9596 = vrot.lane.b32.xlu0 %v15830_v9, %s17539_s23  ;;  %v9136_v40 = vsel %vm18453_vm2, %v9131_v21, %v9135_v59  ;;  %v15846_v10 = vcombine.low %v9435_v23, %v9438_v7  ;;  %v9415_v30 = vrot.slane %v9413_v24, 4  ;;  %v9243_v50 = vshll.u32 %v20871_v14, 16 }
 0x4c9   : > { %v15827_v42 = vcombine.low %v9126_v47, %v9136_v40  ;;  %v9236_v4 = vrot.slane %v9234_v27, 4  ;;  %v9239_v34 = vrot.slane %v9237_v36, 5  ;;  %v9247_v1 = vshrl.u32 %v20871_v14, 16 }
 0x4ca   : > { %v9417_v18 = vsel %vm18372_vm4, %v9415_v30, %v9416_v12  ;;  %v9253_v48 = vshll.u32 %v20873_v31, 16  ;;  %v9162_v60 = vshrl.u32 %v8868_v28, 16  ;;  %v9414_v51 = vsel %vm18372_vm4, %v15795_v20, %v9413_v24  ;;  %v10601_v41 = vpop.permute.xlu1 %10600  ;;  %v11163_v24 = vld [vmem:[#allocation2 + $0x18] sm:$0xf] }
 0x4cb   : > { %9590 = vrot.lane.b32.xlu1 %v15827_v42, %s17539_s23  ;;  %v9240_v58 = vor.u32 %v9239_v34, %v9236_v4  ;;  %v9245_v46 = vrot.slane %v9243_v50, 5  ;;  %v9165_v33 = vshll.u32 %v8868_v28, 16  ;;  %v15843_v57 = vcombine.low %v9414_v51, %v9417_v18  ;;  %v20915_v28 = vld [vmem:[#allocation2 + $0x1c] sm:$0xf]  ;;  %v11195_v42 = vld [vmem:[#allocation2 + $0x20] sm:$0x1] }
 0x4cc   : > { %9676 = vrot.lane.b32.xlu0 %v15846_v10, %s17538_s22  ;;  %v9249_v13 = vrot.slane %v9247_v1, 4  ;;  %v9164_v43 = vrot.slane %v9162_v60, 4  ;;  %v9171_v49 = vshll.u32 %v20883_v55, 16  ;;  %v9175_v35 = vshrl.u32 %v20883_v55, 16  ;;  %v8872_v1 = vld [vmem:[#allocation2 + $0x9c] sm:$0xf] }
 0x4cd   : > { %v9241_v61 = vrot.slane %v9240_v58, 4  ;;  %v9167_v22 = vrot.slane %v9165_v33, 5  ;;  %v9181_v5 = vshll.u32 %v20889_v53, 16  ;;  %v9255_v6 = vrot.slane %v9253_v48, 5  ;;  %v8873_v48 = vld [vmem:[#allocation2 + $0xa0] sm:$0xf] }
 0x4ce   : > { %v9250_v3 = vor.u32 %v9249_v13, %v9245_v46  ;;  %v9173_v32 = vrot.slane %v9171_v49, 5  ;;  %v10645_v45 = vsel %vm9684_vm6, %v15877_v52, %v10521_v62  ;;  %v9177_v25 = vrot.slane %v9175_v35, 4  ;;  %v8891_v58 = vld [vmem:[#allocation2 + $0xa4] sm:$0x1] }
 0x4cf   : > { %9670 = vrot.lane.b32.xlu1 %v15843_v57, %s17538_s22  ;;  %v9246_v59 = vsel %vm18453_vm2, %v9241_v61, %v9245_v46  ;;  %v9168_v11 = vor.u32 %v9167_v22, %v9164_v43  ;;  %v15800_v0 = vrot.slane %v9295_v54, 9  ;;  %v9183_v20 = vrot.slane %v9181_v5, 5 }
 0x4d0   : > { %v9251_v16 = vrot.slane %v9250_v3, 4  ;;  %v9448_v9 = vrot.slane %v20871_v14, 5  ;;  %v9451_v21 = vrot.slane %v20873_v31, 5  ;;  %v9178_v38 = vor.u32 %v9177_v25, %v9173_v32 }
 0x4d1   : > { %v9169_v23 = vrot.slane %v9168_v11, 4  ;;  %v15797_v63 = vrot.slane %v9292_v26, 9  ;;  %v9427_v52 = vrot.slane %v20883_v55, 5  ;;  %v9430_v27 = vrot.slane %v20889_v53, 5  ;;  %v9294_v11 = vld [vmem:[#allocation2 + $0x9c] sm:$0xe] }
 0x4d2   : > { %v9256_v7 = vsel %vm18453_vm2, %v9251_v16, %v9255_v6  ;;  %v9450_v12 = vrot.slane %v9448_v9, 4  ;;  %v10681_v36 = vsel %vm9733_vm1, %v10645_v45, %v10601_v41  ;;  %v9179_v31 = vrot.slane %v9178_v38, 4  ;;  %v11595_v6 = vld [vmem:[#allocation2 + $0x18] sm:$0xe] }
 0x4d3   : > { %v15832_v47 = vcombine.low %v9246_v59, %v9256_v7  ;;  %v9174_v14 = vsel %vm18453_vm2, %v9169_v23, %v9173_v32  ;;  %v9449_v40 = vsel %vm18372_vm4, %v15800_v0, %v9448_v9  ;;  %16897 = vmatmul.mubr.msk.bf16.gmra.mrb[20].mxu1 %vm10739_vm3, %v10681_v36  ;;  %v9429_v30 = vrot.slane %v9427_v52, 4  ;;  %v11167_v7 = vld [vmem:[#allocation2 + $0x30] sm:$0xf] }
 0x4d4   : > { %v9452_v10 = vsel %vm18372_vm4, %v9450_v12, %v9451_v21  ;;  %v11212_v4 = vshrl.u32 %v11163_v24, 16  ;;  %v11215_v34 = vshll.u32 %v11163_v24, 16  ;;  %v9184_v50 = vsel %vm18453_vm2, %v9179_v31, %v9183_v20 }
 0x4d5   : > { %9600 = vrot.lane.b32.xlu0 %v15832_v47, %s17539_s23  ;;  %v9428_v55 = vsel %vm18372_vm4, %v15797_v63, %v9427_v52  ;;  %v11221_v62 = vshll.u32 %v20915_v28, 16  ;;  %v11225_v18 = vshrl.u32 %v20915_v28, 16  ;;  %v15829_v53 = vcombine.low %v9174_v14, %v9184_v50  ;;  %v20941_v14 = vld [vmem:[#allocation2 + $0x34] sm:$0xf] }
 0x4d6   : > { %v9431_v60 = vsel %vm18372_vm4, %v9429_v30, %v9430_v27  ;;  %v11214_v56 = vrot.slane %v11212_v4, 4  ;;  %v11217_v51 = vrot.slane %v11215_v34, 5  ;;  %v15848_v46 = vcombine.low %v9449_v40, %v9452_v10  ;;  %v20947_v30 = vld [vmem:[#allocation2 + $0x38] sm:$0x1] }
 0x4d7   : > { %v11223_v33 = vrot.slane %v11221_v62, 5  ;;  %v11227_v57 = vrot.slane %v11225_v18, 4  ;;  %v11231_v13 = vshll.u32 %v11195_v42, 16  ;;  %9594 = vrot.lane.b32.xlu1 %v15829_v53, %s17539_s23  ;;  %v9210_v49 = vshrl.u32 %v8872_v1, 16  ;;  %v8877_v53 = vld [vmem:[#allocation2 + $0xb8] sm:$0xf] }
 0x4d8   : > { %v11218_v43 = vor.u32 %v11217_v51, %v11214_v56  ;;  %v9213_v54 = vshll.u32 %v8872_v1, 16  ;;  %v9219_v61 = vshll.u32 %v8873_v48, 16  ;;  %v15845_v22 = vcombine.low %v9428_v55, %v9431_v60  ;;  %v8876_v55 = vld [vmem:[#allocation2 + $0xb4] sm:$0xf] }
 0x4d9   : > { %9680 = vrot.lane.b32.xlu0 %v15848_v46, %s17538_s22  ;;  %v11228_v35 = vor.u32 %v11227_v57, %v11223_v33  ;;  %v9223_v5 = vshrl.u32 %v8873_v48, 16  ;;  %v9229_v3 = vshll.u32 %v8891_v58, 16  ;;  %v9212_v45 = vrot.slane %v9210_v49, 4 }
 0x4da   : > { %v11219_v32 = vrot.slane %v11218_v43, 4  ;;  %v9215_v26 = vrot.slane %v9213_v54, 5  ;;  %v9221_v59 = vrot.slane %v9219_v61, 5  ;;  %v11233_v0 = vrot.slane %v11231_v13, 5 }
 0x4db   : > { %v11229_v25 = vrot.slane %v11228_v35, 4  ;;  %v9225_v41 = vrot.slane %v9223_v5, 4  ;;  %v9231_v16 = vrot.slane %v9229_v3, 5  ;;  %9674 = vrot.lane.b32.xlu1 %v15845_v22, %s17538_s22  ;;  %v15970_v21 = vrot.slane %v11595_v6, 9 }
 0x4dc   : > { %v11224_v20 = vsel %vm18453_vm2, %v11219_v32, %v11223_v33  ;;  %v9216_v9 = vor.u32 %v9215_v26, %v9212_v45  ;;  %v11661_v23 = vrot.slane %v20915_v28, 5  ;;  %v15799_v52 = vrot.slane %v9294_v11, 9  ;;  %v10523_v35 = vpop.permute.xlu0 %10522  ;;  %v11597_v45 = vld [vmem:[#allocation2 + $0x30] sm:$0xe] }
 0x4dd   : > { %v11234_v38 = vsel %vm18453_vm2, %v11229_v25, %v11233_v0  ;;  %v9226_v63 = vor.u32 %v9225_v41, %v9221_v59  ;;  %v9441_v24 = vrot.slane %v8873_v48, 5  ;;  %v11664_v47 = vrot.slane %v11195_v42, 5 }
 0x4de   : > { %v16002_v12 = vcombine.low %v11224_v20, %v11234_v38  ;;  %v9217_v27 = vrot.slane %v9216_v9, 4  ;;  %v11663_v36 = vrot.slane %v11661_v23, 4  ;;  %v11662_v40 = vsel %vm18372_vm4, %v15970_v21, %v11661_v23  ;;  %v9296_v9 = vld [vmem:[#allocation2 + $0xb4] sm:$0xe] }
 0x4df   : > { %v9227_v31 = vrot.slane %v9226_v63, 4  ;;  %v9442_v28 = vsel %vm18372_vm4, %v15799_v52, %v9441_v24  ;;  %v9443_v10 = vrot.slane %v9441_v24, 4  ;;  %v9444_v34 = vrot.slane %v8891_v58, 5  ;;  %v8893_v58 = vld [vmem:[#allocation2 + $0xbc] sm:$0x1] }
 0x4e0   : > { %11883 = vrot.lane.b32.xlu0 %v16002_v12, %s17539_s23  ;;  %v11665_v4 = vsel %vm18372_vm4, %v11663_v36, %v11664_v47  ;;  %v11260_v50 = vshrl.u32 %v11167_v7, 16  ;;  %v11263_v42 = vshll.u32 %v11167_v7, 16  ;;  %v9222_v62 = vsel %vm18453_vm2, %v9217_v27, %v9221_v59 }
 0x4e1   : > { %v9232_v18 = vsel %vm18453_vm2, %v9227_v31, %v9231_v16  ;;  %v16018_v1 = vcombine.low %v11662_v40, %v11665_v4  ;;  %v11269_v48 = vshll.u32 %v20941_v14, 16  ;;  %v9445_v56 = vsel %vm18372_vm4, %v9443_v10, %v9444_v34  ;;  %v11172_v10 = vld [vmem:[#allocation2 + $0x4c] sm:$0xf] }
 0x4e2   : > { %v15831_v60 = vcombine.low %v9222_v62, %v9232_v18  ;;  %v11262_v51 = vrot.slane %v11260_v50, 4  ;;  %v11265_v46 = vrot.slane %v11263_v42, 5  ;;  %v11273_v57 = vshrl.u32 %v20941_v14, 16  ;;  %v11199_v42 = vld [vmem:[#allocation2 + $0x50] sm:$0x1] }
 0x4e3   : > { %v11271_v33 = vrot.slane %v11269_v48, 5  ;;  %v11279_v13 = vshll.u32 %v20947_v30, 16  ;;  %v9258_v43 = vshrl.u32 %v8876_v55, 16  ;;  %v9261_v54 = vshll.u32 %v8876_v55, 16  ;;  %v11165_v55 = vld [vmem:[#allocation2 + $0x24] sm:$0xf] }
 0x4e4   : > { %9598 = vrot.lane.b32.xlu1 %v15831_v60, %s17539_s23  ;;  %11963 = vrot.lane.b32.xlu0 %v16018_v1, %s17538_s22  ;;  %v11266_v49 = vor.u32 %v11265_v46, %v11262_v51  ;;  %v9267_v61 = vshll.u32 %v8877_v53, 16  ;;  %v9271_v22 = vshrl.u32 %v8877_v53, 16  ;;  %v15847_v5 = vcombine.low %v9442_v28, %v9445_v56  ;;  %v11171_v28 = vld [vmem:[#allocation2 + $0x48] sm:$0xf] }
 0x4e5   : > { %v11275_v3 = vrot.slane %v11273_v57, 4  ;;  %v9260_v6 = vrot.slane %v9258_v43, 4  ;;  %v9277_v32 = vshll.u32 %v8893_v58, 16  ;;  %v9263_v59 = vrot.slane %v9261_v54, 5  ;;  %v11196_v57 = vld [vmem:[#allocation2 + $0x2c] sm:$0x1] }
 0x4e6   : > { %v11267_v26 = vrot.slane %v11266_v49, 4  ;;  %v9269_v11 = vrot.slane %v9267_v61, 5  ;;  %v9273_v25 = vrot.slane %v9271_v22, 4  ;;  %v11281_v41 = vrot.slane %v11279_v13, 5 }
 0x4e7   : > { %v11276_v0 = vor.u32 %v11275_v3, %v11271_v33  ;;  %v9279_v16 = vrot.slane %v9277_v32, 5  ;;  %v10648_v20 = vsel %vm9684_vm6, %v15878_v29, %v10523_v35  ;;  %v9264_v21 = vor.u32 %v9263_v59, %v9260_v6  ;;  %v10603_v29 = vpop.permute.xlu0 %10602  ;;  %v11599_v32 = vld [vmem:[#allocation2 + $0x48] sm:$0xe] }
 0x4e8   : > { %9678 = vrot.lane.b32.xlu1 %v15847_v5, %s17538_s22  ;;  %v9274_v23 = vor.u32 %v9273_v25, %v9269_v11  ;;  %v15972_v38 = vrot.slane %v11597_v45, 9  ;;  %v11675_v63 = vrot.slane %v20941_v14, 5  ;;  %v11272_v52 = vsel %vm18453_vm2, %v11267_v26, %v11271_v33 }
 0x4e9   : > { %v11277_v24 = vrot.slane %v11276_v0, 4  ;;  %v11678_v7 = vrot.slane %v20947_v30, 5  ;;  %v9455_v12 = vrot.slane %v8877_v53, 5  ;;  %v9265_v27 = vrot.slane %v9264_v21, 4  ;;  %v11166_v53 = vld [vmem:[#allocation2 + $0x28] sm:$0xf] }
 0x4ea   : > { %v9275_v36 = vrot.slane %v9274_v23, 4  ;;  %v11677_v8 = vrot.slane %v11675_v63, 4  ;;  %v15801_v19 = vrot.slane %v9296_v9, 9  ;;  %v11676_v31 = vsel %vm18372_vm4, %v15972_v38, %v11675_v63 }
 0x4eb   : > { %v11282_v47 = vsel %vm18453_vm2, %v11277_v24, %v11281_v41  ;;  %v9457_v40 = vrot.slane %v9455_v12, 4  ;;  %v9458_v14 = vrot.slane %v8893_v58, 5  ;;  %v9270_v30 = vsel %vm18453_vm2, %v9265_v27, %v9269_v11 }
 0x4ec   : > { %v16004_v4 = vcombine.low %v11272_v52, %v11282_v47  ;;  %v9280_v34 = vsel %vm18453_vm2, %v9275_v36, %v9279_v16  ;;  %v11679_v50 = vsel %vm18372_vm4, %v11677_v8, %v11678_v7  ;;  %v9456_v1 = vsel %vm18372_vm4, %v15801_v19, %v9455_v12  ;;  %v11175_v19 = vld [vmem:[#allocation2 + $0x60] sm:$0xf] }
 0x4ed   : > { %v15833_v62 = vcombine.low %v9270_v30, %v9280_v34  ;;  %v16020_v18 = vcombine.low %v11676_v31, %v11679_v50  ;;  %v10683_v48 = vsel %vm9733_vm1, %v10648_v20, %v10603_v29  ;;  %v9459_v60 = vsel %vm18372_vm4, %v9457_v40, %v9458_v14  ;;  %v11596_v20 = vld [vmem:[#allocation2 + $0x24] sm:$0xe] }
 0x4ee   : > { %11887 = vrot.lane.b32.xlu0 %v16004_v4, %s17539_s23  ;;  %v11308_v56 = vshrl.u32 %v11171_v28, 16  ;;  %v11311_v51 = vshll.u32 %v11171_v28, 16  ;;  %v11317_v46 = vshll.u32 %v11172_v10, 16  ;;  %16900 = vmatprep.mubr.msk.bf16.mxu1 %vm10739_vm3, %v10683_v48  ;;  %v11321_v58 = vshrl.u32 %v11172_v10, 16  ;;  %v20994_v29 = vld [vmem:[#allocation2 + $0x64] sm:$0xf]  ;;  %v10525_v48 = vpop.permute.xlu1 %10524 }
 0x4ef   : > { %9602 = vrot.lane.b32.xlu1 %v15833_v62, %s17539_s23  ;;  %v11327_v33 = vshll.u32 %v11199_v42, 16  ;;  %v11236_v13 = vshrl.u32 %v11165_v55, 16  ;;  %v11239_v43 = vshll.u32 %v11165_v55, 16  ;;  %v11245_v22 = vshll.u32 %v11166_v53, 16  ;;  %v21004_v28 = vld [vmem:[#allocation2 + $0x68] sm:$0x1] }
 0x4f0   : > { %v11310_v49 = vrot.slane %v11308_v56, 4  ;;  %v11313_v54 = vrot.slane %v11311_v51, 5  ;;  %v11319_v61 = vrot.slane %v11317_v46, 5  ;;  %v15849_v35 = vcombine.low %v9456_v1, %v9459_v60  ;;  %v11170_v51 = vld [vmem:[#allocation2 + $0x40] sm:$0xf] }
 0x4f1   : > { %v11323_v5 = vrot.slane %v11321_v58, 4  ;;  %v11238_v3 = vrot.slane %v11236_v13, 4  ;;  %v11241_v6 = vrot.slane %v11239_v43, 5  ;;  %v11247_v26 = vrot.slane %v11245_v22, 5  ;;  %v21018_v43 = vld [vmem:[#allocation2 + $0x44] sm:$0x1] }
 0x4f2   : > { %11967 = vrot.lane.b32.xlu0 %v16020_v18, %s17538_s22  ;;  %v11314_v45 = vor.u32 %v11313_v54, %v11310_v49  ;;  %v11249_v59 = vshrl.u32 %v11166_v53, 16  ;;  %v11255_v11 = vshll.u32 %v11196_v57, 16  ;;  %v11329_v0 = vrot.slane %v11327_v33, 5 }
 0x4f3   : > { %9682 = vrot.lane.b32.xlu1 %v15849_v35, %s17538_s22  ;;  %v11324_v25 = vor.u32 %v11323_v5, %v11319_v61  ;;  %v11242_v41 = vor.u32 %v11241_v6, %v11238_v3  ;;  %v11689_v16 = vrot.slane %v11172_v10, 5  ;;  %v15974_v38 = vrot.slane %v11599_v32, 9  ;;  %v11169_v10 = vld [vmem:[#allocation2 + $0x3c] sm:$0xf]  ;;  %v11601_v32 = vld [vmem:[#allocation2 + $0x60] sm:$0xe] }
 0x4f4   : > { %v11315_v9 = vrot.slane %v11314_v45, 4  ;;  %v11251_v21 = vrot.slane %v11249_v59, 4  ;;  %v11257_v23 = vrot.slane %v11255_v11, 5  ;;  %v11692_v7 = vrot.slane %v11199_v42, 5  ;;  %v21008_v42 = vpop.permute.xlu0 %10526 }
 0x4f5   : > { %v11325_v63 = vrot.slane %v11324_v25, 4  ;;  %v11243_v52 = vrot.slane %v11242_v41, 4  ;;  %v11691_v24 = vrot.slane %v11689_v16, 4  ;;  %v11690_v27 = vsel %vm18372_vm4, %v15974_v38, %v11689_v16  ;;  %v10605_v38 = vpop.permute.xlu1 %10604 }
 0x4f6   : > { %v11252_v12 = vor.u32 %v11251_v21, %v11247_v26  ;;  %v15971_v36 = vrot.slane %v11596_v20, 9  ;;  %v11668_v8 = vrot.slane %v11166_v53, 5  ;;  %v11320_v47 = vsel %vm18453_vm2, %v11315_v9, %v11319_v61  ;;  %v17419_v20 = vld [vmem:[#allocation2 + $0xa8] sm:$0xf]  ;;  %v17420_v9 = vld [vmem:[#allocation2 + $0xac] sm:$0xf] }
 0x4f7   : > { %v11330_v31 = vsel %vm18453_vm2, %v11325_v63, %v11329_v0  ;;  %v11248_v40 = vsel %vm18453_vm2, %v11243_v52, %v11247_v26  ;;  %v11693_v14 = vsel %vm18372_vm4, %v11691_v24, %v11692_v7  ;;  %v11671_v50 = vrot.slane %v11196_v57, 5 }
 0x4f8   : > { %v16006_v4 = vcombine.low %v11320_v47, %v11330_v31  ;;  %v11253_v30 = vrot.slane %v11252_v12, 4  ;;  %v11669_v34 = vsel %vm18372_vm4, %v15971_v36, %v11668_v8  ;;  %v11670_v55 = vrot.slane %v11668_v8, 4  ;;  %v21023_v25 = vpop.permute.xlu0 %10606 }
 0x4f9   : > { %v11356_v62 = vshrl.u32 %v11175_v19, 16  ;;  %v11359_v18 = vshll.u32 %v11175_v19, 16  ;;  %v11365_v1 = vshll.u32 %v20994_v29, 16  ;;  %v11369_v60 = vshrl.u32 %v20994_v29, 16 }
 0x4fa   : > { %11891 = vrot.lane.b32.xlu0 %v16006_v4, %s17539_s23  ;;  %v11258_v53 = vsel %vm18453_vm2, %v11253_v30, %v11257_v23  ;;  %v11375_v56 = vshll.u32 %v21004_v28, 16  ;;  %v11284_v46 = vshrl.u32 %v11169_v10, 16  ;;  %v11672_v33 = vsel %vm18372_vm4, %v11670_v55, %v11671_v50  ;;  %v11598_v23 = vld [vmem:[#allocation2 + $0x3c] sm:$0xe]  ;;  %v21033_v50 = vpop.permute.xlu1 %10528 }
 0x4fb   : > { %v16003_v58 = vcombine.low %v11248_v40, %v11258_v53  ;;  %v11358_v57 = vrot.slane %v11356_v62, 4  ;;  %v11361_v13 = vrot.slane %v11359_v18, 5  ;;  %v16022_v49 = vcombine.low %v11690_v27, %v11693_v14  ;;  %v11179_v14 = vld [vmem:[#allocation2 + $0x78] sm:$0xf] }
 0x4fc   : > { %v16019_v54 = vcombine.low %v11669_v34, %v11672_v33  ;;  %v11367_v61 = vrot.slane %v11365_v1, 5  ;;  %v11371_v22 = vrot.slane %v11369_v60, 4  ;;  %v11286_v5 = vrot.slane %v11284_v46, 4  ;;  %v21039_v1 = vld [vmem:[#allocation2 + $0x7c] sm:$0xf] }
 0x4fd   : > { %11885 = vrot.lane.b32.xlu1 %v16003_v58, %s17539_s23  ;;  %v11362_v35 = vor.u32 %v11361_v13, %v11358_v57  ;;  %v11287_v3 = vshll.u32 %v11169_v10, 16  ;;  %v11293_v6 = vshll.u32 %v11170_v51, 16  ;;  %v11377_v26 = vrot.slane %v11375_v56, 5  ;;  %v11203_v56 = vld [vmem:[#allocation2 + $0x80] sm:$0x1] }
 0x4fe   : > { %11971 = vrot.lane.b32.xlu0 %v16022_v49, %s17538_s22  ;;  %v11372_v45 = vor.u32 %v11371_v22, %v11367_v61  ;;  %v11297_v59 = vshrl.u32 %v11170_v51, 16  ;;  %v11303_v11 = vshll.u32 %v21018_v43, 16  ;;  %v15879_v21 = vcombine.low %v17419_v20, %v17420_v9  ;;  %v21048_v46 = vld [vmem:[#allocation2 + $0x54] sm:$0xf]  ;;  %v21055_v49 = vld [vmem:[#allocation2 + $0x58] sm:$0xf] }
 0x4ff   : > { %v11363_v0 = vrot.slane %v11362_v35, 4  ;;  %v11289_v41 = vrot.slane %v11287_v3, 5  ;;  %v11295_v16 = vrot.slane %v11293_v6, 5  ;;  %v15976_v7 = vrot.slane %v11601_v32, 9  ;;  %v21061_v6 = vld [vmem:[#allocation2 + $0x5c] sm:$0x1] }
 0x500   : > { %v11373_v63 = vrot.slane %v11372_v45, 4  ;;  %v11299_v52 = vrot.slane %v11297_v59, 4  ;;  %v11305_v24 = vrot.slane %v11303_v11, 5  ;;  %v10651_v36 = vsel %vm9684_vm6, %v15879_v21, %v10525_v48 }
 0x501   : > { %11965 = vrot.lane.b32.xlu1 %v16019_v54, %s17538_s22  ;;  %v11368_v12 = vsel %vm18453_vm2, %v11363_v0, %v11367_v61  ;;  %v11290_v27 = vor.u32 %v11289_v41, %v11286_v5  ;;  %v11703_v8 = vrot.slane %v20994_v29, 5  ;;  %v15973_v31 = vrot.slane %v11598_v23, 9  ;;  %v21071_v41 = vpop.permute.xlu1 %10608  ;;  %v11603_v23 = vld [vmem:[#allocation2 + $0x78] sm:$0xe] }
 0x502   : > { %v11378_v19 = vsel %vm18453_vm2, %v11373_v63, %v11377_v26  ;;  %v11300_v47 = vor.u32 %v11299_v52, %v11295_v16  ;;  %v11682_v40 = vrot.slane %v11170_v51, 5  ;;  %v11706_v34 = vrot.slane %v21004_v28, 5 }
 0x503   : > { %v16008_v10 = vcombine.low %v11368_v12, %v11378_v19  ;;  %v11291_v4 = vrot.slane %v11290_v27, 4  ;;  %v11705_v30 = vrot.slane %v11703_v8, 4  ;;  %v11704_v62 = vsel %vm18372_vm4, %v15976_v7, %v11703_v8 }
 0x504   : > { %v11301_v55 = vrot.slane %v11300_v47, 4  ;;  %v11683_v29 = vsel %vm18372_vm4, %v15973_v31, %v11682_v40  ;;  %v11684_v18 = vrot.slane %v11682_v40, 4  ;;  %v21041_v48 = vpop.permute.xlu0 %9572  ;;  %v11685_v28 = vrot.slane %v21018_v43, 5  ;;  %v11600_v40 = vld [vmem:[#allocation2 + $0x54] sm:$0xe] }
 0x505   : > { %11895 = vrot.lane.b32.xlu0 %v16008_v10, %s17539_s23  ;;  %v11707_v53 = vsel %vm18372_vm4, %v11705_v30, %v11706_v34  ;;  %v10685_v60 = vsel %vm9733_vm1, %v10651_v36, %v10605_v38  ;;  %v11404_v51 = vshrl.u32 %v11179_v14, 16  ;;  %v11296_v58 = vsel %vm18453_vm2, %v11291_v4, %v11295_v16 }
 0x506   : > { %v11306_v33 = vsel %vm18453_vm2, %v11301_v55, %v11305_v24  ;;  %v16024_v57 = vcombine.low %v11704_v62, %v11707_v53  ;;  %v11407_v13 = vshll.u32 %v11179_v14, 16  ;;  %16901 = vmatmul.mubr.msk.bf16.gmra.mrb[24].mxu1 %vm10739_vm3, %v10685_v60  ;;  %v11686_v43 = vsel %vm18372_vm4, %v11684_v18, %v11685_v28  ;;  %v21076_v14 = vld [vmem:[#allocation2 + $0x90] sm:$0xf] }
 0x507   : > { %v16005_v54 = vcombine.low %v11296_v58, %v11306_v33  ;;  %v11406_v61 = vrot.slane %v11404_v51, 4  ;;  %v11413_v22 = vshll.u32 %v21039_v1, 16  ;;  %v11417_v5 = vshrl.u32 %v21039_v1, 16  ;;  %v21091_v33 = vld [vmem:[#allocation2 + $0x94] sm:$0xf] }
 0x508   : > { %v11409_v35 = vrot.slane %v11407_v13, 5  ;;  %v11423_v3 = vshll.u32 %v11203_v56, 16  ;;  %v11332_v32 = vshrl.u32 %v21048_v46, 16  ;;  %v21064_v45 = vpop.permute.xlu0 %9652  ;;  %v11335_v59 = vshll.u32 %v21048_v46, 16 }
 0x509   : > { %11889 = vrot.lane.b32.xlu1 %v16005_v54, %s17539_s23  ;;  %11975 = vrot.lane.b32.xlu0 %v16024_v57, %s17538_s22  ;;  %v11415_v26 = vrot.slane %v11413_v22, 5  ;;  %v11341_v11 = vshll.u32 %v21055_v49, 16  ;;  %v11345_v0 = vshrl.u32 %v21055_v49, 16  ;;  %v16021_v16 = vcombine.low %v11683_v29, %v11686_v43  ;;  %v21093_v57 = vld [vmem:[#allocation2 + $0x98] sm:$0x1] }
 0x50a   : > { %v11410_v20 = vor.u32 %v11409_v35, %v11406_v61  ;;  %v11419_v9 = vrot.slane %v11417_v5, 4  ;;  %v11334_v21 = vrot.slane %v11332_v32, 4  ;;  %v11337_v38 = vrot.slane %v11335_v59, 5  ;;  %v21101_v22 = vld [vmem:[#allocation2 + $0x6c] sm:$0xf] }
 0x50b   : > { %v11343_v63 = vrot.slane %v11341_v11, 5  ;;  %v11347_v52 = vrot.slane %v11345_v0, 4  ;;  %v11351_v24 = vshll.u32 %v21061_v6, 16  ;;  %v11425_v27 = vrot.slane %v11423_v3, 5  ;;  %v21103_v35 = vld [vmem:[#allocation2 + $0x70] sm:$0xf] }
 0x50c   : > { %v11411_v7 = vrot.slane %v11410_v20, 4  ;;  %v11420_v12 = vor.u32 %v11419_v9, %v11415_v26  ;;  %v11717_v36 = vrot.slane %v21039_v1, 5  ;;  %v11338_v8 = vor.u32 %v11337_v38, %v11334_v21  ;;  %v21078_v10 = vpop.permute.xlu0 %9576  ;;  %v21085_v28 = vpop.permute.xlu1 %9574  ;;  %v21115_v9 = vld [vmem:[#allocation2 + $0x74] sm:$0x1] }
 0x50d   : > { %11969 = vrot.lane.b32.xlu1 %v16021_v16, %s17538_s22  ;;  %v11348_v19 = vor.u32 %v11347_v52, %v11343_v63  ;;  %v11353_v47 = vrot.slane %v11351_v24, 5  ;;  %v15978_v31 = vrot.slane %v11603_v23, 9  ;;  %v11720_v55 = vrot.slane %v11203_v56, 5 }
 0x50e   : > { %v11416_v4 = vsel %vm18453_vm2, %v11411_v7, %v11415_v26  ;;  %v11421_v30 = vrot.slane %v11420_v12, 4  ;;  %v11719_v34 = vrot.slane %v11717_v36, 4  ;;  %v11339_v62 = vrot.slane %v11338_v8, 4 }
 0x50f   : > { %v11349_v29 = vrot.slane %v11348_v19, 4  ;;  %v11718_v18 = vsel %vm18372_vm4, %v15978_v31, %v11717_v36  ;;  %v11696_v53 = vrot.slane %v21055_v49, 5  ;;  %v15975_v58 = vrot.slane %v11600_v40, 9 }
 0x510   : > { %v11426_v60 = vsel %vm18453_vm2, %v11421_v30, %v11425_v27  ;;  %v11721_v51 = vsel %vm18372_vm4, %v11719_v34, %v11720_v55  ;;  %v11452_v56 = vshrl.u32 %v21076_v14, 16  ;;  %v11344_v54 = vsel %vm18453_vm2, %v11339_v62, %v11343_v63  ;;  %v21110_v20 = vpop.permute.xlu0 %9656  ;;  %v21122_v12 = vpop.permute.xlu1 %9654  ;;  %v17421_v62 = vld [vmem:[#allocation2 + $0xb4] sm:$0xf] }
 0x511   : > { %v16010_v13 = vcombine.low %v11416_v4, %v11426_v60  ;;  %v11354_v43 = vsel %vm18453_vm2, %v11349_v29, %v11353_v47  ;;  %v11699_v61 = vrot.slane %v21061_v6, 5  ;;  %v16026_v3 = vcombine.low %v11718_v18, %v11721_v51  ;;  %v11605_v47 = vld [vmem:[#allocation2 + $0x90] sm:$0xe]  ;;  %v17422_v29 = vld [vmem:[#allocation2 + $0xb8] sm:$0xf] }
 0x512   : > { %v16007_v5 = vcombine.low %v11344_v54, %v11354_v43  ;;  %v11698_v32 = vrot.slane %v11696_v53, 4  ;;  %v11454_v26 = vrot.slane %v11452_v56, 4  ;;  %v11455_v59 = vshll.u32 %v21076_v14, 16 }
 0x513   : > { %11899 = vrot.lane.b32.xlu0 %v16010_v13, %s17539_s23  ;;  %v11461_v11 = vshll.u32 %v21091_v33, 16  ;;  %v11465_v0 = vshrl.u32 %v21091_v33, 16  ;;  %v11471_v16 = vshll.u32 %v21093_v57, 16  ;;  %v11380_v21 = vshrl.u32 %v21101_v22, 16 }
 0x514   : > { %11893 = vrot.lane.b32.xlu1 %v16007_v5, %s17539_s23  ;;  %v11700_v6 = vsel %vm18372_vm4, %v11698_v32, %v11699_v61  ;;  %v11383_v23 = vshll.u32 %v21101_v22, 16  ;;  %v11389_v38 = vshll.u32 %v21103_v35, 16  ;;  %v11697_v63 = vsel %vm18372_vm4, %v15975_v58, %v11696_v53  ;;  %v21129_v13 = vpop.permute.xlu0 %9580 }
 0x515   : > { %v11457_v52 = vrot.slane %v11455_v59, 5  ;;  %v11463_v24 = vrot.slane %v11461_v11, 5  ;;  %v11467_v7 = vrot.slane %v11465_v0, 4  ;;  %v16023_v27 = vcombine.low %v11697_v63, %v11700_v6  ;;  %v21138_v0 = vld [vmem:[#allocation2 + $0xa8] sm:$0xf] }
 0x516   : > { %v11382_v36 = vrot.slane %v11380_v21, 4  ;;  %v11385_v8 = vrot.slane %v11383_v23, 5  ;;  %v11391_v19 = vrot.slane %v11389_v38, 5  ;;  %v11393_v4 = vshrl.u32 %v21103_v35, 16  ;;  %v21147_v38 = vld [vmem:[#allocation2 + $0xac] sm:$0xf] }
 0x517   : > { %11979 = vrot.lane.b32.xlu0 %v16026_v3, %s17538_s22  ;;  %v11458_v31 = vor.u32 %v11457_v52, %v11454_v26  ;;  %v11468_v40 = vor.u32 %v11467_v7, %v11463_v24  ;;  %v11399_v30 = vshll.u32 %v21115_v9, 16  ;;  %v11473_v34 = vrot.slane %v11471_v16, 5  ;;  %v11602_v3 = vld [vmem:[#allocation2 + $0x6c] sm:$0xe]  ;;  %v21153_v7 = vld [vmem:[#allocation2 + $0xb0] sm:$0x1] }
 0x518   : > { %11973 = vrot.lane.b32.xlu1 %v16023_v27, %s17538_s22  ;;  %v11386_v55 = vor.u32 %v11385_v8, %v11382_v36  ;;  %v15880_v18 = vcombine.low %v17421_v62, %v17422_v29  ;;  %v11731_v53 = vrot.slane %v21091_v33, 5  ;;  %v11395_v58 = vrot.slane %v11393_v4, 4  ;;  %v21140_v16 = vpop.permute.xlu1 %9578 }
 0x519   : > { %v11459_v60 = vrot.slane %v11458_v31, 4  ;;  %v11469_v51 = vrot.slane %v11468_v40, 4  ;;  %v15980_v56 = vrot.slane %v11605_v47, 9  ;;  %v11401_v43 = vrot.slane %v11399_v30, 5  ;;  %v21159_v47 = vld [vmem:[#allocation2 + $0x84] sm:$0xf] }
 0x51a   : > { %v11387_v54 = vrot.slane %v11386_v55, 4  ;;  %v10654_v61 = vsel %vm9684_vm6, %v15880_v18, %v21008_v42  ;;  %v11733_v5 = vrot.slane %v11731_v53, 4  ;;  %v11396_v59 = vor.u32 %v11395_v58, %v11391_v19  ;;  %v21166_v30 = vld [vmem:[#allocation2 + $0x88] sm:$0xf]  ;;  %v21173_v18 = vld [vmem:[#allocation2 + $0x8c] sm:$0x1] }
 0x51b   : > { %v11464_v32 = vsel %vm18453_vm2, %v11459_v60, %v11463_v24  ;;  %v11474_v26 = vsel %vm18453_vm2, %v11469_v51, %v11473_v34  ;;  %v11734_v11 = vrot.slane %v21093_v57, 5  ;;  %v11732_v42 = vsel %vm18372_vm4, %v15980_v56, %v11731_v53  ;;  %v21168_v34 = vpop.permute.xlu0 %9660 }
 0x51c   : > { %v16012_v6 = vcombine.low %v11464_v32, %v11474_v26  ;;  %v11392_v21 = vsel %vm18453_vm2, %v11387_v54, %v11391_v19  ;;  %v11710_v23 = vrot.slane %v21103_v35, 5  ;;  %v11397_v63 = vrot.slane %v11396_v59, 4  ;;  %v21177_v56 = vpop.permute.xlu1 %9658 }
 0x51d   : > { %v11735_v52 = vsel %vm18372_vm4, %v11733_v5, %v11734_v11  ;;  %v15977_v57 = vrot.slane %v11602_v3, 9  ;;  %v10687_v24 = vsel %vm9733_vm1, %v10654_v61, %v21023_v25  ;;  %v11713_v8 = vrot.slane %v21115_v9, 5 }
 0x51e   : > { %11903 = vrot.lane.b32.xlu0 %v16012_v6, %s17539_s23  ;;  %v16028_v27 = vcombine.low %v11732_v42, %v11735_v52  ;;  %v11712_v36 = vrot.slane %v11710_v23, 4  ;;  %v11500_v19 = vshrl.u32 %v21138_v0, 16  ;;  %16904 = vmatprep.mubr.msk.bf16.mxu1 %vm10739_vm3, %v10687_v24  ;;  %v11402_v31 = vsel %vm18453_vm2, %v11397_v63, %v11401_v43  ;;  %v17423_v24 = vld [vmem:[#allocation2 + $0x4] sm:$0xf] }
 0x51f   : > { %v11503_v40 = vshll.u32 %v21138_v0, 16  ;;  %v11509_v25 = vshll.u32 %v21147_v38, 16  ;;  %v11513_v4 = vshrl.u32 %v21147_v38, 16  ;;  %v16009_v9 = vcombine.low %v11392_v21, %v11402_v31 }
 0x520   : > { %v11714_v55 = vsel %vm18372_vm4, %v11712_v36, %v11713_v8  ;;  %v11502_v62 = vrot.slane %v11500_v19, 4  ;;  %v11519_v29 = vshll.u32 %v21153_v7, 16  ;;  %v11711_v53 = vsel %vm18372_vm4, %v15977_v57, %v11710_v23  ;;  %v11607_v23 = vld [vmem:[#allocation2 + $0xa8] sm:$0xe]  ;;  %v21186_v8 = vpop.permute.xlu0 %9584 }
 0x521   : > { %v11505_v60 = vrot.slane %v11503_v40, 5  ;;  %v11511_v51 = vrot.slane %v11509_v25, 5  ;;  %v11515_v58 = vrot.slane %v11513_v4, 4  ;;  %11897 = vrot.lane.b32.xlu1 %v16009_v9, %s17539_s23  ;;  %v16025_v54 = vcombine.low %v11711_v53, %v11714_v55 }
 0x522   : > { %11983 = vrot.lane.b32.xlu0 %v16028_v27, %s17538_s22  ;;  %v11428_v43 = vshrl.u32 %v21159_v47, 16  ;;  %v11431_v61 = vshll.u32 %v21159_v47, 16  ;;  %v11437_v5 = vshll.u32 %v21166_v30, 16  ;;  %v11441_v26 = vshrl.u32 %v21166_v30, 16  ;;  %v17424_v27 = vld [vmem:[#allocation2] sm:$0xf] }
 0x523   : > { %v11506_v3 = vor.u32 %v11505_v60, %v11502_v62  ;;  %v11516_v32 = vor.u32 %v11515_v58, %v11511_v51  ;;  %v11447_v59 = vshll.u32 %v21173_v18, 16  ;;  %v11521_v11 = vrot.slane %v11519_v29, 5  ;;  %v11604_v62 = vld [vmem:[#allocation2 + $0x84] sm:$0xe]  ;;  %v21194_v29 = vld [vmem:[#allocation2 + $0xc0] sm:$0xf] }
 0x524   : > { %v11430_v6 = vrot.slane %v11428_v43, 4  ;;  %v11433_v21 = vrot.slane %v11431_v61, 5  ;;  %v11439_v42 = vrot.slane %v11437_v5, 5  ;;  %v11443_v57 = vrot.slane %v11441_v26, 4 }
 0x525   : > { %v11507_v63 = vrot.slane %v11506_v3, 4  ;;  %v11517_v52 = vrot.slane %v11516_v32, 4  ;;  %v15802_v36 = vcombine.low %v17424_v27, %v17423_v24  ;;  %11977 = vrot.lane.b32.xlu1 %v16025_v54, %s17538_s22  ;;  %v11449_v31 = vrot.slane %v11447_v59, 5  ;;  %v21204_v32 = vld [vmem:[#allocation2 + $0xc4] sm:$0xf] }
 0x526   : > { %v11434_v19 = vor.u32 %v11433_v21, %v11430_v6  ;;  %v11745_v40 = vrot.slane %v21147_v38, 5  ;;  %v11444_v9 = vor.u32 %v11443_v57, %v11439_v42  ;;  %v15982_v55 = vrot.slane %v11607_v23, 9  ;;  %v21196_v53 = vpop.permute.xlu1 %9582  ;;  %v21211_v6 = vld [vmem:[#allocation2 + $0x9c] sm:$0xf]  ;;  %v21219_v57 = vpop.permute.xlu0 %9664 }
 0x527   : > { %v11512_v25 = vsel %vm18453_vm2, %v11507_v63, %v11511_v51  ;;  %v11522_v4 = vsel %vm18453_vm2, %v11517_v52, %v11521_v11  ;;  %v11748_v43 = vrot.slane %v21153_v7, 5  ;;  %v9687_v5 = vsel %vm9684_vm6, %v15802_v36, %v21041_v48  ;;  %v21217_v52 = vld [vmem:[#allocation2 + $0xc8] sm:$0x1] }
 0x528   : > { %v16014_v60 = vcombine.low %v11512_v25, %v11522_v4  ;;  %v11435_v58 = vrot.slane %v11434_v19, 4  ;;  %v11747_v54 = vrot.slane %v11745_v40, 4  ;;  %v11445_v61 = vrot.slane %v11444_v9, 4  ;;  %v21223_v19 = vld [vmem:[#allocation2 + $0xa0] sm:$0xf] }
 0x529   : > { %v11746_v51 = vsel %vm18372_vm4, %v15982_v55, %v11745_v40  ;;  %v11724_v3 = vrot.slane %v21166_v30, 5  ;;  %v15979_v59 = vrot.slane %v11604_v62, 9  ;;  %v11727_v11 = vrot.slane %v21173_v18, 5  ;;  %v11206_v25 = vld [vmem:[#allocation2 + $0xa4] sm:$0x1] }
 0x52a   : > { %11907 = vrot.lane.b32.xlu0 %v16014_v60, %s17539_s23  ;;  %v11749_v26 = vsel %vm18372_vm4, %v11747_v54, %v11748_v43  ;;  %v11548_v7 = vshrl.u32 %v21194_v29, 16  ;;  %v11440_v48 = vsel %vm18453_vm2, %v11435_v58, %v11439_v42  ;;  %v11450_v21 = vsel %vm18453_vm2, %v11445_v61, %v11449_v31  ;;  %v21231_v9 = vpop.permute.xlu1 %9662 }
 0x52b   : > { %v16030_v23 = vcombine.low %v11746_v51, %v11749_v26  ;;  %v11726_v63 = vrot.slane %v11724_v3, 4  ;;  %v16011_v24 = vcombine.low %v11440_v48, %v11450_v21  ;;  %v11551_v18 = vshll.u32 %v21194_v29, 16  ;;  %v21239_v21 = vpop.permute.xlu0 %9588 }
 0x52c   : > { %v11550_v27 = vrot.slane %v11548_v7, 4  ;;  %v11557_v36 = vshll.u32 %v21204_v32, 16  ;;  %v11725_v42 = vsel %vm18372_vm4, %v15979_v59, %v11724_v3  ;;  %v11561_v40 = vshrl.u32 %v21204_v32, 16 }
 0x52d   : > { %v11728_v31 = vsel %vm18372_vm4, %v11726_v63, %v11727_v11  ;;  %v11476_v4 = vshrl.u32 %v21211_v6, 16  ;;  %11901 = vrot.lane.b32.xlu1 %v16011_v24, %s17539_s23  ;;  %v11553_v55 = vrot.slane %v11551_v18, 5  ;;  %v11567_v60 = vshll.u32 %v21217_v52, 16  ;;  %v17425_v18 = vld [vmem:[#allocation2 + $0xc0] sm:$0xf] }
 0x52e   : > { %11987 = vrot.lane.b32.xlu0 %v16030_v23, %s17538_s22  ;;  %v11559_v62 = vrot.slane %v11557_v36, 5  ;;  %v11479_v58 = vshll.u32 %v21211_v6, 16  ;;  %v16027_v54 = vcombine.low %v11725_v42, %v11728_v31  ;;  %v11563_v43 = vrot.slane %v11561_v40, 4  ;;  %v17426_v36 = vld [vmem:[#allocation2 + $0xc4] sm:$0xf] }
 0x52f   : > { %v11478_v61 = vrot.slane %v11476_v4, 4  ;;  %v11485_v51 = vshll.u32 %v21223_v19, 16  ;;  %v11554_v3 = vor.u32 %v11553_v55, %v11550_v27  ;;  %v11489_v59 = vshrl.u32 %v21223_v19, 16  ;;  %v11609_v31 = vld [vmem:[#allocation2 + $0xc0] sm:$0xe] }
 0x530   : > { %v11481_v26 = vrot.slane %v11479_v58, 5  ;;  %v11495_v11 = vshll.u32 %v11206_v25, 16  ;;  %v11564_v7 = vor.u32 %v11563_v43, %v11559_v62  ;;  %v15881_v42 = vcombine.low %v17425_v18, %v17426_v36  ;;  %v11606_v58 = vld [vmem:[#allocation2 + $0x9c] sm:$0xe] }
 0x531   : > { %v11487_v48 = vrot.slane %v11485_v51, 5  ;;  %11981 = vrot.lane.b32.xlu1 %v16027_v54, %s17538_s22  ;;  %v11555_v23 = vrot.slane %v11554_v3, 4  ;;  %v11491_v24 = vrot.slane %v11489_v59, 4  ;;  %v9735_v27 = vsel %vm9733_vm1, %v9687_v5, %v21064_v45  ;;  %v21244_v43 = vpop.permute.xlu1 %9586 }
 0x532   : > { %v11482_v63 = vor.u32 %v11481_v26, %v11478_v61  ;;  %v11565_v40 = vrot.slane %v11564_v7, 4  ;;  %v11569_v4 = vrot.slane %v11567_v60, 5  ;;  %v11497_v55 = vrot.slane %v11495_v11, 5  ;;  %v21254_v60 = vld [vmem:[#allocation2 + $0xb4] sm:$0xf] }
 0x533   : > { %v11492_v37 = vor.u32 %v11491_v24, %v11487_v48  ;;  %v10657_v54 = vsel %vm9684_vm6, %v15881_v42, %v21033_v50  ;;  %v11759_v61 = vrot.slane %v21204_v32, 5  ;;  %v11560_v3 = vsel %vm18453_vm2, %v11555_v23, %v11559_v62  ;;  %v21259_v62 = vld [vmem:[#allocation2 + $0xb8] sm:$0xf]  ;;  %v21261_v23 = vpop.permute.xlu0 %9668 }
 0x534   : > { %v11483_v51 = vrot.slane %v11482_v63, 4  ;;  %v11570_v26 = vsel %vm18453_vm2, %v11565_v40, %v11569_v4  ;;  %v15984_v45 = vrot.slane %v11609_v31, 9  ;;  %v11738_v5 = vrot.slane %v21223_v19, 5 }
 0x535   : > { %v16016_v59 = vcombine.low %v11560_v3, %v11570_v26  ;;  %v11493_v11 = vrot.slane %v11492_v37, 4  ;;  %v11762_v7 = vrot.slane %v21217_v52, 5  ;;  %v15981_v63 = vrot.slane %v11606_v58, 9 }
 0x536   : > { %v11488_v50 = vsel %vm18453_vm2, %v11483_v51, %v11487_v48  ;;  %v11761_v24 = vrot.slane %v11759_v61, 4  ;;  %v11740_v18 = vrot.slane %v11738_v5, 4  ;;  %v11741_v36 = vrot.slane %v11206_v25, 5  ;;  %v21279_v51 = vld [vmem:[#allocation2 + $0xbc] sm:$0x1] }
 0x537   : > { %11911 = vrot.lane.b32.xlu0 %v16016_v59, %s17539_s23  ;;  %v11498_v42 = vsel %vm18453_vm2, %v11493_v11, %v11497_v55  ;;  %v11760_v37 = vsel %vm18372_vm4, %v15984_v45, %v11759_v61  ;;  %v10689_v52 = vsel %vm9733_vm1, %v10657_v54, %v21071_v41  ;;  %v11524_v48 = vshrl.u32 %v21254_v60, 16  ;;  %v21277_v55 = vpop.permute.xlu1 %9666  ;;  %v17427_v45 = vld [vmem:[#allocation2 + $0x18] sm:$0xf]  ;;  %v17428_v59 = vld [vmem:[#allocation2 + $0x1c] sm:$0xf] }
 0x538   : > { %v16013_v31 = vcombine.low %v11488_v50, %v11498_v42  ;;  %v11763_v25 = vsel %vm18372_vm4, %v11761_v24, %v11762_v7  ;;  %v11742_v40 = vsel %vm18372_vm4, %v11740_v18, %v11741_v36  ;;  %16905 = vmatmul.mubr.msk.bf16.gmra.mrb[28].mxu1 %vm10739_vm3, %v10689_v52  ;;  %v11527_v4 = vshll.u32 %v21254_v60, 16  ;;  %v17429_v24 = vld [vmem:[#allocation2 + $0xc] sm:$0xf]  ;;  %v17430_v18 = vld [vmem:[#allocation2 + $0x10] sm:$0xf] }
 0x539   : > { %v16032_v58 = vcombine.low %v11760_v37, %v11763_v25  ;;  %v11526_v61 = vrot.slane %v11524_v48, 4  ;;  %v11533_v41 = vshll.u32 %v21259_v62, 16  ;;  %16920 = vmatprep.mubr.msk.bf16.mxu1 %vm10739_vm3, %v9735_v27  ;;  %v11739_v54 = vsel %vm18372_vm4, %v15981_v63, %v11738_v5  ;;  %v6857_v42 = vld [vmem:[#allocation2 + $0xcc] sm:$0x1]  ;;  %v6913_v27 = vld [vmem:[#allocation2 + $0xd4] sm:$0x1] }
 0x53a   : > { %11905 = vrot.lane.b32.xlu1 %v16013_v31, %s17539_s23  ;;  %v11529_v3 = vrot.slane %v11527_v4, 5  ;;  %v11537_v26 = vshrl.u32 %v21259_v62, 16  ;;  %v15804_v11 = vcombine.low %v17427_v45, %v17428_v59  ;;  %v16029_v7 = vcombine.low %v11739_v54, %v11742_v40  ;;  %v21290_v63 = vld [vmem:[#allocation2 + $0xd0] sm:$0xf]  ;;  %v21292_v31 = vpop.permute.xlu0 %9592 }
 0x53b   : > { %11991 = vrot.lane.b32.xlu0 %v16032_v58, %s17538_s22  ;;  %v11535_v50 = vrot.slane %v11533_v41, 5  ;;  %v15803_v36 = vcombine.low %v17429_v24, %v17430_v18  ;;  %v11543_v48 = vshll.u32 %v21279_v51, 16  ;;  %v11752_v5 = vrot.slane %v21259_v62, 5  ;;  %v17332_v41 = vld [vmem:[%s22424_s3 + $0x68] sm:$0xff]  }
 0x53c   : > { %v11530_v37 = vor.u32 %v11529_v3, %v11526_v61  ;;  %v11539_v52 = vrot.slane %v11537_v26, 4  ;;  %v9693_v40 = vsel %vm9684_vm6, %v15804_v11, %v21078_v10  ;;  %v6914_v10 = vsel %vm17723_vm5, 0, %v6913_v27  ;;  %v17433_v27 = vld [vmem:[#allocation2 + $0x28] sm:$0xf] }
 0x53d   : > { %v9690_v25 = vsel %vm9684_vm6, %v15803_v36, %v21085_v28  ;;  %v21304_v54 = vpop.permute.xlu1 %9590  ;;  %v9739_v3 = vsel %vm9733_vm1, %v9693_v40, %v21110_v20  ;;  %v6858_v28 = vsel %vm17735_vm7, 0, %v6857_v42  ;;  %v11581_v26 = vshll.u32 %v21290_v63, 16  ;;  %6915 = vst [vmem:[#allocation2 + $0xd4] sm:$0x1] %v6914_v10  ;;  %v17432_v42 = vld [vmem:[#allocation2 + $0x24] sm:$0xf] }
 0x53e   : > { %11985 = vrot.lane.b32.xlu1 %v16029_v7, %s17538_s22  ;;  %v11531_v4 = vrot.slane %v11530_v37, 4  ;;  %v11540_v58 = vor.u32 %v11539_v52, %v11535_v50  ;;  %v9737_v61 = vsel %vm9733_vm1, %v9690_v25, %v21122_v12  ;;  %v11545_v59 = vrot.slane %v11543_v48, 5  ;;  %6859 = vst [vmem:[#allocation2 + $0xcc] sm:$0x1] %v6858_v28  ;;  %v11608_v7 = vld [vmem:[#allocation2 + $0xb4] sm:$0xe] }
 0x53f   : > { %v11754_v12 = vrot.slane %v11752_v5, 4  ;;  %v11585_v11 = vshrl.u32 %v21290_v63, 16  ;;  %v11755_v44 = vrot.slane %v21279_v51, 5  ;;  %v21324_v18 = vrot.slane %v11581_v26, 5  ;;  %v17336_v51 = vld [vmem:[%s22424_s3 + $0x70] sm:$0xff]  }
 0x540   : > { %v11541_v45 = vrot.slane %v11540_v58, 4  ;;  %16921 = vmatmul.mubr.msk.bf16.vlgmr.msra.gmra.mrb[0].mxu1 %vm10739_vm3, %v9737_v61  ;;  %v11536_v20 = vsel %vm18453_vm2, %v11531_v4, %v11535_v50  ;;  %v15805_v37 = vcombine.low %v17432_v42, %v17433_v27  ;;  %v21329_v50 = vpop.permute.xlu0 %9672  ;;  %v15983_v48 = vrot.slane %v11608_v7, 9  ;;  %v17434_v58 = vld [vmem:[#allocation2 + $0x30] sm:$0xf]  ;;  %v17435_v61 = vld [vmem:[#allocation2 + $0x34] sm:$0xf] }
 0x541   : > { %16953 = vmatpush3.bf16.msra.mxu1 %v17431_v39  ;;  %16924 = vmatprep.mubr.msk.bf16.mxu1 %vm10739_vm3, %v9739_v3  ;;  %v11587_v36 = vrot.slane %v11585_v11, 4  ;;  %v11756_v25 = vsel %vm18372_vm4, %v11754_v12, %v11755_v44  ;;  %v21335_v4 = vpop.permute.xlu1 %9670  ;;  %v15806_v3 = vcombine.low %v17434_v58, %v17435_v61  ;;  %v11766_v11 = vrot.slane %v21290_v63, 5  ;;  %v11610_v44 = vld [vmem:[#allocation2 + $0xcc] sm:$0xe]  ;;  %v17436_v39 = vld [vmem:[#allocation2 + $0x3c] sm:$0xf] }
 0x542   : > { %v11546_v24 = vsel %vm18453_vm2, %v11541_v45, %v11545_v59  ;;  %16954 = vmatprep.subr.bf16.mxu1 %v17332_v41  ;;  %v9696_v40 = vsel %vm9684_vm6, %v15805_v37, %v21140_v16  ;;  %v11753_v10 = vsel %vm18372_vm4, %v15983_v48, %v11752_v5  ;;  %v15985_v48 = vrot.slane %v11610_v44, 9  ;;  %v17343_v58 = vld [vmem:[%s22424_s3 + $0x80] sm:$0xff]   ;;  %v17440_v44 = vld [vmem:[#allocation2 + $0x54] sm:$0xf] }
 0x543   : > { %v16015_v52 = vcombine.low %v11536_v20, %v11546_v24  ;;  %v9741_v28 = vsel %vm9733_vm1, %v9696_v40, %v21177_v56  ;;  %v11588_v26 = vor.u32 %v11587_v36, %v21324_v18  ;;  %v9699_v16 = vsel %vm9684_vm6, %v15806_v3, %v21129_v13  ;;  %v17339_v56 = vld [vmem:[%s22424_s3 + $0x78] sm:$0xff]   ;;  %v17437_v24 = vld [vmem:[#allocation2 + $0x40] sm:$0xf]  ;;  %v17362_v61 = vld [vmem:[%s22426_s5 + $0x10] ss:$20 sps:$4 sm:$0xff]  }
 0x544   : > { %v16031_v45 = vcombine.low %v11753_v10, %v11756_v25  ;;  %v11210_v12 = vld [vmem:[#allocation2 + $0xd4] sm:$0x1]  ;;  %v21356_v13 = vpop.permute.xlu0 %9596  ;;  %v15807_v36 = vcombine.low %v17436_v39, %v17437_v24  ;;  %v11768_v25 = vrot.slane %v11766_v11, 4  ;;  %v17438_v10 = vld [vmem:[#allocation2 + $0x48] sm:$0xf]  ;;  %16996 = vmatprep.subr.bf16.mxu0 %v17362_v61  ;;  %v15993_v17 = vcombine.low %v21101_v22, %v21103_v35 }
 0x545   : > { %11909 = vrot.lane.b32.xlu1 %v16015_v52, %s17539_s23  ;;  %16955 = vmatpush3.bf16.msra.mxu1 %v17332_v41  ;;  %v21345_v59 = vld [vmem:[#allocation2 + $0xcc] sm:$0xf]  ;;  %v9743_v41 = vsel %vm9733_vm1, %v9699_v16, %v21168_v34  ;;  %v11591_v7 = vshll.u32 %v11210_v12, 16  ;;  %v11589_v34 = vrot.slane %v11588_v26, 4  ;;  %v11769_v40 = vrot.slane %v11210_v12, 5 }
 0x546   : > { %16956 = vmatprep.subr.bf16.mxu1 %v17336_v51  ;;  %v11572_v5 = vshrl.u32 %v21345_v59, 16  ;;  %v11575_v20 = vshll.u32 %v21345_v59, 16  ;;  %16997 = vmatpush3.bf16.msra.mxu0 %v17362_v61  ;;  %v17441_v39 = vld [vmem:[#allocation2 + $0x58] sm:$0xf]  ;;  %v17442_v61 = vld [vmem:[#allocation2 + $0x60] sm:$0xf] }
 0x547   : > { %v11593_v37 = vrot.slane %v11591_v7, 5  ;;  %v15809_v24 = vcombine.low %v17440_v44, %v17441_v39  ;;  %16998 = vmatprep.subr.bf16.mxu0 %v17363_v2 }
 0x548   : > { %16925 = vmatmul.mubr.msk.bf16.gmra.mrb[4].mxu1 %vm10739_vm3, %v9741_v28  ;;  %v11574_v42 = vrot.slane %v11572_v5, 4  ;;  %v11577_v27 = vrot.slane %v11575_v20, 5  ;;  %v9702_v28 = vsel %vm9684_vm6, %v15807_v36, %v21196_v53  ;;  %v11767_v53 = vsel %vm18372_vm4, %v15985_v48, %v11766_v11 }
 0x549   : > { %11989 = vrot.lane.b32.xlu1 %v16031_v45, %s17538_s22  ;;  %16928 = vmatprep.mubr.msk.bf16.mxu1 %vm10739_vm3, %v9743_v41  ;;  %v21360_v52 = vpop.permute.xlu1 %9594  ;;  %v9745_v16 = vsel %vm9733_vm1, %v9702_v28, %v21231_v9  ;;  %v11594_v12 = vsel %vm18453_vm2, %v11589_v34, %v11593_v37  ;;  %v21374_v41 = vpop.permute.xlu0 %9676  ;;  %v11770_v20 = vsel %vm18372_vm4, %v11768_v25, %v11769_v40  ;;  %v17347_v9 = vld [vmem:[%s22424_s3 + $0x88] sm:$0xff]   ;;  %v17367_v25 = vld [vmem:[%s22426_s5 + $0x4] ss:$20 sps:$4 sm:$0xff]  }
 0x54a   : > { %16957 = vmatpush3.bf16.msra.mxu1 %v17336_v51  ;;  %v11578_v3 = vor.u32 %v11577_v27, %v11574_v42  ;;  %v17439_v51 = vld [vmem:[#allocation2 + $0x4c] sm:$0xf]  ;;  %v15995_v36 = vcombine.low %v21159_v47, %v21166_v30  ;;  %v16000_v42 = vcombine.low %v21194_v29, %v21204_v32  ;;  %v17364_v27 = vld [vmem:[%s22426_s5 + $0x60] ss:$20 sps:$4 sm:$0xff]   ;;  %v15997_v34 = vcombine.low %v21211_v6, %v21223_v19  ;;  %v17368_v32 = vld [vmem:[%s22426_s5 + $0x28] ss:$20 sps:$4 sm:$0xff]  }
 0x54b   : > { %16958 = vmatprep.subr.bf16.mxu1 %v17339_v56  ;;  %v15808_v26 = vcombine.low %v17438_v10, %v17439_v51  ;;  %v15999_v37 = vcombine.low %v21254_v60, %v21259_v62  ;;  %v16001_v48 = vcombine.low %v21345_v59, %v21290_v63  ;;  %v9708_v40 = vsel %vm9684_vm6, %v15809_v24, %v21244_v43  ;;  %v17371_v63 = vld [vmem:[%s22426_s5 + $0x50] ss:$20 sps:$4 sm:$0xff]   ;;  %v17373_v59 = vld [vmem:[%s22426_s5 + $0x54] ss:$20 sps:$4 sm:$0xff]  }
 0x54c   : > { %v11579_v45 = vrot.slane %v11578_v3, 4  ;;  %v17443_v3 = vld [vmem:[#allocation2 + $0x64] sm:$0xf]  ;;  %v9749_v10 = vsel %vm9733_vm1, %v9708_v40, %v21277_v55  ;;  %16999 = vmatpush3.bf16.msra.mxu0 %v17363_v2  ;;  %v17445_v55 = vld [vmem:[#allocation2 + $0x70] sm:$0xf]  ;;  %v22517_v29 = vmov 0  }
 0x54d   : > { %v9705_v5 = vsel %vm9684_vm6, %v15808_v26, %v21186_v8  ;;  %v9675_v8 = vpop.permute.xlu1 %9674  ;;  %v15810_v28 = vcombine.low %v17442_v61, %v17443_v3  ;;  %17000 = vmatprep.subr.bf16.mxu0 %v17364_v27  ;;  %v17452_v3 = vld [vmem:[#allocation2 + $0x9c] sm:$0xf] }
 0x54e   : > { %16959 = vmatpush3.bf16.msra.mxu1 %v17339_v56  ;;  %v11584_v7 = vsel %vm18453_vm2, %v11579_v45, %v21324_v18  ;;  %v9747_v56 = vsel %vm9733_vm1, %v9705_v5, %v21219_v57  ;;  %v16033_v18 = vcombine.low %v11767_v53, %v11770_v20  ;;  %v15998_v57 = vcombine.low %v21138_v0, %v21147_v38  ;;  %v17446_v20 = vld [vmem:[#allocation2 + $0x78] sm:$0xf] }
 0x54f   : > { %16960 = vmatprep.subr.bf16.mxu1 %v17343_v58  ;;  %v16017_v11 = vcombine.low %v11584_v7, %v11594_v12  ;;  %v9711_v26 = vsel %vm9684_vm6, %v15810_v28, %v21239_v21  ;;  %v17453_v28 = vld [vmem:[#allocation2 + $0xa0] sm:$0xf] }
 0x550   : > { %16929 = vmatmul.mubr.msk.bf16.gmra.mrb[8].mxu1 %vm10739_vm3, %v9745_v16  ;;  %v9751_v43 = vsel %vm9733_vm1, %v9711_v26, %v21261_v23  ;;  %17001 = vmatpush3.bf16.msra.mxu0 %v17364_v27  ;;  %v17444_v16 = vld [vmem:[#allocation2 + $0x6c] sm:$0xf] }
 0x551   : > { %16932 = vmatprep.mubr.msk.bf16.mxu1 %vm10739_vm3, %v9747_v56  ;;  %11913 = vrot.lane.b32.xlu1 %v16017_v11, %s17539_s23  ;;  %v15811_v45 = vcombine.low %v17444_v16, %v17445_v55  ;;  %v17448_v11 = vld [vmem:[#allocation2 + $0x84] sm:$0xf]  ;;  %s17478_s23 = scalar_lea.vmem %s17477_s16, 32 }
 0x552   : > { %16961 = vmatpush3.bf16.msra.mxu1 %v17343_v58  ;;  %v9601_v58 = vpop.permute.xlu0 %9600 }
 0x553   : > { %16962 = vmatprep.subr.bf16.mxu1 %v17347_v9  ;;  %v9714_v5 = vsel %vm9684_vm6, %v15811_v45, %v21304_v54  ;;  %v17449_v54 = vld [vmem:[#allocation2 + $0x88] sm:$0xf] }
 0x554   : > { %v9753_v7 = vsel %vm9733_vm1, %v9714_v5, %v21335_v4  ;;  %v15813_v44 = vcombine.low %v17448_v11, %v17449_v54  ;;  %v17451_v4 = vld [vmem:[#allocation2 + $0x94] sm:$0xf] }
 0x555   : > { %11993 = vrot.lane.b32.xlu1 %v16033_v18, %s17538_s22  ;;  %v17450_v18 = vld [vmem:[#allocation2 + $0x90] sm:$0xf]  ;;  %v17456_v5 = vld [vmem:[#allocation2 + $0xb4] sm:$0xf]  ;;  %s323_s22 = sand.u32 1, %s17526_s10  }
 0x556   : > { %v9599_v51 = vpop.permute.xlu1 %9598  ;;  %16963 = vmatpush3.bf16.msra.mxu1 %v17347_v9  ;;  %v9681_v12 = vpop.permute.xlu0 %9680  ;;  %v17447_v9 = vld [vmem:[#allocation2 + $0x7c] sm:$0xf]  ;;  %v9720_v24 = vsel %vm9684_vm6, %v15813_v44, %v21360_v52  ;;  %v15814_v27 = vcombine.low %v17450_v18, %v17451_v4  ;;  %v15815_v52 = vcombine.low %v17452_v3, %v17453_v28  ;;  %v17460_v44 = vld [vmem:[#allocation2 + $0x24] sm:$0xf]  ;;  %s324_s24 = scalar_lea.vmem [#allocation3], %s323_s22  ;;  %s14798_s29 = scalar_lea.sflag [#allocation4], %s323_s22 }
 0x557   : > { %14148 = vmatprep.subr.bf16.mxu1 %v17367_v25  ;;  %v15812_v21 = vcombine.low %v17446_v20, %v17447_v9  ;;  %v17457_v20 = vld [vmem:[#allocation2 + $0xb8] sm:$0xf]  ;;  %s14810_s25 = sshll.u32 %s324_s24, 4  ;;  %s22381_s25 = int_to_ptr.vmem [resolvable:$true] %s14810_s25 }
 0x558   : > { %16933 = vmatmul.mubr.msk.bf16.gmra.mrb[12].mxu1 %vm10739_vm3, %v9749_v10  ;;  %v9726_v10 = vsel %vm9684_vm6, %v15815_v52, %v9599_v51  ;;  %v15817_v9 = vcombine.low %v17456_v5, %v17457_v20  ;;  %v17464_v52 = vld [vmem:[#allocation2 + $0x3c] sm:$0xf]  ;;  %s17472_s14 = scalar_lea.vmem %s22381_s25, 16  ;;  %p17479_p0 = scmp.lt.s32.totalorder %s22381_s25, %s17477_s16 }
 0x559   : > { %16936 = vmatprep.mubr.msk.bf16.mxu1 %vm10739_vm3, %v9751_v43  ;;  %v9717_v23 = vsel %vm9684_vm6, %v15812_v21, %v21292_v31  ;;  %v9757_v31 = vsel %vm9733_vm1, %v9720_v24, %v9675_v8  ;;  %v17454_v43 = vld [vmem:[#allocation2 + $0xa8] sm:$0xf]  ;;  %v17455_v8 = vld [vmem:[#allocation2 + $0xac] sm:$0xf]  ;;  %p17473_p11 = scmp.ne.s32.totalorder %s22381_s25, %s17472_s14  ;;  %p17480_p1 = scmp.lt.s32.totalorder %s17478_s23, %s17472_s14 }
 0x55a   : > { %v9679_v53 = vpop.permute.xlu1 %9678  ;;  %v9755_v56 = vsel %vm9733_vm1, %v9717_v23, %v21329_v50  ;;  %v11884_v2 = vpop.permute.xlu0 %11883  ;;  %v9723_v50 = vsel %vm9684_vm6, %v15814_v27, %v21356_v13  ;;  %v15816_v16 = vcombine.low %v17454_v43, %v17455_v8  ;;  %v17458_v23 = vld [vmem:[#allocation2 + $0x18] sm:$0xf]  ;;  %v17461_v24 = vld [vmem:[#allocation2 + $0x28] sm:$0xf]  ;;  %v17462_v27 = vld [vmem:[#allocation2 + $0x30] sm:$0xf] }
 0x55b   : > { %v9759_v40 = vsel %vm9733_vm1, %v9723_v50, %v21374_v41  ;;  %v9761_v55 = vsel %vm9733_vm1, %v9726_v10, %v9679_v53  ;;  %v15987_v18 = vcombine.low %v17460_v44, %v17461_v24  ;;  %v17465_v10 = vld [vmem:[#allocation2 + $0x40] sm:$0xf]  ;;  %v17470_v24 = vld [vmem:[#allocation2 + $0x78] sm:$0xf]  ;;  %p17474_p12 = pnand %p17473_p11, %p17633_p5  ;;  %p17481_p2 = por %p17480_p1, %p17479_p0 }
 0x55c   : > { %v9729_v45 = vsel %vm9684_vm6, %v15816_v16, %v9601_v58  ;;  %v15989_v43 = vcombine.low %v17464_v52, %v17465_v10 }
 0x55d   : > { %v9763_v41 = vsel %vm9733_vm1, %v9729_v45, %v9681_v12  ;;  %p17475_p13 = pneg %p17474_p12 }
 0x55e   : > { %v11964_v25 = vpop.permute.xlu0 %11963 }
 0x55f   : > { %p17482_p3 = pnand %p17481_p2, %p17475_p13 }
 0x560   : > { %16937 = vmatmul.mubr.msk.bf16.gmra.mrb[16].mxu1 %vm10739_vm3, %v9753_v7 }
 0x561   : > { %16940 = vmatprep.mubr.msk.bf16.mxu1 %vm10739_vm3, %v9755_v56  ;;  %v9603_v39 = vpop.permute.xlu1 %9602  ;;  %v17459_v56 = vld [vmem:[#allocation2 + $0x1c] sm:$0xf] }
 0x562   : > { %v11888_v26 = vpop.permute.xlu0 %11887  ;;  %v9732_v51 = vsel %vm9684_vm6, %v15817_v9, %v9603_v39  ;;  %v15986_v11 = vcombine.low %v17458_v23, %v17459_v56  ;;  %v17468_v23 = vld [vmem:[#allocation2 + $0x60] sm:$0xf]  ;;  %v17469_v56 = vld [vmem:[#allocation2 + $0x64] sm:$0xf] }
 0x564   : > { %v11997_v58 = vsel %vm9684_vm6, %v15986_v11, %v11884_v2  ;;  %v17365_v2 = vld [vmem:[%s22426_s5] ss:$20 sps:$4 sm:$0xff]   ;;  %v15992_v11 = vcombine.low %v17468_v23, %v17469_v56 }
 0x565   : > { %v9683_v61 = vpop.permute.xlu1 %9682  ;;  %v12044_v12 = vsel %vm9733_vm1, %v11997_v58, %v11964_v25 }
 0x566   : > { %v11968_v21 = vpop.permute.xlu0 %11967  ;;  %v9765_v53 = vsel %vm9733_vm1, %v9732_v51, %v9683_v61 }
 0x568   : > { %16941 = vmatmul.mubr.msk.bf16.gmra.mrb[20].mxu1 %vm10739_vm3, %v9757_v31  ;;  %v17463_v31 = vld [vmem:[#allocation2 + $0x34] sm:$0xf] }
 0x569   : > { %16944 = vmatprep.mubr.msk.bf16.mxu1 %vm10739_vm3, %v9759_v40  ;;  %v15988_v50 = vcombine.low %v17462_v27, %v17463_v31 }
 0x56b   : > { %v12003_v61 = vsel %vm9684_vm6, %v15988_v50, %v11888_v26 }
 0x56c   : > { %v11892_v54 = vpop.permute.xlu0 %11891  ;;  %v12048_v28 = vsel %vm9733_vm1, %v12003_v61, %v11968_v21  ;;  %v15991_v21 = vcombine.low %v21048_v46, %v21055_v49  ;;  %v15994_v46 = vcombine.low %v17470_v24, %v21039_v1  ;;  %v15996_v1 = vcombine.low %v21076_v14, %v21091_v33 }
 0x56f   : > { %v11886_v13 = vpop.permute.xlu1 %11885 }
 0x570   : > { %16945 = vmatmul.mubr.msk.bf16.gmra.mrb[24].mxu1 %vm10739_vm3, %v9761_v55  ;;  %v12000_v39 = vsel %vm9684_vm6, %v15987_v18, %v11886_v13  ;;  %v11972_v25 = vpop.permute.xlu0 %11971  ;;  %v17466_v55 = vld [vmem:[#allocation2 + $0x48] sm:$0xf]  ;;  %v17467_v13 = vld [vmem:[#allocation2 + $0x4c] sm:$0xf] }
 0x571   : > { %16948 = vmatprep.mubr.msk.bf16.mxu1 %vm10739_vm3, %v9763_v41  ;;  %v15990_v45 = vcombine.low %v17466_v55, %v17467_v13  ;;  %v17376_v55 = vld [vmem:[%s22426_s5 + $0x7c] ss:$20 sps:$4 sm:$0xff]  }
 0x573   : > { %v11966_v7 = vpop.permute.xlu1 %11965  ;;  %v12009_v5 = vsel %vm9684_vm6, %v15990_v45, %v11892_v54 }
 0x574   : > { %v12046_v40 = vsel %vm9733_vm1, %v12000_v39, %v11966_v7  ;;  %v12052_v20 = vsel %vm9733_vm1, %v12009_v5, %v11972_v25 }
 0x577   : > { %v11896_v8 = vpop.permute.xlu0 %11895 }
 0x578   : > { %16949 = vmatmul.mubr.msk.bf16.gmra.mrb[28].mxu1 %vm10739_vm3, %v9765_v53  ;;  %v12015_v58 = vsel %vm9684_vm6, %v15992_v11, %v11896_v8 }
 0x579   : > { %16964 = vmatprep.mubr.msk.bf16.mxu1 %vm10739_vm3, %v12044_v12 }
 0x57b   : > { %v11890_v4 = vpop.permute.xlu1 %11889  ;;  %v11976_v9 = vpop.permute.xlu0 %11975 }
 0x57c   : > { %v12006_v16 = vsel %vm9684_vm6, %v15989_v43, %v11890_v4  ;;  %v12056_v12 = vsel %vm9733_vm1, %v12015_v58, %v11976_v9 }
 0x57f   : > { %v11970_v3 = vpop.permute.xlu1 %11969 }
 0x580   : > { %16965 = vmatmul.mubr.msk.bf16.vlgmr.msra.gmra.mrb[0].mxu1 %vm10739_vm3, %v12046_v40  ;;  %v12050_v41 = vsel %vm9733_vm1, %v12006_v16, %v11970_v3  ;;  %v17374_v16 = vld [vmem:[%s22426_s5 + $0x78] ss:$20 sps:$4 sm:$0xff]  }
 0x581   : > { %16968 = vmatprep.mubr.msk.bf16.mxu1 %vm10739_vm3, %v12048_v28  ;;  %14149 = vmatpush1.bf16.msra.mxu1 %v17365_v2 }
 0x585   : > { %v11900_v54 = vpop.permute.xlu0 %11899 }
 0x586   : > { %v11894_v26 = vpop.permute.xlu1 %11893  ;;  %v12021_v39 = vsel %vm9684_vm6, %v15994_v46, %v11900_v54 }
 0x587   : > { %v12012_v7 = vsel %vm9684_vm6, %v15991_v21, %v11894_v26 }
 0x588   : > { %16969 = vmatmul.mubr.msk.bf16.gmra.mrb[4].mxu1 %vm10739_vm3, %v12050_v41 }
 0x589   : > { %16972 = vmatprep.mubr.msk.bf16.mxu1 %vm10739_vm3, %v12052_v20  ;;  %v11980_v49 = vpop.permute.xlu0 %11979 }
 0x58a   : > { %v11974_v51 = vpop.permute.xlu1 %11973  ;;  %v12060_v31 = vsel %vm9733_vm1, %v12021_v39, %v11980_v49 }
 0x58b   : > { %v12054_v53 = vsel %vm9733_vm1, %v12012_v7, %v11974_v51 }
 0x590   : > { %16973 = vmatmul.mubr.msk.bf16.gmra.mrb[8].mxu1 %vm10739_vm3, %v12054_v53  ;;  %v11904_v50 = vpop.permute.xlu0 %11903 }
 0x591   : > { %16976 = vmatprep.mubr.msk.bf16.mxu1 %vm10739_vm3, %v12056_v12 }
 0x593   : > { %v11898_v44 = vpop.permute.xlu1 %11897 }
 0x594   : > { %v12018_v18 = vsel %vm9684_vm6, %v15993_v17, %v11898_v44  ;;  %v11984_v2 = vpop.permute.xlu0 %11983  ;;  %v12027_v17 = vsel %vm9684_vm6, %v15996_v1, %v11904_v50 }
 0x595   : > { %v12064_v61 = vsel %vm9733_vm1, %v12027_v17, %v11984_v2 }
 0x597   : > { %v11978_v4 = vpop.permute.xlu1 %11977 }
 0x598   : > { %v12058_v27 = vsel %vm9733_vm1, %v12018_v18, %v11978_v4 }
 0x599   : > { %16977 = vmatmul.mubr.msk.bf16.gmra.mrb[12].mxu1 %vm10739_vm3, %v12058_v27 }
 0x59a   : > { %16980 = vmatprep.mubr.msk.bf16.mxu1 %vm10739_vm3, %v12060_v31 }
 0x59c   : > { %v11908_v3 = vpop.permute.xlu0 %11907 }
 0x59d   : > { %v12033_v30 = vsel %vm9684_vm6, %v15998_v57, %v11908_v3 }
 0x59f   : > { %v11902_v40 = vpop.permute.xlu1 %11901 }
 0x5a0   : > { %v12024_v22 = vsel %vm9684_vm6, %v15995_v36, %v11902_v40  ;;  %v11988_v14 = vpop.permute.xlu0 %11987 }
 0x5a1   : > { %v12068_v52 = vsel %vm9733_vm1, %v12033_v30, %v11988_v14 }
 0x5a3   : > { %v11982_v35 = vpop.permute.xlu1 %11981 }
 0x5a4   : > { %v12062_v25 = vsel %vm9733_vm1, %v12024_v22, %v11982_v35 }
 0x5a5   : > { %16981 = vmatmul.mubr.msk.bf16.gmra.mrb[16].mxu1 %vm10739_vm3, %v12062_v25 }
 0x5a6   : > { %16984 = vmatprep.mubr.msk.bf16.mxu1 %vm10739_vm3, %v12064_v61 }
 0x5a9   : > { %v11912_v10 = vpop.permute.xlu0 %11911 }
 0x5aa   : > { %v12039_v0 = vsel %vm9684_vm6, %v16000_v42, %v11912_v10  ;;  %v17370_v42 = vld [vmem:[%s22426_s5 + $0x2c] ss:$20 sps:$4 sm:$0xff]  }
 0x5ab   : > { %14150 = vmatprep.subr.bf16.mxu1 %v17370_v42 }
 0x5ac   : > { %v11906_v28 = vpop.permute.xlu1 %11905  ;;  %14151 = vmatpush1.bf16.msra.mxu1 %v17368_v32 }
 0x5ad   : > { %v12030_v33 = vsel %vm9684_vm6, %v15997_v34, %v11906_v28  ;;  %v11992_v8 = vpop.permute.xlu0 %11991  ;;  %14152 = vmatprep.subr.bf16.mxu1 %v17373_v59 }
 0x5ae   : > { %v12072_v57 = vsel %vm9733_vm1, %v12039_v0, %v11992_v8 }
 0x5b0   : > { %v11986_v47 = vpop.permute.xlu1 %11985  ;;  %14153 = vmatpush1.bf16.msra.mxu1 %v17371_v63 }
 0x5b1   : > { %v12066_v36 = vsel %vm9733_vm1, %v12030_v33, %v11986_v47  ;;  %14154 = vmatprep.subr.bf16.mxu1 %v17376_v55 }
 0x5b2   : > { %16985 = vmatmul.mubr.msk.bf16.gmra.mrb[20].mxu1 %vm10739_vm3, %v12066_v36 }
 0x5b3   : > { %16988 = vmatprep.mubr.msk.bf16.mxu1 %vm10739_vm3, %v12068_v52 }
 0x5b4   : > { %14155 = vmatpush1.bf16.msra.mxu1 %v17374_v16 }
 0x5b7   : > { %v11910_v43 = vpop.permute.xlu1 %11909 }
 0x5b8   : > { %v12036_v6 = vsel %vm9684_vm6, %v15999_v37, %v11910_v43 }
 0x5bb   : > { %v11990_v19 = vpop.permute.xlu1 %11989 }
 0x5bc   : > { %v12070_v38 = vsel %vm9733_vm1, %v12036_v6, %v11990_v19 }
 0x5bd   : > { %16989 = vmatmul.mubr.msk.bf16.gmra.mrb[24].mxu1 %vm10739_vm3, %v12070_v38 }
 0x5be   : > { %16992 = vmatprep.mubr.msk.bf16.mxu1 %vm10739_vm3, %v12072_v57 }
 0x5c3   : > { %v11914_v34 = vpop.permute.xlu1 %11913 }
 0x5c4   : > { %v12042_v60 = vsel %vm9684_vm6, %v16001_v48, %v11914_v34  ;;  %v21548_v48 = vld [vmem:[%s22425_s4] ss:$0 sm:$0xff] }
 0x5c7   : > { %v11994_v62 = vpop.permute.xlu1 %11993 }
 0x5c8   : > { %v12074_v37 = vsel %vm9733_vm1, %v12042_v60, %v11994_v62 }
 0x5c9   : > { %16993 = vmatmul.mubr.msk.bf16.gmra.mrb[28].mxu1 %vm10739_vm3, %v12074_v37  ;;  %vm22518_vm3 = vcmask 1047559  }
 0x5ca   : > { %14180 = vmatprep.mubr.bf16.mxu1 %v22517_v29  ;;  %vm22519_vm5 = vmmov %vm22518_vm3 }
 0x5cb   : > { %vm22529_vm7 = vmmov %vm22518_vm3 }
 0x5cc   : > { %vm22531_vm14 = vmmov %vm22518_vm3 }
 0x5cd   : > { %vm22543_vm15 = vmmov %vm22518_vm3 }
 0x5ce   : > { %vm22544_vm4 = vmmov %vm22518_vm3 }
 0x653   : > { %v16966_v13 = vpop.f32.mrb[0].mxu1 }
 0x654   : > { %v12358_v45 = vadd.f32 %v16966_v13, %v21548_v48  ;;  %v12190_v41 = vpop.f32.mrb[1].mxu1 }
 0x655   : > { %v12356_v26 = vadd.f32 %v21548_v48, %v12190_v41  ;;  %v16967_v5 = vpop.f32.mrb[2].mxu1 }
 0x656   : > { %v12390_v20 = vmax.f32 %v12358_v45, 0.0  ;;  %v12359_v9 = vadd.f32 %v16967_v5, %v21548_v48  ;;  %v12193_v21 = vpop.f32.mrb[3].mxu1 }
 0x657   : > { %v12388_v51 = vmax.f32 %v12356_v26, 0.0  ;;  %v12357_v7 = vadd.f32 %v21548_v48, %v12193_v21 }
 0x658   : > { %v12486_v23 = vcombine.high %v12390_v20, %v12390_v20  ;;  %v12493_v56 = vrot.slane %v12390_v20, %v17791_v15  ;;  %v12391_v11 = vmax.f32 %v12359_v9, 0.0 }
 0x659   : > { %v12452_v53 = vcombine.high %v12388_v51, %v12388_v51  ;;  %v12459_v58 = vrot.slane %v12388_v51, %v17791_v15  ;;  %v12389_v12 = vmax.f32 %v12357_v7, 0.0 }
 0x65a   : > { %v12500_v54 = vrot.slane %v12486_v23, %v17791_v15  ;;  %v12501_v44 = vcombine.high %v12493_v56, %v12493_v56  ;;  %v16077_v24 = vrot.slane %v12493_v56, 9  ;;  %v12503_v46 = vcombine.high %v12391_v11, %v12391_v11 }
 0x65b   : > { %v12466_v49 = vrot.slane %v12452_v53, %v17791_v15  ;;  %v12467_v18 = vcombine.high %v12459_v58, %v12459_v58  ;;  %v16069_v4 = vrot.slane %v12459_v58, 9  ;;  %v12510_v39 = vrot.slane %v12391_v11, %v17791_v15  ;;  %v16970_v27 = vpop.f32.mrb[4].mxu1 }
 0x65c   : > { %v12502_v31 = vcombine.high %v12500_v54, %v12500_v54  ;;  %v16078_v50 = vrot.slane %v12501_v44, 9  ;;  %v16079_v40 = vrot.slane %v12500_v54, 9  ;;  %v13516_v1 = vmax.f32 %v12493_v56, %v16077_v24  ;;  %v12206_v2 = vpop.f32.mrb[5].mxu1 }
 0x65d   : > { %v12468_v22 = vcombine.high %v12466_v49, %v12466_v49  ;;  %v16070_v35 = vrot.slane %v12467_v18, 9  ;;  %v16071_v17 = vrot.slane %v12466_v49, 9  ;;  %v13508_v25 = vmax.f32 %v12459_v58, %v16069_v4  ;;  %v21565_v61 = vpop.f32.mrb[6].mxu1 }
 0x65e   : > { %v16080_v3 = vrot.slane %v12502_v31, 9  ;;  %v13517_v28 = vmax.f32 %v12501_v44, %v16078_v50  ;;  %v13518_v14 = vmax.f32 %v12500_v54, %v16079_v40  ;;  %v12517_v33 = vrot.slane %v12503_v46, %v17791_v15  ;;  %v21568_v47 = vpop.f32.mrb[7].mxu1  ;;  %v17377_v46 = vld [vmem:[%s22426_s5 + $0x88] ss:$20 sps:$4 sm:$0xff]  }
 0x65f   : > { %v16072_v30 = vrot.slane %v12468_v22, 9  ;;  %v13509_v36 = vmax.f32 %v12467_v18, %v16070_v35  ;;  %v13510_v52 = vmax.f32 %v12466_v49, %v16071_v17  ;;  %v13636_v10 = vmax.f32 %v13508_v25, %v13516_v1  ;;  %17002 = vmatprep.subr.bf16.mxu0 %v17377_v46 }
 0x660   : > { %v13519_v43 = vmax.f32 %v12502_v31, %v16080_v3  ;;  %v12518_v8 = vcombine.high %v12510_v39, %v12510_v39  ;;  %v12519_v6 = vcombine.high %v12517_v33, %v12517_v33  ;;  %v16081_v19 = vrot.slane %v12510_v39, 9  ;;  %17003 = vmatpush3.bf16.msra.mxu0 %v17377_v46 }
 0x661   : > { %v13511_v0 = vmax.f32 %v12468_v22, %v16072_v30  ;;  %v13637_v38 = vmax.f32 %v13509_v36, %v13517_v28  ;;  %v13638_v57 = vmax.f32 %v13510_v52, %v13518_v14  ;;  %v13700_v34 = vpack.c.bf16 %v13636_v10, %v13636_v10 }
 0x662   : > { %v16082_v60 = vrot.slane %v12518_v8, 9  ;;  %v16083_v62 = vrot.slane %v12517_v33, 9  ;;  %v16084_v37 = vrot.slane %v12519_v6, 9  ;;  %v13520_v59 = vmax.f32 %v12510_v39, %v16081_v19 }
 0x663   : > { %v13639_v32 = vmax.f32 %v13511_v0, %v13519_v43  ;;  %v13701_v42 = vpack.c.bf16 %v13637_v38, %v13637_v38  ;;  %v13702_v63 = vpack.c.bf16 %v13638_v57, %v13638_v57  ;;  %v21570_v16 = vpop.f32.mrb[8].mxu1  ;;  %v13852_v55 = vunpack.c.l.b16 %v13700_v34 }
 0x664   : > { %v13521_v13 = vmax.f32 %v12518_v8, %v16082_v60  ;;  %v13522_v45 = vmax.f32 %v12517_v33, %v16083_v62  ;;  %v12469_v41 = vcombine.high %v12389_v12, %v12389_v12  ;;  %v21572_v26 = vpop.f32.mrb[9].mxu1  ;;  %v12476_v21 = vrot.slane %v12389_v12, %v17791_v15 }
 0x665   : > { %v13703_v5 = vpack.c.bf16 %v13639_v32, %v13639_v32  ;;  %v13853_v20 = vunpack.c.l.b16 %v13701_v42  ;;  %v13854_v9 = vunpack.c.l.b16 %v13702_v63  ;;  %v21575_v51 = vpop.f32.mrb[10].mxu1  ;;  %v13523_v7 = vmax.f32 %v12519_v6, %v16084_v37 }
 0x666   : > { %v12483_v23 = vrot.slane %v12469_v41, %v17791_v15  ;;  %v12362_v56 = vadd.f32 %v16970_v27, %v21548_v48  ;;  %v12360_v11 = vadd.f32 %v21548_v48, %v12206_v2  ;;  %v21580_v53 = vpop.f32.mrb[11].mxu1  ;;  %v12484_v24 = vcombine.high %v12476_v21, %v12476_v21 }
 0x667   : > { %v13855_v58 = vunpack.c.l.b16 %v13703_v5  ;;  %v13916_v54 = vrot.slane %v13853_v20, 7  ;;  %v13918_v44 = vrot.slane %v13854_v9, 6  ;;  %v16073_v49 = vrot.slane %v12476_v21, 9 }
 0x668   : > { %v12485_v12 = vcombine.high %v12483_v23, %v12483_v23  ;;  %v16075_v18 = vrot.slane %v12483_v23, 9  ;;  %v12394_v4 = vmax.f32 %v12362_v56, 0.0  ;;  %v16074_v27 = vrot.slane %v12484_v24, 9 }
 0x669   : > { %v13917_v39 = vsel %vm8216_vm13, %v13916_v54, %v13852_v55  ;;  %v13920_v31 = vrot.slane %v13855_v58, 5  ;;  %v12392_v50 = vmax.f32 %v12360_v11, 0.0  ;;  %v13512_v2 = vmax.f32 %v12476_v21, %v16073_v49 }
 0x66a   : > { %v13919_v40 = vsel %vm8198_vm8, %v13918_v44, %v13917_v39  ;;  %v16076_v1 = vrot.slane %v12485_v12, 9  ;;  %v13514_v22 = vmax.f32 %v12483_v23, %v16075_v18  ;;  %v13513_v35 = vmax.f32 %v12484_v24, %v16074_v27 }
 0x66b   : > { %v13921_v17 = vsel %vm8201_vm9, %v13920_v31, %v13919_v40  ;;  %v12554_v25 = vcombine.high %v12394_v4, %v12394_v4  ;;  %v12561_v3 = vrot.slane %v12394_v4, %v17791_v15  ;;  %v13640_v14 = vmax.f32 %v13512_v2, %v13520_v59 }
 0x66c   : > { %v13515_v28 = vmax.f32 %v12485_v12, %v16076_v1  ;;  %v13642_v33 = vmax.f32 %v13514_v22, %v13522_v45  ;;  %v12520_v30 = vcombine.high %v12392_v50, %v12392_v50  ;;  %v21589_v36 = vpop.f32.mrb[12].mxu1  ;;  %v13641_v52 = vmax.f32 %v13513_v35, %v13521_v13 }
 0x66d   : > { %v12568_v10 = vrot.slane %v12554_v25, %v17791_v15  ;;  %v12569_v43 = vcombine.high %v12561_v3, %v12561_v3  ;;  %v16093_v8 = vrot.slane %v12561_v3, 9  ;;  %v21592_v6 = vpop.f32.mrb[13].mxu1  ;;  %v13704_v0 = vpack.c.bf16 %v13640_v14, %v13640_v14 }
 0x66e   : > { %v13643_v19 = vmax.f32 %v13515_v28, %v13523_v7  ;;  %v13706_v38 = vpack.c.bf16 %v13642_v33, %v13642_v33  ;;  %v12527_v57 = vrot.slane %v12392_v50, %v17791_v15  ;;  %v21595_v34 = vpop.f32.mrb[14].mxu1  ;;  %v13705_v60 = vpack.c.bf16 %v13641_v52, %v13641_v52 }
 0x66f   : > { %v12570_v62 = vcombine.high %v12568_v10, %v12568_v10  ;;  %v16094_v37 = vrot.slane %v12569_v43, 9  ;;  %v16095_v32 = vrot.slane %v12568_v10, 9  ;;  %v21597_v42 = vpop.f32.mrb[15].mxu1  ;;  %v13856_v59 = vunpack.c.l.b16 %v13704_v0 }
 0x670   : > { %v13707_v63 = vpack.c.bf16 %v13643_v19, %v13643_v19  ;;  %v13858_v55 = vunpack.c.l.b16 %v13706_v38  ;;  %v12363_v13 = vadd.f32 %v21565_v61, %v21548_v48  ;;  %v13857_v45 = vunpack.c.l.b16 %v13705_v60 }
 0x671   : > { %v16096_v41 = vrot.slane %v12570_v62, 9  ;;  %v13532_v5 = vmax.f32 %v12561_v3, %v16093_v8  ;;  %v13533_v20 = vmax.f32 %v12569_v43, %v16094_v37  ;;  %v13922_v21 = vrot.slane %v13856_v59, 4 }
 0x672   : > { %v21601_v9 = vunpack.c.l.b16 %v13707_v63  ;;  %v13534_v7 = vmax.f32 %v12568_v10, %v16095_v32  ;;  %v12534_v23 = vrot.slane %v12520_v30, %v17791_v15  ;;  %v13924_v56 = vrot.slane %v13857_v45, 3 }
 0x673   : > { %v13926_v11 = vrot.slane %v13858_v55, 2  ;;  %v12535_v58 = vcombine.high %v12527_v57, %v12527_v57  ;;  %v16085_v54 = vrot.slane %v12527_v57, 9  ;;  %v13923_v44 = vsel %vm8204_vm10, %v13922_v21, %v13921_v17 }
 0x674   : > { %v13535_v24 = vmax.f32 %v12570_v62, %v16096_v41  ;;  %v12536_v46 = vcombine.high %v12534_v23, %v12534_v23  ;;  %v16087_v12 = vrot.slane %v12534_v23, 9  ;;  %v13925_v61 = vsel %vm8207_vm11, %v13924_v56, %v13923_v44 }
 0x675   : > { %v16086_v49 = vrot.slane %v12535_v58, 9  ;;  %v13524_v18 = vmax.f32 %v12527_v57, %v16085_v54  ;;  %v12395_v4 = vmax.f32 %v12363_v13, 0.0  ;;  %v21607_v39 = vsel %vm8210_vm12, %v13926_v11, %v13925_v61 }
 0x676   : > { %v16088_v31 = vrot.slane %v12536_v46, 9  ;;  %v13526_v27 = vmax.f32 %v12534_v23, %v16087_v12  ;;  %v12361_v50 = vadd.f32 %v21548_v48, %v21568_v47  ;;  %v12366_v3 = vadd.f32 %v21570_v16, %v21548_v48 }
 0x677   : > { %v13525_v40 = vmax.f32 %v12535_v58, %v16086_v49  ;;  %v13644_v1 = vmax.f32 %v13524_v18, %v13532_v5  ;;  %v12571_v2 = vcombine.high %v12395_v4, %v12395_v4  ;;  %v12578_v22 = vrot.slane %v12395_v4, %v17791_v15 }
 0x678   : > { %v13527_v35 = vmax.f32 %v12536_v46, %v16088_v31  ;;  %v13646_v17 = vmax.f32 %v13526_v27, %v13534_v7  ;;  %v12393_v25 = vmax.f32 %v12361_v50, 0.0  ;;  %v21614_v28 = vpop.f32.mrb[16].mxu1  ;;  %v12398_v46 = vmax.f32 %v12366_v3, 0.0 }
 0x679   : > { %v13645_v14 = vmax.f32 %v13525_v40, %v13533_v20  ;;  %v13708_v33 = vpack.c.bf16 %v13644_v1, %v13644_v1  ;;  %v12585_v30 = vrot.slane %v12571_v2, %v17791_v15  ;;  %v12586_v52 = vcombine.high %v12578_v22, %v12578_v22  ;;  %v21617_v10 = vpop.f32.mrb[17].mxu1 }
 0x67a   : > { %v13647_v47 = vmax.f32 %v13527_v35, %v13535_v24  ;;  %v13710_v43 = vpack.c.bf16 %v13646_v17, %v13646_v17  ;;  %v16097_v8 = vrot.slane %v12578_v22, 9  ;;  %v12537_v19 = vcombine.high %v12393_v25, %v12393_v25  ;;  %v21619_v0 = vpop.f32.mrb[18].mxu1 }
 0x67b   : > { %v13709_v38 = vpack.c.bf16 %v13645_v14, %v13645_v14  ;;  %v13860_v57 = vunpack.c.l.b16 %v13708_v33  ;;  %v12587_v60 = vcombine.high %v12585_v30, %v12585_v30  ;;  %v16098_v62 = vrot.slane %v12586_v52, 9  ;;  %v21621_v16 = vpop.f32.mrb[19].mxu1 }
 0x67c   : > { %v13711_v37 = vpack.c.bf16 %v13647_v47, %v13647_v47  ;;  %v13862_v32 = vunpack.c.l.b16 %v13710_v43  ;;  %v16099_v63 = vrot.slane %v12585_v30, 9  ;;  %v13536_v59 = vmax.f32 %v12578_v22, %v16097_v8 }
 0x67d   : > { %v13861_v55 = vunpack.c.l.b16 %v13709_v38  ;;  %v16100_v13 = vrot.slane %v12587_v60, 9  ;;  %v13537_v45 = vmax.f32 %v12586_v52, %v16098_v62  ;;  %v12544_v41 = vrot.slane %v12393_v25, %v17791_v15 }
 0x67e   : > { %v13863_v5 = vunpack.c.l.b16 %v13711_v37  ;;  %v13932_v20 = vrot.slane %v13862_v32, 6  ;;  %v13538_v21 = vmax.f32 %v12585_v30, %v16099_v63  ;;  %v12551_v7 = vrot.slane %v12537_v19, %v17791_v15 }
 0x67f   : > { %v13930_v23 = vrot.slane %v13861_v55, 7  ;;  %v13539_v56 = vmax.f32 %v12587_v60, %v16100_v13  ;;  %v12552_v11 = vcombine.high %v12544_v41, %v12544_v41  ;;  %v16089_v58 = vrot.slane %v12544_v41, 9 }
 0x680   : > { %v13934_v54 = vrot.slane %v13863_v5, 5  ;;  %v12553_v44 = vcombine.high %v12551_v7, %v12551_v7  ;;  %v16091_v24 = vrot.slane %v12551_v7, 9  ;;  %v12364_v18 = vadd.f32 %v21548_v48, %v21572_v26 }
 0x681   : > { %v13931_v12 = vsel %vm8216_vm13, %v13930_v23, %v13860_v57  ;;  %v16090_v61 = vrot.slane %v12552_v11, 9  ;;  %v13528_v49 = vmax.f32 %v12544_v41, %v16089_v58  ;;  %v12622_v50 = vcombine.high %v12398_v46, %v12398_v46 }
 0x682   : > { %v13933_v4 = vsel %vm8198_vm8, %v13932_v20, %v13931_v12  ;;  %v16092_v31 = vrot.slane %v12553_v44, 9  ;;  %v13530_v27 = vmax.f32 %v12551_v7, %v16091_v24  ;;  %v12629_v22 = vrot.slane %v12398_v46, %v17791_v15 }
 0x683   : > { %v13529_v40 = vmax.f32 %v12552_v11, %v16090_v61  ;;  %v13648_v1 = vmax.f32 %v13528_v49, %v13536_v59  ;;  %v13935_v2 = vsel %vm8201_vm9, %v13934_v54, %v13933_v4  ;;  %v12636_v25 = vrot.slane %v12622_v50, %v17791_v15 }
 0x684   : > { %v13531_v35 = vmax.f32 %v12553_v44, %v16092_v31  ;;  %v13650_v17 = vmax.f32 %v13530_v27, %v13538_v21  ;;  %v12396_v3 = vmax.f32 %v12364_v18, 0.0  ;;  %v12637_v30 = vcombine.high %v12629_v22, %v12629_v22 }
 0x685   : > { %v13649_v14 = vmax.f32 %v13529_v40, %v13537_v45  ;;  %v13712_v33 = vpack.c.bf16 %v13648_v1, %v13648_v1  ;;  %v16109_v26 = vrot.slane %v12629_v22, 9  ;;  %v21632_v52 = vpop.f32.mrb[20].mxu1  ;;  %v12638_v8 = vcombine.high %v12636_v25, %v12636_v25 }
 0x686   : > { %v13651_v47 = vmax.f32 %v13531_v35, %v13539_v56  ;;  %v13714_v43 = vpack.c.bf16 %v13650_v17, %v13650_v17  ;;  %v16111_v19 = vrot.slane %v12636_v25, 9  ;;  %v21634_v38 = vpop.f32.mrb[21].mxu1  ;;  %v13928_v57 = vrot.slane %v21601_v9, 1 }
 0x687   : > { %v13713_v60 = vpack.c.bf16 %v13649_v14, %v13649_v14  ;;  %v13864_v62 = vunpack.c.l.b16 %v13712_v33  ;;  %v16110_v37 = vrot.slane %v12637_v30, 9  ;;  %v21637_v32 = vpop.f32.mrb[22].mxu1  ;;  %v16112_v55 = vrot.slane %v12638_v8, 9 }
 0x688   : > { %v13715_v63 = vpack.c.bf16 %v13651_v47, %v13651_v47  ;;  %v13866_v59 = vunpack.c.l.b16 %v13714_v43  ;;  %v13548_v13 = vmax.f32 %v12629_v22, %v16109_v26  ;;  %v21639_v45 = vpop.f32.mrb[23].mxu1  ;;  %v13550_v20 = vmax.f32 %v12636_v25, %v16111_v19 }
 0x689   : > { %v13865_v41 = vunpack.c.l.b16 %v13713_v60  ;;  %v13936_v5 = vrot.slane %v13864_v62, 4  ;;  %v12588_v21 = vcombine.high %v12396_v3, %v12396_v3  ;;  %v13549_v56 = vmax.f32 %v12637_v30, %v16110_v37 }
 0x68a   : > { %v21641_v7 = vunpack.c.l.b16 %v13715_v63  ;;  %v13940_v23 = vrot.slane %v13866_v59, 2  ;;  %v12595_v11 = vrot.slane %v12396_v3, %v17791_v15  ;;  %v12367_v24 = vadd.f32 %v21575_v51, %v21548_v48 }
 0x68b   : > { %v13937_v58 = vsel %vm8204_vm10, %v13936_v5, %v13935_v2  ;;  %v13938_v54 = vrot.slane %v13865_v41, 3  ;;  %v12602_v44 = vrot.slane %v12588_v21, %v17791_v15  ;;  %v13551_v46 = vmax.f32 %v12638_v8, %v16112_v55 }
 0x68c   : > { %v12603_v12 = vcombine.high %v12595_v11, %v12595_v11  ;;  %v16101_v61 = vrot.slane %v12595_v11, 9  ;;  %v12365_v49 = vadd.f32 %v21548_v48, %v21580_v53  ;;  %v12399_v27 = vmax.f32 %v12367_v24, 0.0 }
 0x68d   : > { %v13939_v18 = vsel %vm8207_vm11, %v13938_v54, %v13937_v58  ;;  %v12604_v4 = vcombine.high %v12602_v44, %v12602_v44  ;;  %v16103_v31 = vrot.slane %v12602_v44, 9 }
 0x68e   : > { %v21652_v50 = vsel %vm8210_vm12, %v13940_v23, %v13939_v18  ;;  %v16102_v40 = vrot.slane %v12603_v12, 9  ;;  %v13540_v1 = vmax.f32 %v12595_v11, %v16101_v61  ;;  %v12397_v2 = vmax.f32 %v12365_v49, 0.0 }
 0x68f   : > { %v16104_v22 = vrot.slane %v12604_v4, 9  ;;  %v13542_v35 = vmax.f32 %v12602_v44, %v16103_v31  ;;  %v12639_v51 = vcombine.high %v12399_v27, %v12399_v27  ;;  %v12646_v17 = vrot.slane %v12399_v27, %v17791_v15 }
 0x690   : > { %v13541_v25 = vmax.f32 %v12603_v12, %v16102_v40  ;;  %v13652_v3 = vmax.f32 %v13540_v1, %v13548_v13  ;;  %v12605_v14 = vcombine.high %v12397_v2, %v12397_v2  ;;  %v12612_v53 = vrot.slane %v12397_v2, %v17791_v15  ;;  %v21656_v33 = vpop.f32.mrb[24].mxu1 }
 0x691   : > { %v13543_v30 = vmax.f32 %v12604_v4, %v16104_v22  ;;  %v13654_v26 = vmax.f32 %v13542_v35, %v13550_v20  ;;  %v12653_v47 = vrot.slane %v12639_v51, %v17791_v15  ;;  %v12654_v43 = vcombine.high %v12646_v17, %v12646_v17  ;;  %v21659_v8 = vpop.f32.mrb[25].mxu1 }
 0x692   : > { %v13653_v19 = vmax.f32 %v13541_v25, %v13549_v56  ;;  %v13716_v60 = vpack.c.bf16 %v13652_v3, %v13652_v3  ;;  %v16113_v62 = vrot.slane %v12646_v17, 9  ;;  %v12619_v37 = vrot.slane %v12605_v14, %v17791_v15  ;;  %v21662_v63 = vpop.f32.mrb[26].mxu1  ;;  %v17380_v25 = vld [vmem:[%s22426_s5 + $0xc] ss:$20 sps:$4 sm:$0xff]  }
 0x693   : > { %v13655_v59 = vmax.f32 %v13543_v30, %v13551_v46  ;;  %v13718_v55 = vpack.c.bf16 %v13654_v26, %v13654_v26  ;;  %v12655_v13 = vcombine.high %v12653_v47, %v12653_v47  ;;  %v16114_v41 = vrot.slane %v12654_v43, 9  ;;  %v21664_v5 = vpop.f32.mrb[27].mxu1  ;;  %14221 = vmatprep.subr.bf16.mxu1 %v17380_v25 }
 0x694   : > { %v13942_v20 = vrot.slane %v21641_v7, 1  ;;  %v13717_v21 = vpack.c.bf16 %v13653_v19, %v13653_v19  ;;  %v13868_v23 = vunpack.c.l.b16 %v13716_v60  ;;  %v16115_v11 = vrot.slane %v12653_v47, 9 }
 0x695   : > { %v13719_v58 = vpack.c.bf16 %v13655_v59, %v13655_v59  ;;  %v13870_v54 = vunpack.c.l.b16 %v13718_v55  ;;  %v16116_v56 = vrot.slane %v12655_v13, 9  ;;  %v13552_v44 = vmax.f32 %v12646_v17, %v16113_v62 }
 0x696   : > { %v13869_v24 = vunpack.c.l.b16 %v13717_v21  ;;  %v13553_v12 = vmax.f32 %v12654_v43, %v16114_v41  ;;  %v12620_v61 = vcombine.high %v12612_v53, %v12612_v53  ;;  %v12621_v49 = vcombine.high %v12619_v37, %v12619_v37 }
 0x697   : > { %v13946_v18 = vrot.slane %v13870_v54, 6  ;;  %v13554_v46 = vmax.f32 %v12653_v47, %v16115_v11  ;;  %v13555_v4 = vmax.f32 %v12655_v13, %v16116_v56  ;;  %v16105_v31 = vrot.slane %v12612_v53, 9 }
 0x698   : > { %v13944_v27 = vrot.slane %v13869_v24, 7  ;;  %v16106_v40 = vrot.slane %v12620_v61, 9  ;;  %v16107_v1 = vrot.slane %v12619_v37, 9  ;;  %v16108_v2 = vrot.slane %v12621_v49, 9 }
 0x699   : > { %v21667_v22 = vunpack.c.l.b16 %v13719_v58  ;;  %v13544_v35 = vmax.f32 %v12612_v53, %v16105_v31  ;;  %v12370_v51 = vadd.f32 %v21589_v36, %v21548_v48  ;;  %v12368_v17 = vadd.f32 %v21548_v48, %v21592_v6 }
 0x69a   : > { %v13945_v3 = vsel %vm8216_vm13, %v13944_v27, %v13868_v23  ;;  %v13545_v14 = vmax.f32 %v12620_v61, %v16106_v40  ;;  %v13546_v30 = vmax.f32 %v12619_v37, %v16107_v1  ;;  %v13547_v26 = vmax.f32 %v12621_v49, %v16108_v2 }
 0x69b   : > { %v21678_v47 = vsel %vm8198_vm8, %v13946_v18, %v13945_v3  ;;  %v13656_v43 = vmax.f32 %v13544_v35, %v13552_v44  ;;  %v12402_v53 = vmax.f32 %v12370_v51, 0.0  ;;  %v12400_v19 = vmax.f32 %v12368_v17, 0.0 }
 0x69c   : > { %v13657_v36 = vmax.f32 %v13545_v14, %v13553_v12  ;;  %v13658_v60 = vmax.f32 %v13546_v30, %v13554_v46  ;;  %v21680_v62 = vmax.f32 %v13547_v26, %v13555_v4  ;;  %v12371_v6 = vadd.f32 %v21595_v34, %v21548_v48  ;;  %v21687_v58 = vpop.f32.mrb[28].mxu1 }
 0x69d   : > { %v13720_v59 = vpack.c.bf16 %v13656_v43, %v13656_v43  ;;  %v12690_v55 = vcombine.high %v12402_v53, %v12402_v53  ;;  %v12697_v13 = vrot.slane %v12402_v53, %v17791_v15  ;;  %v12656_v37 = vcombine.high %v12400_v19, %v12400_v19  ;;  %v21692_v34 = vpop.f32.mrb[29].mxu1 }
 0x69e   : > { %v13721_v21 = vpack.c.bf16 %v13657_v36, %v13657_v36  ;;  %v13722_v23 = vpack.c.bf16 %v13658_v60, %v13658_v60  ;;  %v12663_v11 = vrot.slane %v12400_v19, %v17791_v15  ;;  %v12403_v18 = vmax.f32 %v12371_v6, 0.0  ;;  %v21697_v46 = vpop.f32.mrb[30].mxu1 }
 0x69f   : > { %v21689_v54 = vunpack.c.l.b16 %v13720_v59  ;;  %v12704_v56 = vrot.slane %v12690_v55, %v17791_v15  ;;  %v12705_v44 = vcombine.high %v12697_v13, %v12697_v13  ;;  %v16125_v24 = vrot.slane %v12697_v13, 9  ;;  %v21701_v1 = vpop.f32.mrb[31].mxu1 }
 0x6a0   : > { %v21694_v12 = vunpack.c.l.b16 %v13721_v21  ;;  %v12670_v61 = vrot.slane %v12656_v37, %v17791_v15  ;;  %v12671_v49 = vcombine.high %v12663_v11, %v12663_v11  ;;  %v21699_v4 = vunpack.c.l.b16 %v13722_v23 }
 0x6a1   : > { %v12706_v31 = vcombine.high %v12704_v56, %v12704_v56  ;;  %v16126_v27 = vrot.slane %v12705_v44, 9  ;;  %v16127_v40 = vrot.slane %v12704_v56, 9  ;;  %v13564_v51 = vmax.f32 %v12697_v13, %v16125_v24 }
 0x6a2   : > { %v12672_v17 = vcombine.high %v12670_v61, %v12670_v61  ;;  %v16117_v30 = vrot.slane %v12663_v11, 9  ;;  %v16118_v26 = vrot.slane %v12671_v49, 9  ;;  %v16119_v43 = vrot.slane %v12670_v61, 9 }
 0x6a3   : > { %v16128_v25 = vrot.slane %v12706_v31, 9  ;;  %v13565_v3 = vmax.f32 %v12705_v44, %v16126_v27  ;;  %v13566_v14 = vmax.f32 %v12704_v56, %v16127_v40  ;;  %v12707_v19 = vcombine.high %v12403_v18, %v12403_v18 }
 0x6a4   : > { %v16120_v53 = vrot.slane %v12672_v17, 9  ;;  %v13556_v60 = vmax.f32 %v12663_v11, %v16117_v30  ;;  %v12714_v6 = vrot.slane %v12403_v18, %v17791_v15  ;;  %v12369_v59 = vadd.f32 %v21548_v48, %v21597_v42 }
 0x6a5   : > { %v13567_v36 = vmax.f32 %v12706_v31, %v16128_v25  ;;  %v13557_v55 = vmax.f32 %v12671_v49, %v16118_v26  ;;  %v13558_v37 = vmax.f32 %v12670_v61, %v16119_v43  ;;  %v12721_v13 = vrot.slane %v12707_v19, %v17791_v15 }
 0x6a6   : > { %v13559_v21 = vmax.f32 %v12672_v17, %v16120_v53  ;;  %v13660_v23 = vmax.f32 %v13556_v60, %v13564_v51  ;;  %v12722_v44 = vcombine.high %v12714_v6, %v12714_v6  ;;  %v16129_v56 = vrot.slane %v12714_v6, 9 }
 0x6a7   : > { %v12401_v24 = vmax.f32 %v12369_v59, 0.0  ;;  %v13661_v27 = vmax.f32 %v13557_v55, %v13565_v3  ;;  %v13662_v40 = vmax.f32 %v13558_v37, %v13566_v14  ;;  %v12723_v2 = vcombine.high %v12721_v13, %v12721_v13 }
 0x6a8   : > { %v13663_v35 = vmax.f32 %v13559_v21, %v13567_v36  ;;  %v13724_v31 = vpack.c.bf16 %v13660_v23, %v13660_v23  ;;  %v16130_v18 = vrot.slane %v12722_v44, 9  ;;  %v16131_v25 = vrot.slane %v12721_v13, 9 }
 0x6a9   : > { %v13725_v30 = vpack.c.bf16 %v13661_v27, %v13661_v27  ;;  %v13726_v42 = vpack.c.bf16 %v13662_v40, %v13662_v40  ;;  %v16132_v61 = vrot.slane %v12723_v2, 9  ;;  %v13568_v26 = vmax.f32 %v12714_v6, %v16129_v56 }
 0x6aa   : > { %v13727_v49 = vpack.c.bf16 %v13663_v35, %v13663_v35  ;;  %v13876_v17 = vunpack.c.l.b16 %v13724_v31  ;;  %v13569_v43 = vmax.f32 %v12722_v44, %v16130_v18  ;;  %v12673_v51 = vcombine.high %v12401_v24, %v12401_v24 }
 0x6ab   : > { %v13877_v53 = vunpack.c.l.b16 %v13725_v30  ;;  %v13878_v19 = vunpack.c.l.b16 %v13726_v42  ;;  %v13570_v3 = vmax.f32 %v12721_v13, %v16131_v25  ;;  %v12680_v14 = vrot.slane %v12401_v24, %v17791_v15 }
 0x6ac   : > { %v21710_v60 = vunpack.c.l.b16 %v13727_v49  ;;  %v12687_v36 = vrot.slane %v12673_v51, %v17791_v15  ;;  %v12374_v59 = vadd.f32 %v21614_v28, %v21548_v48  ;;  %v12372_v35 = vadd.f32 %v21548_v48, %v21617_v10 }
 0x6ad   : > { %v13958_v55 = vrot.slane %v13877_v53, 7  ;;  %v13960_v37 = vrot.slane %v13878_v19, 6  ;;  %v13571_v21 = vmax.f32 %v12723_v2, %v16132_v61  ;;  %v12688_v23 = vcombine.high %v12680_v14, %v12680_v14 }
 0x6ae   : > { %v12689_v44 = vcombine.high %v12687_v36, %v12687_v36  ;;  %v16121_v56 = vrot.slane %v12680_v14, 9  ;;  %v16123_v27 = vrot.slane %v12687_v36, 9  ;;  %v12406_v24 = vmax.f32 %v12374_v59, 0.0 }
 0x6af   : > { %v13959_v13 = vsel %vm8216_vm13, %v13958_v55, %v13876_v17  ;;  %v12404_v40 = vmax.f32 %v12372_v35, 0.0  ;;  %v12375_v31 = vadd.f32 %v21619_v0, %v21548_v48  ;;  %v16122_v10 = vrot.slane %v12688_v23, 9 }
 0x6b0   : > { %v21723_v28 = vsel %vm8198_vm8, %v13960_v37, %v13959_v13  ;;  %v16124_v18 = vrot.slane %v12689_v44, 9  ;;  %v13560_v25 = vmax.f32 %v12680_v14, %v16121_v56  ;;  %v13562_v30 = vmax.f32 %v12687_v36, %v16123_v27 }
 0x6b1   : > { %v12758_v42 = vcombine.high %v12406_v24, %v12406_v24  ;;  %v12765_v2 = vrot.slane %v12406_v24, %v17791_v15  ;;  %v12724_v49 = vcombine.high %v12404_v40, %v12404_v40  ;;  %v13561_v61 = vmax.f32 %v12688_v23, %v16122_v10 }
 0x6b2   : > { %v13563_v51 = vmax.f32 %v12689_v44, %v16124_v18  ;;  %v13664_v53 = vmax.f32 %v13560_v25, %v13568_v26  ;;  %v12731_v17 = vrot.slane %v12404_v40, %v17791_v15  ;;  %v13666_v19 = vmax.f32 %v13562_v30, %v13570_v3 }
 0x6b3   : > { %v12772_v59 = vrot.slane %v12758_v42, %v17791_v15  ;;  %v12773_v0 = vcombine.high %v12765_v2, %v12765_v2  ;;  %v16141_v35 = vrot.slane %v12765_v2, 9  ;;  %v13665_v55 = vmax.f32 %v13561_v61, %v13569_v43 }
 0x6b4   : > { %v21728_v37 = vmax.f32 %v13563_v51, %v13571_v21  ;;  %v13728_v13 = vpack.c.bf16 %v13664_v53, %v13664_v53  ;;  %v12738_v14 = vrot.slane %v12724_v49, %v17791_v15  ;;  %v13730_v36 = vpack.c.bf16 %v13666_v19, %v13666_v19 }
 0x6b5   : > { %v12774_v56 = vcombine.high %v12772_v59, %v12772_v59  ;;  %v16142_v27 = vrot.slane %v12773_v0, 9  ;;  %v16143_v24 = vrot.slane %v12772_v59, 9  ;;  %v13729_v23 = vpack.c.bf16 %v13665_v55, %v13665_v55 }
 0x6b6   : > { %v21731_v44 = vunpack.c.l.b16 %v13728_v13  ;;  %v12739_v26 = vcombine.high %v12731_v17, %v12731_v17  ;;  %v12407_v40 = vmax.f32 %v12375_v31, 0.0  ;;  %v21733_v3 = vunpack.c.l.b16 %v13730_v36 }
 0x6b7   : > { %v16144_v10 = vrot.slane %v12774_v56, 9  ;;  %v13580_v18 = vmax.f32 %v12765_v2, %v16141_v35  ;;  %v13581_v25 = vmax.f32 %v12773_v0, %v16142_v27  ;;  %v21735_v43 = vunpack.c.l.b16 %v13729_v23 }
 0x6b8   : > { %v13582_v21 = vmax.f32 %v12772_v59, %v16143_v24  ;;  %v12740_v30 = vcombine.high %v12738_v14, %v12738_v14  ;;  %v16133_v42 = vrot.slane %v12731_v17, 9  ;;  %v16134_v51 = vrot.slane %v12739_v26, 9 }
 0x6b9   : > { %v16135_v53 = vrot.slane %v12738_v14, 9  ;;  %v13583_v19 = vmax.f32 %v12774_v56, %v16144_v10  ;;  %v12775_v31 = vcombine.high %v12407_v40, %v12407_v40  ;;  %v12782_v2 = vrot.slane %v12407_v40, %v17791_v15 }
 0x6ba   : > { %v16136_v55 = vrot.slane %v12740_v30, 9  ;;  %v13572_v13 = vmax.f32 %v12731_v17, %v16133_v42  ;;  %v13573_v36 = vmax.f32 %v12739_v26, %v16134_v51  ;;  %v12373_v0 = vadd.f32 %v21548_v48, %v21621_v16 }
 0x6bb   : > { %v13574_v11 = vmax.f32 %v12738_v14, %v16135_v53  ;;  %v12789_v27 = vrot.slane %v12775_v31, %v17791_v15  ;;  %v13929_v24 = vsel %vm22518_vm3, %v13928_v57, %v21607_v39  ;;  %v12790_v17 = vcombine.high %v12782_v2, %v12782_v2 }
 0x6bc   : > { %v13575_v59 = vmax.f32 %v12740_v30, %v16136_v55  ;;  %v13668_v35 = vmax.f32 %v13572_v13, %v13580_v18  ;;  %v13669_v56 = vmax.f32 %v13573_v36, %v13581_v25  ;;  %v16145_v10 = vrot.slane %v12782_v2, 9 }
 0x6bd   : > { %v13670_v23 = vmax.f32 %v13574_v11, %v13582_v21  ;;  %v12791_v42 = vcombine.high %v12789_v27, %v12789_v27  ;;  %v16147_v40 = vrot.slane %v12789_v27, 9  ;;  %v16146_v18 = vrot.slane %v12790_v17, 9 }
 0x6be   : > { %v13671_v26 = vmax.f32 %v13575_v59, %v13583_v19  ;;  %v13732_v14 = vpack.c.bf16 %v13668_v35, %v13668_v35  ;;  %v13733_v16 = vpack.c.bf16 %v13669_v56, %v13669_v56  ;;  %v13584_v31 = vmax.f32 %v12782_v2, %v16145_v10 }
 0x6bf   : > { %v13734_v30 = vpack.c.bf16 %v13670_v23, %v13670_v23  ;;  %v16148_v13 = vrot.slane %v12791_v42, 9  ;;  %v13586_v39 = vmax.f32 %v12789_v27, %v16147_v40  ;;  %v12405_v57 = vmax.f32 %v12373_v0, 0.0  ;;  %v17378_v0 = vld [vmem:[%s22426_s5 + $0x8] ss:$20 sps:$4 sm:$0xff]  }
 0x6c0   : > { %v13735_v53 = vpack.c.bf16 %v13671_v26, %v13671_v26  ;;  %v13884_v55 = vunpack.c.l.b16 %v13732_v14  ;;  %v13885_v9 = vunpack.c.l.b16 %v13733_v16  ;;  %v13585_v25 = vmax.f32 %v12790_v17, %v16146_v18  ;;  %v17381_v16 = vld [vmem:[%s22426_s5 + $0x30] ss:$20 sps:$4 sm:$0xff]  }
 0x6c1   : > { %v13886_v61 = vunpack.c.l.b16 %v13734_v30  ;;  %v13943_v21 = vsel %vm22519_vm5, %v13942_v20, %v21652_v50  ;;  %v12378_v19 = vadd.f32 %v21632_v52, %v21548_v48  ;;  %v12741_v35 = vcombine.high %v12405_v57, %v12405_v57  ;;  %v17383_v52 = vld [vmem:[%s22426_s5 + $0x34] ss:$20 sps:$4 sm:$0xff]  }
 0x6c2   : > { %v21748_v11 = vunpack.c.l.b16 %v13735_v53  ;;  %v13972_v36 = vrot.slane %v13885_v9, 7  ;;  %v12748_v2 = vrot.slane %v12405_v57, %v17791_v15  ;;  %v13587_v27 = vmax.f32 %v12791_v42, %v16148_v13  ;;  %v17386_v13 = vld [vmem:[%s22426_s5 + $0x5c] ss:$20 sps:$4 sm:$0xff]  }
 0x6c3   : > { %v13974_v59 = vrot.slane %v13886_v61, 6  ;;  %v21760_v56 = vpack.c.b16 %v13943_v21, %v13929_v24  ;;  %v12410_v23 = vmax.f32 %v12378_v19, 0.0  ;;  %v12376_v7 = vadd.f32 %v21548_v48, %v21634_v38 }
 0x6c4   : > { %v13973_v50 = vsel %vm8216_vm13, %v13972_v36, %v13884_v55  ;;  %v12755_v20 = vrot.slane %v12741_v35, %v17791_v15  ;;  %v12756_v61 = vcombine.high %v12748_v2, %v12748_v2  ;;  %v16137_v17 = vrot.slane %v12748_v2, 9 }
 0x6c5   : > { %22520 = vst [vmem:[#allocation12_spill] sm:$0xff] %v21760_v56  ;;  %v21770_v10 = vsel %vm8198_vm8, %v13974_v59, %v13973_v50  ;;  %16217 = vmatmul.mubr.msk.bf16.vlgmr.msra.gmra.mrb[32].mxu1 %vm9733_vm1, %v21760_v56  ;;  %17004 = vmatprep.mubr.msk.bf16.mxu0 %vm9733_vm1, %v21760_v56  ;;  %v12826_v48 = vcombine.high %v12410_v23, %v12410_v23  ;;  %v12408_v24 = vmax.f32 %v12376_v7, 0.0 }
 0x6c6   : > { %v12833_v38 = vrot.slane %v12410_v23, %v17791_v15  ;;  %v12757_v26 = vcombine.high %v12755_v20, %v12755_v20  ;;  %v16138_v14 = vrot.slane %v12756_v61, 9  ;;  %v16139_v42 = vrot.slane %v12755_v20, 9  ;;  %14190 = vmatprep.mubr.bf16.mxu1 %v22517_v29  ;;  %14222 = vmatpush1.bf16.msra.mxu1 %v17378_v0 }
 0x6c7   : > { %v13576_v40 = vmax.f32 %v12748_v2, %v16137_v17  ;;  %v12840_v18 = vrot.slane %v12826_v48, %v17791_v15  ;;  %14223 = vmatprep.subr.bf16.mxu1 %v17383_v52  ;;  %v12792_v2 = vcombine.high %v12408_v24, %v12408_v24  ;;  %v17384_v52 = vld [vmem:[%s22426_s5 + $0x58] ss:$20 sps:$4 sm:$0xff]  }
 0x6c8   : > { %v12841_v53 = vcombine.high %v12833_v38, %v12833_v38  ;;  %v16157_v55 = vrot.slane %v12833_v38, 9  ;;  %v16140_v9 = vrot.slane %v12757_v26, 9  ;;  %v13577_v57 = vmax.f32 %v12756_v61, %v16138_v14 }
 0x6c9   : > { %v13578_v21 = vmax.f32 %v12755_v20, %v16139_v42  ;;  %v13672_v19 = vmax.f32 %v13576_v40, %v13584_v31  ;;  %v12842_v36 = vcombine.high %v12840_v18, %v12840_v18  ;;  %v16159_v35 = vrot.slane %v12840_v18, 9  ;;  %v17389_v31 = vld [vmem:[%s22426_s5 + $0x84] ss:$20 sps:$4 sm:$0xff]  }
 0x6ca   : > { %v16158_v59 = vrot.slane %v12841_v53, 9  ;;  %v13579_v0 = vmax.f32 %v12757_v26, %v16140_v9  ;;  %v13673_v23 = vmax.f32 %v13577_v57, %v13585_v25  ;;  %14224 = vmatpush1.bf16.msra.mxu1 %v17381_v16  ;;  %v13596_v48 = vmax.f32 %v12833_v38, %v16157_v55  ;;  %v21805_v55 = vld [vmem:[%s22425_s4] ss:$0 sm:$0xff] }
 0x6cb   : > { %v13674_v7 = vmax.f32 %v13578_v21, %v13586_v39  ;;  %v13736_v50 = vpack.c.bf16 %v13672_v19, %v13672_v19  ;;  %v16160_v17 = vrot.slane %v12842_v36, 9  ;;  %v12799_v61 = vrot.slane %v12408_v24, %v17791_v15  ;;  %14225 = vmatprep.subr.bf16.mxu1 %v17386_v13 }
 0x6cc   : > { %v13597_v30 = vmax.f32 %v12841_v53, %v16158_v59  ;;  %v21793_v20 = vmax.f32 %v13579_v0, %v13587_v27  ;;  %v13737_v25 = vpack.c.bf16 %v13673_v23, %v13673_v23  ;;  %v13598_v14 = vmax.f32 %v12840_v18, %v16159_v35  ;;  %v17387_v18 = vld [vmem:[%s22426_s5 + $0x80] ss:$20 sps:$4 sm:$0xff]  }
 0x6cd   : > { %v13738_v39 = vpack.c.bf16 %v13674_v7, %v13674_v7  ;;  %v21795_v26 = vunpack.c.l.b16 %v13736_v50  ;;  %v12806_v42 = vrot.slane %v12792_v2, %v17791_v15  ;;  %v12807_v40 = vcombine.high %v12799_v61, %v12799_v61 }
 0x6ce   : > { %v16149_v16 = vrot.slane %v12799_v61, 9  ;;  %v21798_v38 = vunpack.c.l.b16 %v13737_v25  ;;  %v13599_v24 = vmax.f32 %v12842_v36, %v16160_v17  ;;  %v12379_v27 = vadd.f32 %v21805_v55, %v21637_v32  ;;  %14226 = vmatpush1.bf16.msra.mxu1 %v17384_v52 }
 0x6cf   : > { %v21800_v53 = vunpack.c.l.b16 %v13738_v39  ;;  %v12808_v13 = vcombine.high %v12806_v42, %v12806_v42  ;;  %v16150_v9 = vrot.slane %v12807_v40, 9  ;;  %v16151_v57 = vrot.slane %v12806_v42, 9  ;;  %14227 = vmatprep.subr.bf16.mxu1 %v17389_v31 }
 0x6d0   : > { %v13588_v21 = vmax.f32 %v12799_v61, %v16149_v16  ;;  %v12411_v59 = vmax.f32 %v12379_v27, 0.0  ;;  %v12377_v35 = vadd.f32 %v21805_v55, %v21639_v45 }
 0x6d1   : > { %v16152_v2 = vrot.slane %v12808_v13, 9  ;;  %v13589_v32 = vmax.f32 %v12807_v40, %v16150_v9  ;;  %v13590_v0 = vmax.f32 %v12806_v42, %v16151_v57 }
 0x6d2   : > { %v13676_v23 = vmax.f32 %v13588_v21, %v13596_v48  ;;  %v12843_v50 = vcombine.high %v12411_v59, %v12411_v59  ;;  %v12850_v52 = vrot.slane %v12411_v59, %v17791_v15  ;;  %v12409_v17 = vmax.f32 %v12377_v35, 0.0  ;;  %14228 = vmatpush1.bf16.msra.mxu1 %v17387_v18 }
 0x6d3   : > { %v13591_v61 = vmax.f32 %v12808_v13, %v16152_v2  ;;  %v13677_v31 = vmax.f32 %v13589_v32, %v13597_v30  ;;  %v13678_v25 = vmax.f32 %v13590_v0, %v13598_v14  ;;  %v12382_v48 = vadd.f32 %v21805_v55, %v21656_v33 }
 0x6d4   : > { %v13740_v39 = vpack.c.bf16 %v13676_v23, %v13676_v23  ;;  %v12857_v16 = vrot.slane %v12843_v50, %v17791_v15  ;;  %v12858_v27 = vcombine.high %v12850_v52, %v12850_v52  ;;  %v16161_v36 = vrot.slane %v12850_v52, 9 }
 0x6d5   : > { %v12809_v45 = vcombine.high %v12409_v17, %v12409_v17  ;;  %v13679_v19 = vmax.f32 %v13591_v61, %v13599_v24  ;;  %v13741_v40 = vpack.c.bf16 %v13677_v31, %v13677_v31  ;;  %v13742_v42 = vpack.c.bf16 %v13678_v25, %v13678_v25 }
 0x6d6   : > { %v13892_v9 = vunpack.c.l.b16 %v13740_v39  ;;  %v12859_v57 = vcombine.high %v12857_v16, %v12857_v16  ;;  %v16162_v21 = vrot.slane %v12858_v27, 9  ;;  %v16163_v59 = vrot.slane %v12857_v16, 9 }
 0x6d7   : > { %v13743_v18 = vpack.c.bf16 %v13679_v19, %v13679_v19  ;;  %v13893_v13 = vunpack.c.l.b16 %v13741_v40  ;;  %v13894_v30 = vunpack.c.l.b16 %v13742_v42  ;;  %v12816_v14 = vrot.slane %v12409_v17, %v17791_v15 }
 0x6d8   : > { %v16164_v35 = vrot.slane %v12859_v57, 9  ;;  %v13600_v2 = vmax.f32 %v12850_v52, %v16161_v36  ;;  %v13601_v32 = vmax.f32 %v12858_v27, %v16162_v21  ;;  %v12823_v0 = vrot.slane %v12809_v45, %v17791_v15 }
 0x6d9   : > { %v13986_v24 = vrot.slane %v13893_v13, 7  ;;  %v13988_v23 = vrot.slane %v13894_v30, 6  ;;  %v13602_v50 = vmax.f32 %v12857_v16, %v16163_v59  ;;  %v12824_v61 = vcombine.high %v12816_v14, %v12816_v14 }
 0x6da   : > { %v21823_v31 = vunpack.c.l.b16 %v13743_v18  ;;  %v12825_v33 = vcombine.high %v12823_v0, %v12823_v0  ;;  %v16153_v25 = vrot.slane %v12816_v14, 9  ;;  %v16155_v39 = vrot.slane %v12823_v0, 9 }
 0x6db   : > { %v13987_v19 = vsel %vm8216_vm13, %v13986_v24, %v13892_v9  ;;  %v13603_v40 = vmax.f32 %v12859_v57, %v16164_v35  ;;  %v16154_v42 = vrot.slane %v12824_v61, 9  ;;  %v12414_v7 = vmax.f32 %v12382_v48, 0.0 }
 0x6dc   : > { %v21827_v17 = vsel %vm8198_vm8, %v13988_v23, %v13987_v19  ;;  %v16156_v36 = vrot.slane %v12825_v33, 9  ;;  %v13592_v52 = vmax.f32 %v12816_v14, %v16153_v25  ;;  %v13594_v27 = vmax.f32 %v12823_v0, %v16155_v39 }
 0x6dd   : > { %v13593_v45 = vmax.f32 %v12824_v61, %v16154_v42  ;;  %v12894_v21 = vcombine.high %v12414_v7, %v12414_v7  ;;  %v12901_v16 = vrot.slane %v12414_v7, %v17791_v15  ;;  %v12380_v59 = vadd.f32 %v21805_v55, %v21659_v8 }
 0x6de   : > { %v13595_v18 = vmax.f32 %v12825_v33, %v16156_v36  ;;  %v13680_v13 = vmax.f32 %v13592_v52, %v13600_v2  ;;  %v13682_v30 = vmax.f32 %v13594_v27, %v13602_v50  ;;  %v12383_v9 = vadd.f32 %v21805_v55, %v21662_v63 }
 0x6df   : > { %v13681_v48 = vmax.f32 %v13593_v45, %v13601_v32  ;;  %v12908_v57 = vrot.slane %v12894_v21, %v17791_v15  ;;  %v12909_v35 = vcombine.high %v12901_v16, %v12901_v16  ;;  %v16173_v24 = vrot.slane %v12901_v16, 9 }
 0x6e0   : > { %v21835_v14 = vmax.f32 %v13595_v18, %v13603_v40  ;;  %v13744_v0 = vpack.c.bf16 %v13680_v13, %v13680_v13  ;;  %v13746_v23 = vpack.c.bf16 %v13682_v30, %v13682_v30  ;;  %v12412_v61 = vmax.f32 %v12380_v59, 0.0 }
 0x6e1   : > { %v13745_v7 = vpack.c.bf16 %v13681_v48, %v13681_v48  ;;  %v12910_v25 = vcombine.high %v12908_v57, %v12908_v57  ;;  %v16174_v39 = vrot.slane %v12909_v35, 9  ;;  %v16175_v8 = vrot.slane %v12908_v57, 9 }
 0x6e2   : > { %v21838_v50 = vunpack.c.l.b16 %v13744_v0  ;;  %v21840_v33 = vunpack.c.l.b16 %v13746_v23  ;;  %v12860_v63 = vcombine.high %v12412_v61, %v12412_v61  ;;  %v13612_v42 = vmax.f32 %v12901_v16, %v16173_v24 }
 0x6e3   : > { %v21842_v32 = vunpack.c.l.b16 %v13745_v7  ;;  %v16176_v19 = vrot.slane %v12910_v25, 9  ;;  %v13613_v40 = vmax.f32 %v12909_v35, %v16174_v39  ;;  %v13614_v52 = vmax.f32 %v12908_v57, %v16175_v8 }
 0x6e4   : > { %22521 = vst [vmem:[#allocation13_spill] sm:$0xff] %v21840_v33  ;;  %v12867_v27 = vrot.slane %v12412_v61, %v17791_v15  ;;  %v12874_v45 = vrot.slane %v12860_v63, %v17791_v15  ;;  %v12415_v18 = vmax.f32 %v12383_v9, 0.0  ;;  %v12381_v13 = vadd.f32 %v21805_v55, %v21664_v5 }
 0x6e5   : > { %v13615_v35 = vmax.f32 %v12910_v25, %v16176_v19  ;;  %v13723_v5 = vpack.c.bf16 %v21680_v62, %v21680_v62 }
 0x6e6   : > { %v12875_v30 = vcombine.high %v12867_v27, %v12867_v27  ;;  %v12876_v48 = vcombine.high %v12874_v45, %v12874_v45  ;;  %v16165_v0 = vrot.slane %v12867_v27, 9  ;;  %v16167_v16 = vrot.slane %v12874_v45, 9 }
 0x6e7   : > { %v12911_v24 = vcombine.high %v12415_v18, %v12415_v18  ;;  %v12918_v57 = vrot.slane %v12415_v18, %v17791_v15  ;;  %v12413_v23 = vmax.f32 %v12381_v13, 0.0 }
 0x6e8   : > { %v16166_v61 = vrot.slane %v12875_v30, 9  ;;  %v16168_v7 = vrot.slane %v12876_v48, 9  ;;  %v13604_v39 = vmax.f32 %v12867_v27, %v16165_v0  ;;  %v13606_v8 = vmax.f32 %v12874_v45, %v16167_v16 }
 0x6e9   : > { %v12925_v63 = vrot.slane %v12911_v24, %v17791_v15  ;;  %v12926_v59 = vcombine.high %v12918_v57, %v12918_v57  ;;  %v16177_v9 = vrot.slane %v12918_v57, 9  ;;  %v12877_v18 = vcombine.high %v12413_v23, %v12413_v23 }
 0x6ea   : > { %v13605_v21 = vmax.f32 %v12875_v30, %v16166_v61  ;;  %v13607_v36 = vmax.f32 %v12876_v48, %v16168_v7  ;;  %v13684_v2 = vmax.f32 %v13604_v39, %v13612_v42  ;;  %v13686_v51 = vmax.f32 %v13606_v8, %v13614_v52 }
 0x6eb   : > { %v12927_v25 = vcombine.high %v12925_v63, %v12925_v63  ;;  %v16178_v19 = vrot.slane %v12926_v59, 9  ;;  %v16179_v49 = vrot.slane %v12925_v63, 9  ;;  %v13616_v0 = vmax.f32 %v12918_v57, %v16177_v9 }
 0x6ec   : > { %v13685_v13 = vmax.f32 %v13605_v21, %v13613_v40  ;;  %v13687_v6 = vmax.f32 %v13607_v36, %v13615_v35  ;;  %v13748_v41 = vpack.c.bf16 %v13684_v2, %v13684_v2  ;;  %v13750_v27 = vpack.c.bf16 %v13686_v51, %v13686_v51 }
 0x6ed   : > { %v16180_v45 = vrot.slane %v12927_v25, 9  ;;  %v13617_v16 = vmax.f32 %v12926_v59, %v16178_v19  ;;  %v12884_v24 = vrot.slane %v12413_v23, %v17791_v15  ;;  %v13618_v30 = vmax.f32 %v12925_v63, %v16179_v49 }
 0x6ee   : > { %v13749_v56 = vpack.c.bf16 %v13685_v13, %v13685_v13  ;;  %v13751_v33 = vpack.c.bf16 %v13687_v6, %v13687_v6  ;;  %v13902_v62 = vunpack.c.l.b16 %v13750_v27  ;;  %v13900_v48 = vunpack.c.l.b16 %v13748_v41 }
 0x6ef   : > { %v12891_v42 = vrot.slane %v12877_v18, %v17791_v15  ;;  %v12892_v52 = vcombine.high %v12884_v24, %v12884_v24  ;;  %v16169_v61 = vrot.slane %v12884_v24, 9  ;;  %v13619_v40 = vmax.f32 %v12927_v25, %v16180_v45 }
 0x6f0   : > { %v13901_v7 = vunpack.c.l.b16 %v13749_v56  ;;  %v14002_v39 = vrot.slane %v13902_v62, 6  ;;  %v13731_v51 = vpack.c.bf16 %v21728_v37, %v21728_v37  ;;  %v21859_v35 = vunpack.c.l.b16 %v13751_v33 }
 0x6f1   : > { %v12893_v2 = vcombine.high %v12891_v42, %v12891_v42  ;;  %v16170_v36 = vrot.slane %v12892_v52, 9  ;;  %v16171_v21 = vrot.slane %v12891_v42, 9  ;;  %v13608_v59 = vmax.f32 %v12884_v24, %v16169_v61 }
 0x6f2   : > { %v14000_v6 = vrot.slane %v13901_v7, 7  ;;  %v13875_v57 = vunpack.c.l.b16 %v13723_v5  ;;  %v13883_v49 = vunpack.c.l.b16 %v13731_v51  ;;  %v22522_v9 = vrot.slane %v21667_v22, 5 }
 0x6f3   : > { %v16172_v41 = vrot.slane %v12893_v2, 9  ;;  %v13609_v23 = vmax.f32 %v12892_v52, %v16170_v36  ;;  %v13610_v8 = vmax.f32 %v12891_v42, %v16171_v21  ;;  %v13688_v63 = vmax.f32 %v13608_v59, %v13616_v0 }
 0x6f4   : > { %v14001_v56 = vsel %vm8216_vm13, %v14000_v6, %v13900_v48  ;;  %v13949_v37 = vsel %vm8201_vm9, %v22522_v9, %v21678_v47  ;;  %v13956_v25 = vrot.slane %v13875_v57, 1  ;;  %v22523_v19 = vrot.slane %v21710_v60, 5 }
 0x6f5   : > { %v21871_v5 = vsel %vm8198_vm8, %v14002_v39, %v14001_v56  ;;  %v13611_v18 = vmax.f32 %v12893_v2, %v16172_v41  ;;  %v13689_v13 = vmax.f32 %v13609_v23, %v13617_v16  ;;  %v13690_v27 = vmax.f32 %v13610_v8, %v13618_v30 }
 0x6f6   : > { %v13963_v33 = vsel %vm8201_vm9, %v22523_v19, %v21723_v28  ;;  %v13752_v45 = vpack.c.bf16 %v13688_v63, %v13688_v63  ;;  %v22524_v0 = vrot.slane %v21689_v54, 4  ;;  %v22525_v22 = vrot.slane %v21731_v44, 4 }
 0x6f7   : > { %v13970_v62 = vrot.slane %v13883_v49, 1  ;;  %v21879_v48 = vmax.f32 %v13611_v18, %v13619_v40  ;;  %v13753_v60 = vpack.c.bf16 %v13689_v13, %v13689_v13  ;;  %v13754_v28 = vpack.c.bf16 %v13690_v27, %v13690_v27 }
 0x6f8   : > { %v13951_v24 = vsel %vm8204_vm10, %v22524_v0, %v13949_v37  ;;  %v13965_v47 = vsel %vm8204_vm10, %v22525_v22, %v13963_v33  ;;  %v22526_v42 = vrot.slane %v21694_v12, 3  ;;  %v21884_v16 = vunpack.c.l.b16 %v13752_v45 }
 0x6f9   : > { %v22527_v30 = vrot.slane %v21699_v4, 2  ;;  %v22528_v61 = vrot.slane %v21735_v43, 3  ;;  %v12386_v7 = vadd.f32 %v21805_v55, %v21687_v58  ;;  %v14004_v39 = vrot.slane %v21859_v35, 5 }
 0x6fa   : > { %v13953_v52 = vsel %vm8207_vm11, %v22526_v42, %v13951_v24  ;;  %v21895_v40 = vunpack.c.l.b16 %v13753_v60  ;;  %v22530_v51 = vrot.slane %v21733_v3, 2  ;;  %v21901_v4 = vunpack.c.l.b16 %v13754_v28 }
 0x6fb   : > { %v13955_v54 = vsel %vm8210_vm12, %v22527_v30, %v13953_v52  ;;  %v13967_v44 = vsel %vm8207_vm11, %v22528_v61, %v13965_v47  ;;  %v12418_v43 = vmax.f32 %v12386_v7, 0.0  ;;  %v12384_v21 = vadd.f32 %v21805_v55, %v21692_v34 }
 0x6fc   : > { %v13957_v12 = vsel %vm22529_vm7, %v13956_v25, %v13955_v54  ;;  %v13969_v2 = vsel %vm8210_vm12, %v22530_v51, %v13967_v44  ;;  %v14006_v58 = vrot.slane %v21884_v16, 4  ;;  %v14008_v59 = vrot.slane %v21895_v40, 3 }
 0x6fd   : > { %v13971_v36 = vsel %vm22531_vm14, %v13970_v62, %v13969_v2  ;;  %v12387_v57 = vadd.f32 %v21805_v55, %v21697_v46  ;;  %v12962_v3 = vcombine.high %v12418_v43, %v12418_v43  ;;  %v12969_v49 = vrot.slane %v12418_v43, %v17791_v15 }
 0x6fe   : > { %v21908_v6 = vpack.c.b16 %v13971_v36, %v13957_v12  ;;  %v12416_v41 = vmax.f32 %v12384_v21, 0.0  ;;  %v12385_v23 = vadd.f32 %v21805_v55, %v21701_v1  ;;  %v13739_v8 = vpack.c.bf16 %v21793_v20, %v21793_v20 }
 0x6ff   : > { %v12419_v34 = vmax.f32 %v12387_v57, 0.0  ;;  %v13747_v46 = vpack.c.bf16 %v21835_v14, %v21835_v14  ;;  %v22532_v63 = vrot.slane %v21748_v11, 5  ;;  %v12976_v1 = vrot.slane %v12962_v3, %v17791_v15 }
 0x700   : > { %16218 = vmatmul.mubr.msk.bf16.gmra.mrb[36].mxu1 %vm9733_vm1, %v21908_v6  ;;  %17005 = vmatmul.mubr.msk.bf16.vlgmr.msra.gmra.mrb[128].mxu0 %vm9733_vm1, %v21908_v6  ;;  %v12977_v55 = vcombine.high %v12969_v49, %v12969_v49  ;;  %v16189_v9 = vrot.slane %v12969_v49, 9  ;;  %v12928_v37 = vcombine.high %v12416_v41, %v12416_v41  ;;  %v12935_v25 = vrot.slane %v12416_v41, %v17791_v15 }
 0x701   : > { %v21927_v56 = vsel %vm8201_vm9, %v22532_v63, %v21770_v10  ;;  %14200 = vmatprep.mubr.bf16.mxu1 %v22517_v29  ;;  %v12979_v19 = vcombine.high %v12419_v34, %v12419_v34  ;;  %v12986_v20 = vrot.slane %v12419_v34, %v17791_v15  ;;  %v12417_v33 = vmax.f32 %v12385_v23, 0.0 }
 0x702   : > { %v12978_v14 = vcombine.high %v12976_v1, %v12976_v1  ;;  %v16190_v18 = vrot.slane %v12977_v55, 9  ;;  %v16191_v13 = vrot.slane %v12976_v1, 9  ;;  %v13628_v11 = vmax.f32 %v12969_v49, %v16189_v9 }
 0x703   : > { %v12942_v10 = vrot.slane %v12928_v37, %v17791_v15  ;;  %v12943_v27 = vcombine.high %v12935_v25, %v12935_v25  ;;  %v16181_v45 = vrot.slane %v12935_v25, 9  ;;  %v12993_v0 = vrot.slane %v12979_v19, %v17791_v15 }
 0x704   : > { %v16192_v24 = vrot.slane %v12978_v14, 9  ;;  %v13629_v22 = vmax.f32 %v12977_v55, %v16190_v18  ;;  %v13630_v47 = vmax.f32 %v12976_v1, %v16191_v13  ;;  %v12994_v62 = vcombine.high %v12986_v20, %v12986_v20 }
 0x705   : > { %v12944_v60 = vcombine.high %v12942_v10, %v12942_v10  ;;  %v16182_v28 = vrot.slane %v12943_v27, 9  ;;  %v16183_v42 = vrot.slane %v12942_v10, 9  ;;  %v13620_v52 = vmax.f32 %v12935_v25, %v16181_v45 }
 0x706   : > { %v13631_v30 = vmax.f32 %v12978_v14, %v16192_v24  ;;  %v12995_v54 = vcombine.high %v12993_v0, %v12993_v0  ;;  %v16193_v61 = vrot.slane %v12986_v20, 9  ;;  %v16194_v44 = vrot.slane %v12994_v62, 9 }
 0x707   : > { %v16184_v7 = vrot.slane %v12944_v60, 9  ;;  %v13621_v12 = vmax.f32 %v12943_v27, %v16182_v28  ;;  %v13622_v51 = vmax.f32 %v12942_v10, %v16183_v42  ;;  %v13692_v2 = vmax.f32 %v13620_v52, %v13628_v11 }
 0x708   : > { %v16195_v36 = vrot.slane %v12993_v0, 9  ;;  %v16196_v43 = vrot.slane %v12995_v54, 9  ;;  %v13632_v21 = vmax.f32 %v12986_v20, %v16193_v61  ;;  %v13633_v57 = vmax.f32 %v12994_v62, %v16194_v44 }
 0x709   : > { %v13623_v3 = vmax.f32 %v12944_v60, %v16184_v7  ;;  %v13693_v49 = vmax.f32 %v13621_v12, %v13629_v22  ;;  %v13694_v41 = vmax.f32 %v13622_v51, %v13630_v47  ;;  %v13756_v23 = vpack.c.bf16 %v13692_v2, %v13692_v2 }
 0x70a   : > { %v13634_v34 = vmax.f32 %v12993_v0, %v16195_v36  ;;  %v13635_v63 = vmax.f32 %v12995_v54, %v16196_v43  ;;  %v12945_v1 = vcombine.high %v12417_v33, %v12417_v33  ;;  %v12952_v55 = vrot.slane %v12417_v33, %v17791_v15 }
 0x70b   : > { %v13695_v9 = vmax.f32 %v13623_v3, %v13631_v30  ;;  %v13757_v37 = vpack.c.bf16 %v13693_v49, %v13693_v49  ;;  %v13758_v25 = vpack.c.bf16 %v13694_v41, %v13694_v41  ;;  %v13908_v19 = vunpack.c.l.b16 %v13756_v23 }
 0x70c   : > { %v12959_v14 = vrot.slane %v12945_v1, %v17791_v15  ;;  %v12960_v18 = vcombine.high %v12952_v55, %v12952_v55  ;;  %v16185_v13 = vrot.slane %v12952_v55, 9  ;;  %v13891_v11 = vunpack.c.l.b16 %v13739_v8 }
 0x70d   : > { %v13759_v20 = vpack.c.bf16 %v13695_v9, %v13695_v9  ;;  %v13909_v10 = vunpack.c.l.b16 %v13757_v37  ;;  %v13910_v27 = vunpack.c.l.b16 %v13758_v25  ;;  %v13899_v45 = vunpack.c.l.b16 %v13747_v46 }
 0x70e   : > { %v12961_v24 = vcombine.high %v12959_v14, %v12959_v14  ;;  %v16186_v22 = vrot.slane %v12960_v18, 9  ;;  %v16187_v0 = vrot.slane %v12959_v14, 9  ;;  %v13624_v47 = vmax.f32 %v12952_v55, %v16185_v13 }
 0x70f   : > { %v13911_v62 = vunpack.c.l.b16 %v13759_v20  ;;  %v14014_v60 = vrot.slane %v13909_v10, 7  ;;  %v14016_v33 = vrot.slane %v13910_v27, 6  ;;  %v22533_v28 = vrot.slane %v21795_v26, 4 }
 0x710   : > { %v16188_v15 = vrot.slane %v12961_v24, 9  ;;  %v13625_v52 = vmax.f32 %v12960_v18, %v16186_v22  ;;  %v13626_v30 = vmax.f32 %v12959_v14, %v16187_v0  ;;  %v13696_v8 = vmax.f32 %v13624_v47, %v13632_v21  ;;  %v22545_v47 = vld [vmem:[#allocation12_spill] sm:$0xff] }
 0x711   : > { %v13979_v42 = vsel %vm8204_vm10, %v22533_v28, %v21927_v56  ;;  %v14015_v54 = vsel %vm8216_vm13, %v14014_v60, %v13908_v19  ;;  %v14018_v61 = vrot.slane %v13911_v62, 5  ;;  %v22534_v46 = vrot.slane %v21798_v38, 3  ;;  %vm22537_vm13 = vmmov %vm22518_vm3  ;;  %v14520_v62 = vld [vmem:[%s22428_s7 + $0x80] sm:$0xff]  ;;  %v14521_v60 = vld [vmem:[%s22428_s7 + $0x88] sm:$0xff] }
 0x712   : > { %v13984_v7 = vrot.slane %v13891_v11, 1  ;;  %v14017_v12 = vsel %vm8198_vm8, %v14016_v33, %v14015_v54  ;;  %v13627_v51 = vmax.f32 %v12961_v24, %v16188_v15  ;;  %v13697_v2 = vmax.f32 %v13625_v52, %v13633_v57  ;;  %vm22542_vm8 = vmmov %vm22518_vm3  ;;  %v14505_v28 = vld [vmem:[%s22428_s7 + $0x8] sm:$0xff]  ;;  %v14524_v54 = vld [vmem:[%s22428_s7 + $0xa0] sm:$0xff] }
 0x713   : > { %v13981_v44 = vsel %vm8207_vm11, %v22534_v46, %v13979_v42  ;;  %v13698_v36 = vmax.f32 %v13626_v30, %v13634_v34  ;;  %v13760_v26 = vpack.c.bf16 %v13696_v8, %v13696_v8  ;;  %v22535_v56 = vrot.slane %v21800_v53, 2  ;;  %v14523_v42 = vld [vmem:[%s22428_s7 + $0x98] sm:$0xff]  ;;  %v14506_v30 = vld [vmem:[%s22428_s7 + $0x10] sm:$0xff] }
 0x714   : > { %v22536_v21 = vrot.slane %v21823_v31, 5  ;;  %v13998_v49 = vrot.slane %v13899_v45, 1  ;;  %v13699_v38 = vmax.f32 %v13627_v51, %v13635_v63  ;;  %v13761_v41 = vpack.c.bf16 %v13697_v2, %v13697_v2  ;;  %v14507_v8 = vld [vmem:[%s22428_s7 + $0x18] sm:$0xff]  ;;  %v14526_v51 = vld [vmem:[%s22428_s7 + $0xb0] sm:$0xff] }
 0x715   : > { %v13983_v43 = vsel %vm8210_vm12, %v22535_v56, %v13981_v44  ;;  %v13762_v23 = vpack.c.bf16 %v13698_v36, %v13698_v36  ;;  %v13912_v55 = vunpack.c.l.b16 %v13760_v26  ;;  %v22538_v57 = vrot.slane %v21838_v50, 4  ;;  %v22540_v50 = vld [vmem:[#allocation13_spill] sm:$0xff] }
 0x716   : > { %v13991_v3 = vsel %vm8201_vm9, %v22536_v21, %v21827_v17  ;;  %v13985_v1 = vsel %vm22537_vm13, %v13984_v7, %v13983_v43  ;;  %v13755_v53 = vpack.c.bf16 %v21879_v48, %v21879_v48  ;;  %v14005_v31 = vsel %vm8201_vm9, %v14004_v39, %v21871_v5  ;;  %v14508_v7 = vld [vmem:[%s22428_s7 + $0x20] sm:$0xff]  ;;  %v14527_v2 = vld [vmem:[%s22428_s7 + $0xb8] sm:$0xff]  ;;  %v14510_v56 = vld [vmem:[%s22428_s7 + $0x30] sm:$0xff] }
 0x717   : > { %v13993_v34 = vsel %vm8204_vm10, %v22538_v57, %v13991_v3  ;;  %v13913_v17 = vunpack.c.l.b16 %v13761_v41  ;;  %v13914_v9 = vunpack.c.l.b16 %v13762_v23  ;;  %v22539_v63 = vrot.slane %v21842_v32, 3  ;;  %v14511_v43 = vld [vmem:[%s22428_s7 + $0x38] sm:$0xff]  ;;  %v14528_v3 = vld [vmem:[%s22428_s7 + $0xc0] sm:$0xff]  ;;  %v14513_v23 = vld [vmem:[%s22428_s7 + $0x48] sm:$0xff] }
 0x718   : > { %v13763_v25 = vpack.c.bf16 %v13699_v38, %v13699_v38  ;;  %v14010_v19 = vrot.slane %v21901_v4, 2  ;;  %v22541_v14 = vrot.slane %v22540_v50, 2  ;;  %v13907_v13 = vunpack.c.l.b16 %v13755_v53  ;;  %v14512_v38 = vld [vmem:[%s22428_s7 + $0x40] sm:$0xff]  ;;  %v14531_v57 = vld [vmem:[%s22428_s7 + $0xd8] sm:$0xff]  ;;  %v14534_v50 = vld [vmem:[%s22428_s7 + $0xf0] sm:$0xff] }
 0x719   : > { %v13995_v37 = vsel %vm8207_vm11, %v22539_v63, %v13993_v34  ;;  %v14007_v35 = vsel %vm8204_vm10, %v14006_v58, %v14005_v31  ;;  %v14020_v48 = vrot.slane %v13912_v55, 4  ;;  %v14022_v5 = vrot.slane %v13913_v17, 3  ;;  %v14514_v34 = vld [vmem:[%s22428_s7 + $0x50] sm:$0xff]  ;;  %v14515_v31 = vld [vmem:[%s22428_s7 + $0x58] sm:$0xff]  ;;  %v14533_v63 = vld [vmem:[%s22428_s7 + $0xe8] sm:$0xff] }
 0x71a   : > { %v13997_v18 = vsel %vm8210_vm12, %v22541_v14, %v13995_v37  ;;  %v13915_v11 = vunpack.c.l.b16 %v13763_v25  ;;  %v14009_v20 = vsel %vm8207_vm11, %v14008_v59, %v14007_v35  ;;  %v14012_v4 = vrot.slane %v13907_v13, 1  ;;  %v14516_v25 = vld [vmem:[%s22428_s7 + $0x60] sm:$0xff]  ;;  %v14535_v14 = vld [vmem:[%s22428_s7 + $0xf8] sm:$0xff]  ;;  %v14518_v13 = vld [vmem:[%s22428_s7 + $0x70] sm:$0xff] }
 0x71b   : > { %v13999_v39 = vsel %vm22542_vm8, %v13998_v49, %v13997_v18  ;;  %v14019_v10 = vsel %vm8201_vm9, %v14018_v61, %v14017_v12  ;;  %v14024_v27 = vrot.slane %v13914_v9, 2  ;;  %v14011_v45 = vsel %vm8210_vm12, %v14010_v19, %v14009_v20  ;;  %v14525_v61 = vld [vmem:[%s22428_s7 + $0xa8] sm:$0xff]  ;;  %v14532_v9 = vld [vmem:[%s22428_s7 + $0xe0] sm:$0xff] }
 0x71c   : > { %v14030_v32 = vpack.c.b16 %v13999_v39, %v13985_v1  ;;  %v14021_v16 = vsel %vm8204_vm10, %v14020_v48, %v14019_v10  ;;  %v14013_v58 = vsel %vm22543_vm15, %v14012_v4, %v14011_v45  ;;  %v14026_v22 = vrot.slane %v13915_v11, 1  ;;  %v14509_v12 = vld [vmem:[%s22428_s7 + $0x28] sm:$0xff]  ;;  %v14530_v1 = vld [vmem:[%s22428_s7 + $0xd0] sm:$0xff]  ;;  %v14552_v35 = vld [vmem:[%s22428_s7 + $0x180] sm:$0xff] }
 0x71d   : > { %v14023_v24 = vsel %vm8207_vm11, %v14022_v5, %v14021_v16  ;;  %v17047_v33 = vpack.c.bf16 %v14521_v60, %v14520_v62  ;;  %v17053_v46 = vpack.c.bf16 %v14507_v8, %v14506_v30  ;;  %v17055_v44 = vpack.c.bf16 %v14525_v61, %v14524_v54  ;;  %v14529_v49 = vld [vmem:[%s22428_s7 + $0xc8] sm:$0xff]  ;;  %v14519_v39 = vld [vmem:[%s22428_s7 + $0x78] sm:$0xff]  ;;  %v14554_v10 = vld [vmem:[%s22428_s7 + $0x190] sm:$0xff] }
 0x71e   : > { %16219 = vmatmul.mubr.msk.bf16.gmra.mrb[40].mxu1 %vm9733_vm1, %v14030_v32  ;;  %17008 = vmatprep.mubr.msk.bf16.mxu0 %vm9733_vm1, %v14030_v32  ;;  %v14025_v40 = vsel %vm8210_vm12, %v14024_v27, %v14023_v24  ;;  %v17057_v36 = vpack.c.bf16 %v14509_v12, %v14508_v7  ;;  %v17059_v26 = vpack.c.bf16 %v14527_v2, %v14526_v51  ;;  %v14517_v19 = vld [vmem:[%s22428_s7 + $0x68] sm:$0xff]  ;;  %v14555_v27 = vld [vmem:[%s22428_s7 + $0x198] sm:$0xff]  ;;  %v14365_v8 = vld [vmem:[%s22427_s6 + $0x30] sm:$0xff]  ;;  %vm17542_vm9 = vmmov 0  }
 0x71f   : > { %14210 = vmatprep.mubr.bf16.mxu1 %v22517_v29  ;;  %v14027_v59 = vsel %vm22544_vm4, %v14026_v22, %v14025_v40  ;;  %17048 = vmatprep.subr.bf16.mxu1 %v17047_v33  ;;  %v17061_v21 = vpack.c.bf16 %v14511_v43, %v14510_v56  ;;  %v17063_v41 = vpack.c.bf16 %v14529_v49, %v14528_v3  ;;  %v14553_v48 = vld [vmem:[%s22428_s7 + $0x188] sm:$0xff]  ;;  %v14539_v24 = vld [vmem:[%s22428_s7 + $0x118] sm:$0xff]  ;;  %v14556_v40 = vld [vmem:[%s22428_s7 + $0x1a0] sm:$0xff]  ;;  %v17541_v33 = vmov 0.0|0.0  }
 0x720   : > { %v14031_v0 = vpack.c.b16 %v14027_v59, %v14013_v58  ;;  %v17065_v55 = vpack.c.bf16 %v14513_v23, %v14512_v38  ;;  %v17067_v53 = vpack.c.bf16 %v14531_v57, %v14530_v1  ;;  %v17069_v17 = vpack.c.bf16 %v14515_v31, %v14514_v34  ;;  %v14537_v20 = vld [vmem:[%s22428_s7 + $0x108] sm:$0xff]  ;;  %v14538_v58 = vld [vmem:[%s22428_s7 + $0x110] sm:$0xff]  ;;  %v14543_v56 = vld [vmem:[%s22428_s7 + $0x138] sm:$0xff] }
 0x721   : > { %v17071_v37 = vpack.c.bf16 %v14533_v63, %v14532_v9  ;;  %v17073_v18 = vpack.c.bf16 %v14517_v19, %v14516_v25  ;;  %v17075_v5 = vpack.c.bf16 %v14535_v14, %v14534_v50  ;;  %v17079_v11 = vpack.c.bf16 %v14553_v48, %v14552_v35  ;;  %v14557_v59 = vld [vmem:[%s22428_s7 + $0x1a8] sm:$0xff]  ;;  %v14544_v38 = vld [vmem:[%s22428_s7 + $0x140] sm:$0xff]  ;;  %v14562_v1 = vld [vmem:[%s22428_s7 + $0x1d0] sm:$0xff] }
 0x722   : > { %17009 = vmatmul.mubr.msk.bf16.gmra.mrb[132].mxu0 %vm9733_vm1, %v14031_v0  ;;  %v17077_v45 = vpack.c.bf16 %v14519_v39, %v14518_v13  ;;  %v17083_v16 = vpack.c.bf16 %v14555_v27, %v14554_v10  ;;  %v17085_v22 = vpack.c.bf16 %v14539_v24, %v14538_v58  ;;  %v14541_v62 = vld [vmem:[%s22428_s7 + $0x128] sm:$0xff]  ;;  %v14546_v34 = vld [vmem:[%s22428_s7 + $0x150] sm:$0xff]  ;;  %v14564_v31 = vld [vmem:[%s22428_s7 + $0x1e0] sm:$0xff]  ;;  %vm14795_vm10 = vcmask 73728  }
 0x723   : > { %17080 = vmatprep.subr.bf16.mxu0 %v17079_v11  ;;  %v14360_v30 = vld [vmem:[%s22427_s6 + $0x8] sm:$0xff]  ;;  %v14566_v19 = vld [vmem:[%s22428_s7 + $0x1f0] sm:$0xff]  ;;  %v14567_v50 = vld [vmem:[%s22428_s7 + $0x1f8] sm:$0xff] }
 0x724   : > { %v14561_v3 = vld [vmem:[%s22428_s7 + $0x1c8] sm:$0xff]  ;;  %v14550_v13 = vld [vmem:[%s22428_s7 + $0x170] sm:$0xff]  ;;  %v14551_v35 = vld [vmem:[%s22428_s7 + $0x178] sm:$0xff] }
 0x725   : > { %v14549_v25 = vld [vmem:[%s22428_s7 + $0x168] sm:$0xff]  ;;  %v17109_v48 = vpack.c.bf16 %v14551_v35, %v14550_v13  ;;  %v14370_v39 = vld [vmem:[%s22427_s6 + $0x58] sm:$0xff] }
 0x726   : > { %16220 = vmatmul.mubr.msk.bf16.gmra.mrb[44].mxu1 %vm9733_vm1, %v14031_v0  ;;  %v14368_v58 = vld [vmem:[%s22427_s6 + $0x48] sm:$0xff] }
 0x727   : > { %14253 = vmatprep.mubr.bf16.mxu1 %v22517_v29 }
 0x72e   : > { %16221 = vmatmul.mubr.msk.bf16.vlgmr.msra.gmra.mrb[48].mxu1 %vm9733_vm1, %v22545_v47  ;;  %v14540_v47 = vld [vmem:[%s22428_s7 + $0x120] sm:$0xff] }
 0x72f   : > { %14263 = vmatprep.mubr.bf16.mxu1 %v22517_v29  ;;  %v17089_v60 = vpack.c.bf16 %v14541_v62, %v14540_v47 }
 0x736   : > { %16222 = vmatmul.mubr.msk.bf16.gmra.mrb[52].mxu1 %vm9733_vm1, %v21908_v6  ;;  %v14504_v6 = vld [vmem:[%s22428_s7] sm:$0xff] }
 0x737   : > { %14273 = vmatprep.mubr.bf16.mxu1 %v22517_v29  ;;  %v17049_v15 = vpack.c.bf16 %v14505_v28, %v14504_v6  ;;  %v14359_v6 = vld [vmem:[%s22427_s6] sm:$0xff] }
 0x739   : > { %17050 = vmatpush3.bf16.msra.mxu1 %v17049_v15  ;;  %v14559_v15 = vld [vmem:[%s22428_s7 + $0x1b8] sm:$0xff] }
 0x73e   : > { %16223 = vmatmul.mubr.msk.bf16.gmra.mrb[56].mxu1 %vm9733_vm1, %v14030_v32  ;;  %v14536_v32 = vld [vmem:[%s22428_s7 + $0x100] sm:$0xff] }
 0x73f   : > { %14283 = vmatprep.mubr.bf16.mxu1 %v22517_v29  ;;  %v14522_v29 = vld [vmem:[%s22428_s7 + $0x90] sm:$0xff]  ;;  %v17081_v4 = vpack.c.bf16 %v14537_v20, %v14536_v32  ;;  %v14374_v20 = vld [vmem:[%s22427_s6 + $0x78] sm:$0xff] }
 0x740   : > { %v17051_v52 = vpack.c.bf16 %v14523_v42, %v14522_v29  ;;  %v14364_v29 = vld [vmem:[%s22427_s6 + $0x28] sm:$0xff]  ;;  %v14558_v42 = vld [vmem:[%s22428_s7 + $0x1b0] sm:$0xff] }
 0x741   : > { %17082 = vmatpush3.bf16.msra.mxu0 %v17081_v4  ;;  %v17091_v54 = vpack.c.bf16 %v14559_v15, %v14558_v42 }
 0x742   : > { %17052 = vmatprep.subr.bf16.mxu1 %v17051_v52  ;;  %17084 = vmatprep.subr.bf16.mxu0 %v17083_v16  ;;  %v14375_v16 = vld [vmem:[%s22427_s6 + $0x80] sm:$0xff] }
 0x743   : > { %17054 = vmatpush3.bf16.msra.mxu1 %v17053_v46 }
 0x744   : > { %17056 = vmatprep.subr.bf16.mxu1 %v17055_v44 }
 0x745   : > { %17086 = vmatpush3.bf16.msra.mxu0 %v17085_v22 }
 0x746   : > { %16224 = vmatmul.mubr.msk.bf16.gmra.mrb[60].mxu1 %vm9733_vm1, %v14031_v0  ;;  %v17087_v0 = vpack.c.bf16 %v14557_v59, %v14556_v40 }
 0x747   : > { %17058 = vmatpush3.bf16.msra.mxu1 %v17057_v36 }
 0x748   : > { %17060 = vmatprep.subr.bf16.mxu1 %v17059_v26  ;;  %17088 = vmatprep.subr.bf16.mxu0 %v17087_v0  ;;  %v14542_v26 = vld [vmem:[%s22428_s7 + $0x130] sm:$0xff] }
 0x749   : > { %17090 = vmatpush3.bf16.msra.mxu0 %v17089_v60  ;;  %v17093_v43 = vpack.c.bf16 %v14543_v56, %v14542_v26  ;;  %v14373_v0 = vld [vmem:[%s22427_s6 + $0x70] sm:$0xff] }
 0x74a   : > { %17092 = vmatprep.subr.bf16.mxu0 %v17091_v54  ;;  %v14385_v56 = vld [vmem:[%s22427_s6 + $0xd0] sm:$0xff] }
 0x74b   : > { %17062 = vmatpush3.bf16.msra.mxu1 %v17061_v21  ;;  %v14560_v21 = vld [vmem:[%s22428_s7 + $0x1c0] sm:$0xff] }
 0x74c   : > { %17064 = vmatprep.subr.bf16.mxu1 %v17063_v41  ;;  %v17095_v49 = vpack.c.bf16 %v14561_v3, %v14560_v21  ;;  %v14545_v41 = vld [vmem:[%s22428_s7 + $0x148] sm:$0xff] }
 0x74d   : > { %17094 = vmatpush3.bf16.msra.mxu0 %v17093_v43  ;;  %v17097_v23 = vpack.c.bf16 %v14545_v41, %v14544_v38 }
 0x74e   : > { %17096 = vmatprep.subr.bf16.mxu0 %v17095_v49 }
 0x74f   : > { %17066 = vmatpush3.bf16.msra.mxu1 %v17065_v55  ;;  %v14563_v55 = vld [vmem:[%s22428_s7 + $0x1d8] sm:$0xff] }
 0x750   : > { %17068 = vmatprep.subr.bf16.mxu1 %v17067_v53  ;;  %v17099_v57 = vpack.c.bf16 %v14563_v55, %v14562_v1  ;;  %v14547_v53 = vld [vmem:[%s22428_s7 + $0x158] sm:$0xff]  ;;  %v14383_v1 = vld [vmem:[%s22427_s6 + $0xc0] sm:$0xff] }
 0x751   : > { %17098 = vmatpush3.bf16.msra.mxu0 %v17097_v23  ;;  %v17101_v9 = vpack.c.bf16 %v14547_v53, %v14546_v34  ;;  %v14389_v53 = vld [vmem:[%s22427_s6 + $0xf0] sm:$0xff] }
 0x752   : > { %17100 = vmatprep.subr.bf16.mxu0 %v17099_v57 }
 0x753   : > { %17070 = vmatpush3.bf16.msra.mxu1 %v17069_v17  ;;  %v14565_v17 = vld [vmem:[%s22428_s7 + $0x1e8] sm:$0xff] }
 0x754   : > { %17072 = vmatprep.subr.bf16.mxu1 %v17071_v37  ;;  %v17103_v63 = vpack.c.bf16 %v14565_v17, %v14564_v31  ;;  %v14548_v37 = vld [vmem:[%s22428_s7 + $0x160] sm:$0xff]  ;;  %v14388_v17 = vld [vmem:[%s22427_s6 + $0xe8] sm:$0xff] }
 0x755   : > { %17102 = vmatpush3.bf16.msra.mxu0 %v17101_v9  ;;  %v17105_v14 = vpack.c.bf16 %v14549_v25, %v14548_v37  ;;  %v14390_v9 = vld [vmem:[%s22427_s6 + $0xf8] sm:$0xff] }
 0x756   : > { %17104 = vmatprep.subr.bf16.mxu0 %v17103_v63 }
 0x757   : > { %17074 = vmatpush3.bf16.msra.mxu1 %v17073_v18  ;;  %v17107_v18 = vpack.c.bf16 %v14567_v50, %v14566_v19  ;;  %v14393_v19 = vld [vmem:[%s22427_s6 + $0x110] sm:$0xff]  ;;  %v14394_v50 = vld [vmem:[%s22427_s6 + $0x118] sm:$0xff] }
 0x758   : > { %17076 = vmatprep.subr.bf16.mxu1 %v17075_v5  ;;  %v14369_v5 = vld [vmem:[%s22427_s6 + $0x50] sm:$0xff] }
 0x759   : > { %17106 = vmatpush3.bf16.msra.mxu0 %v17105_v14 }
 0x75a   : > { %17108 = vmatprep.subr.bf16.mxu0 %v17107_v18 }
 0x75b   : > { %17078 = vmatpush3.bf16.msra.mxu1 %v17077_v45  ;;  %v14363_v45 = vld [vmem:[%s22427_s6 + $0x20] sm:$0xff] }
 0x75c   : > { %17111 = vmatprep.subr.bf16.mxu1 %v17541_v33 }
 0x75d   : > { %17110 = vmatpush3.bf16.msra.mxu0 %v17109_v48  ;;  %v14395_v48 = vld [vmem:[%s22427_s6 + $0x120] sm:$0xff] }
 0x798   : > { %v14182_v28 = vpop.f32.mrb[32].mxu1 }
 0x799   : > { %v14184_v52 = vpop.f32.mrb[33].mxu1  ;;  %v14399_v46 = vmul.f32 %v14359_v6, %v14182_v28 }
 0x79a   : > { %v14186_v61 = vpop.f32.mrb[34].mxu1  ;;  %v14400_v12 = vmul.f32 %v14360_v30, %v14184_v52  ;;  %v14378_v52 = vld [vmem:[%s22427_s6 + $0x98] sm:$0xff] }
 0x79b   : > { %v14404_v44 = vmul.f32 %v14364_v29, %v14186_v61  ;;  %v14188_v7 = vpop.f32.mrb[35].mxu1 }
 0x79c   : > { %v14405_v51 = vmul.f32 %v14365_v8, %v14188_v7  ;;  %v14379_v7 = vld [vmem:[%s22427_s6 + $0xa0] sm:$0xff] }
 0x79d   : > { %v14439_v2 = vadd.f32 %v14404_v44, %v14399_v46 }
 0x79e   : > { %v14452_v36 = vadd.f32 %v14405_v51, %v14400_v12  ;;  %v14380_v12 = vld [vmem:[%s22427_s6 + $0xa8] sm:$0xff] }
 0x7d3   : > { %v14192_v11 = vpop.f32.mrb[36].mxu1  ;;  %v17006_v32 = vpop.f32.mrb[128].mxu0 }
 0x7d4   : > { %v14409_v4 = vmul.f32 %v14369_v5, %v14192_v11  ;;  %v14194_v10 = vpop.f32.mrb[37].mxu1  ;;  %v14328_v27 = vpop.f32.mrb[129].mxu0  ;;  %v14413_v30 = vmul.f32 %v17006_v32, %v14373_v0  ;;  %v14398_v32 = vld [vmem:[%s22427_s6 + $0x138] sm:$0xff] }
 0x7d5   : > { %v14410_v24 = vmul.f32 %v14370_v39, %v14194_v10  ;;  %v14196_v22 = vpop.f32.mrb[38].mxu1  ;;  %v17007_v40 = vpop.f32.mrb[130].mxu0  ;;  %v14403_v28 = vmul.f32 %v14363_v45, %v14328_v27 }
 0x7d6   : > { %v14440_v59 = vadd.f32 %v14439_v2, %v14409_v4  ;;  %v14414_v47 = vmul.f32 %v14374_v20, %v14196_v22  ;;  %v14198_v62 = vpop.f32.mrb[39].mxu1  ;;  %v14331_v60 = vpop.f32.mrb[131].mxu0  ;;  %v14418_v61 = vmul.f32 %v17007_v40, %v14378_v52  ;;  %v14384_v2 = vld [vmem:[%s22427_s6 + $0xc8] sm:$0xff]  ;;  %v14367_v52 = vld [vmem:[%s22427_s6 + $0x40] sm:$0xff] }
 0x7d7   : > { %v14453_v6 = vadd.f32 %v14452_v36, %v14410_v24  ;;  %v14415_v29 = vmul.f32 %v14375_v16, %v14198_v62  ;;  %v14408_v42 = vmul.f32 %v14368_v58, %v14331_v60 }
 0x7d8   : > { %v14441_v15 = vadd.f32 %v14440_v59, %v14414_v47 }
 0x7d9   : > { %v14454_v8 = vadd.f32 %v14453_v6, %v14415_v29  ;;  %v14491_v54 = vadd.f32 %v14408_v42, %v14403_v28  ;;  %v14361_v6 = vld [vmem:[%s22427_s6 + $0x10] sm:$0xff]  ;;  %v14366_v28 = vld [vmem:[%s22427_s6 + $0x38] sm:$0xff] }
 0x7db   : > { %v14492_v46 = vadd.f32 %v14491_v54, %v14413_v30 }
 0x7dd   : > { %v14493_v44 = vadd.f32 %v14492_v46, %v14418_v61 }
 0x7f1   : > { %v14202_v51 = vpop.f32.mrb[40].mxu1 }
 0x7f2   : > { %v14419_v36 = vmul.f32 %v14379_v7, %v14202_v51  ;;  %v14204_v26 = vpop.f32.mrb[41].mxu1 }
 0x7f3   : > { %v14420_v43 = vmul.f32 %v14380_v12, %v14204_v26  ;;  %v14206_v21 = vpop.f32.mrb[42].mxu1 }
 0x7f4   : > { %v14442_v3 = vadd.f32 %v14441_v15, %v14419_v36  ;;  %v14424_v49 = vmul.f32 %v14384_v2, %v14206_v21  ;;  %v14208_v38 = vpop.f32.mrb[43].mxu1  ;;  %v14362_v15 = vld [vmem:[%s22427_s6 + $0x18] sm:$0xff] }
 0x7f5   : > { %v14455_v41 = vadd.f32 %v14454_v8, %v14420_v43  ;;  %v14425_v23 = vmul.f32 %v14385_v56, %v14208_v38  ;;  %v17010_v57 = vpop.f32.mrb[132].mxu0  ;;  %v14371_v56 = vld [vmem:[%s22427_s6 + $0x60] sm:$0xff]  ;;  %v14569_v38 = vld [vmem:[%s22428_s7 + $0x208] sm:$0xff] }
 0x7f6   : > { %v14443_v55 = vadd.f32 %v14442_v3, %v14424_v49  ;;  %v14344_v31 = vpop.f32.mrb[133].mxu0  ;;  %v14433_v4 = vmul.f32 %v17010_v57, %v14393_v19  ;;  %v14372_v3 = vld [vmem:[%s22427_s6 + $0x68] sm:$0xff]  ;;  %v14568_v49 = vld [vmem:[%s22428_s7 + $0x200] sm:$0xff] }
 0x7f7   : > { %v14456_v34 = vadd.f32 %v14455_v41, %v14425_v23  ;;  %v14423_v63 = vmul.f32 %v14383_v1, %v14344_v31  ;;  %v17011_v37 = vpop.f32.mrb[134].mxu0  ;;  %v14376_v23 = vld [vmem:[%s22427_s6 + $0x88] sm:$0xff] }
 0x7f8   : > { %v14347_v14 = vpop.f32.mrb[135].mxu0  ;;  %v14438_v22 = vmul.f32 %v17011_v37, %v14398_v32  ;;  %v14382_v32 = vld [vmem:[%s22427_s6 + $0xb8] sm:$0xff] }
 0x7f9   : > { %v14212_v25 = vpop.f32.mrb[44].mxu1  ;;  %v14494_v35 = vadd.f32 %v14493_v44, %v14423_v63  ;;  %v14428_v5 = vmul.f32 %v14388_v17, %v14347_v14  ;;  %v14571_v14 = vld [vmem:[%s22428_s7 + $0x218] sm:$0xff] }
 0x7fa   : > { %v14429_v18 = vmul.f32 %v14389_v53, %v14212_v25  ;;  %v14214_v13 = vpop.f32.mrb[45].mxu1 }
 0x7fb   : > { %v14430_v39 = vmul.f32 %v14390_v9, %v14214_v13  ;;  %v14216_v11 = vpop.f32.mrb[46].mxu1  ;;  %v14495_v45 = vadd.f32 %v14494_v35, %v14428_v5  ;;  %v17112_v9 = vpack.c.bf16 %v14569_v38, %v14568_v49  ;;  %v14381_v5 = vld [vmem:[%s22427_s6 + $0xb0] sm:$0xff] }
 0x7fc   : > { %v14444_v20 = vadd.f32 %v14443_v55, %v14429_v18  ;;  %v14434_v10 = vmul.f32 %v14394_v50, %v14216_v11  ;;  %v14218_v27 = vpop.f32.mrb[47].mxu1  ;;  %v14570_v50 = vld [vmem:[%s22428_s7 + $0x210] sm:$0xff]  ;;  %v17543_v11 = vmov 0.0  }
 0x7fd   : > { %v14457_v16 = vadd.f32 %v14456_v34, %v14430_v39  ;;  %v14435_v58 = vmul.f32 %v14395_v48, %v14218_v27  ;;  %v14496_v40 = vadd.f32 %v14495_v45, %v14433_v4  ;;  %v14377_v34 = vld [vmem:[%s22427_s6 + $0x90] sm:$0xff]  ;;  %v17115_v39 = vpack.c.bf16 %v14571_v14, %v14570_v50  ;;  %v14573_v4 = vld [vmem:[%s22428_s7 + $0x228] sm:$0xff]  ;;  %v14386_v27 = vld [vmem:[%s22427_s6 + $0xd8] sm:$0xff] }
 0x7fe   : > { %v14445_v24 = vadd.f32 %v14444_v20, %v14434_v10  ;;  %v14572_v20 = vld [vmem:[%s22428_s7 + $0x220] sm:$0xff]  ;;  %v14578_v38 = vld [vmem:[%s22428_s7 + $0x250] sm:$0xff]  ;;  %v14583_v14 = vld [vmem:[%s22428_s7 + $0x278] sm:$0xff] }
 0x7ff   : > { %v14458_v59 = vadd.f32 %v14457_v16, %v14435_v58  ;;  %v22264_v47 = vadd.f32 %v14496_v40, %v14438_v22  ;;  %v14387_v58 = vld [vmem:[%s22427_s6 + $0xe0] sm:$0xff]  ;;  %v17118_v40 = vpack.c.bf16 %v14573_v4, %v14572_v20  ;;  %v14582_v50 = vld [vmem:[%s22428_s7 + $0x270] sm:$0xff] }
 0x800   : > { %v14446_v0 = vrot.slane %v14445_v24, 4 }
 0x801   : > { %v14459_v62 = vrot.slane %v14458_v59, 4  ;;  %v14255_v60 = vpop.f32.mrb[48].mxu1 }
 0x802   : > { %v14447_v29 = vadd.f32 %v14446_v0, %v14445_v24  ;;  %v14257_v42 = vpop.f32.mrb[49].mxu1  ;;  %v14401_v61 = vmul.f32 %v14361_v6, %v14255_v60  ;;  %v14574_v60 = vld [vmem:[%s22428_s7 + $0x230] sm:$0xff]  ;;  %v14575_v6 = vld [vmem:[%s22428_s7 + $0x238] sm:$0xff] }
 0x803   : > { %v14460_v30 = vadd.f32 %v14459_v62, %v14458_v59  ;;  %v14259_v8 = vpop.f32.mrb[50].mxu1  ;;  %v14402_v12 = vmul.f32 %v14362_v15, %v14257_v42 }
 0x804   : > { %v14448_v54 = vrot.slane %v14447_v29, 2  ;;  %v14406_v46 = vmul.f32 %v14366_v28, %v14259_v8  ;;  %v14261_v44 = vpop.f32.mrb[51].mxu1  ;;  %v14498_v8 = vrot.slane %v22264_v47, 4 }
 0x805   : > { %v14461_v7 = vrot.slane %v14460_v30, 2  ;;  %v14407_v51 = vmul.f32 %v14367_v52, %v14261_v44  ;;  %v14391_v52 = vld [vmem:[%s22427_s6 + $0x100] sm:$0xff] }
 0x806   : > { %v14449_v2 = vadd.f32 %v14448_v54, %v14447_v29  ;;  %v14465_v36 = vadd.f32 %v14406_v46, %v14401_v61  ;;  %v14392_v54 = vld [vmem:[%s22427_s6 + $0x108] sm:$0xff]  ;;  %v14576_v61 = vld [vmem:[%s22428_s7 + $0x240] sm:$0xff] }
 0x807   : > { %v14478_v26 = vadd.f32 %v14407_v51, %v14402_v12  ;;  %v14462_v43 = vadd.f32 %v14461_v7, %v14460_v30  ;;  %v17121_v30 = vpack.c.bf16 %v14575_v6, %v14574_v60  ;;  %v14577_v46 = vld [vmem:[%s22428_s7 + $0x248] sm:$0xff] }
 0x808   : > { %v14450_v21 = vrot.slane %v14449_v2, 1  ;;  %v14396_v7 = vld [vmem:[%s22427_s6 + $0x128] sm:$0xff] }
 0x809   : > { %v14265_v41 = vpop.f32.mrb[52].mxu1  ;;  %v14463_v1 = vrot.slane %v14462_v43, 1 }
 0x80a   : > { %v14411_v55 = vmul.f32 %v14371_v56, %v14265_v41  ;;  %v14267_v57 = vpop.f32.mrb[53].mxu1  ;;  %v14451_v63 = vadd.f32 %v14450_v21, %v14449_v2  ;;  %v14397_v2 = vld [vmem:[%s22427_s6 + $0x130] sm:$0xff]  ;;  %v17124_v56 = vpack.c.bf16 %v14577_v46, %v14576_v61  ;;  %v14579_v41 = vld [vmem:[%s22428_s7 + $0x258] sm:$0xff] }
 0x80b   : > { %v14412_v53 = vmul.f32 %v14372_v3, %v14267_v57  ;;  %v14269_v31 = vpop.f32.mrb[54].mxu1  ;;  %v14464_v17 = vadd.f32 %v14463_v1, %v14462_v43  ;;  %v14499_v43 = vadd.f32 %v14498_v8, %v22264_v47 }
 0x80c   : > { %v14466_v37 = vadd.f32 %v14465_v36, %v14411_v55  ;;  %v14416_v25 = vmul.f32 %v14376_v23, %v14269_v31  ;;  %v14271_v19 = vpop.f32.mrb[55].mxu1  ;;  %v14580_v31 = vld [vmem:[%s22428_s7 + $0x260] sm:$0xff] }
 0x80d   : > { %v14479_v18 = vadd.f32 %v14478_v26, %v14412_v53  ;;  %v14417_v13 = vmul.f32 %v14377_v34, %v14271_v19  ;;  %14649 = vmatprep.mubr.f32.mxu1 %v14464_v17  ;;  %v17127_v34 = vpack.c.bf16 %v14579_v41, %v14578_v38  ;;  %v14500_v47 = vrot.slane %v14499_v43, 2  ;;  %v14581_v17 = vld [vmem:[%s22428_s7 + $0x268] sm:$0xff] }
 0x80e   : > { %v14467_v35 = vadd.f32 %v14466_v37, %v14416_v25  ;;  %14650 = vmatmul.mubr.f32.vlgmr.msra.gmra.mrb[64].mxu1 %v14451_v63  ;;  %v17130_v25 = vpack.c.bf16 %v14581_v17, %v14580_v31 }
 0x80f   : > { %v14480_v48 = vadd.f32 %v14479_v18, %v14417_v13  ;;  %17113 = vmatpush3.bf16.msra.mxu1 %v17112_v9  ;;  %17044 = vmatprep.mubr.msk.f32.mxu1 %vm17542_vm9, %v17543_v11  ;;  %v14501_v18 = vadd.f32 %v14500_v47, %v14499_v43 }
 0x810   : > { %17114 = vmatprep.subr.bf16.mxu1 %v17541_v33 }
 0x811   : > { %v14275_v10 = vpop.f32.mrb[56].mxu1  ;;  %v14502_v11 = vrot.slane %v14501_v18, 1 }
 0x812   : > { %v14421_v45 = vmul.f32 %v14381_v5, %v14275_v10  ;;  %v14277_v16 = vpop.f32.mrb[57].mxu1 }
 0x813   : > { %v14422_v24 = vmul.f32 %v14382_v32, %v14277_v16  ;;  %17116 = vmatpush3.bf16.msra.mxu1 %v17115_v39  ;;  %v14279_v22 = vpop.f32.mrb[58].mxu1  ;;  %v14503_v10 = vadd.f32 %v14502_v11, %v14501_v18 }
 0x814   : > { %v14468_v59 = vadd.f32 %v14467_v35, %v14421_v45  ;;  %v14426_v0 = vmul.f32 %v14386_v27, %v14279_v22  ;;  %v14281_v62 = vpop.f32.mrb[59].mxu1  ;;  %17117 = vmatprep.subr.bf16.mxu1 %v17541_v33 }
 0x815   : > { %v14481_v28 = vadd.f32 %v14480_v48, %v14422_v24  ;;  %v14427_v29 = vmul.f32 %v14387_v58, %v14281_v62  ;;  %v17133_v48 = vpack.c.bf16 %v14583_v14, %v14582_v50  ;;  %v14584_v58 = vld [vmem:[%s22429_s8] sm:$0x1] }
 0x816   : > { %v14469_v42 = vadd.f32 %v14468_v59, %v14426_v0 }
 0x817   : > { %v14482_v15 = vadd.f32 %v14481_v28, %v14427_v29  ;;  %17119 = vmatpush3.bf16.msra.mxu1 %v17118_v40 }
 0x818   : > { %17120 = vmatprep.subr.bf16.mxu1 %v17541_v33 }
 0x819   : > { %v14285_v44 = vpop.f32.mrb[60].mxu1 }
 0x81a   : > { %v14431_v12 = vmul.f32 %v14391_v52, %v14285_v44  ;;  %v14287_v51 = vpop.f32.mrb[61].mxu1 }
 0x81b   : > { %v14432_v36 = vmul.f32 %v14392_v54, %v14287_v51  ;;  %17122 = vmatpush3.bf16.msra.mxu1 %v17121_v30  ;;  %v14289_v26 = vpop.f32.mrb[62].mxu1 }
 0x81c   : > { %v14470_v21 = vadd.f32 %v14469_v42, %v14431_v12  ;;  %v14436_v3 = vmul.f32 %v14396_v7, %v14289_v26  ;;  %v14291_v49 = vpop.f32.mrb[63].mxu1  ;;  %17123 = vmatprep.subr.bf16.mxu1 %v17541_v33 }
 0x81d   : > { %v14483_v23 = vadd.f32 %v14482_v15, %v14432_v36  ;;  %v14437_v1 = vmul.f32 %v14397_v2, %v14291_v49 }
 0x81e   : > { %v14471_v55 = vadd.f32 %v14470_v21, %v14436_v3 }
 0x81f   : > { %v14484_v57 = vadd.f32 %v14483_v23, %v14437_v1  ;;  %17125 = vmatpush3.bf16.msra.mxu1 %v17124_v56 }
 0x820   : > { %v14472_v53 = vrot.slane %v14471_v55, 4  ;;  %17126 = vmatprep.subr.bf16.mxu1 %v17541_v33 }
 0x821   : > { %v14485_v9 = vrot.slane %v14484_v57, 4 }
 0x822   : > { %v14473_v63 = vadd.f32 %v14472_v53, %v14471_v55 }
 0x823   : > { %v14486_v37 = vadd.f32 %v14485_v9, %v14484_v57  ;;  %17128 = vmatpush3.bf16.msra.mxu1 %v17127_v34 }
 0x824   : > { %v14474_v19 = vrot.slane %v14473_v63, 2  ;;  %17129 = vmatprep.subr.bf16.mxu1 %v17541_v33 }
 0x825   : > { %v14487_v13 = vrot.slane %v14486_v37, 2 }
 0x826   : > { %v14475_v35 = vadd.f32 %v14474_v19, %v14473_v63 }
 0x827   : > { %17131 = vmatpush3.bf16.msra.mxu1 %v17130_v25  ;;  %v14488_v5 = vadd.f32 %v14487_v13, %v14486_v37 }
 0x828   : > { %v14476_v39 = vrot.slane %v14475_v35, 1  ;;  %17132 = vmatprep.subr.bf16.mxu1 %v17541_v33 }
 0x829   : > { %v14489_v32 = vrot.slane %v14488_v5, 1 }
 0x82a   : > { %v14477_v4 = vadd.f32 %v14476_v39, %v14475_v35 }
 0x82b   : > { %17134 = vmatpush3.bf16.msra.mxu1 %v17133_v48  ;;  %v14490_v20 = vadd.f32 %v14489_v32, %v14488_v5 }
 0x82d   : > { %14719 = vmatprep.mubr.f32.mxu0 %v14490_v20 }
 0x82e   : > { %17045 = vmatmul.mubr.f32.vlgmr.msra.gmra.mrb[66].mxu1 %v14503_v10  ;;  %14720 = vmatmul.mubr.f32.vlgmr.msra.gmra.mrb[136].mxu0 %v14477_v4 }
 0x8e1   : > { %v16677_v27 = vpop.f32.mrb[64].mxu1 }
 0x8e2   : > { %v16678_v45 = vpop.f32.mrb[65].mxu1 }
 0x8e3   : > { %v16679_v16 = vadd.f32 %v16678_v45, %v16677_v27 }
 0x8e5   : > { %v14652_v59 = vadd.f32 %v16679_v16, %v14584_v58 }
 0x901   : > { %v14791_v24 = vpop.f32.mrb[66].mxu1  ;;  %v16712_v33 = vpop.f32.mrb[136].mxu0 }
 0x902   : > { %v17046_v22 = vpop.f32.mrb[67].mxu1  ;;  %v16713_v40 = vpop.f32.mrb[137].mxu0 }
 0x903   : > { %v16714_v0 = vadd.f32 %v16713_v40, %v16712_v33 }
 0x905   : > { %v14722_v62 = vadd.f32 %v16714_v0, %v14652_v59 }
 0x907   : > { %v14792_v60 = vadd.f32 %v14791_v24, %v14722_v62 }
 0x909   : > { %14796 = vst.msk [vmem:[%s324_s24] sm:$0x1] %vm14795_vm10, %v14792_v60 }
 0x90a   : > { %17485 = shalt.err (!%p17482_p3)
}
 0x90b   : > { %s17486_s22 = scalar_lea.hbm %s22379_s28, 16  ;;  %s17490_s24 = scalar_lea.hbm %s22430_s9, 32 }
 0x90c   : > { %p17487_p4 = scmp.ne.s32.totalorder %s22379_s28, %s17486_s22  ;;  %p17491_p9 = scmp.lt.u32.totalorder %s22379_s28, %s22430_s9 }
 0x90d   : > { %p17492_p10 = scmp.lt.u32.totalorder %s17490_s24, %s17486_s22  ;;  %p17494_p12 = scmp.lt.u32.totalorder %s17486_s22, %s22379_s28 }
 0x90e   : > { %p17488_p7 = pnand %p17487_p4, %p17633_p5 }
 0x90f   : > { %p17493_p11 = por %p17492_p10, %p17491_p9 }
 0x910   : > { %p17489_p8 = pneg %p17488_p7 }
 0x911   : > { %p17495_p13 = por %p17494_p12, %p17493_p11 }
 0x913   : > { %p17496_p0 = pnand %p17495_p13, %p17489_p8 }
 0x915   : > { %17499 = shalt.err (!%p17496_p0)
}
 0x916   : > { %17199 = dma.vmem_to_hbm [thread:$0]  (%p17633_p5), %s22381_s25, 16, %s22379_s28, %s14798_s29  }
 0x917 PF: > { %p17205_p1 = scmp.ge.s32.totalorder %s17534_s12, 2  ;;  %s14822_s14 = sand.u32 1, %s17522_s30  }
 0x918   : > { %s14823_s13 = scalar_lea.sflag [#allocation4], %s14822_s14 }
 0x919   : > { %p17202_p2 = pnand %p17205_p1, %p17637_p6 }
 0x91b   : > { %17517 = dma.done.wait (!%p17202_p2), %s14823_s13, 16  }
 0x91c   : > { %17519 = vsyncadd (!%p17202_p2), %s14823_s13, 4294967280  ;;  %p19_p3 = scmp.ge.s32.totalorder %s17620_s15, 4   ;;  %s22546_s30 = smov %s17526_s10 }
 0x91d   : > { %s22547_s10 = smov %s17530_s11  ;;  %s22548_s11 = smov %s17631_s18 }
 0x91e   : > { %s22549_s12 = smov %s17620_s15  ;;  %21 = sbr.rel (!%p19_p3) target bundleno = 3 (0x3), region = 96 }
 0x925   :  { %14827 = vsyncpa [#allocation4], 1 }
 0x926   :  { %14829 = vsyncpa [#allocation4 + $0x1], 1 }

</bundles_post_ra>
